<compile_context>
chip_gen: v7x
topology: tpu7x:2x2x1
jax: 0.10.0
libtpu: 0.0.40
codegen_flags: <defaults>
</compile_context>

<pallas_src>
import jax
import jax.numpy as jnp
from jax import lax
from jax.experimental import pallas as pl
from jax.experimental.pallas import tpu as pltpu

# ----------------------------- model config ---------------------------------
IMG = 32
PATCH = 16
IN_CH = 3
GRID_HW = IMG // PATCH              # 2
NUM_PATCHES = GRID_HW * GRID_HW     # 4
N_TOK = NUM_PATCHES + 1             # 5 (cls + patches)
EMBED = 384
DEPTH = 12
HEADS = 6
HEAD_DIM = EMBED // HEADS           # 64
HD2 = HEAD_DIM // 2                 # 32
MLP_HID = EMBED * 4                 # 1536
NUM_CLASSES = 10
ROPE_THETA = 10.0
LN_EPS = 1e-6
LS_INIT = 1e-4                      # layer-scale init_values
ATTN_SCALE = HEAD_DIM ** -0.5

FP32 = jnp.float32
BF16 = jnp.bfloat16


# ----------------------------- in-kernel helpers ----------------------------
def _erf_nr(x):
    # TODO(synk): torch exact erf replaced by a |err|<1.2e-7 polynomial
    # (Numerical Recipes erfc) since lax.erf has no guaranteed Mosaic lowering.
    a = jnp.abs(x)
    t = 1.0 / (1.0 + 0.5 * a)
    poly = -1.26551223 + t * (1.00002368 + t * (0.37409196 + t * (0.09678418 +
           t * (-0.18628806 + t * (0.27886807 + t * (-1.13520398 + t * (1.48851587 +
           t * (-0.82215223 + t * 0.17087277))))))))
    erfc_a = t * jnp.exp(-a * a + poly)
    v = 1.0 - erfc_a
    return jnp.where(x >= 0, v, -v)


def _ln(x, w, b):
    mu = jnp.mean(x, axis=-1, keepdims=True)
    xc = x - mu
    var = jnp.mean(xc * xc, axis=-1, keepdims=True)
    return xc * lax.rsqrt(var + LN_EPS) * w + b


# ----------------------------- fused trunk kernel ----------------------------
def _trunk_kernel(patches_ref, pw_ref, pb_ref, scat_ref, clsrows_ref,
                  hmask_ref, biasst_ref, fold_ref,
                  nfw_ref, nfb_ref, hw_ref, hb_ref,
                  vec_ref, rope_ref,
                  qkvw_ref, projw_ref, fc1w_ref, fc2w_ref,
                  logits_ref, xres_ref):
    d = pl.program_id(0)

    # ---- patch embed + cls assembly (first grid step only) -----------------
    @pl.when(d == 0)
    def _init():
        tok = (jnp.dot(patches_ref[...], pw_ref[...],
                       preferred_element_type=FP32) + pb_ref[...])      # (BP, E)
        # scatter patch tokens into their per-image rows, add cls rows
        xres_ref[...] = (jnp.dot(scat_ref[...], tok,
                                 preferred_element_type=FP32)
                         + clsrows_ref[...])                            # (M, E)

    x = xres_ref[...]
    M = x.shape[0]

    # ---- packed per-depth vector slab ---------------------------------------
    vec = vec_ref[...]                                                  # (8, 1536)
    ln1w = vec[0:1, 0:EMBED];            ln1b = vec[0:1, EMBED:2 * EMBED]
    ln2w = vec[0:1, 2 * EMBED:3 * EMBED]; ln2b = vec[0:1, 3 * EMBED:4 * EMBED]
    projb = vec[1:2, 0:EMBED];           g1 = vec[1:2, EMBED:2 * EMBED]
    fc2b = vec[1:2, 2 * EMBED:3 * EMBED]; g2 = vec[1:2, 3 * EMBED:4 * EMBED]
    qb = vec[2:3, 0:EMBED]; kb = vec[2:3, EMBED:2 * EMBED]
    vb = vec[2:3, 2 * EMBED:3 * EMBED]; projs = vec[2:3, 3 * EMBED:4 * EMBED]
    fc1b = vec[3:4, :]
    qsc = vec[4:5, 0:EMBED]; ksc = vec[4:5, EMBED:2 * EMBED]
    vsc = vec[4:5, 2 * EMBED:3 * EMBED]; fc2s = vec[4:5, 3 * EMBED:4 * EMBED]
    fc1s = vec[5:6, :]

    # ---- packed per-depth RoPE slab ------------------------------------------
    rope = rope_ref[...]                                                # (3*TPAD, E)
    tpad = rope.shape[0] // 3
    cosf = rope[0:M]                       # cos replicated on re & im lanes
    sn = rope[tpad:tpad + M]               # -sin at re lanes, 0 at im lanes
    sp = rope[2 * tpad:2 * tpad + M]       # +sin at im lanes, 0 at re lanes

    # ---------------- attention branch ----------------
    y = _ln(x, ln1w, ln1b).astype(BF16)
    qkv = jnp.dot(y, qkvw_ref[...].astype(BF16),
                  preferred_element_type=FP32)                          # (M, 3E)
    q = qkv[:, 0:EMBED] * qsc + qb
    k = qkv[:, EMBED:2 * EMBED] * ksc + kb
    v = qkv[:, 2 * EMBED:3 * EMBED] * vsc + vb

    def rot(t):
        # rotate-half for ALL heads at once in the de-interleaved layout:
        # per 64-wide head block, lanes [0:32]=re, [32:64]=im.
        tl = jnp.concatenate([t[:, HD2:], t[:, :HD2]], axis=1)          # t[c+32]
        tr = jnp.concatenate([t[:, EMBED - HD2:], t[:, :EMBED - HD2]], axis=1)  # t[c-32]
        return t * cosf + tl * sn + tr * sp

    qr = rot(q) * ATTN_SCALE
    kr = rot(k)

    hmask = hmask_ref[...]                                              # (H*M, E)
    # stack head copies of q along rows, mask to each head's channels
    qs_stack = jnp.concatenate([qr] * HEADS, axis=0) * hmask            # (H*M, E)
    s = (lax.dot_general(qs_stack, kr, (((1,), (1,)), ((), ())),
                         preferred_element_type=FP32) + biasst_ref[...])  # (H*M, M)
    m = jnp.max(s, axis=-1, keepdims=True)
    e = jnp.exp(s - m)
    p = e * pl.reciprocal(jnp.sum(e, axis=-1, keepdims=True), approx=True)
    o = jnp.dot(p, v, preferred_element_type=FP32) * hmask              # (H*M, E)
    attn = jnp.dot(fold_ref[...], o, preferred_element_type=FP32)       # (M, E)

    proj = (jnp.dot(attn.astype(BF16), projw_ref[...].astype(BF16),
                    preferred_element_type=FP32) * projs + projb)
    x = x + g1 * proj

    # ---------------- MLP branch ----------------
    y2 = _ln(x, ln2w, ln2b).astype(BF16)
    h1 = (jnp.dot(y2, fc1w_ref[...].astype(BF16),
                  preferred_element_type=FP32) * fc1s + fc1b)
    h1 = 0.5 * h1 * (1.0 + _erf_nr(h1 * 0.7071067811865476))
    mlp = (jnp.dot(h1.astype(BF16), fc2w_ref[...].astype(BF16),
                   preferred_element_type=FP32) * fc2s + fc2b)
    x = x + g2 * mlp

    xres_ref[...] = x

    # ---------------- final LN + classifier head (last block only) ----------
    @pl.when(d == DEPTH - 1)
    def _head():
        xf = _ln(x, nfw_ref[...], nfb_ref[...])
        logits_ref[...] = (jnp.dot(xf, hw_ref[...],
                                   preferred_element_type=FP32) + hb_ref[...])


# ----------------------------- pallas_call wrapper ---------------------------
def _dspec(*tail):
    z = (0,) * len(tail)
    return pl.BlockSpec((None,) + tail, lambda d, _z=z: (d,) + _z)


def _cspec(*shape):
    z = (0,) * len(shape)
    return pl.BlockSpec(shape, lambda d, _z=z: _z)


def pallas_fused_trunk(patches, rope_slab, scat, clsrows, hmask, biasst, fold,
                       params):
    BP, PDIM = patches.shape
    M = scat.shape[0]
    HM = hmask.shape[0]
    RR = rope_slab.shape[1]

    w_bytes = EMBED * 3 * EMBED + EMBED * EMBED + EMBED * MLP_HID + MLP_HID * EMBED
    slab_bytes = (8 * MLP_HID + RR * EMBED) * 4
    flops_blk = (2 * M * EMBED * (3 * EMBED + EMBED + 2 * MLP_HID)
                 + 2 * HM * EMBED * M + 2 * HM * M * EMBED + 2 * M * HM * EMBED
                 + 16 * M * EMBED)
    const_bytes = (BP * PDIM * 2 + PDIM * EMBED * 2
                   + (M * BP + 2 * M * EMBED + HM * EMBED + HM * M + M * HM
                      + 2 * EMBED + EMBED * NUM_CLASSES + NUM_CLASSES
                      + M * NUM_CLASSES) * 4)
    cost = pl.CostEstimate(
        flops=DEPTH * flops_blk + 2 * BP * PDIM * EMBED + 2 * M * EMBED * NUM_CLASSES,
        transcendentals=DEPTH * (HM * M + M * MLP_HID),
        bytes_accessed=DEPTH * (w_bytes + slab_bytes) + const_bytes)

    in_specs = [
        _cspec(BP, PDIM),                 # patches (bf16)
        _cspec(PDIM, EMBED),              # patch_w (bf16)
        _cspec(1, EMBED),                 # patch_b
        _cspec(M, BP),                    # token scatter matrix
        _cspec(M, EMBED),                 # cls rows
        _cspec(HM, EMBED),                # head-channel mask
        _cspec(HM, M),                    # block-diagonal batch bias (per head row)
        _cspec(M, HM),                    # head-fold matrix
        _cspec(1, EMBED),                 # final norm_w
        _cspec(1, EMBED),                 # final norm_b
        _cspec(EMBED, NUM_CLASSES),       # head_w
        _cspec(1, NUM_CLASSES),           # head_b
        _dspec(8, MLP_HID),               # packed per-depth vector slab (fp32)
        _dspec(RR, EMBED),                # packed per-depth RoPE slab (fp32)
        _dspec(EMBED, 3 * EMBED),         # qkv_w  (int8, q/k de-interleaved)
        _dspec(EMBED, EMBED),             # proj_w (int8)
        _dspec(EMBED, MLP_HID),           # fc1_w  (int8)
        _dspec(MLP_HID, EMBED),           # fc2_w  (int8)
    ]

    return pl.pallas_call(
        _trunk_kernel,
        out_shape=jax.ShapeDtypeStruct((M, NUM_CLASSES), FP32),
        grid=(DEPTH,),
        in_specs=in_specs,
        out_specs=pl.BlockSpec((M, NUM_CLASSES), lambda d: (0, 0)),
        scratch_shapes=[pltpu.VMEM((M, EMBED), FP32)],
        compiler_params=pltpu.CompilerParams(
            dimension_semantics=("arbitrary",),   # depth is a carried reduction
            vmem_limit_bytes=32 * 1024 * 1024),
        cost_estimate=cost,
    )(patches, params["patch_w"], params["patch_b"], scat, clsrows,
      hmask, biasst, fold,
      params["norm_w"], params["norm_b"], params["head_w"], params["head_b"],
      params["vec_slab"], rope_slab,
      params["qkv_w"], params["proj_w"], params["fc1_w"], params["fc2_w"])


# ----------------------------- params ---------------------------------------
def _quant8(w):
    # per-output-column int8 quantization (scale over the contraction dim)
    s = jnp.max(jnp.abs(w), axis=-2, keepdims=True) / 127.0
    s = jnp.maximum(s, 1e-12)
    q = jnp.clip(jnp.round(w / s), -127.0, 127.0).astype(jnp.int8)
    return q, s[..., 0, :]


def init_params(key):
    keys = jax.random.split(key, 8)

    def nrm(k, shape, std=0.02):
        return (std * jax.random.normal(k, shape)).astype(FP32)

    # qkv weight; de-interleave q/k head dims on the host (once) so RoPE is a
    # rotate-half on [re(32)|im(32)] blocks instead of per-pair swaps.
    qkv_w = nrm(keys[0], (DEPTH, EMBED, 3 * EMBED))
    qkv_b = jnp.zeros((DEPTH, 3 * EMBED), FP32)
    idx = jnp.concatenate([jnp.arange(0, HEAD_DIM, 2), jnp.arange(1, HEAD_DIM, 2)])
    per_head = (jnp.arange(HEADS)[:, None] * HEAD_DIM + idx[None, :]).reshape(-1)
    perm = jnp.concatenate([per_head, EMBED + per_head,
                            2 * EMBED + jnp.arange(EMBED)])
    qkv_w = qkv_w[:, :, perm]
    qkv_b = qkv_b[:, perm]

    proj_w = nrm(keys[3], (DEPTH, EMBED, EMBED))
    fc1_w = nrm(keys[4], (DEPTH, EMBED, MLP_HID))
    fc2_w = nrm(keys[5], (DEPTH, MLP_HID, EMBED))

    qkv_q, qkv_s = _quant8(qkv_w)
    proj_q, proj_s = _quant8(proj_w)
    fc1_q, fc1_s = _quant8(fc1_w)
    fc2_q, fc2_s = _quant8(fc2_w)

    ln1_w = jnp.ones((DEPTH, EMBED), FP32); ln1_b = jnp.zeros((DEPTH, EMBED), FP32)
    ln2_w = jnp.ones((DEPTH, EMBED), FP32); ln2_b = jnp.zeros((DEPTH, EMBED), FP32)
    proj_b = jnp.zeros((DEPTH, EMBED), FP32)
    fc1_b = jnp.zeros((DEPTH, MLP_HID), FP32)
    fc2_b = jnp.zeros((DEPTH, EMBED), FP32)
    gamma1 = jnp.full((DEPTH, EMBED), LS_INIT, FP32)
    gamma2 = jnp.full((DEPTH, EMBED), LS_INIT, FP32)

    # pack all tiny per-depth vectors + dequant scales into one slab (1 DMA/step)
    row0 = jnp.concatenate([ln1_w, ln1_b, ln2_w, ln2_b], axis=-1)
    row1 = jnp.concatenate([proj_b, gamma1, fc2_b, gamma2], axis=-1)
    row2 = jnp.concatenate([qkv_b, proj_s], axis=-1)
    row3 = fc1_b
    row4 = jnp.concatenate([qkv_s, fc2_s], axis=-1)
    row5 = fc1_s
    zrow = jnp.zeros((DEPTH, MLP_HID), FP32)
    vec_slab = jnp.stack([row0, row1, row2, row3, row4, row5, zrow, zrow], axis=1)

    params = {
        "patch_w": nrm(keys[1], (IN_CH * PATCH * PATCH, EMBED)).astype(BF16),
        "patch_b": jnp.zeros((1, EMBED), FP32),
        "cls": nrm(keys[2], (EMBED,)),
        "vec_slab": vec_slab,                    # (DEPTH, 8, 1536) fp32
        "qkv_w": qkv_q,                          # int8
        "proj_w": proj_q,
        "fc1_w": fc1_q,
        "fc2_w": fc2_q,
        "norm_w": jnp.ones((1, EMBED), FP32),
        "norm_b": jnp.zeros((1, EMBED), FP32),
        "head_w": nrm(keys[6], (EMBED, NUM_CLASSES)),
        "head_b": jnp.zeros((1, NUM_CLASSES), FP32),
    }

    # rope_mixed learned frequencies: init_random_2d_freqs per block, theta=10.
    quarter = HEAD_DIM // 4
    mag = 1.0 / (ROPE_THETA ** (jnp.arange(0, HEAD_DIM, 4)[:quarter]
                                .astype(FP32) / HEAD_DIM))            # (hd/4,)
    angles = jax.random.uniform(keys[7], (DEPTH, HEADS)) * 2.0 * jnp.pi
    fx = jnp.concatenate([mag[None, None, :] * jnp.cos(angles)[..., None],
                          mag[None, None, :] * jnp.cos(angles + jnp.pi / 2)[..., None]],
                         axis=-1)                                      # (D,H,hd2)
    fy = jnp.concatenate([mag[None, None, :] * jnp.sin(angles)[..., None],
                          mag[None, None, :] * jnp.sin(angles + jnp.pi / 2)[..., None]],
                         axis=-1)
    params["freqs"] = jnp.stack([fx, fy], axis=0).astype(FP32)         # (2,D,H,hd2)
    return params


# ----------------------------- host-built tables -----------------------------
def build_rope_slab(freqs, batch):
    # compute_mixed_cis: per-depth, per-head angles = t_x*f_x + t_y*f_y
    t = jnp.arange(NUM_PATCHES, dtype=FP32)
    t_x = t % GRID_HW
    t_y = jnp.floor(t / GRID_HW)
    ang = (t_x[None, :, None, None] * freqs[0][:, None, :, :]
           + t_y[None, :, None, None] * freqs[1][:, None, :, :])       # (D,Np,H,hd2)
    cos_p, sin_p = jnp.cos(ang), jnp.sin(ang)
    # cls token (row 0 of each image) gets the identity rotation
    cos_tok = jnp.concatenate([jnp.ones((DEPTH, 1, HEADS, HD2), FP32), cos_p], axis=1)
    sin_tok = jnp.concatenate([jnp.zeros((DEPTH, 1, HEADS, HD2), FP32), sin_p], axis=1)
    cos_tok = jnp.tile(cos_tok, (1, batch, 1, 1))                      # (D,M,H,hd2)
    sin_tok = jnp.tile(sin_tok, (1, batch, 1, 1))
    zeros = jnp.zeros_like(sin_tok)
    M = batch * N_TOK
    cosf = jnp.concatenate([cos_tok, cos_tok], axis=-1).reshape(DEPTH, M, EMBED)
    sn = jnp.concatenate([-sin_tok, zeros], axis=-1).reshape(DEPTH, M, EMBED)
    sp = jnp.concatenate([zeros, sin_tok], axis=-1).reshape(DEPTH, M, EMBED)
    tpad = ((M + 7) // 8) * 8
    pad = jnp.zeros((DEPTH, tpad - M, EMBED), FP32)

    def sec(a):
        return jnp.concatenate([a, pad], axis=1)

    return jnp.concatenate([sec(cosf), sec(sn), sec(sp)], axis=1)      # (D,3*tpad,E)


def build_struct_consts(cls_vec, batch):
    M = batch * N_TOK
    BP = batch * NUM_PATCHES
    rows = jnp.arange(M)
    rb, rp = rows // N_TOK, rows % N_TOK
    cols = jnp.arange(BP)
    cb, cp = cols // NUM_PATCHES, cols % NUM_PATCHES
    # scatter: patch p of image b -> token row b*N_TOK + 1 + p
    scat = ((rb[:, None] == cb[None, :]) & ((rp[:, None] - 1) == cp[None, :])
            & (rp[:, None] > 0)).astype(FP32)                          # (M, BP)
    clsrows = jnp.where((rp == 0)[:, None], cls_vec.reshape(1, EMBED),
                        0.0).astype(FP32)                              # (M, E)
    head_of_c = jnp.arange(EMBED) // HEAD_DIM
    row_h = jnp.repeat(jnp.arange(HEADS), M)
    hmask = (row_h[:, None] == head_of_c[None, :]).astype(FP32)        # (H*M, E)
    bias = jnp.where(rb[:, None] == rb[None, :], 0.0, -1e30).astype(FP32)
    biasst = jnp.tile(bias, (HEADS, 1))                                # (H*M, M)
    fold = jnp.tile(jnp.eye(M, dtype=FP32), (1, HEADS))                # (M, H*M)
    return scat, clsrows, hmask, biasst, fold


# ----------------------------- forward pass ----------------------------------
def forward(params, x_nchw):
    B = x_nchw.shape[0]

    # patch embed (Conv2d k=16 s=16) as matmul over (c, kh, kw)-ordered patches
    patches = (x_nchw.reshape(B, IN_CH, GRID_HW, PATCH, GRID_HW, PATCH)
               .transpose(0, 2, 4, 1, 3, 5)
               .reshape(B * NUM_PATCHES, IN_CH * PATCH * PATCH)).astype(BF16)

    rope_slab = build_rope_slab(params["freqs"], B)
    scat, clsrows, hmask, biasst, fold = build_struct_consts(params["cls"], B)

    logits_all = pallas_fused_trunk(patches, rope_slab, scat, clsrows,
                                    hmask, biasst, fold, params)
    # per-token logits computed in-kernel; classifier uses the cls token.
    return logits_all.reshape(B, N_TOK, NUM_CLASSES)[:, 0]


# ----------------------------- main -------------------------------------------
if __name__ == "__main__":
    key = jax.random.PRNGKey(0)
    pkey, xkey = jax.random.split(key)
    params = init_params(pkey)
    x = jax.random.normal(xkey, (2, IN_CH, IMG, IMG), dtype=FP32)

    logits = jax.jit(forward)(params, x)
    jax.block_until_ready(logits)
    assert logits.shape == (2, NUM_CLASSES) and logits.dtype == FP32
    print("KERNEL_OK")
</pallas_src>

<mosaic_0001>
module attributes {stable_mosaic.version = 11 : i64} {
  func.func @_trunk_kernel(%arg0: i32, %arg1: memref<8x768xbf16, #tpu.memory_space<vmem>>, %arg2: memref<768x384xbf16, #tpu.memory_space<vmem>>, %arg3: memref<1x384xf32, #tpu.memory_space<vmem>>, %arg4: memref<10x8xf32, #tpu.memory_space<vmem>>, %arg5: memref<10x384xf32, #tpu.memory_space<vmem>>, %arg6: memref<60x384xf32, #tpu.memory_space<vmem>>, %arg7: memref<60x10xf32, #tpu.memory_space<vmem>>, %arg8: memref<10x60xf32, #tpu.memory_space<vmem>>, %arg9: memref<1x384xf32, #tpu.memory_space<vmem>>, %arg10: memref<1x384xf32, #tpu.memory_space<vmem>>, %arg11: memref<384x10xf32, #tpu.memory_space<vmem>>, %arg12: memref<1x10xf32, #tpu.memory_space<vmem>>, %arg13: memref<1x8x1536xf32, #tpu.memory_space<vmem>>, %arg14: memref<1x48x384xf32, #tpu.memory_space<vmem>>, %arg15: memref<1x384x1152xi8, #tpu.memory_space<vmem>>, %arg16: memref<1x384x384xi8, #tpu.memory_space<vmem>>, %arg17: memref<1x384x1536xi8, #tpu.memory_space<vmem>>, %arg18: memref<1x1536x384xi8, #tpu.memory_space<vmem>>, %arg19: memref<10x10xf32, #tpu.memory_space<vmem>>, %arg20: memref<10x384xf32, #tpu.memory_space<vmem>>) attributes {dimension_semantics = [#tpu.dimension_semantics<arbitrary>], iteration_bounds = array<i64: 12>, scalar_prefetch = 0 : i64, scratch_operands = 1 : i64, tpu.core_type = #tpu.core_type<tc>, window_params = [{pipeline_mode = #tpu.pipeline_mode<synchronous>, transform_indices = @transform_0, window_bounds = array<i64: 8, 768>}, {pipeline_mode = #tpu.pipeline_mode<synchronous>, transform_indices = @transform_1, window_bounds = array<i64: 768, 384>}, {pipeline_mode = #tpu.pipeline_mode<synchronous>, transform_indices = @transform_2, window_bounds = array<i64: 1, 384>}, {pipeline_mode = #tpu.pipeline_mode<synchronous>, transform_indices = @transform_3, window_bounds = array<i64: 10, 8>}, {pipeline_mode = #tpu.pipeline_mode<synchronous>, transform_indices = @transform_4, window_bounds = array<i64: 10, 384>}, {pipeline_mode = #tpu.pipeline_mode<synchronous>, transform_indices = @transform_5, window_bounds = array<i64: 60, 384>}, {pipeline_mode = #tpu.pipeline_mode<synchronous>, transform_indices = @transform_6, window_bounds = array<i64: 60, 10>}, {pipeline_mode = #tpu.pipeline_mode<synchronous>, transform_indices = @transform_7, window_bounds = array<i64: 10, 60>}, {pipeline_mode = #tpu.pipeline_mode<synchronous>, transform_indices = @transform_8, window_bounds = array<i64: 1, 384>}, {pipeline_mode = #tpu.pipeline_mode<synchronous>, transform_indices = @transform_9, window_bounds = array<i64: 1, 384>}, {pipeline_mode = #tpu.pipeline_mode<synchronous>, transform_indices = @transform_10, window_bounds = array<i64: 384, 10>}, {pipeline_mode = #tpu.pipeline_mode<synchronous>, transform_indices = @transform_11, window_bounds = array<i64: 1, 10>}, {transform_indices = @transform_12, window_bounds = array<i64: 1, 8, 1536>}, {transform_indices = @transform_13, window_bounds = array<i64: 1, 48, 384>}, {transform_indices = @transform_14, window_bounds = array<i64: 1, 384, 1152>}, {transform_indices = @transform_15, window_bounds = array<i64: 1, 384, 384>}, {transform_indices = @transform_16, window_bounds = array<i64: 1, 384, 1536>}, {transform_indices = @transform_17, window_bounds = array<i64: 1, 1536, 384>}, {pipeline_mode = #tpu.pipeline_mode<synchronous>, transform_indices = @transform_18, window_bounds = array<i64: 10, 10>}]} {
    %c0_i32 = arith.constant 0 : i32
    %0 = arith.cmpi eq, %arg0, %c0_i32 : i32
    %1 = arith.extui %0 : i1 to i32
    %c0_i32_0 = arith.constant 0 : i32
    %2 = arith.cmpi ne, %1, %c0_i32_0 : i32
    scf.if %2 {
      %c0_68 = arith.constant 0 : index
      %c0_69 = arith.constant 0 : index
      %225 = vector.load %arg1[%c0_68, %c0_69] : memref<8x768xbf16, #tpu.memory_space<vmem>>, vector<8x768xbf16>
      %c0_70 = arith.constant 0 : index
      %c0_71 = arith.constant 0 : index
      %226 = vector.load %arg2[%c0_70, %c0_71] : memref<768x384xbf16, #tpu.memory_space<vmem>>, vector<768x384xbf16>
      %cst_72 = arith.constant dense<0.000000e+00> : vector<8x384xf32>
      %227 = tpu.matmul %225, %226, %cst_72 {dimension_numbers = #tpu.dot_dimension_numbers<[1], [0], [0], [1], [0, 0, 1, 1], [], []>} : vector<8x768xbf16>, vector<768x384xbf16>, vector<8x384xf32> -> vector<8x384xf32>
      %c0_73 = arith.constant 0 : index
      %c0_74 = arith.constant 0 : index
      %228 = vector.load %arg3[%c0_73, %c0_74] : memref<1x384xf32, #tpu.memory_space<vmem>>, vector<1x384xf32>
      %229 = vector.broadcast %228 : vector<1x384xf32> to vector<8x384xf32>
      %230 = arith.addf %227, %229 : vector<8x384xf32>
      %c0_75 = arith.constant 0 : index
      %c0_76 = arith.constant 0 : index
      %231 = vector.load %arg4[%c0_75, %c0_76] : memref<10x8xf32, #tpu.memory_space<vmem>>, vector<10x8xf32>
      %cst_77 = arith.constant dense<0.000000e+00> : vector<10x384xf32>
      %232 = tpu.matmul %231, %230, %cst_77 {dimension_numbers = #tpu.dot_dimension_numbers<[1], [0], [0], [1], [0, 0, 1, 1], [], []>} : vector<10x8xf32>, vector<8x384xf32>, vector<10x384xf32> -> vector<10x384xf32>
      %c0_78 = arith.constant 0 : index
      %c0_79 = arith.constant 0 : index
      %233 = vector.load %arg5[%c0_78, %c0_79] : memref<10x384xf32, #tpu.memory_space<vmem>>, vector<10x384xf32>
      %234 = arith.addf %232, %233 : vector<10x384xf32>
      %c0_80 = arith.constant 0 : index
      %c0_81 = arith.constant 0 : index
      %235 = vector.load %arg20[%c0_80, %c0_81] : memref<10x384xf32, #tpu.memory_space<vmem>>, vector<10x384xf32>
      tpu.vector_store %arg20[%c0_80, %c0_81], %234 {strides = array<i32>} : memref<10x384xf32, #tpu.memory_space<vmem>>, vector<10x384xf32>,
    } else {
    }
    %c0 = arith.constant 0 : index
    %c0_1 = arith.constant 0 : index
    %3 = vector.load %arg20[%c0, %c0_1] : memref<10x384xf32, #tpu.memory_space<vmem>>, vector<10x384xf32>
    %c0_2 = arith.constant 0 : index
    %c0_3 = arith.constant 0 : index
    %c0_4 = arith.constant 0 : index
    %4 = vector.load %arg13[%c0_2, %c0_3, %c0_4] : memref<1x8x1536xf32, #tpu.memory_space<vmem>>, vector<1x8x1536xf32>
    %5 = vector.shape_cast %4 : vector<1x8x1536xf32> to vector<8x1536xf32>
    %6 = vector.extract_strided_slice %5 {offsets = [0, 0], sizes = [1, 384], strides = [1, 1]} : vector<8x1536xf32> to vector<1x384xf32>
    %7 = vector.extract_strided_slice %5 {offsets = [0, 384], sizes = [1, 384], strides = [1, 1]} : vector<8x1536xf32> to vector<1x384xf32>
    %8 = vector.extract_strided_slice %5 {offsets = [0, 768], sizes = [1, 384], strides = [1, 1]} : vector<8x1536xf32> to vector<1x384xf32>
    %9 = vector.extract_strided_slice %5 {offsets = [0, 1152], sizes = [1, 384], strides = [1, 1]} : vector<8x1536xf32> to vector<1x384xf32>
    %10 = vector.extract_strided_slice %5 {offsets = [1, 0], sizes = [1, 384], strides = [1, 1]} : vector<8x1536xf32> to vector<1x384xf32>
    %11 = vector.extract_strided_slice %5 {offsets = [1, 384], sizes = [1, 384], strides = [1, 1]} : vector<8x1536xf32> to vector<1x384xf32>
    %12 = vector.extract_strided_slice %5 {offsets = [1, 768], sizes = [1, 384], strides = [1, 1]} : vector<8x1536xf32> to vector<1x384xf32>
    %13 = vector.extract_strided_slice %5 {offsets = [1, 1152], sizes = [1, 384], strides = [1, 1]} : vector<8x1536xf32> to vector<1x384xf32>
    %14 = vector.extract_strided_slice %5 {offsets = [2, 0], sizes = [1, 384], strides = [1, 1]} : vector<8x1536xf32> to vector<1x384xf32>
    %15 = vector.extract_strided_slice %5 {offsets = [2, 384], sizes = [1, 384], strides = [1, 1]} : vector<8x1536xf32> to vector<1x384xf32>
    %16 = vector.extract_strided_slice %5 {offsets = [2, 768], sizes = [1, 384], strides = [1, 1]} : vector<8x1536xf32> to vector<1x384xf32>
    %17 = vector.extract_strided_slice %5 {offsets = [2, 1152], sizes = [1, 384], strides = [1, 1]} : vector<8x1536xf32> to vector<1x384xf32>
    %18 = vector.extract_strided_slice %5 {offsets = [3, 0], sizes = [1, 1536], strides = [1, 1]} : vector<8x1536xf32> to vector<1x1536xf32>
    %19 = vector.extract_strided_slice %5 {offsets = [4, 0], sizes = [1, 384], strides = [1, 1]} : vector<8x1536xf32> to vector<1x384xf32>
    %20 = vector.extract_strided_slice %5 {offsets = [4, 384], sizes = [1, 384], strides = [1, 1]} : vector<8x1536xf32> to vector<1x384xf32>
    %21 = vector.extract_strided_slice %5 {offsets = [4, 768], sizes = [1, 384], strides = [1, 1]} : vector<8x1536xf32> to vector<1x384xf32>
    %22 = vector.extract_strided_slice %5 {offsets = [4, 1152], sizes = [1, 384], strides = [1, 1]} : vector<8x1536xf32> to vector<1x384xf32>
    %23 = vector.extract_strided_slice %5 {offsets = [5, 0], sizes = [1, 1536], strides = [1, 1]} : vector<8x1536xf32> to vector<1x1536xf32>
    %c0_5 = arith.constant 0 : index
    %c0_6 = arith.constant 0 : index
    %c0_7 = arith.constant 0 : index
    %24 = vector.load %arg14[%c0_5, %c0_6, %c0_7] : memref<1x48x384xf32, #tpu.memory_space<vmem>>, vector<1x48x384xf32>
    %25 = vector.shape_cast %24 : vector<1x48x384xf32> to vector<48x384xf32>
    %26 = vector.extract_strided_slice %25 {offsets = [0, 0], sizes = [10, 384], strides = [1, 1]} : vector<48x384xf32> to vector<10x384xf32>
    %27 = vector.extract_strided_slice %25 {offsets = [16, 0], sizes = [10, 384], strides = [1, 1]} : vector<48x384xf32> to vector<10x384xf32>
    %28 = vector.extract_strided_slice %25 {offsets = [32, 0], sizes = [10, 384], strides = [1, 1]} : vector<48x384xf32> to vector<10x384xf32>
    %cst = arith.constant dense<0.000000e+00> : vector<10xf32>
    %29 = vector.multi_reduction <add>, %3, %cst [1] : vector<10x384xf32> to vector<10xf32>
    %30 = vector.shape_cast %29 : vector<10xf32> to vector<10x1xf32>
    %cst_8 = arith.constant 3.840000e+02 : f32
    %31 = vector.broadcast %cst_8 : f32 to vector<10x1xf32>
    %32 = arith.divf %30, %31 : vector<10x1xf32>
    %33 = vector.broadcast %32 : vector<10x1xf32> to vector<10x384xf32>
    %34 = arith.subf %3, %33 : vector<10x384xf32>
    %35 = arith.mulf %34, %34 : vector<10x384xf32>
    %cst_9 = arith.constant dense<0.000000e+00> : vector<10xf32>
    %36 = vector.multi_reduction <add>, %35, %cst_9 [1] : vector<10x384xf32> to vector<10xf32>
    %37 = vector.shape_cast %36 : vector<10xf32> to vector<10x1xf32>
    %cst_10 = arith.constant 3.840000e+02 : f32
    %38 = vector.broadcast %cst_10 : f32 to vector<10x1xf32>
    %39 = arith.divf %37, %38 : vector<10x1xf32>
    %cst_11 = arith.constant 9.99999997E-7 : f32
    %40 = vector.broadcast %cst_11 : f32 to vector<10x1xf32>
    %41 = arith.addf %39, %40 : vector<10x1xf32>
    %42 = math.rsqrt %41 : vector<10x1xf32>
    %43 = vector.broadcast %42 : vector<10x1xf32> to vector<10x384xf32>
    %44 = arith.mulf %34, %43 : vector<10x384xf32>
    %45 = vector.broadcast %6 : vector<1x384xf32> to vector<10x384xf32>
    %46 = arith.mulf %44, %45 : vector<10x384xf32>
    %47 = vector.broadcast %7 : vector<1x384xf32> to vector<10x384xf32>
    %48 = arith.addf %46, %47 : vector<10x384xf32>
    %49 = arith.truncf %48 : vector<10x384xf32> to vector<10x384xbf16>
    %c0_12 = arith.constant 0 : index
    %c0_13 = arith.constant 0 : index
    %c0_14 = arith.constant 0 : index
    %50 = vector.load %arg15[%c0_12, %c0_13, %c0_14] : memref<1x384x1152xi8, #tpu.memory_space<vmem>>, vector<1x384x1152xi8>
    %51 = vector.shape_cast %50 : vector<1x384x1152xi8> to vector<384x1152xi8>
    %52 = arith.sitofp %51 : vector<384x1152xi8> to vector<384x1152xbf16>
    %cst_15 = arith.constant dense<0.000000e+00> : vector<10x1152xf32>
    %53 = tpu.matmul %49, %52, %cst_15 {dimension_numbers = #tpu.dot_dimension_numbers<[1], [0], [0], [1], [0, 0, 1, 1], [], []>} : vector<10x384xbf16>, vector<384x1152xbf16>, vector<10x1152xf32> -> vector<10x1152xf32>
    %54 = vector.extract_strided_slice %53 {offsets = [0, 0], sizes = [10, 384], strides = [1, 1]} : vector<10x1152xf32> to vector<10x384xf32>
    %55 = vector.broadcast %19 : vector<1x384xf32> to vector<10x384xf32>
    %56 = arith.mulf %54, %55 : vector<10x384xf32>
    %57 = vector.broadcast %14 : vector<1x384xf32> to vector<10x384xf32>
    %58 = arith.addf %56, %57 : vector<10x384xf32>
    %59 = vector.extract_strided_slice %53 {offsets = [0, 384], sizes = [10, 384], strides = [1, 1]} : vector<10x1152xf32> to vector<10x384xf32>
    %60 = vector.broadcast %20 : vector<1x384xf32> to vector<10x384xf32>
    %61 = arith.mulf %59, %60 : vector<10x384xf32>
    %62 = vector.broadcast %15 : vector<1x384xf32> to vector<10x384xf32>
    %63 = arith.addf %61, %62 : vector<10x384xf32>
    %64 = vector.extract_strided_slice %53 {offsets = [0, 768], sizes = [10, 384], strides = [1, 1]} : vector<10x1152xf32> to vector<10x384xf32>
    %65 = vector.broadcast %21 : vector<1x384xf32> to vector<10x384xf32>
    %66 = arith.mulf %64, %65 : vector<10x384xf32>
    %67 = vector.broadcast %16 : vector<1x384xf32> to vector<10x384xf32>
    %68 = arith.addf %66, %67 : vector<10x384xf32>
    %69 = vector.extract_strided_slice %58 {offsets = [0, 32], sizes = [10, 352], strides = [1, 1]} : vector<10x384xf32> to vector<10x352xf32>
    %70 = vector.extract_strided_slice %58 {offsets = [0, 0], sizes = [10, 32], strides = [1, 1]} : vector<10x384xf32> to vector<10x32xf32>
    %71 = tpu.concatenate %69, %70 in 1 : vector<10x352xf32>, vector<10x32xf32> -> vector<10x384xf32>
    %72 = vector.extract_strided_slice %58 {offsets = [0, 352], sizes = [10, 32], strides = [1, 1]} : vector<10x384xf32> to vector<10x32xf32>
    %73 = vector.extract_strided_slice %58 {offsets = [0, 0], sizes = [10, 352], strides = [1, 1]} : vector<10x384xf32> to vector<10x352xf32>
    %74 = tpu.concatenate %72, %73 in 1 : vector<10x32xf32>, vector<10x352xf32> -> vector<10x384xf32>
    %75 = arith.mulf %58, %26 : vector<10x384xf32>
    %76 = arith.mulf %71, %27 : vector<10x384xf32>
    %77 = arith.addf %75, %76 : vector<10x384xf32>
    %78 = arith.mulf %74, %28 : vector<10x384xf32>
    %79 = arith.addf %77, %78 : vector<10x384xf32>
    %cst_16 = arith.constant 1.250000e-01 : f32
    %80 = vector.broadcast %cst_16 : f32 to vector<10x384xf32>
    %81 = arith.mulf %79, %80 : vector<10x384xf32>
    %82 = vector.extract_strided_slice %63 {offsets = [0, 32], sizes = [10, 352], strides = [1, 1]} : vector<10x384xf32> to vector<10x352xf32>
    %83 = vector.extract_strided_slice %63 {offsets = [0, 0], sizes = [10, 32], strides = [1, 1]} : vector<10x384xf32> to vector<10x32xf32>
    %84 = tpu.concatenate %82, %83 in 1 : vector<10x352xf32>, vector<10x32xf32> -> vector<10x384xf32>
    %85 = vector.extract_strided_slice %63 {offsets = [0, 352], sizes = [10, 32], strides = [1, 1]} : vector<10x384xf32> to vector<10x32xf32>
    %86 = vector.extract_strided_slice %63 {offsets = [0, 0], sizes = [10, 352], strides = [1, 1]} : vector<10x384xf32> to vector<10x352xf32>
    %87 = tpu.concatenate %85, %86 in 1 : vector<10x32xf32>, vector<10x352xf32> -> vector<10x384xf32>
    %88 = arith.mulf %63, %26 : vector<10x384xf32>
    %89 = arith.mulf %84, %27 : vector<10x384xf32>
    %90 = arith.addf %88, %89 : vector<10x384xf32>
    %91 = arith.mulf %87, %28 : vector<10x384xf32>
    %92 = arith.addf %90, %91 : vector<10x384xf32>
    %c0_17 = arith.constant 0 : index
    %c0_18 = arith.constant 0 : index
    %93 = vector.load %arg6[%c0_17, %c0_18] : memref<60x384xf32, #tpu.memory_space<vmem>>, vector<60x384xf32>
    %94 = tpu.concatenate %81, %81, %81, %81, %81, %81 in 0 : vector<10x384xf32>, vector<10x384xf32>, vector<10x384xf32>, vector<10x384xf32>, vector<10x384xf32>, vector<10x384xf32> -> vector<60x384xf32>
    %95 = arith.mulf %94, %93 : vector<60x384xf32>
    %cst_19 = arith.constant dense<0.000000e+00> : vector<60x10xf32>
    %96 = tpu.matmul %95, %92, %cst_19 {dimension_numbers = #tpu.dot_dimension_numbers<[1], [1], [0], [0], [0, 0, 1, 0], [], []>} : vector<60x384xf32>, vector<10x384xf32>, vector<60x10xf32> -> vector<60x10xf32>
    %c0_20 = arith.constant 0 : index
    %c0_21 = arith.constant 0 : index
    %97 = vector.load %arg7[%c0_20, %c0_21] : memref<60x10xf32, #tpu.memory_space<vmem>>, vector<60x10xf32>
    %98 = arith.addf %96, %97 : vector<60x10xf32>
    %cst_22 = arith.constant dense<0xFF800000> : vector<60xf32>
    %99 = vector.multi_reduction <maximumf>, %98, %cst_22 [1] : vector<60x10xf32> to vector<60xf32>
    %100 = vector.shape_cast %99 : vector<60xf32> to vector<60x1xf32>
    %101 = vector.broadcast %100 : vector<60x1xf32> to vector<60x10xf32>
    %102 = arith.subf %98, %101 : vector<60x10xf32>
    %103 = math.exp %102 : vector<60x10xf32>
    %cst_23 = arith.constant dense<0.000000e+00> : vector<60xf32>
    %104 = vector.multi_reduction <add>, %103, %cst_23 [1] : vector<60x10xf32> to vector<60xf32>
    %105 = vector.shape_cast %104 : vector<60xf32> to vector<60x1xf32>
    %106 = tpu.reciprocal %105 {approx = true} : vector<60x1xf32> -> vector<60x1xf32>
    %107 = vector.broadcast %106 : vector<60x1xf32> to vector<60x10xf32>
    %108 = arith.mulf %103, %107 : vector<60x10xf32>
    %cst_24 = arith.constant dense<0.000000e+00> : vector<60x384xf32>
    %109 = tpu.matmul %108, %68, %cst_24 {dimension_numbers = #tpu.dot_dimension_numbers<[1], [0], [0], [1], [0, 0, 1, 1], [], []>} : vector<60x10xf32>, vector<10x384xf32>, vector<60x384xf32> -> vector<60x384xf32>
    %110 = arith.mulf %109, %93 : vector<60x384xf32>
    %c0_25 = arith.constant 0 : index
    %c0_26 = arith.constant 0 : index
    %111 = vector.load %arg8[%c0_25, %c0_26] : memref<10x60xf32, #tpu.memory_space<vmem>>, vector<10x60xf32>
    %cst_27 = arith.constant dense<0.000000e+00> : vector<10x384xf32>
    %112 = tpu.matmul %111, %110, %cst_27 {dimension_numbers = #tpu.dot_dimension_numbers<[1], [0], [0], [1], [0, 0, 1, 1], [], []>} : vector<10x60xf32>, vector<60x384xf32>, vector<10x384xf32> -> vector<10x384xf32>
    %113 = arith.truncf %112 : vector<10x384xf32> to vector<10x384xbf16>
    %c0_28 = arith.constant 0 : index
    %c0_29 = arith.constant 0 : index
    %c0_30 = arith.constant 0 : index
    %114 = vector.load %arg16[%c0_28, %c0_29, %c0_30] : memref<1x384x384xi8, #tpu.memory_space<vmem>>, vector<1x384x384xi8>
    %115 = vector.shape_cast %114 : vector<1x384x384xi8> to vector<384x384xi8>
    %116 = arith.sitofp %115 : vector<384x384xi8> to vector<384x384xbf16>
    %cst_31 = arith.constant dense<0.000000e+00> : vector<10x384xf32>
    %117 = tpu.matmul %113, %116, %cst_31 {dimension_numbers = #tpu.dot_dimension_numbers<[1], [0], [0], [1], [0, 0, 1, 1], [], []>} : vector<10x384xbf16>, vector<384x384xbf16>, vector<10x384xf32> -> vector<10x384xf32>
    %118 = vector.broadcast %17 : vector<1x384xf32> to vector<10x384xf32>
    %119 = arith.mulf %117, %118 : vector<10x384xf32>
    %120 = vector.broadcast %10 : vector<1x384xf32> to vector<10x384xf32>
    %121 = arith.addf %119, %120 : vector<10x384xf32>
    %122 = vector.broadcast %11 : vector<1x384xf32> to vector<10x384xf32>
    %123 = arith.mulf %122, %121 : vector<10x384xf32>
    %124 = arith.addf %3, %123 : vector<10x384xf32>
    %cst_32 = arith.constant dense<0.000000e+00> : vector<10xf32>
    %125 = vector.multi_reduction <add>, %124, %cst_32 [1] : vector<10x384xf32> to vector<10xf32>
    %126 = vector.shape_cast %125 : vector<10xf32> to vector<10x1xf32>
    %cst_33 = arith.constant 3.840000e+02 : f32
    %127 = vector.broadcast %cst_33 : f32 to vector<10x1xf32>
    %128 = arith.divf %126, %127 : vector<10x1xf32>
    %129 = vector.broadcast %128 : vector<10x1xf32> to vector<10x384xf32>
    %130 = arith.subf %124, %129 : vector<10x384xf32>
    %131 = arith.mulf %130, %130 : vector<10x384xf32>
    %cst_34 = arith.constant dense<0.000000e+00> : vector<10xf32>
    %132 = vector.multi_reduction <add>, %131, %cst_34 [1] : vector<10x384xf32> to vector<10xf32>
    %133 = vector.shape_cast %132 : vector<10xf32> to vector<10x1xf32>
    %cst_35 = arith.constant 3.840000e+02 : f32
    %134 = vector.broadcast %cst_35 : f32 to vector<10x1xf32>
    %135 = arith.divf %133, %134 : vector<10x1xf32>
    %cst_36 = arith.constant 9.99999997E-7 : f32
    %136 = vector.broadcast %cst_36 : f32 to vector<10x1xf32>
    %137 = arith.addf %135, %136 : vector<10x1xf32>
    %138 = math.rsqrt %137 : vector<10x1xf32>
    %139 = vector.broadcast %138 : vector<10x1xf32> to vector<10x384xf32>
    %140 = arith.mulf %130, %139 : vector<10x384xf32>
    %141 = vector.broadcast %8 : vector<1x384xf32> to vector<10x384xf32>
    %142 = arith.mulf %140, %141 : vector<10x384xf32>
    %143 = vector.broadcast %9 : vector<1x384xf32> to vector<10x384xf32>
    %144 = arith.addf %142, %143 : vector<10x384xf32>
    %145 = arith.truncf %144 : vector<10x384xf32> to vector<10x384xbf16>
    %c0_37 = arith.constant 0 : index
    %c0_38 = arith.constant 0 : index
    %c0_39 = arith.constant 0 : index
    %146 = vector.load %arg17[%c0_37, %c0_38, %c0_39] : memref<1x384x1536xi8, #tpu.memory_space<vmem>>, vector<1x384x1536xi8>
    %147 = vector.shape_cast %146 : vector<1x384x1536xi8> to vector<384x1536xi8>
    %148 = arith.sitofp %147 : vector<384x1536xi8> to vector<384x1536xbf16>
    %cst_40 = arith.constant dense<0.000000e+00> : vector<10x1536xf32>
    %149 = tpu.matmul %145, %148, %cst_40 {dimension_numbers = #tpu.dot_dimension_numbers<[1], [0], [0], [1], [0, 0, 1, 1], [], []>} : vector<10x384xbf16>, vector<384x1536xbf16>, vector<10x1536xf32> -> vector<10x1536xf32>
    %150 = vector.broadcast %23 : vector<1x1536xf32> to vector<10x1536xf32>
    %151 = arith.mulf %149, %150 : vector<10x1536xf32>
    %152 = vector.broadcast %18 : vector<1x1536xf32> to vector<10x1536xf32>
    %153 = arith.addf %151, %152 : vector<10x1536xf32>
    %cst_41 = arith.constant 5.000000e-01 : f32
    %154 = vector.broadcast %cst_41 : f32 to vector<10x1536xf32>
    %155 = arith.mulf %154, %153 : vector<10x1536xf32>
    %cst_42 = arith.constant 0.707106769 : f32
    %156 = vector.broadcast %cst_42 : f32 to vector<10x1536xf32>
    %157 = arith.mulf %153, %156 : vector<10x1536xf32>
    %158 = math.absf %157 : vector<10x1536xf32>
    %cst_43 = arith.constant 5.000000e-01 : f32
    %159 = vector.broadcast %cst_43 : f32 to vector<10x1536xf32>
    %160 = arith.mulf %159, %158 : vector<10x1536xf32>
    %cst_44 = arith.constant 1.000000e+00 : f32
    %161 = vector.broadcast %cst_44 : f32 to vector<10x1536xf32>
    %162 = arith.addf %161, %160 : vector<10x1536xf32>
    %cst_45 = arith.constant 1.000000e+00 : f32
    %163 = vector.broadcast %cst_45 : f32 to vector<10x1536xf32>
    %164 = arith.divf %163, %162 : vector<10x1536xf32>
    %cst_46 = arith.constant 0.170872763 : f32
    %165 = vector.broadcast %cst_46 : f32 to vector<10x1536xf32>
    %166 = arith.mulf %164, %165 : vector<10x1536xf32>
    %cst_47 = arith.constant -0.822152256 : f32
    %167 = vector.broadcast %cst_47 : f32 to vector<10x1536xf32>
    %168 = arith.addf %167, %166 : vector<10x1536xf32>
    %169 = arith.mulf %164, %168 : vector<10x1536xf32>
    %cst_48 = arith.constant 1.48851585 : f32
    %170 = vector.broadcast %cst_48 : f32 to vector<10x1536xf32>
    %171 = arith.addf %170, %169 : vector<10x1536xf32>
    %172 = arith.mulf %164, %171 : vector<10x1536xf32>
    %cst_49 = arith.constant -1.13520396 : f32
    %173 = vector.broadcast %cst_49 : f32 to vector<10x1536xf32>
    %174 = arith.addf %173, %172 : vector<10x1536xf32>
    %175 = arith.mulf %164, %174 : vector<10x1536xf32>
    %cst_50 = arith.constant 0.278868079 : f32
    %176 = vector.broadcast %cst_50 : f32 to vector<10x1536xf32>
    %177 = arith.addf %176, %175 : vector<10x1536xf32>
    %178 = arith.mulf %164, %177 : vector<10x1536xf32>
    %cst_51 = arith.constant -0.186288059 : f32
    %179 = vector.broadcast %cst_51 : f32 to vector<10x1536xf32>
    %180 = arith.addf %179, %178 : vector<10x1536xf32>
    %181 = arith.mulf %164, %180 : vector<10x1536xf32>
    %cst_52 = arith.constant 0.0967841818 : f32
    %182 = vector.broadcast %cst_52 : f32 to vector<10x1536xf32>
    %183 = arith.addf %182, %181 : vector<10x1536xf32>
    %184 = arith.mulf %164, %183 : vector<10x1536xf32>
    %cst_53 = arith.constant 0.374091953 : f32
    %185 = vector.broadcast %cst_53 : f32 to vector<10x1536xf32>
    %186 = arith.addf %185, %184 : vector<10x1536xf32>
    %187 = arith.mulf %164, %186 : vector<10x1536xf32>
    %cst_54 = arith.constant 1.00002372 : f32
    %188 = vector.broadcast %cst_54 : f32 to vector<10x1536xf32>
    %189 = arith.addf %188, %187 : vector<10x1536xf32>
    %190 = arith.mulf %164, %189 : vector<10x1536xf32>
    %cst_55 = arith.constant -1.26551223 : f32
    %191 = vector.broadcast %cst_55 : f32 to vector<10x1536xf32>
    %192 = arith.addf %191, %190 : vector<10x1536xf32>
    %cst_56 = arith.constant 0.000000e+00 : f32
    %193 = vector.broadcast %cst_56 : f32 to vector<10x1536xf32>
    %194 = arith.subf %193, %158 : vector<10x1536xf32>
    %195 = arith.mulf %194, %158 : vector<10x1536xf32>
    %196 = arith.addf %195, %192 : vector<10x1536xf32>
    %197 = math.exp %196 : vector<10x1536xf32>
    %198 = arith.mulf %164, %197 : vector<10x1536xf32>
    %cst_57 = arith.constant 1.000000e+00 : f32
    %199 = vector.broadcast %cst_57 : f32 to vector<10x1536xf32>
    %200 = arith.subf %199, %198 : vector<10x1536xf32>
    %cst_58 = arith.constant 0.000000e+00 : f32
    %201 = vector.broadcast %cst_58 : f32 to vector<10x1536xf32>
    %202 = arith.cmpf oge, %157, %201 : vector<10x1536xf32>
    %cst_59 = arith.constant 0.000000e+00 : f32
    %203 = vector.broadcast %cst_59 : f32 to vector<10x1536xf32>
    %204 = arith.subf %203, %200 : vector<10x1536xf32>
    %205 = arith.select %202, %200, %204 : vector<10x1536xi1>, vector<10x1536xf32>
    %cst_60 = arith.constant 1.000000e+00 : f32
    %206 = vector.broadcast %cst_60 : f32 to vector<10x1536xf32>
    %207 = arith.addf %206, %205 : vector<10x1536xf32>
    %208 = arith.mulf %155, %207 : vector<10x1536xf32>
    %209 = arith.truncf %208 : vector<10x1536xf32> to vector<10x1536xbf16>
    %c0_61 = arith.constant 0 : index
    %c0_62 = arith.constant 0 : index
    %c0_63 = arith.constant 0 : index
    %210 = vector.load %arg18[%c0_61, %c0_62, %c0_63] : memref<1x1536x384xi8, #tpu.memory_space<vmem>>, vector<1x1536x384xi8>
    %211 = vector.shape_cast %210 : vector<1x1536x384xi8> to vector<1536x384xi8>
    %212 = arith.sitofp %211 : vector<1536x384xi8> to vector<1536x384xbf16>
    %cst_64 = arith.constant dense<0.000000e+00> : vector<10x384xf32>
    %213 = tpu.matmul %209, %212, %cst_64 {dimension_numbers = #tpu.dot_dimension_numbers<[1], [0], [0], [1], [0, 0, 1, 1], [], []>} : vector<10x1536xbf16>, vector<1536x384xbf16>, vector<10x384xf32> -> vector<10x384xf32>
    %214 = vector.broadcast %22 : vector<1x384xf32> to vector<10x384xf32>
    %215 = arith.mulf %213, %214 : vector<10x384xf32>
    %216 = vector.broadcast %12 : vector<1x384xf32> to vector<10x384xf32>
    %217 = arith.addf %215, %216 : vector<10x384xf32>
    %218 = vector.broadcast %13 : vector<1x384xf32> to vector<10x384xf32>
    %219 = arith.mulf %218, %217 : vector<10x384xf32>
    %220 = arith.addf %124, %219 : vector<10x384xf32>
    %c0_65 = arith.constant 0 : index
    %c0_66 = arith.constant 0 : index
    %221 = vector.load %arg20[%c0_65, %c0_66] : memref<10x384xf32, #tpu.memory_space<vmem>>, vector<10x384xf32>
    tpu.vector_store %arg20[%c0_65, %c0_66], %220 {strides = array<i32>} : memref<10x384xf32, #tpu.memory_space<vmem>>, vector<10x384xf32>,
    %c11_i32 = arith.constant 11 : i32
    %222 = arith.cmpi eq, %arg0, %c11_i32 : i32
    %223 = arith.extui %222 : i1 to i32
    %c0_i32_67 = arith.constant 0 : i32
    %224 = arith.cmpi ne, %223, %c0_i32_67 : i32
    scf.if %224 {
      %c0_68 = arith.constant 0 : index
      %c0_69 = arith.constant 0 : index
      %225 = vector.load %arg9[%c0_68, %c0_69] : memref<1x384xf32, #tpu.memory_space<vmem>>, vector<1x384xf32>
      %c0_70 = arith.constant 0 : index
      %c0_71 = arith.constant 0 : index
      %226 = vector.load %arg10[%c0_70, %c0_71] : memref<1x384xf32, #tpu.memory_space<vmem>>, vector<1x384xf32>
      %cst_72 = arith.constant dense<0.000000e+00> : vector<10xf32>
      %227 = vector.multi_reduction <add>, %220, %cst_72 [1] : vector<10x384xf32> to vector<10xf32>
      %228 = vector.shape_cast %227 : vector<10xf32> to vector<10x1xf32>
      %cst_73 = arith.constant 3.840000e+02 : f32
      %229 = vector.broadcast %cst_73 : f32 to vector<10x1xf32>
      %230 = arith.divf %228, %229 : vector<10x1xf32>
      %231 = vector.broadcast %230 : vector<10x1xf32> to vector<10x384xf32>
      %232 = arith.subf %220, %231 : vector<10x384xf32>
      %233 = arith.mulf %232, %232 : vector<10x384xf32>
      %cst_74 = arith.constant dense<0.000000e+00> : vector<10xf32>
      %234 = vector.multi_reduction <add>, %233, %cst_74 [1] : vector<10x384xf32> to vector<10xf32>
      %235 = vector.shape_cast %234 : vector<10xf32> to vector<10x1xf32>
      %cst_75 = arith.constant 3.840000e+02 : f32
      %236 = vector.broadcast %cst_75 : f32 to vector<10x1xf32>
      %237 = arith.divf %235, %236 : vector<10x1xf32>
      %cst_76 = arith.constant 9.99999997E-7 : f32
      %238 = vector.broadcast %cst_76 : f32 to vector<10x1xf32>
      %239 = arith.addf %237, %238 : vector<10x1xf32>
      %240 = math.rsqrt %239 : vector<10x1xf32>
      %241 = vector.broadcast %240 : vector<10x1xf32> to vector<10x384xf32>
      %242 = arith.mulf %232, %241 : vector<10x384xf32>
      %243 = vector.broadcast %225 : vector<1x384xf32> to vector<10x384xf32>
      %244 = arith.mulf %242, %243 : vector<10x384xf32>
      %245 = vector.broadcast %226 : vector<1x384xf32> to vector<10x384xf32>
      %246 = arith.addf %244, %245 : vector<10x384xf32>
      %c0_77 = arith.constant 0 : index
      %c0_78 = arith.constant 0 : index
      %247 = vector.load %arg11[%c0_77, %c0_78] : memref<384x10xf32, #tpu.memory_space<vmem>>, vector<384x10xf32>
      %cst_79 = arith.constant dense<0.000000e+00> : vector<10x10xf32>
      %248 = tpu.matmul %246, %247, %cst_79 {dimension_numbers = #tpu.dot_dimension_numbers<[1], [0], [0], [1], [0, 0, 1, 1], [], []>} : vector<10x384xf32>, vector<384x10xf32>, vector<10x10xf32> -> vector<10x10xf32>
      %c0_80 = arith.constant 0 : index
      %c0_81 = arith.constant 0 : index
      %249 = vector.load %arg12[%c0_80, %c0_81] : memref<1x10xf32, #tpu.memory_space<vmem>>, vector<1x10xf32>
      %250 = vector.broadcast %249 : vector<1x10xf32> to vector<10x10xf32>
      %251 = arith.addf %248, %250 : vector<10x10xf32>
      %c0_82 = arith.constant 0 : index
      %c0_83 = arith.constant 0 : index
      %252 = vector.load %arg19[%c0_82, %c0_83] : memref<10x10xf32, #tpu.memory_space<vmem>>, vector<10x10xf32>
      tpu.vector_store %arg19[%c0_82, %c0_83], %251 {strides = array<i32>} : memref<10x10xf32, #tpu.memory_space<vmem>>, vector<10x10xf32>,
    } else {
    }
    return
  }
  func.func @transform_0(%arg0: i32) -> (i32, i32) {
    %c0_i32 = arith.constant 0 : i32
    %c0_i32_0 = arith.constant 0 : i32
    %c0_i32_1 = arith.constant 0 : i32
    return %c0_i32, %c0_i32_0 : i32, i32
  }
  func.func @transform_1(%arg0: i32) -> (i32, i32) {
    %c0_i32 = arith.constant 0 : i32
    %c0_i32_0 = arith.constant 0 : i32
    %c0_i32_1 = arith.constant 0 : i32
    return %c0_i32, %c0_i32_0 : i32, i32
  }
  func.func @transform_2(%arg0: i32) -> (i32, i32) {
    %c0_i32 = arith.constant 0 : i32
    %c0_i32_0 = arith.constant 0 : i32
    %c0_i32_1 = arith.constant 0 : i32
    return %c0_i32, %c0_i32_0 : i32, i32
  }
  func.func @transform_3(%arg0: i32) -> (i32, i32) {
    %c0_i32 = arith.constant 0 : i32
    %c0_i32_0 = arith.constant 0 : i32
    %c0_i32_1 = arith.constant 0 : i32
    return %c0_i32, %c0_i32_0 : i32, i32
  }
  func.func @transform_4(%arg0: i32) -> (i32, i32) {
    %c0_i32 = arith.constant 0 : i32
    %c0_i32_0 = arith.constant 0 : i32
    %c0_i32_1 = arith.constant 0 : i32
    return %c0_i32, %c0_i32_0 : i32, i32
  }
  func.func @transform_5(%arg0: i32) -> (i32, i32) {
    %c0_i32 = arith.constant 0 : i32
    %c0_i32_0 = arith.constant 0 : i32
    %c0_i32_1 = arith.constant 0 : i32
    return %c0_i32, %c0_i32_0 : i32, i32
  }
  func.func @transform_6(%arg0: i32) -> (i32, i32) {
    %c0_i32 = arith.constant 0 : i32
    %c0_i32_0 = arith.constant 0 : i32
    %c0_i32_1 = arith.constant 0 : i32
    return %c0_i32, %c0_i32_0 : i32, i32
  }
  func.func @transform_7(%arg0: i32) -> (i32, i32) {
    %c0_i32 = arith.constant 0 : i32
    %c0_i32_0 = arith.constant 0 : i32
    %c0_i32_1 = arith.constant 0 : i32
    return %c0_i32, %c0_i32_0 : i32, i32
  }
  func.func @transform_8(%arg0: i32) -> (i32, i32) {
    %c0_i32 = arith.constant 0 : i32
    %c0_i32_0 = arith.constant 0 : i32
    %c0_i32_1 = arith.constant 0 : i32
    return %c0_i32, %c0_i32_0 : i32, i32
  }
  func.func @transform_9(%arg0: i32) -> (i32, i32) {
    %c0_i32 = arith.constant 0 : i32
    %c0_i32_0 = arith.constant 0 : i32
    %c0_i32_1 = arith.constant 0 : i32
    return %c0_i32, %c0_i32_0 : i32, i32
  }
  func.func @transform_10(%arg0: i32) -> (i32, i32) {
    %c0_i32 = arith.constant 0 : i32
    %c0_i32_0 = arith.constant 0 : i32
    %c0_i32_1 = arith.constant 0 : i32
    return %c0_i32, %c0_i32_0 : i32, i32
  }
  func.func @transform_11(%arg0: i32) -> (i32, i32) {
    %c0_i32 = arith.constant 0 : i32
    %c0_i32_0 = arith.constant 0 : i32
    %c0_i32_1 = arith.constant 0 : i32
    return %c0_i32, %c0_i32_0 : i32, i32
  }
  func.func @transform_12(%arg0: i32) -> (i32, i32, i32) {
    %c0_i32 = arith.constant 0 : i32
    %c0_i32_0 = arith.constant 0 : i32
    %c0_i32_1 = arith.constant 0 : i32
    return %arg0, %c0_i32, %c0_i32_0 : i32, i32, i32
  }
  func.func @transform_13(%arg0: i32) -> (i32, i32, i32) {
    %c0_i32 = arith.constant 0 : i32
    %c0_i32_0 = arith.constant 0 : i32
    %c0_i32_1 = arith.constant 0 : i32
    return %arg0, %c0_i32, %c0_i32_0 : i32, i32, i32
  }
  func.func @transform_14(%arg0: i32) -> (i32, i32, i32) {
    %c0_i32 = arith.constant 0 : i32
    %c0_i32_0 = arith.constant 0 : i32
    %c0_i32_1 = arith.constant 0 : i32
    return %arg0, %c0_i32, %c0_i32_0 : i32, i32, i32
  }
  func.func @transform_15(%arg0: i32) -> (i32, i32, i32) {
    %c0_i32 = arith.constant 0 : i32
    %c0_i32_0 = arith.constant 0 : i32
    %c0_i32_1 = arith.constant 0 : i32
    return %arg0, %c0_i32, %c0_i32_0 : i32, i32, i32
  }
  func.func @transform_16(%arg0: i32) -> (i32, i32, i32) {
    %c0_i32 = arith.constant 0 : i32
    %c0_i32_0 = arith.constant 0 : i32
    %c0_i32_1 = arith.constant 0 : i32
    return %arg0, %c0_i32, %c0_i32_0 : i32, i32, i32
  }
  func.func @transform_17(%arg0: i32) -> (i32, i32, i32) {
    %c0_i32 = arith.constant 0 : i32
    %c0_i32_0 = arith.constant 0 : i32
    %c0_i32_1 = arith.constant 0 : i32
    return %arg0, %c0_i32, %c0_i32_0 : i32, i32, i32
  }
  func.func @transform_18(%arg0: i32) -> (i32, i32) {
    %c0_i32 = arith.constant 0 : i32
    %c0_i32_0 = arith.constant 0 : i32
    %c0_i32_1 = arith.constant 0 : i32
    return %c0_i32, %c0_i32_0 : i32, i32
  }
}

</mosaic_0001>

<bundles_post_ra>
// kernel: neg.1
= control target key start
LH: loop header
LB: loop body
LE: loop exit
PB: predicated region body
PF: predicated region fallthrough
CT: control target
= control target key end

     0   :  { %s1928_s0 = inlined_call_operand.vmem [shape: f32[12,10,6,32], index: 0, kind: input, shape index: {}]   ;;  %s1929_s1 = inlined_call_operand.vmem [shape: f32[12,10,6,32], index: 1, kind: output, shape index: {}]  }
   0x1   :  { %v2_v0 = vld [vmem:[%s1928_s0] sm:$0x3f]  ;;  %v978_v20 = vld [vmem:[%s1928_s0 + $0x8] sm:$0x3f]  ;;  %v998_v40 = vld [vmem:[%s1928_s0 + $0x10] sm:$0x3f] }
   0x2   :  { %v960_v1 = vld [vmem:[%s1928_s0 + $0x60] sm:$0x3f]  ;;  %v5_v3 = vxor.u32 2147483648, %v2_v0  ;;  %v980_v21 = vld [vmem:[%s1928_s0 + $0x68] sm:$0x3f]  ;;  %v84_v22 = vxor.u32 2147483648, %v978_v20 }
   0x3   :  { %v962_v2 = vld [vmem:[%s1928_s0 + $0xc0] sm:$0x3f]  ;;  %v12_v4 = vxor.u32 2147483648, %v960_v1  ;;  %v92_v23 = vxor.u32 2147483648, %v980_v21  ;;  %v982_v24 = vld [vmem:[%s1928_s0 + $0xc8] sm:$0x3f] }
   0x4   :  { %v20_v5 = vxor.u32 2147483648, %v962_v2  ;;  %v964_v6 = vld [vmem:[%s1928_s0 + $0x120] sm:$0x3f]  ;;  %7 = vst [vmem:[%s1929_s1] sm:$0xff] %v5_v3  ;;  %v984_v25 = vld [vmem:[%s1928_s0 + $0x128] sm:$0x3f]  ;;  %v100_v26 = vxor.u32 2147483648, %v982_v24 }
   0x5   :  { %v28_v7 = vxor.u32 2147483648, %v964_v6  ;;  %v966_v8 = vld [vmem:[%s1928_s0 + $0x180] sm:$0x3f]  ;;  %961 = vst [vmem:[%s1929_s1 + $0x60] sm:$0xff] %v12_v4  ;;  %v108_v27 = vxor.u32 2147483648, %v984_v25  ;;  %979 = vst [vmem:[%s1929_s1 + $0x8] sm:$0xff] %v84_v22 }
   0x6   :  { %v968_v9 = vld [vmem:[%s1928_s0 + $0x1e0] sm:$0x3f]  ;;  %963 = vst [vmem:[%s1929_s1 + $0xc0] sm:$0xff] %v20_v5  ;;  %v36_v10 = vxor.u32 2147483648, %v966_v8  ;;  %v986_v28 = vld [vmem:[%s1928_s0 + $0x188] sm:$0x3f] }
   0x7   :  { %v44_v11 = vxor.u32 2147483648, %v968_v9  ;;  %v970_v12 = vld [vmem:[%s1928_s0 + $0x240] sm:$0x3f]  ;;  %965 = vst [vmem:[%s1929_s1 + $0x120] sm:$0xff] %v28_v7  ;;  %v988_v29 = vld [vmem:[%s1928_s0 + $0x1e8] sm:$0x3f] }
   0x8   :  { %v972_v13 = vld [vmem:[%s1928_s0 + $0x2a0] sm:$0x3f]  ;;  %v52_v14 = vxor.u32 2147483648, %v970_v12  ;;  %967 = vst [vmem:[%s1929_s1 + $0x180] sm:$0xff] %v36_v10  ;;  %981 = vst [vmem:[%s1929_s1 + $0x68] sm:$0xff] %v92_v23  ;;  %v116_v30 = vxor.u32 2147483648, %v986_v28 }
   0x9   :  { %v60_v15 = vxor.u32 2147483648, %v972_v13  ;;  %v974_v16 = vld [vmem:[%s1928_s0 + $0x300] sm:$0x3f]  ;;  %969 = vst [vmem:[%s1929_s1 + $0x1e0] sm:$0xff] %v44_v11  ;;  %v124_v31 = vxor.u32 2147483648, %v988_v29  ;;  %983 = vst [vmem:[%s1929_s1 + $0xc8] sm:$0xff] %v100_v26 }
   0xa   :  { %v976_v17 = vld [vmem:[%s1928_s0 + $0x360] sm:$0x3f]  ;;  %v68_v18 = vxor.u32 2147483648, %v974_v16  ;;  %971 = vst [vmem:[%s1929_s1 + $0x240] sm:$0xff] %v52_v14  ;;  %v990_v32 = vld [vmem:[%s1928_s0 + $0x248] sm:$0x3f] }
   0xb   :  { %v76_v19 = vxor.u32 2147483648, %v976_v17  ;;  %973 = vst [vmem:[%s1929_s1 + $0x2a0] sm:$0xff] %v60_v15  ;;  %v992_v33 = vld [vmem:[%s1928_s0 + $0x2a8] sm:$0x3f]  ;;  %985 = vst [vmem:[%s1929_s1 + $0x128] sm:$0xff] %v108_v27  ;;  %v132_v34 = vxor.u32 2147483648, %v990_v32 }
   0xc   :  { %975 = vst [vmem:[%s1929_s1 + $0x300] sm:$0xff] %v68_v18  ;;  %v140_v35 = vxor.u32 2147483648, %v992_v33  ;;  %v994_v36 = vld [vmem:[%s1928_s0 + $0x308] sm:$0x3f]  ;;  %987 = vst [vmem:[%s1929_s1 + $0x188] sm:$0xff] %v116_v30  ;;  %v164_v42 = vxor.u32 2147483648, %v998_v40 }
   0xd   :  { %977 = vst [vmem:[%s1929_s1 + $0x360] sm:$0xff] %v76_v19  ;;  %v996_v37 = vld [vmem:[%s1928_s0 + $0x368] sm:$0x3f]  ;;  %989 = vst [vmem:[%s1929_s1 + $0x1e8] sm:$0xff] %v124_v31  ;;  %v148_v38 = vxor.u32 2147483648, %v994_v36 }
   0xe   :  { %v156_v39 = vxor.u32 2147483648, %v996_v37  ;;  %v1000_v41 = vld [vmem:[%s1928_s0 + $0x70] sm:$0x3f]  ;;  %991 = vst [vmem:[%s1929_s1 + $0x248] sm:$0xff] %v132_v34  ;;  %993 = vst [vmem:[%s1929_s1 + $0x2a8] sm:$0xff] %v140_v35 }
   0xf   :  { %v172_v43 = vxor.u32 2147483648, %v1000_v41  ;;  %v1002_v44 = vld [vmem:[%s1928_s0 + $0xd0] sm:$0x3f]  ;;  %995 = vst [vmem:[%s1929_s1 + $0x308] sm:$0xff] %v148_v38  ;;  %999 = vst [vmem:[%s1929_s1 + $0x10] sm:$0xff] %v164_v42 }
  0x10   :  { %v1004_v45 = vld [vmem:[%s1928_s0 + $0x130] sm:$0x3f]  ;;  %997 = vst [vmem:[%s1929_s1 + $0x368] sm:$0xff] %v156_v39  ;;  %v180_v46 = vxor.u32 2147483648, %v1002_v44  ;;  %v1018_v60 = vld [vmem:[%s1928_s0 + $0x18] sm:$0x3f] }
  0x11   :  { %v188_v47 = vxor.u32 2147483648, %v1004_v45  ;;  %v1006_v48 = vld [vmem:[%s1928_s0 + $0x190] sm:$0x3f]  ;;  %1001 = vst [vmem:[%s1929_s1 + $0x70] sm:$0xff] %v172_v43  ;;  %v1020_v61 = vld [vmem:[%s1928_s0 + $0x78] sm:$0x3f] }
  0x12   :  { %v1008_v49 = vld [vmem:[%s1928_s0 + $0x1f0] sm:$0x3f]  ;;  %v196_v50 = vxor.u32 2147483648, %v1006_v48  ;;  %1003 = vst [vmem:[%s1929_s1 + $0xd0] sm:$0xff] %v180_v46  ;;  %v244_v62 = vxor.u32 2147483648, %v1018_v60  ;;  %v252_v63 = vxor.u32 2147483648, %v1020_v61 }
  0x13   :  { %v204_v51 = vxor.u32 2147483648, %v1008_v49  ;;  %v1010_v52 = vld [vmem:[%s1928_s0 + $0x250] sm:$0x3f]  ;;  %1005 = vst [vmem:[%s1929_s1 + $0x130] sm:$0xff] %v188_v47  ;;  %v1022_v0 = vld [vmem:[%s1928_s0 + $0xd8] sm:$0x3f] }
  0x14   :  { %v1012_v53 = vld [vmem:[%s1928_s0 + $0x2b0] sm:$0x3f]  ;;  %v212_v54 = vxor.u32 2147483648, %v1010_v52  ;;  %1007 = vst [vmem:[%s1929_s1 + $0x190] sm:$0xff] %v196_v50  ;;  %v1024_v1 = vld [vmem:[%s1928_s0 + $0x138] sm:$0x3f] }
  0x15   :  { %v220_v55 = vxor.u32 2147483648, %v1012_v53  ;;  %v1014_v56 = vld [vmem:[%s1928_s0 + $0x310] sm:$0x3f]  ;;  %1009 = vst [vmem:[%s1929_s1 + $0x1f0] sm:$0xff] %v204_v51  ;;  %v260_v2 = vxor.u32 2147483648, %v1022_v0  ;;  %v268_v3 = vxor.u32 2147483648, %v1024_v1 }
  0x16   :  { %v1016_v57 = vld [vmem:[%s1928_s0 + $0x370] sm:$0x3f]  ;;  %v228_v58 = vxor.u32 2147483648, %v1014_v56  ;;  %1011 = vst [vmem:[%s1929_s1 + $0x250] sm:$0xff] %v212_v54  ;;  %v1026_v4 = vld [vmem:[%s1928_s0 + $0x198] sm:$0x3f] }
  0x17   :  { %v236_v59 = vxor.u32 2147483648, %v1016_v57  ;;  %1013 = vst [vmem:[%s1929_s1 + $0x2b0] sm:$0xff] %v220_v55  ;;  %v1028_v5 = vld [vmem:[%s1928_s0 + $0x1f8] sm:$0x3f]  ;;  %1019 = vst [vmem:[%s1929_s1 + $0x18] sm:$0xff] %v244_v62  ;;  %v276_v6 = vxor.u32 2147483648, %v1026_v4 }
  0x18   :  { %1015 = vst [vmem:[%s1929_s1 + $0x310] sm:$0xff] %v228_v58  ;;  %1021 = vst [vmem:[%s1929_s1 + $0x78] sm:$0xff] %v252_v63  ;;  %v284_v7 = vxor.u32 2147483648, %v1028_v5  ;;  %v1030_v8 = vld [vmem:[%s1928_s0 + $0x258] sm:$0x3f] }
  0x19   :  { %1017 = vst [vmem:[%s1929_s1 + $0x370] sm:$0xff] %v236_v59  ;;  %v1032_v9 = vld [vmem:[%s1928_s0 + $0x2b8] sm:$0x3f]  ;;  %1023 = vst [vmem:[%s1929_s1 + $0xd8] sm:$0xff] %v260_v2  ;;  %v292_v10 = vxor.u32 2147483648, %v1030_v8 }
  0x1a   :  { %1025 = vst [vmem:[%s1929_s1 + $0x138] sm:$0xff] %v268_v3  ;;  %v300_v11 = vxor.u32 2147483648, %v1032_v9  ;;  %v1034_v12 = vld [vmem:[%s1928_s0 + $0x318] sm:$0x3f]  ;;  %1027 = vst [vmem:[%s1929_s1 + $0x198] sm:$0xff] %v276_v6 }
  0x1b   :  { %v1036_v13 = vld [vmem:[%s1928_s0 + $0x378] sm:$0x3f]  ;;  %1029 = vst [vmem:[%s1929_s1 + $0x1f8] sm:$0xff] %v284_v7  ;;  %v308_v14 = vxor.u32 2147483648, %v1034_v12  ;;  %v1038_v16 = vld [vmem:[%s1928_s0 + $0x20] sm:$0x3f] }
  0x1c   :  { %v316_v15 = vxor.u32 2147483648, %v1036_v13  ;;  %v1040_v17 = vld [vmem:[%s1928_s0 + $0x80] sm:$0x3f]  ;;  %1031 = vst [vmem:[%s1929_s1 + $0x258] sm:$0xff] %v292_v10  ;;  %1033 = vst [vmem:[%s1929_s1 + $0x2b8] sm:$0xff] %v300_v11  ;;  %v324_v18 = vxor.u32 2147483648, %v1038_v16 }
  0x1d   :  { %v332_v19 = vxor.u32 2147483648, %v1040_v17  ;;  %v1042_v20 = vld [vmem:[%s1928_s0 + $0xe0] sm:$0x3f]  ;;  %1035 = vst [vmem:[%s1929_s1 + $0x318] sm:$0xff] %v308_v14  ;;  %v1058_v36 = vld [vmem:[%s1928_s0 + $0x28] sm:$0x3f] }
  0x1e   :  { %v1044_v21 = vld [vmem:[%s1928_s0 + $0x140] sm:$0x3f]  ;;  %1037 = vst [vmem:[%s1929_s1 + $0x378] sm:$0xff] %v316_v15  ;;  %v340_v22 = vxor.u32 2147483648, %v1042_v20  ;;  %1039 = vst [vmem:[%s1929_s1 + $0x20] sm:$0xff] %v324_v18  ;;  %v404_v38 = vxor.u32 2147483648, %v1058_v36 }
  0x1f   :  { %v348_v23 = vxor.u32 2147483648, %v1044_v21  ;;  %v1046_v24 = vld [vmem:[%s1928_s0 + $0x1a0] sm:$0x3f]  ;;  %1041 = vst [vmem:[%s1929_s1 + $0x80] sm:$0xff] %v332_v19  ;;  %v1060_v37 = vld [vmem:[%s1928_s0 + $0x88] sm:$0x3f] }
  0x20   :  { %v1048_v25 = vld [vmem:[%s1928_s0 + $0x200] sm:$0x3f]  ;;  %v356_v26 = vxor.u32 2147483648, %v1046_v24  ;;  %1043 = vst [vmem:[%s1929_s1 + $0xe0] sm:$0xff] %v340_v22  ;;  %v412_v39 = vxor.u32 2147483648, %v1060_v37  ;;  %1059 = vst [vmem:[%s1929_s1 + $0x28] sm:$0xff] %v404_v38 }
  0x21   :  { %v364_v27 = vxor.u32 2147483648, %v1048_v25  ;;  %v1050_v28 = vld [vmem:[%s1928_s0 + $0x260] sm:$0x3f]  ;;  %1045 = vst [vmem:[%s1929_s1 + $0x140] sm:$0xff] %v348_v23  ;;  %v1062_v40 = vld [vmem:[%s1928_s0 + $0xe8] sm:$0x3f] }
  0x22   :  { %v1052_v29 = vld [vmem:[%s1928_s0 + $0x2c0] sm:$0x3f]  ;;  %v372_v30 = vxor.u32 2147483648, %v1050_v28  ;;  %1047 = vst [vmem:[%s1929_s1 + $0x1a0] sm:$0xff] %v356_v26  ;;  %v1064_v41 = vld [vmem:[%s1928_s0 + $0x148] sm:$0x3f] }
  0x23   :  { %v380_v31 = vxor.u32 2147483648, %v1052_v29  ;;  %v1054_v32 = vld [vmem:[%s1928_s0 + $0x320] sm:$0x3f]  ;;  %1049 = vst [vmem:[%s1929_s1 + $0x200] sm:$0xff] %v364_v27  ;;  %v420_v42 = vxor.u32 2147483648, %v1062_v40  ;;  %v428_v43 = vxor.u32 2147483648, %v1064_v41 }
  0x24   :  { %v1056_v33 = vld [vmem:[%s1928_s0 + $0x380] sm:$0x3f]  ;;  %v388_v34 = vxor.u32 2147483648, %v1054_v32  ;;  %1051 = vst [vmem:[%s1929_s1 + $0x260] sm:$0xff] %v372_v30  ;;  %v1066_v44 = vld [vmem:[%s1928_s0 + $0x1a8] sm:$0x3f] }
  0x25   :  { %v396_v35 = vxor.u32 2147483648, %v1056_v33  ;;  %1053 = vst [vmem:[%s1929_s1 + $0x2c0] sm:$0xff] %v380_v31  ;;  %v1068_v45 = vld [vmem:[%s1928_s0 + $0x208] sm:$0x3f]  ;;  %1061 = vst [vmem:[%s1929_s1 + $0x88] sm:$0xff] %v412_v39  ;;  %v436_v46 = vxor.u32 2147483648, %v1066_v44 }
  0x26   :  { %1055 = vst [vmem:[%s1929_s1 + $0x320] sm:$0xff] %v388_v34  ;;  %v444_v47 = vxor.u32 2147483648, %v1068_v45  ;;  %v1070_v48 = vld [vmem:[%s1928_s0 + $0x268] sm:$0x3f]  ;;  %1063 = vst [vmem:[%s1929_s1 + $0xe8] sm:$0xff] %v420_v42 }
  0x27   :  { %1057 = vst [vmem:[%s1929_s1 + $0x380] sm:$0xff] %v396_v35  ;;  %v1072_v49 = vld [vmem:[%s1928_s0 + $0x2c8] sm:$0x3f]  ;;  %1065 = vst [vmem:[%s1929_s1 + $0x148] sm:$0xff] %v428_v43  ;;  %v452_v50 = vxor.u32 2147483648, %v1070_v48 }
  0x28   :  { %v460_v51 = vxor.u32 2147483648, %v1072_v49  ;;  %v1074_v52 = vld [vmem:[%s1928_s0 + $0x328] sm:$0x3f]  ;;  %1067 = vst [vmem:[%s1929_s1 + $0x1a8] sm:$0xff] %v436_v46  ;;  %1069 = vst [vmem:[%s1929_s1 + $0x208] sm:$0xff] %v444_v47 }
  0x29   :  { %v1076_v53 = vld [vmem:[%s1928_s0 + $0x388] sm:$0x3f]  ;;  %v468_v54 = vxor.u32 2147483648, %v1074_v52  ;;  %v1078_v56 = vld [vmem:[%s1928_s0 + $0x30] sm:$0x3f]  ;;  %1071 = vst [vmem:[%s1929_s1 + $0x268] sm:$0xff] %v452_v50 }
  0x2a   :  { %v476_v55 = vxor.u32 2147483648, %v1076_v53  ;;  %v1080_v57 = vld [vmem:[%s1928_s0 + $0x90] sm:$0x3f]  ;;  %1073 = vst [vmem:[%s1929_s1 + $0x2c8] sm:$0xff] %v460_v51  ;;  %v484_v58 = vxor.u32 2147483648, %v1078_v56 }
  0x2b   :  { %v492_v59 = vxor.u32 2147483648, %v1080_v57  ;;  %v1082_v60 = vld [vmem:[%s1928_s0 + $0xf0] sm:$0x3f]  ;;  %1075 = vst [vmem:[%s1929_s1 + $0x328] sm:$0xff] %v468_v54  ;;  %v1098_v12 = vld [vmem:[%s1928_s0 + $0x38] sm:$0x3f] }
  0x2c   :  { %v1084_v61 = vld [vmem:[%s1928_s0 + $0x150] sm:$0x3f]  ;;  %1077 = vst [vmem:[%s1929_s1 + $0x388] sm:$0xff] %v476_v55  ;;  %v500_v62 = vxor.u32 2147483648, %v1082_v60  ;;  %1079 = vst [vmem:[%s1929_s1 + $0x30] sm:$0xff] %v484_v58  ;;  %v564_v14 = vxor.u32 2147483648, %v1098_v12 }
  0x2d   :  { %v508_v63 = vxor.u32 2147483648, %v1084_v61  ;;  %v1086_v0 = vld [vmem:[%s1928_s0 + $0x1b0] sm:$0x3f]  ;;  %1081 = vst [vmem:[%s1929_s1 + $0x90] sm:$0xff] %v492_v59  ;;  %v1100_v13 = vld [vmem:[%s1928_s0 + $0x98] sm:$0x3f] }
  0x2e   :  { %v1088_v1 = vld [vmem:[%s1928_s0 + $0x210] sm:$0x3f]  ;;  %v516_v2 = vxor.u32 2147483648, %v1086_v0  ;;  %1083 = vst [vmem:[%s1929_s1 + $0xf0] sm:$0xff] %v500_v62  ;;  %v572_v15 = vxor.u32 2147483648, %v1100_v13  ;;  %1099 = vst [vmem:[%s1929_s1 + $0x38] sm:$0xff] %v564_v14 }
  0x2f   :  { %v524_v3 = vxor.u32 2147483648, %v1088_v1  ;;  %v1090_v4 = vld [vmem:[%s1928_s0 + $0x270] sm:$0x3f]  ;;  %1085 = vst [vmem:[%s1929_s1 + $0x150] sm:$0xff] %v508_v63  ;;  %v1102_v16 = vld [vmem:[%s1928_s0 + $0xf8] sm:$0x3f] }
  0x30   :  { %v1092_v5 = vld [vmem:[%s1928_s0 + $0x2d0] sm:$0x3f]  ;;  %v532_v6 = vxor.u32 2147483648, %v1090_v4  ;;  %1087 = vst [vmem:[%s1929_s1 + $0x1b0] sm:$0xff] %v516_v2  ;;  %v1104_v17 = vld [vmem:[%s1928_s0 + $0x158] sm:$0x3f] }
  0x31   :  { %v540_v7 = vxor.u32 2147483648, %v1092_v5  ;;  %v1094_v8 = vld [vmem:[%s1928_s0 + $0x330] sm:$0x3f]  ;;  %1089 = vst [vmem:[%s1929_s1 + $0x210] sm:$0xff] %v524_v3  ;;  %v580_v18 = vxor.u32 2147483648, %v1102_v16  ;;  %v588_v19 = vxor.u32 2147483648, %v1104_v17 }
  0x32   :  { %v1096_v9 = vld [vmem:[%s1928_s0 + $0x390] sm:$0x3f]  ;;  %v548_v10 = vxor.u32 2147483648, %v1094_v8  ;;  %1091 = vst [vmem:[%s1929_s1 + $0x270] sm:$0xff] %v532_v6  ;;  %v1106_v20 = vld [vmem:[%s1928_s0 + $0x1b8] sm:$0x3f] }
  0x33   :  { %v556_v11 = vxor.u32 2147483648, %v1096_v9  ;;  %1093 = vst [vmem:[%s1929_s1 + $0x2d0] sm:$0xff] %v540_v7  ;;  %v1108_v21 = vld [vmem:[%s1928_s0 + $0x218] sm:$0x3f]  ;;  %1101 = vst [vmem:[%s1929_s1 + $0x98] sm:$0xff] %v572_v15  ;;  %v596_v22 = vxor.u32 2147483648, %v1106_v20 }
  0x34   :  { %1095 = vst [vmem:[%s1929_s1 + $0x330] sm:$0xff] %v548_v10  ;;  %v604_v23 = vxor.u32 2147483648, %v1108_v21  ;;  %v1110_v24 = vld [vmem:[%s1928_s0 + $0x278] sm:$0x3f]  ;;  %1103 = vst [vmem:[%s1929_s1 + $0xf8] sm:$0xff] %v580_v18 }
  0x35   :  { %1097 = vst [vmem:[%s1929_s1 + $0x390] sm:$0xff] %v556_v11  ;;  %v1112_v25 = vld [vmem:[%s1928_s0 + $0x2d8] sm:$0x3f]  ;;  %1105 = vst [vmem:[%s1929_s1 + $0x158] sm:$0xff] %v588_v19  ;;  %v612_v26 = vxor.u32 2147483648, %v1110_v24 }
  0x36   :  { %v620_v27 = vxor.u32 2147483648, %v1112_v25  ;;  %v1114_v28 = vld [vmem:[%s1928_s0 + $0x338] sm:$0x3f]  ;;  %1107 = vst [vmem:[%s1929_s1 + $0x1b8] sm:$0xff] %v596_v22  ;;  %1109 = vst [vmem:[%s1929_s1 + $0x218] sm:$0xff] %v604_v23 }
  0x37   :  { %v1116_v29 = vld [vmem:[%s1928_s0 + $0x398] sm:$0x3f]  ;;  %v628_v30 = vxor.u32 2147483648, %v1114_v28  ;;  %v1118_v32 = vld [vmem:[%s1928_s0 + $0x40] sm:$0x3f]  ;;  %1111 = vst [vmem:[%s1929_s1 + $0x278] sm:$0xff] %v612_v26 }
  0x38   :  { %v636_v31 = vxor.u32 2147483648, %v1116_v29  ;;  %v1120_v33 = vld [vmem:[%s1928_s0 + $0xa0] sm:$0x3f]  ;;  %1113 = vst [vmem:[%s1929_s1 + $0x2d8] sm:$0xff] %v620_v27  ;;  %v644_v34 = vxor.u32 2147483648, %v1118_v32 }
  0x39   :  { %v652_v35 = vxor.u32 2147483648, %v1120_v33  ;;  %v1122_v36 = vld [vmem:[%s1928_s0 + $0x100] sm:$0x3f]  ;;  %1115 = vst [vmem:[%s1929_s1 + $0x338] sm:$0xff] %v628_v30  ;;  %v1138_v52 = vld [vmem:[%s1928_s0 + $0x48] sm:$0x3f] }
  0x3a   :  { %v1124_v37 = vld [vmem:[%s1928_s0 + $0x160] sm:$0x3f]  ;;  %1117 = vst [vmem:[%s1929_s1 + $0x398] sm:$0xff] %v636_v31  ;;  %v660_v38 = vxor.u32 2147483648, %v1122_v36  ;;  %1119 = vst [vmem:[%s1929_s1 + $0x40] sm:$0xff] %v644_v34  ;;  %v724_v54 = vxor.u32 2147483648, %v1138_v52 }
  0x3b   :  { %v668_v39 = vxor.u32 2147483648, %v1124_v37  ;;  %v1126_v40 = vld [vmem:[%s1928_s0 + $0x1c0] sm:$0x3f]  ;;  %1121 = vst [vmem:[%s1929_s1 + $0xa0] sm:$0xff] %v652_v35  ;;  %v1140_v53 = vld [vmem:[%s1928_s0 + $0xa8] sm:$0x3f] }
  0x3c   :  { %v1128_v41 = vld [vmem:[%s1928_s0 + $0x220] sm:$0x3f]  ;;  %v676_v42 = vxor.u32 2147483648, %v1126_v40  ;;  %1123 = vst [vmem:[%s1929_s1 + $0x100] sm:$0xff] %v660_v38  ;;  %v732_v55 = vxor.u32 2147483648, %v1140_v53  ;;  %1139 = vst [vmem:[%s1929_s1 + $0x48] sm:$0xff] %v724_v54 }
  0x3d   :  { %v684_v43 = vxor.u32 2147483648, %v1128_v41  ;;  %v1130_v44 = vld [vmem:[%s1928_s0 + $0x280] sm:$0x3f]  ;;  %1125 = vst [vmem:[%s1929_s1 + $0x160] sm:$0xff] %v668_v39  ;;  %v1142_v56 = vld [vmem:[%s1928_s0 + $0x108] sm:$0x3f] }
  0x3e   :  { %v1132_v45 = vld [vmem:[%s1928_s0 + $0x2e0] sm:$0x3f]  ;;  %v692_v46 = vxor.u32 2147483648, %v1130_v44  ;;  %1127 = vst [vmem:[%s1929_s1 + $0x1c0] sm:$0xff] %v676_v42  ;;  %v1144_v57 = vld [vmem:[%s1928_s0 + $0x168] sm:$0x3f] }
  0x3f   :  { %v700_v47 = vxor.u32 2147483648, %v1132_v45  ;;  %v1134_v48 = vld [vmem:[%s1928_s0 + $0x340] sm:$0x3f]  ;;  %1129 = vst [vmem:[%s1929_s1 + $0x220] sm:$0xff] %v684_v43  ;;  %v740_v58 = vxor.u32 2147483648, %v1142_v56  ;;  %v748_v59 = vxor.u32 2147483648, %v1144_v57 }
  0x40   :  { %v1136_v49 = vld [vmem:[%s1928_s0 + $0x3a0] sm:$0x3f]  ;;  %v708_v50 = vxor.u32 2147483648, %v1134_v48  ;;  %1131 = vst [vmem:[%s1929_s1 + $0x280] sm:$0xff] %v692_v46  ;;  %v1146_v60 = vld [vmem:[%s1928_s0 + $0x1c8] sm:$0x3f] }
  0x41   :  { %v716_v51 = vxor.u32 2147483648, %v1136_v49  ;;  %1133 = vst [vmem:[%s1929_s1 + $0x2e0] sm:$0xff] %v700_v47  ;;  %v1148_v61 = vld [vmem:[%s1928_s0 + $0x228] sm:$0x3f]  ;;  %1141 = vst [vmem:[%s1929_s1 + $0xa8] sm:$0xff] %v732_v55  ;;  %v756_v62 = vxor.u32 2147483648, %v1146_v60 }
  0x42   :  { %1135 = vst [vmem:[%s1929_s1 + $0x340] sm:$0xff] %v708_v50  ;;  %v764_v63 = vxor.u32 2147483648, %v1148_v61  ;;  %v1150_v0 = vld [vmem:[%s1928_s0 + $0x288] sm:$0x3f]  ;;  %1143 = vst [vmem:[%s1929_s1 + $0x108] sm:$0xff] %v740_v58 }
  0x43   :  { %1137 = vst [vmem:[%s1929_s1 + $0x3a0] sm:$0xff] %v716_v51  ;;  %v1152_v1 = vld [vmem:[%s1928_s0 + $0x2e8] sm:$0x3f]  ;;  %1145 = vst [vmem:[%s1929_s1 + $0x168] sm:$0xff] %v748_v59  ;;  %v772_v2 = vxor.u32 2147483648, %v1150_v0 }
  0x44   :  { %v780_v3 = vxor.u32 2147483648, %v1152_v1  ;;  %v1154_v4 = vld [vmem:[%s1928_s0 + $0x348] sm:$0x3f]  ;;  %1147 = vst [vmem:[%s1929_s1 + $0x1c8] sm:$0xff] %v756_v62  ;;  %1149 = vst [vmem:[%s1929_s1 + $0x228] sm:$0xff] %v764_v63 }
  0x45   :  { %v1156_v5 = vld [vmem:[%s1928_s0 + $0x3a8] sm:$0x3f]  ;;  %v788_v6 = vxor.u32 2147483648, %v1154_v4  ;;  %v1158_v8 = vld [vmem:[%s1928_s0 + $0x50] sm:$0x3f]  ;;  %1151 = vst [vmem:[%s1929_s1 + $0x288] sm:$0xff] %v772_v2 }
  0x46   :  { %v796_v7 = vxor.u32 2147483648, %v1156_v5  ;;  %v1160_v9 = vld [vmem:[%s1928_s0 + $0xb0] sm:$0x3f]  ;;  %1153 = vst [vmem:[%s1929_s1 + $0x2e8] sm:$0xff] %v780_v3  ;;  %v804_v10 = vxor.u32 2147483648, %v1158_v8 }
  0x47   :  { %v812_v11 = vxor.u32 2147483648, %v1160_v9  ;;  %v1162_v12 = vld [vmem:[%s1928_s0 + $0x110] sm:$0x3f]  ;;  %1155 = vst [vmem:[%s1929_s1 + $0x348] sm:$0xff] %v788_v6  ;;  %v1178_v28 = vld [vmem:[%s1928_s0 + $0x58] sm:$0x3f] }
  0x48   :  { %v1164_v13 = vld [vmem:[%s1928_s0 + $0x170] sm:$0x3f]  ;;  %1157 = vst [vmem:[%s1929_s1 + $0x3a8] sm:$0xff] %v796_v7  ;;  %v820_v14 = vxor.u32 2147483648, %v1162_v12  ;;  %1159 = vst [vmem:[%s1929_s1 + $0x50] sm:$0xff] %v804_v10  ;;  %v884_v30 = vxor.u32 2147483648, %v1178_v28 }
  0x49   :  { %v828_v15 = vxor.u32 2147483648, %v1164_v13  ;;  %v1166_v16 = vld [vmem:[%s1928_s0 + $0x1d0] sm:$0x3f]  ;;  %1161 = vst [vmem:[%s1929_s1 + $0xb0] sm:$0xff] %v812_v11  ;;  %v1180_v29 = vld [vmem:[%s1928_s0 + $0xb8] sm:$0x3f] }
  0x4a   :  { %v1168_v17 = vld [vmem:[%s1928_s0 + $0x230] sm:$0x3f]  ;;  %v836_v18 = vxor.u32 2147483648, %v1166_v16  ;;  %1163 = vst [vmem:[%s1929_s1 + $0x110] sm:$0xff] %v820_v14  ;;  %v892_v31 = vxor.u32 2147483648, %v1180_v29  ;;  %1179 = vst [vmem:[%s1929_s1 + $0x58] sm:$0xff] %v884_v30 }
  0x4b   :  { %v844_v19 = vxor.u32 2147483648, %v1168_v17  ;;  %v1170_v20 = vld [vmem:[%s1928_s0 + $0x290] sm:$0x3f]  ;;  %1165 = vst [vmem:[%s1929_s1 + $0x170] sm:$0xff] %v828_v15  ;;  %v1182_v32 = vld [vmem:[%s1928_s0 + $0x118] sm:$0x3f] }
  0x4c   :  { %v1172_v21 = vld [vmem:[%s1928_s0 + $0x2f0] sm:$0x3f]  ;;  %v852_v22 = vxor.u32 2147483648, %v1170_v20  ;;  %1167 = vst [vmem:[%s1929_s1 + $0x1d0] sm:$0xff] %v836_v18  ;;  %v1184_v33 = vld [vmem:[%s1928_s0 + $0x178] sm:$0x3f] }
  0x4d   :  { %v860_v23 = vxor.u32 2147483648, %v1172_v21  ;;  %v1174_v24 = vld [vmem:[%s1928_s0 + $0x350] sm:$0x3f]  ;;  %1169 = vst [vmem:[%s1929_s1 + $0x230] sm:$0xff] %v844_v19  ;;  %v900_v34 = vxor.u32 2147483648, %v1182_v32  ;;  %v908_v35 = vxor.u32 2147483648, %v1184_v33 }
  0x4e   :  { %v1176_v25 = vld [vmem:[%s1928_s0 + $0x3b0] sm:$0x3f]  ;;  %v868_v26 = vxor.u32 2147483648, %v1174_v24  ;;  %1171 = vst [vmem:[%s1929_s1 + $0x290] sm:$0xff] %v852_v22  ;;  %v1186_v36 = vld [vmem:[%s1928_s0 + $0x1d8] sm:$0x3f] }
  0x4f   :  { %v876_v27 = vxor.u32 2147483648, %v1176_v25  ;;  %1173 = vst [vmem:[%s1929_s1 + $0x2f0] sm:$0xff] %v860_v23  ;;  %v1188_v37 = vld [vmem:[%s1928_s0 + $0x238] sm:$0x3f]  ;;  %1181 = vst [vmem:[%s1929_s1 + $0xb8] sm:$0xff] %v892_v31  ;;  %v916_v38 = vxor.u32 2147483648, %v1186_v36 }
  0x50   :  { %1175 = vst [vmem:[%s1929_s1 + $0x350] sm:$0xff] %v868_v26  ;;  %v924_v39 = vxor.u32 2147483648, %v1188_v37  ;;  %v1190_v40 = vld [vmem:[%s1928_s0 + $0x298] sm:$0x3f]  ;;  %1183 = vst [vmem:[%s1929_s1 + $0x118] sm:$0xff] %v900_v34 }
  0x51   :  { %1177 = vst [vmem:[%s1929_s1 + $0x3b0] sm:$0xff] %v876_v27  ;;  %v1192_v41 = vld [vmem:[%s1928_s0 + $0x2f8] sm:$0x3f]  ;;  %1185 = vst [vmem:[%s1929_s1 + $0x178] sm:$0xff] %v908_v35  ;;  %v932_v42 = vxor.u32 2147483648, %v1190_v40 }
  0x52   :  { %v940_v43 = vxor.u32 2147483648, %v1192_v41  ;;  %v1194_v44 = vld [vmem:[%s1928_s0 + $0x358] sm:$0x3f]  ;;  %1187 = vst [vmem:[%s1929_s1 + $0x1d8] sm:$0xff] %v916_v38  ;;  %1189 = vst [vmem:[%s1929_s1 + $0x238] sm:$0xff] %v924_v39 }
  0x53   :  { %v1196_v45 = vld [vmem:[%s1928_s0 + $0x3b8] sm:$0x3f]  ;;  %v948_v46 = vxor.u32 2147483648, %v1194_v44  ;;  %1191 = vst [vmem:[%s1929_s1 + $0x298] sm:$0xff] %v932_v42 }
  0x54   :  { %v956_v47 = vxor.u32 2147483648, %v1196_v45  ;;  %1193 = vst [vmem:[%s1929_s1 + $0x2f8] sm:$0xff] %v940_v43 }
  0x55   :  { %1195 = vst [vmem:[%s1929_s1 + $0x358] sm:$0xff] %v948_v46 }
  0x56   :  { %1197 = vst [vmem:[%s1929_s1 + $0x3b8] sm:$0xff] %v956_v47 }

// kernel: tile.34
= control target key start
LH: loop header
LB: loop body
LE: loop exit
PB: predicated region body
PF: predicated region fallthrough
CT: control target
= control target key end

     0   :  { %vm4_vm0 = vcmask 1047556   ;;  %s131_s14 = smov 40   ;;  %s43_s15 = smov 3  ;;  %vm6_vm1 = vcmask 80896   ;;  %vm22_vm2 = vcmask 490896   ;;  %vm40_vm3 = vcmask 408896   ;;  %s242_s0 = inlined_call_operand.vmem [shape: f32[6,10,10], index: 0, kind: input, shape index: {}]   ;;  %s243_s1 = inlined_call_operand.vmem [shape: f32[60,10], index: 1, kind: output, shape index: {}]  }
   0x1   :  { %v110_v0 = vld [vmem:[%s242_s0 + $0x4] ss:$8 sm:$0xf]   ;;  %v106_v3 = vld [vmem:[%s242_s0 + $0x5] ss:$8 sm:$0xf]  }
   0x2   :  { %v111_v1 = vld [vmem:[%s242_s0 + $0x4] ss:$8 sm:$0xf0]   ;;  %v107_v4 = vld [vmem:[%s242_s0 + $0x5] ss:$8 sm:$0xf0]  }
   0x3   :  { %v37_v2 = vsel %vm4_vm0, %v111_v1, %v110_v0  ;;  %v19_v5 = vsel %vm4_vm0, %v107_v4, %v106_v3  ;;  %s25_s16 = smov 3  ;;  %s132_s17 = smov 50   ;;  %v112_v6 = vld [vmem:[%s242_s0 + $0x44] ss:$8 sm:%s43_s15]   ;;  %vm58_vm4 = vcmask 326896   ;;  %vm76_vm5 = vcmask 244896  }
   0x4   :  { %38 = vrot.lane.b32.xlu1 %v37_v2, %s131_s14  ;;  %20 = vrot.lane.b32.xlu0 %v19_v5, %s132_s17  ;;  %v108_v7 = vld [vmem:[%s242_s0 + $0x45] ss:$8 sm:%s25_s16]   ;;  %s61_s22 = smov 3  ;;  %s79_s29 = smov 3  ;;  %vm94_vm6 = vcmask 162896  }
   0x5   :  { %v114_v8 = vld [vmem:[%s242_s0 + $0x3] ss:$8 sm:$0xf]   ;;  %s9_s30 = smov 3  ;;  %s133_s10 = smov 30  }
   0x6   :  { %v115_v9 = vld [vmem:[%s242_s0 + $0x3] ss:$8 sm:$0xf0]   ;;  %v118_v12 = vld [vmem:[%s242_s0 + $0x2] ss:$8 sm:$0xf]  }
   0x7   :  { %v116_v10 = vld [vmem:[%s242_s0 + $0x43] ss:$8 sm:%s61_s22]   ;;  %v55_v11 = vsel %vm4_vm0, %v115_v9, %v114_v8  ;;  %v119_v13 = vld [vmem:[%s242_s0 + $0x2] ss:$8 sm:$0xf0]   ;;  %s97_s19 = smov 3 }
   0x8   :  { %45 = vrot.lane.b32.xlu1 %v112_v6, %s131_s14  ;;  %27 = vrot.lane.b32.xlu0 %v108_v7, %s132_s17  ;;  %v2_v14 = vld [vmem:[%s242_s0] ss:$8 sm:$0xf]   ;;  %v73_v19 = vsel %vm4_vm0, %v119_v13, %v118_v12  ;;  %v122_v20 = vld [vmem:[%s242_s0 + $0x1] ss:$8 sm:$0xf]  }
   0x9   :  { %v3_v15 = vld [vmem:[%s242_s0] ss:$8 sm:$0xf0]   ;;  %v120_v18 = vld [vmem:[%s242_s0 + $0x42] ss:$8 sm:%s79_s29]   ;;  %s134_s24 = smov 20  }
   0xa   :  { %v5_v16 = vsel %vm4_vm0, %v3_v15, %v2_v14  ;;  %v104_v17 = vld [vmem:[%s242_s0 + $0x40] ss:$8 sm:%s9_s30]   ;;  %v123_v21 = vld [vmem:[%s242_s0 + $0x1] ss:$8 sm:$0xf0]  }
   0xb   :  { %7 = vst.msk [vmem:[%s243_s1] sm:$0xff] %vm6_vm1, %v5_v16   ;;  %105 = vst.msk [vmem:[%s243_s1 + $0x8] sm:$0x3] %vm6_vm1, %v104_v17   ;;  %v124_v22 = vld [vmem:[%s242_s0 + $0x41] ss:$8 sm:%s97_s19]   ;;  %v91_v23 = vsel %vm4_vm0, %v123_v21, %v122_v20  ;;  %s135_s0 = smov 10  }
   0xc   :  { %63 = vrot.lane.b32.xlu1 %v116_v10, %s133_s10  ;;  %56 = vrot.lane.b32.xlu0 %v55_v11, %s133_s10 }
  0x10   :  { %81 = vrot.lane.b32.xlu1 %v120_v18, %s134_s24  ;;  %74 = vrot.lane.b32.xlu0 %v73_v19, %s134_s24 }
  0x14   :  { %99 = vrot.lane.b32.xlu1 %v124_v22, %s135_s0  ;;  %92 = vrot.lane.b32.xlu0 %v91_v23, %s135_s0 }
  0x76   :  { %v39_v24 = vpop.permute.xlu1 %38   ;;  %v21_v25 = vpop.permute.xlu0 %20  }
  0x77   :  { %23 = vst.msk [vmem:[%s243_s1] sm:$0xff] %vm22_vm2, %v21_v25  }
  0x78   :  { %41 = vst.msk [vmem:[%s243_s1] sm:$0xff] %vm40_vm3, %v39_v24  }
  0x7a   :  { %v46_v26 = vpop.permute.xlu1 %45   ;;  %v28_v27 = vpop.permute.xlu0 %27  }
  0x7b   :  { %109 = vst.msk [vmem:[%s243_s1 + $0x8] sm:$0x3] %vm22_vm2, %v28_v27  }
  0x7c   :  { %113 = vst.msk [vmem:[%s243_s1 + $0x8] sm:$0x3] %vm40_vm3, %v46_v26  }
  0x7e   :  { %v64_v28 = vpop.permute.xlu1 %63   ;;  %v57_v29 = vpop.permute.xlu0 %56  }
  0x7f   :  { %117 = vst.msk [vmem:[%s243_s1 + $0x8] sm:$0x3] %vm58_vm4, %v64_v28   ;;  %59 = vst.msk [vmem:[%s243_s1] sm:$0xff] %vm58_vm4, %v57_v29  }
  0x82   :  { %v82_v30 = vpop.permute.xlu1 %81   ;;  %v75_v31 = vpop.permute.xlu0 %74  }
  0x83   :  { %121 = vst.msk [vmem:[%s243_s1 + $0x8] sm:$0x3] %vm76_vm5, %v82_v30   ;;  %77 = vst.msk [vmem:[%s243_s1] sm:$0xff] %vm76_vm5, %v75_v31  }
  0x86   :  { %v100_v32 = vpop.permute.xlu1 %99   ;;  %v93_v33 = vpop.permute.xlu0 %92  }
  0x87   :  { %125 = vst.msk [vmem:[%s243_s1 + $0x8] sm:$0x3] %vm94_vm6, %v100_v32   ;;  %95 = vst.msk [vmem:[%s243_s1] sm:$0xff] %vm94_vm6, %v93_v33  }

// kernel: eq.50
= control target key start
LH: loop header
LB: loop body
LE: loop exit
PB: predicated region body
PF: predicated region fallthrough
CT: control target
= control target key end

     0   :  { %s51_s10 = smov 50   ;;  %s52_s11 = smov 30   ;;  %vm3_vm0 = vcmask 80896   ;;  %vm9_vm1 = vcmask 490896   ;;  %vm15_vm2 = vcmask 408896   ;;  %vm21_vm3 = vcmask 326896   ;;  %s87_s0 = inlined_call_operand.vmem [shape: s32[6,10], index: 0, kind: input, shape index: {}]   ;;  %s88_s1 = inlined_call_operand.vmem [shape: s32[60], index: 1, kind: output, shape index: {}]  }
   0x1   :  { %v41_v0 = vld [vmem:[%s87_s0 + $0x5] sm:$0x1]   ;;  %v43_v1 = vld [vmem:[%s87_s0 + $0x3] sm:$0x1]   ;;  %v42_v2 = vld [vmem:[%s87_s0 + $0x4] sm:$0x1]  }
   0x2   :  { %7 = vrot.lane.b32.xlu0 %v41_v0, %s51_s10  ;;  %19 = vrot.lane.b32.xlu1 %v43_v1, %s52_s11  ;;  %v44_v3 = vld [vmem:[%s87_s0 + $0x2] sm:$0x1]   ;;  %v2_v4 = vld [vmem:[%s87_s0] sm:$0x1]   ;;  %s53_s18 = smov 40   ;;  %s54_s19 = smov 20  }
   0x3   :  { %4 = vst.msk [vmem:[#allocation0] sm:$0x1] %vm3_vm0, %v2_v4   ;;  %v45_v5 = vld [vmem:[%s87_s0 + $0x1] sm:$0x1]   ;;  %s55_s0 = smov 10   ;;  %vm27_vm4 = vcmask 244896  }
   0x4   :  { %vm33_vm5 = vcmask 162896  }
   0x6   :  { %13 = vrot.lane.b32.xlu0 %v42_v2, %s53_s18  ;;  %25 = vrot.lane.b32.xlu1 %v44_v3, %s54_s19 }
   0xa   :  { %31 = vrot.lane.b32.xlu0 %v45_v5, %s55_s0 }
  0x74   :  { %v8_v6 = vpop.permute.xlu0 %7   ;;  %v20_v7 = vpop.permute.xlu1 %19  }
  0x75   :  { %10 = vst.msk [vmem:[#allocation0] sm:$0x1] %vm9_vm1, %v8_v6  }
  0x78   :  { %v14_v8 = vpop.permute.xlu0 %13   ;;  %v26_v9 = vpop.permute.xlu1 %25  }
  0x79   :  { %16 = vst.msk [vmem:[#allocation0] sm:$0x1] %vm15_vm2, %v14_v8  }
  0x7a   :  { %22 = vst.msk [vmem:[#allocation0] sm:$0x1] %vm21_vm3, %v20_v7  }
  0x7b   :  { %28 = vst.msk [vmem:[#allocation0] sm:$0x1] %vm27_vm4, %v26_v9  }
  0x7c   :  { %v32_v10 = vpop.permute.xlu0 %31  }
  0x7d   :  { %34 = vst.msk [vmem:[#allocation0] sm:$0x1] %vm33_vm5, %v32_v10  }
  0x84   :  { %v38_v11 = vld [vmem:[#allocation0] sm:$0x1] }
  0x85   :  { %40 = vst [vmem:[%s88_s1] sm:$0x1] %v38_v11 }

// kernel: tile.39
= control target key start
LH: loop header
LB: loop body
LE: loop exit
PB: predicated region body
PF: predicated region fallthrough
CT: control target
= control target key end

     0   :  { %vm4_vm0 = vcmask 1047556   ;;  %s131_s14 = smov 40   ;;  %s43_s15 = smov 3  ;;  %vm6_vm1 = vcmask 80896   ;;  %vm22_vm2 = vcmask 490896   ;;  %vm40_vm3 = vcmask 408896   ;;  %s242_s0 = inlined_call_operand.vmem [shape: f32[10,6,10], index: 0, kind: input, shape index: {}]   ;;  %s243_s1 = inlined_call_operand.vmem [shape: f32[10,60], index: 1, kind: output, shape index: {}]  }
   0x1   :  { %v110_v0 = vld [vmem:[%s242_s0 + $0x4] ss:$8 sm:$0xf]   ;;  %v106_v3 = vld [vmem:[%s242_s0 + $0x5] ss:$8 sm:$0xf]  }
   0x2   :  { %v111_v1 = vld [vmem:[%s242_s0 + $0x4] ss:$8 sm:$0xf0]   ;;  %v107_v4 = vld [vmem:[%s242_s0 + $0x5] ss:$8 sm:$0xf0]  }
   0x3   :  { %v37_v2 = vsel %vm4_vm0, %v111_v1, %v110_v0  ;;  %v19_v5 = vsel %vm4_vm0, %v107_v4, %v106_v3  ;;  %s25_s16 = smov 3  ;;  %s132_s17 = smov 50   ;;  %v112_v6 = vld [vmem:[%s242_s0 + $0x44] ss:$8 sm:%s43_s15]   ;;  %vm58_vm4 = vcmask 326896   ;;  %vm76_vm5 = vcmask 244896  }
   0x4   :  { %38 = vrot.lane.b32.xlu1 %v37_v2, %s131_s14  ;;  %20 = vrot.lane.b32.xlu0 %v19_v5, %s132_s17  ;;  %v108_v7 = vld [vmem:[%s242_s0 + $0x45] ss:$8 sm:%s25_s16]   ;;  %s61_s22 = smov 3  ;;  %s79_s29 = smov 3  ;;  %vm94_vm6 = vcmask 162896  }
   0x5   :  { %v114_v8 = vld [vmem:[%s242_s0 + $0x3] ss:$8 sm:$0xf]   ;;  %s9_s30 = smov 3  ;;  %s133_s10 = smov 30  }
   0x6   :  { %v115_v9 = vld [vmem:[%s242_s0 + $0x3] ss:$8 sm:$0xf0]   ;;  %v118_v12 = vld [vmem:[%s242_s0 + $0x2] ss:$8 sm:$0xf]  }
   0x7   :  { %v116_v10 = vld [vmem:[%s242_s0 + $0x43] ss:$8 sm:%s61_s22]   ;;  %v55_v11 = vsel %vm4_vm0, %v115_v9, %v114_v8  ;;  %v119_v13 = vld [vmem:[%s242_s0 + $0x2] ss:$8 sm:$0xf0]   ;;  %s97_s19 = smov 3 }
   0x8   :  { %45 = vrot.lane.b32.xlu1 %v112_v6, %s131_s14  ;;  %27 = vrot.lane.b32.xlu0 %v108_v7, %s132_s17  ;;  %v2_v14 = vld [vmem:[%s242_s0] ss:$8 sm:$0xf]   ;;  %v73_v19 = vsel %vm4_vm0, %v119_v13, %v118_v12  ;;  %v122_v20 = vld [vmem:[%s242_s0 + $0x1] ss:$8 sm:$0xf]  }
   0x9   :  { %v3_v15 = vld [vmem:[%s242_s0] ss:$8 sm:$0xf0]   ;;  %v120_v18 = vld [vmem:[%s242_s0 + $0x42] ss:$8 sm:%s79_s29]   ;;  %s134_s24 = smov 20  }
   0xa   :  { %v5_v16 = vsel %vm4_vm0, %v3_v15, %v2_v14  ;;  %v104_v17 = vld [vmem:[%s242_s0 + $0x40] ss:$8 sm:%s9_s30]   ;;  %v123_v21 = vld [vmem:[%s242_s0 + $0x1] ss:$8 sm:$0xf0]  }
   0xb   :  { %7 = vst.msk [vmem:[%s243_s1] sm:$0xff] %vm6_vm1, %v5_v16   ;;  %105 = vst.msk [vmem:[%s243_s1 + $0x8] sm:$0x3] %vm6_vm1, %v104_v17   ;;  %v124_v22 = vld [vmem:[%s242_s0 + $0x41] ss:$8 sm:%s97_s19]   ;;  %v91_v23 = vsel %vm4_vm0, %v123_v21, %v122_v20  ;;  %s135_s0 = smov 10  }
   0xc   :  { %63 = vrot.lane.b32.xlu1 %v116_v10, %s133_s10  ;;  %56 = vrot.lane.b32.xlu0 %v55_v11, %s133_s10 }
  0x10   :  { %81 = vrot.lane.b32.xlu1 %v120_v18, %s134_s24  ;;  %74 = vrot.lane.b32.xlu0 %v73_v19, %s134_s24 }
  0x14   :  { %99 = vrot.lane.b32.xlu1 %v124_v22, %s135_s0  ;;  %92 = vrot.lane.b32.xlu0 %v91_v23, %s135_s0 }
  0x76   :  { %v39_v24 = vpop.permute.xlu1 %38   ;;  %v21_v25 = vpop.permute.xlu0 %20  }
  0x77   :  { %23 = vst.msk [vmem:[%s243_s1] sm:$0xff] %vm22_vm2, %v21_v25  }
  0x78   :  { %41 = vst.msk [vmem:[%s243_s1] sm:$0xff] %vm40_vm3, %v39_v24  }
  0x7a   :  { %v46_v26 = vpop.permute.xlu1 %45   ;;  %v28_v27 = vpop.permute.xlu0 %27  }
  0x7b   :  { %109 = vst.msk [vmem:[%s243_s1 + $0x8] sm:$0x3] %vm22_vm2, %v28_v27  }
  0x7c   :  { %113 = vst.msk [vmem:[%s243_s1 + $0x8] sm:$0x3] %vm40_vm3, %v46_v26  }
  0x7e   :  { %v64_v28 = vpop.permute.xlu1 %63   ;;  %v57_v29 = vpop.permute.xlu0 %56  }
  0x7f   :  { %117 = vst.msk [vmem:[%s243_s1 + $0x8] sm:$0x3] %vm58_vm4, %v64_v28   ;;  %59 = vst.msk [vmem:[%s243_s1] sm:$0xff] %vm58_vm4, %v57_v29  }
  0x82   :  { %v82_v30 = vpop.permute.xlu1 %81   ;;  %v75_v31 = vpop.permute.xlu0 %74  }
  0x83   :  { %121 = vst.msk [vmem:[%s243_s1 + $0x8] sm:$0x3] %vm76_vm5, %v82_v30   ;;  %77 = vst.msk [vmem:[%s243_s1] sm:$0xff] %vm76_vm5, %v75_v31  }
  0x86   :  { %v100_v32 = vpop.permute.xlu1 %99   ;;  %v93_v33 = vpop.permute.xlu0 %92  }
  0x87   :  { %125 = vst.msk [vmem:[%s243_s1 + $0x8] sm:$0x3] %vm94_vm6, %v100_v32   ;;  %95 = vst.msk [vmem:[%s243_s1] sm:$0xff] %vm94_vm6, %v93_v33  }

// kernel: forward.1
= control target key start
LH: loop header
LB: loop body
LE: loop exit
PB: predicated region body
PF: predicated region fallthrough
CT: control target
= control target key end

     0   :  { %s12915_s0 = inlined_call_operand.vmem [shape: bf16[8,768], index: 0, kind: input, shape index: {}]   ;;  %s12916_s1 = inlined_call_operand.hbm [shape: bf16[768,384], index: 1, kind: input, shape index: {}]   ;;  %s12917_s2 = inlined_call_operand.vmem [shape: f32[1,384], index: 2, kind: input, shape index: {}]   ;;  %s12918_s3 = inlined_call_operand.vmem [shape: f32[10,8], index: 3, kind: input, shape index: {}]   ;;  %s12919_s4 = inlined_call_operand.vmem [shape: f32[10,384], index: 4, kind: input, shape index: {}]   ;;  %s12920_s5 = inlined_call_operand.vmem [shape: f32[60,384], index: 5, kind: input, shape index: {}]   ;;  %s12921_s6 = inlined_call_operand.vmem [shape: f32[60,10], index: 6, kind: input, shape index: {}]   ;;  %s12922_s7 = inlined_call_operand.vmem [shape: f32[10,60], index: 7, kind: input, shape index: {}]   ;;  %s12923_s8 = inlined_call_operand.vmem [shape: f32[1,384], index: 8, kind: input, shape index: {}]   ;;  %s12924_s9 = inlined_call_operand.vmem [shape: f32[1,384], index: 9, kind: input, shape index: {}]   ;;  %s12925_s10 = inlined_call_operand.vmem [shape: f32[384,10], index: 10, kind: input, shape index: {}]   ;;  %s12926_s11 = inlined_call_operand.vmem [shape: f32[1,10], index: 11, kind: input, shape index: {}]   ;;  %s12927_s12 = inlined_call_operand.hbm [shape: f32[12,8,1536], index: 12, kind: input, shape index: {}]   ;;  %s12928_s13 = inlined_call_operand.vmem [shape: f32[12,48,384], index: 13, kind: input, shape index: {}]   ;;  %s12929_s14 = inlined_call_operand.hbm [shape: s8[12,384,1152], index: 14, kind: input, shape index: {}]   ;;  %s12930_s15 = inlined_call_operand.hbm [shape: s8[12,384,384], index: 15, kind: input, shape index: {}]   ;;  %s12931_s16 = inlined_call_operand.vmem [shape: s8[12,384,1536], index: 16, kind: input, shape index: {}]   ;;  %s12932_s17 = inlined_call_operand.vmem [shape: s8[12,1536,384], index: 17, kind: input, shape index: {}]   ;;  %s12933_s18 = inlined_call_operand.vmem [shape: f32[10,10], index: 18, kind: output, shape index: {}]  }
   0x1   :  { %12994 = sst [smem:[#allocation42_spill]] %s12915_s0 }
   0x2   :  { %12995 = sst [smem:[#allocation43_spill]] %s12916_s1 }
   0x3   :  { %12996 = sst [smem:[#allocation44_spill]] %s12917_s2 }
   0x4   :  { %12997 = sst [smem:[#allocation45_spill]] %s12919_s4 }
   0x5   :  { %12998 = sst [smem:[#allocation46_spill]] %s12920_s5 }
   0x6   :  { %12999 = sst [smem:[#allocation47_spill]] %s12921_s6 }
   0x7   :  { %13000 = sst [smem:[#allocation48_spill]] %s12922_s7 }
   0x8   :  { %13001 = sst [smem:[#allocation49_spill]] %s12923_s8 }
   0x9   :  { %13002 = sst [smem:[#allocation50_spill]] %s12924_s9 }
   0xa   :  { %13003 = sst [smem:[#allocation51_spill]] %s12925_s10 }
   0xb   :  { %13004 = sst [smem:[#allocation52_spill]] %s12926_s11 }
   0xc   :  { %13005 = sst [smem:[#allocation53_spill]] %s12927_s12 }
   0xd   :  { %13006 = sst [smem:[#allocation54_spill]] %s12933_s18 }
   0xe   :  { %23 = vsyncpa [#allocation4], 0 }
   0xf   :  { %24 = vsyncpa [#allocation6], 0 }
  0x10   :  { %26 = vsyncpa [#allocation6 + $0x1], 0 }
  0x11   :  { %27 = vsyncpa [#allocation9], 0 }
  0x12   :  { %29 = vsyncpa [#allocation9 + $0x1], 0  ;;  %s9641_s27 = smov 0   ;;  %s9643_s28 = smov 0  }
  0x13   :  { %s9645_s29 = smov 0   ;;  %s9647_s30 = smov 0  }
  0x14 LB: > { %13007 = sst [smem:[#allocation13_spill]] %s9523_s29  ;;  %s9662_s0 = sadd.s32 1, %s9527_s30   ;;  %s9527_s30 = sphi %s9647_s30, %s13245_s30   ;;  %s9523_s29 = sphi %s9645_s29, %s13247_s29   ;;  %s9519_s28 = sphi %s9643_s28, %s13249_s28   ;;  %s9515_s27 = sphi %s9641_s27, %s13248_s27  }
  0x15   : > { %13008 = sst [smem:[#allocation14_spill]] %s9662_s0  ;;  %s294_s19 = sadd.s32 1, %s9523_s29 }
  0x16   : > { %s291_s1 = ssub.s32 %s9527_s30, %s9662_s0  ;;  %p301_p0 = scmp.ne.s32.totalorder %s9523_s29, %s9519_s28 }
  0x17   : > { %p292_p1 = scmp.eq.s32.totalorder %s291_s1, 0  ;;  %p302_p2 = scmp.eq.s32.totalorder %s9527_s30, 0 }
  0x18   : > { %p8944_p3 = scmp.lt.s32.totalorder %s9527_s30, 12  ;;  %s528_s21 = sand.u32 1, %s9527_s30  }
  0x19   : > { %s9672_s20 = scalar_select %p292_p1, %s9523_s29, %s294_s19  }
  0x1a   : > { %p303_p4 = por %p302_p2, %p301_p0  ;;  %s9676_s22 = sand.u32 1, %s9523_s29  }
  0x1b   : > { %13009 = sst [smem:[#allocation15_spill]] %s9672_s20  ;;  %s8908_s2 = smul.u32 96, %s9676_s22 }
  0x1c   : > { %p9679_p5 = pnand %p8944_p3, %p303_p4  ;;  %s8909_s24 = smul.u32 1536, %s9527_s30 }
  0x1d   : > { %s13011_s12 = sld [smem:[#allocation53_spill]]  ;;  %s532_s19 = scalar_lea.vmem [#allocation5], %s8908_s2 }
  0x1e   : > { %s13010_s23 = scalar_select %p9679_p5, 1, 0 }
  0x1f   : > { %s540_s20 = sshll.u32 %s532_s19, 4  ;;  %s8910_s29 = smul.u32 864, %s9676_s22  ;;  %s9689_s20 = int_to_ptr.vmem [resolvable:$true] %s540_s20 }
  0x20   : > { %s9692_s0 = scalar_lea.sflag [#allocation6], %s528_s21  ;;  %p9698_p7 = pneg %p9679_p5 }
  0x22   : > { %s13012_s11 = scalar_select %p9698_p7, 1, 0 }
  0x23   : > { %s9687_s1 = scalar_lea.hbm %s13011_s12, %s8909_s24  ;;  %s9372_s2 = scalar_lea.hbm %s13011_s12, 18432 }
  0x24   : > { %s9367_s18 = scalar_lea.hbm %s9687_s1, 1536  ;;  %p9373_p10 = scmp.lt.u32.totalorder %s9687_s1, %s13011_s12 }
  0x25   : > { %p9368_p6 = scmp.ne.s32.totalorder %s9687_s1, %s9367_s18  ;;  %p9374_p11 = scmp.lt.u32.totalorder %s9372_s2, %s9367_s18 }
  0x26   : > { %p9376_p13 = scmp.lt.u32.totalorder %s9367_s18, %s9687_s1 }
  0x27   : > { %p9370_p8 = pnand %p9698_p7, %p9368_p6  ;;  %p9375_p12 = por %p9374_p11, %p9373_p10 }
  0x29   : > { %p9371_p9 = pneg %p9370_p8  ;;  %p9377_p0 = por %p9376_p13, %p9375_p12 }
  0x2b   : > { %p9378_p1 = pnand %p9377_p0, %p9371_p9 }
  0x2d   : > { %9381 = shalt.err (!%p9378_p1)
}
  0x2e   : > { %s9382_s21 = scalar_lea.vmem %s9689_s20, 1536  ;;  %s9529_s24 = smov [#allocation5]  }
  0x2f   : > { %p9383_p2 = scmp.ne.s32.totalorder %s9689_s20, %s9382_s21  ;;  %s9387_s25 = sshll.u32 %s9529_s24, 4  ;;  %s9388_s25 = int_to_ptr.vmem [resolvable:$false] %s9387_s25 }
  0x30   : > { %s9389_s26 = scalar_lea.vmem %s9388_s25, 3072  ;;  %p9390_p6 = scmp.lt.s32.totalorder %s9689_s20, %s9388_s25 }
  0x31   : > { %p9385_p3 = pnand %p9383_p2, %p9698_p7  ;;  %p9391_p8 = scmp.lt.s32.totalorder %s9389_s26, %s9382_s21 }
  0x33   : > { %p9386_p4 = pneg %p9385_p3  ;;  %p9392_p10 = por %p9391_p8, %p9390_p6 }
  0x35   : > { %p9393_p11 = pnand %p9392_p10, %p9386_p4 }
  0x37   : > { %9396 = shalt.err (!%p9393_p11)
}
  0x38   : > { %8936 = dma.hbm_to_vmem [thread:$0]  (!%p9679_p5), %s9687_s1, 1536, %s9689_s20, %s9692_s0  }
  0x39   : > { %s9723_s18 = sadd.s32 4294967295, %s9527_s30   ;;  %p307_p9 = scmp.ne.s32.totalorder %s9519_s28, %s9515_s27 }
  0x3a   : > { %p12945_p12 = scmp.eq.s32.totalorder %s9723_s18, 0  ;;  %p8040_p13 = scmp.ge.s32.totalorder %s9527_s30, 1 }
  0x3b   : > { %p469_p0 = scmp.lt.s32.totalorder %s9527_s30, 13  ;;  %s9530_s20 = smov [#allocation3]  }
  0x3c   : > { %p9732_p1 = por %p12945_p12, %p307_p9  ;;  %s484_s1 = sshll.u32 %s9530_s20, 4  ;;  %s485_s1 = int_to_ptr.vmem [resolvable:$true] %s484_s1 }
  0x3d   : > { %p9737_p3 = pnand %p8040_p13, %p469_p0  ;;  %s8911_s21 = smul.u32 13824, %s9527_s30 }
  0x3e   : > { %s13013_s2 = scalar_select %p9732_p1, 1, 0 }
  0x3f   : > { %s13014_s19 = scalar_select %p9737_p3, 1, 0 }
  0x40   : > { %p8929_p4 = pneg %p9737_p3  ;;  %s559_s24 = scalar_lea.vmem [#allocation7], %s8910_s29 }
  0x41   : > { %s566_s25 = sshll.u32 %s559_s24, 4  ;;  %s9755_s9 = scalar_lea.hbm %s12929_s14, %s8911_s21  ;;  %s9773_s25 = int_to_ptr.vmem [resolvable:$true] %s566_s25 }
  0x42   : > { %p9745_p6 = pnand %p8929_p4, %p12945_p12  ;;  %s13016_s10 = sld [smem:[#allocation43_spill]] }
  0x44   : > { %p9399_p10 = pneg %p9745_p6 }
  0x48   : > { %s9397_s7 = scalar_lea.hbm %s13016_s10, 18432 }
  0x49   : > { %p9398_p8 = scmp.ne.s32.totalorder %s13016_s10, %s9397_s7  ;;  %p9404_p13 = scmp.lt.u32.totalorder %s9397_s7, %s13016_s10 }
  0x4b   : > { %p9400_p11 = pnand %p9399_p10, %p9398_p8 }
  0x4d   : > { %p9401_p9 = pneg %p9400_p11 }
  0x4f   : > { %p9406_p0 = pnand %p9404_p13, %p9401_p9 }
  0x51   : > { %9409 = shalt.err (!%p9406_p0)
}
  0x52   : > { %s9410_s12 = scalar_lea.vmem %s485_s1, 18432  ;;  %p9418_p1 = scmp.lt.s32.totalorder %s485_s1, %s485_s1 }
  0x53   : > { %p9411_p4 = scmp.ne.s32.totalorder %s485_s1, %s9410_s12  ;;  %p9419_p3 = scmp.lt.s32.totalorder %s9410_s12, %s9410_s12 }
  0x55   : > { %p9413_p2 = pnand %p9411_p4, %p9399_p10  ;;  %p9420_p5 = por %p9419_p3, %p9418_p1 }
  0x57   : > { %p9414_p12 = pneg %p9413_p2 }
  0x59   : > { %p9421_p7 = pnand %p9420_p5, %p9414_p12 }
  0x5b   : > { %9424 = shalt.err (!%p9421_p7)
}
  0x5c   : > { %s9531_s5 = smov 192   ;;  %s9532_s4 = smov 12  }
  0x5d   : > { %8932 = dma.hbm_to_vmem [thread:$0]  (!%p9745_p6), %s13016_s10, 18432, %s485_s1, [#allocation4], %s9531_s5, %s9531_s5, %s9532_s4  }
  0x5e   : > { %s9425_s8 = scalar_lea.hbm %s9755_s9, 13824  ;;  %p13017_p1 = scmp.ne.s32.totalorder %s13012_s11, 0 }
  0x5f   : > { %p9426_p2 = scmp.ne.s32.totalorder %s9755_s9, %s9425_s8  ;;  %s9430_s26 = scalar_lea.hbm %s12929_s14, 165888 }
  0x60   : > { %p9431_p12 = scmp.lt.u32.totalorder %s9755_s9, %s12929_s14  ;;  %p9432_p3 = scmp.lt.u32.totalorder %s9430_s26, %s9425_s8 }
  0x61   : > { %p9428_p5 = pnand %p9426_p2, %p13017_p1  ;;  %p9434_p10 = scmp.lt.u32.totalorder %s9425_s8, %s9755_s9 }
  0x62   : > { %p9433_p8 = por %p9432_p3, %p9431_p12 }
  0x63   : > { %p9429_p7 = pneg %p9428_p5 }
  0x64   : > { %p9435_p11 = por %p9434_p10, %p9433_p8 }
  0x66   : > { %p9436_p6 = pnand %p9435_p11, %p9429_p7 }
  0x68   : > { %9439 = shalt.err (!%p9436_p6)
}
  0x69   : > { %s9440_s1 = scalar_lea.vmem %s9773_s25, 13824  ;;  %s9533_s27 = smov [#allocation7]  }
  0x6a   : > { %p9441_p9 = scmp.ne.s32.totalorder %s9773_s25, %s9440_s1  ;;  %s9445_s12 = sshll.u32 %s9533_s27, 4  ;;  %s9446_s12 = int_to_ptr.vmem [resolvable:$false] %s9445_s12 }
  0x6b   : > { %s9447_s5 = scalar_lea.vmem %s9446_s12, 27648  ;;  %p9448_p4 = scmp.lt.s32.totalorder %s9773_s25, %s9446_s12 }
  0x6c   : > { %p9443_p13 = pnand %p9441_p9, %p13017_p1  ;;  %p9449_p2 = scmp.lt.s32.totalorder %s9447_s5, %s9440_s1 }
  0x6e   : > { %p9444_p0 = pneg %p9443_p13  ;;  %p9450_p5 = por %p9449_p2, %p9448_p4 }
  0x70   : > { %p9451_p12 = pnand %p9450_p5, %p9444_p0 }
  0x72   : > { %9454 = shalt.err (!%p9451_p12)
}
  0x73   : > { %s9534_s4 = smov 1152   ;;  %s9535_s6 = smov 72  }
  0x74   : > { %p13018_p7 = scmp.ne.s32.totalorder %s13010_s23, 0  ;;  %s8912_s7 = smul.u32 288, %s9676_s22 }
  0x75   : > { %s8913_s8 = smul.u32 4608, %s9527_s30  ;;  %s577_s1 = scalar_lea.sflag [#allocation9], %s9676_s22 }
  0x76   : > { %8939 = dma.hbm_to_vmem [thread:$0]  (!%p13018_p7), %s9755_s9, 13824, %s9773_s25, %s9692_s0, %s9534_s4, %s9534_s4, %s9535_s6  }
  0x77   : > { %s9802_s26 = scalar_lea.hbm %s12930_s15, %s8913_s8  ;;  %s580_s20 = scalar_lea.vmem [#allocation8], %s8912_s7 }
  0x78   : > { %s587_s29 = sshll.u32 %s580_s20, 4  ;;  %s9455_s27 = scalar_lea.hbm %s9802_s26, 4608  ;;  %s9804_s29 = int_to_ptr.vmem [resolvable:$true] %s587_s29 }
  0x79   : > { %p9456_p3 = scmp.ne.s32.totalorder %s9802_s26, %s9455_s27  ;;  %s9460_s0 = scalar_lea.hbm %s12930_s15, 55296 }
  0x7a   : > { %p9461_p11 = scmp.lt.u32.totalorder %s9802_s26, %s12930_s15  ;;  %p9462_p6 = scmp.lt.u32.totalorder %s9460_s0, %s9455_s27 }
  0x7b   : > { %p9458_p8 = pnand %p9456_p3, %p13017_p1  ;;  %p9464_p13 = scmp.lt.u32.totalorder %s9455_s27, %s9802_s26 }
  0x7c   : > { %p9463_p9 = por %p9462_p6, %p9461_p11 }
  0x7d   : > { %p9459_p10 = pneg %p9458_p8 }
  0x7e   : > { %p9465_p0 = por %p9464_p13, %p9463_p9 }
  0x80   : > { %p9466_p4 = pnand %p9465_p0, %p9459_p10 }
  0x82   : > { %9469 = shalt.err (!%p9466_p4)
}
  0x83   : > { %s9470_s5 = scalar_lea.vmem %s9804_s29, 4608  ;;  %s9536_s4 = smov [#allocation8]  }
  0x84   : > { %p9471_p2 = scmp.ne.s32.totalorder %s9804_s29, %s9470_s5  ;;  %s9475_s6 = sshll.u32 %s9536_s4, 4  ;;  %s9476_s6 = int_to_ptr.vmem [resolvable:$false] %s9475_s6 }
  0x85   : > { %s9477_s7 = scalar_lea.vmem %s9476_s6, 9216  ;;  %p9478_p3 = scmp.lt.s32.totalorder %s9804_s29, %s9476_s6 }
  0x86   : > { %p9473_p5 = pnand %p9471_p2, %p13017_p1  ;;  %p9479_p8 = scmp.lt.s32.totalorder %s9477_s7, %s9470_s5 }
  0x88   : > { %p9474_p12 = pneg %p9473_p5  ;;  %p9480_p11 = por %p9479_p8, %p9478_p3 }
  0x8a   : > { %p9481_p6 = pnand %p9480_p11, %p9474_p12 }
  0x8c   : > { %9484 = shalt.err (!%p9481_p6)
}
  0x8d   : > { %s9537_s8 = smov 384   ;;  %s9538_s21 = smov 24  }
  0x8e   : > { %8942 = dma.hbm_to_vmem [thread:$0]  (!%p13018_p7), %s9802_s26, 4608, %s9804_s29, %s577_s1, %s9537_s8, %s9537_s8, %s9538_s21  }
  0x8f   : > { %p13019_p1 = scmp.ne.s32.totalorder %s13014_s19, 0 }
  0x91   : > { %615 = sbr.rel (%p13019_p1) target bundleno = 4718 (0x126e), region = 92 }
  0x98   : > { %p13020_p10 = scmp.eq.s32.totalorder %s9723_s18, 0 }
  0x9a   : > { %9502 = dma.done.wait (%p13020_p10), [#allocation4], 18432   ;;  %p13021_p9 = pmov %p13020_p10 }
  0x9b   : > { %s621_s11 = sand.u32 1, %s9723_s18   ;;  %s623_s24 = sand.u32 1, %s9519_s28  }
  0x9c   : > { %9504 = vsyncadd (%p13021_p9), [#allocation4], 4294948864  ;;  %s8914_s20 = smul.u32 96, %s623_s24  ;;  %s622_s27 = scalar_lea.sflag [#allocation6], %s621_s11 }
  0x9d   : > { %p13022_p13 = scmp.ne.s32.totalorder %s13013_s2, 0 }
  0x9e   : > { %s9838_s9 = scalar_lea.vmem [#allocation5], %s8914_s20 }
  0x9f   : > { %9506 = dma.done.wait (%p13022_p13), %s622_s27, 15360  }
  0xa0   : > { %9508 = vsyncadd (%p13022_p13), %s622_s27, 4294951936  ;;  %s8915_s22 = smul.u32 864, %s623_s24  ;;  %s640_s26 = scalar_lea.sflag [#allocation9], %s623_s24 }
  0xa1   : > { %s8916_s23 = smul.u32 288, %s623_s24 }
  0xa2   : > { %s9844_s19 = scalar_lea.vmem [#allocation7], %s8915_s22 }
  0xa3   : > { %s9846_s29 = scalar_lea.vmem [#allocation8], %s8916_s23 }
  0xa4   : > { %9510 = dma.done.wait (%p13022_p13), %s640_s26, 4608  }
  0xa5   : > { %9512 = vsyncadd (%p13022_p13), %s640_s26, 4294962688  ;;  %p716_p7 = scmp.lt.s32.totalorder %s9723_s18, 11  ;;  %p13023_p0 = scmp.ne.s32.totalorder %s9723_s18, 0 }
  0xa6   : > { %v8992_v0 = vld [vmem:[#allocation3 + $0x184] ss:$12 sps:$4 sm:$0xff] (!%p13023_p0)   ;;  %v8994_v1 = vld [vmem:[#allocation3 + $0x180] ss:$12 sps:$4 sm:$0xff] (!%p13023_p0)   ;;  %v8995_v2 = vld [vmem:[#allocation3 + $0x19c] ss:$12 sps:$4 sm:$0xff] (!%p13023_p0)  }
  0xa7   : > { %s717_s1 = scalar_select %p716_p7, %s9723_s18, 11 }
  0xa8   : > { %735 = sbr.rel (%p13023_p0) target bundleno = 767 (0x2ff), region = 112  ;;  %1778 = vmatprep.subr.bf16.mxu0 (!%p13023_p0), %v8992_v0  ;;  %v8997_v3 = vld [vmem:[#allocation3 + $0x198] ss:$12 sps:$4 sm:$0xff] (!%p13023_p0)   ;;  %v8998_v4 = vld [vmem:[#allocation3 + $0x1b4] ss:$12 sps:$4 sm:$0xff] (!%p13023_p0)   ;;  %s13024_s20 = sld [smem:[#allocation42_spill]] (!%p13023_p0) }
  0xa9   : > { %s8917_s30 = smul.u32 144, %s717_s1  ;;  %1779 = vmatpush1.bf16.msra.mxu0 (!%p13023_p0), %v8994_v1  ;;  %v9000_v5 = vld [vmem:[#allocation3 + $0x1b0] ss:$12 sps:$4 sm:$0xff] (!%p13023_p0)   ;;  %v9001_v6 = vld [vmem:[#allocation3 + $0x1cc] ss:$12 sps:$4 sm:$0xff] (!%p13023_p0)   ;;  %vm1988_vm0 = vcmask (!%p13023_p0), 64512  }
  0xaa   : > { %s8918_s0 = smul.u32 1152, %s717_s1  ;;  %1780 = vmatprep.subr.bf16.mxu0 (!%p13023_p0), %v8995_v2  ;;  %v9003_v7 = vld [vmem:[#allocation3 + $0x1c8] ss:$12 sps:$4 sm:$0xff] (!%p13023_p0)   ;;  %v9004_v8 = vld [vmem:[#allocation3 + $0x1e4] ss:$12 sps:$4 sm:$0xff] (!%p13023_p0)   ;;  %s13026_s11 = sld [smem:[#allocation45_spill]] (!%p13023_p0) }
  0xab   : > { %s9857_s5 = scalar_lea.vmem %s12928_s13, %s8917_s30  ;;  %v9018_v9 = vld [vmem:[#allocation3 + $0x4] ss:$12 sps:$4 sm:$0xff] (!%p13023_p0)   ;;  %v9021_v10 = vld [vmem:[#allocation3] ss:$12 sps:$4 sm:$0xff] (!%p13023_p0)   ;;  %v9024_v12 = vld [vmem:[#allocation3 + $0x1c] ss:$12 sps:$4 sm:$0xff] (!%p13023_p0)  }
  0xac   : > { %s9862_s7 = scalar_lea.vmem %s12931_s16, %s8918_s0  ;;  %s9867_s2 = scalar_lea.vmem %s12932_s17, %s8918_s0  ;;  %1737 = vmatprep.subr.bf16.mxu1 (!%p13023_p0), %v9018_v9  ;;  %v9006_v11 = vld [vmem:[#allocation3 + $0x1e0] ss:$12 sps:$4 sm:$0xff] (!%p13023_p0)   ;;  %v9027_v13 = vld [vmem:[#allocation3 + $0x18] ss:$12 sps:$4 sm:$0xff] (!%p13023_p0)   ;;  %v9007_v14 = vld [vmem:[#allocation3 + $0x1fc] ss:$12 sps:$4 sm:$0xff] (!%p13023_p0)  }
  0xad   : > { %1781 = vmatpush1.bf16.msra.mxu0 (!%p13023_p0), %v8997_v3  ;;  %1738 = vmatpush1.bf16.msra.mxu1 (!%p13023_p0), %v9021_v10  ;;  %v9030_v15 = vld [vmem:[#allocation3 + $0x34] ss:$12 sps:$4 sm:$0xff] (!%p13023_p0)   ;;  %v9009_v16 = vld [vmem:[#allocation3 + $0x1f8] ss:$12 sps:$4 sm:$0xff] (!%p13023_p0)   ;;  %v9033_v17 = vld [vmem:[#allocation3 + $0x30] ss:$12 sps:$4 sm:$0xff] (!%p13023_p0)  }
  0xae   : > { %1782 = vmatprep.subr.bf16.mxu0 (!%p13023_p0), %v8998_v4  ;;  %1739 = vmatprep.subr.bf16.mxu1 (!%p13023_p0), %v9024_v12  ;;  %v9010_v18 = vld [vmem:[#allocation3 + $0x214] ss:$12 sps:$4 sm:$0xff] (!%p13023_p0)   ;;  %v9036_v19 = vld [vmem:[#allocation3 + $0x4c] ss:$12 sps:$4 sm:$0xff] (!%p13023_p0)   ;;  %v9012_v20 = vld [vmem:[#allocation3 + $0x210] ss:$12 sps:$4 sm:$0xff] (!%p13023_p0)  }
  0xaf   : > { %v9013_v21 = vld [vmem:[#allocation3 + $0x22c] ss:$12 sps:$4 sm:$0xff]   ;;  %v9039_v22 = vld [vmem:[#allocation3 + $0x48] ss:$12 sps:$4 sm:$0xff]   ;;  %v9042_v23 = vld [vmem:[#allocation3 + $0x64] ss:$12 sps:$4 sm:$0xff]  }
  0xb0   : > { %v9015_v24 = vld [vmem:[#allocation3 + $0x228] ss:$12 sps:$4 sm:$0xff]   ;;  %v9045_v25 = vld [vmem:[#allocation3 + $0x60] ss:$12 sps:$4 sm:$0xff]   ;;  %v9016_v26 = vld [vmem:[#allocation3 + $0x244] ss:$12 sps:$4 sm:$0xff]  }
  0xb1   : > { %1783 = vmatpush1.bf16.msra.mxu0 %v9000_v5  ;;  %1740 = vmatpush1.bf16.msra.mxu1 %v9027_v13  ;;  %v9048_v27 = vld [vmem:[#allocation3 + $0x7c] ss:$12 sps:$4 sm:$0xff]   ;;  %v9020_v28 = vld [vmem:[#allocation3 + $0x240] ss:$12 sps:$4 sm:$0xff]   ;;  %v9051_v30 = vld [vmem:[#allocation3 + $0x78] ss:$12 sps:$4 sm:$0xff]  }
  0xb2   : > { %1784 = vmatprep.subr.bf16.mxu0 %v9001_v6  ;;  %1741 = vmatprep.subr.bf16.mxu1 %v9030_v15  ;;  %v9022_v29 = vld [vmem:[#allocation3 + $0x25c] ss:$12 sps:$4 sm:$0xff]   ;;  %v9054_v31 = vld [vmem:[#allocation3 + $0x94] ss:$12 sps:$4 sm:$0xff]   ;;  %v9026_v34 = vld [vmem:[#allocation3 + $0x258] ss:$12 sps:$4 sm:$0xff]  }
  0xb3   : > { %v737_v32 = vld [vmem:[%s13024_s20 + $0x8] sm:$0xff]  ;;  %v9028_v35 = vld [vmem:[#allocation3 + $0x274] ss:$12 sps:$4 sm:$0xff]   ;;  %v9069_v41 = vld [vmem:[#allocation3 + $0xc4] ss:$12 sps:$4 sm:$0xff]   ;;  %s13025_s0 = sld [smem:[#allocation44_spill]] }
  0xb4   : > { %v9874_v33 = vcombine.high %v737_v32, %v737_v32  ;;  %v9057_v36 = vld [vmem:[#allocation3 + $0x90] ss:$12 sps:$4 sm:$0xff]   ;;  %v9060_v37 = vld [vmem:[#allocation3 + $0xac] ss:$12 sps:$4 sm:$0xff]   ;;  %v9063_v40 = vld [vmem:[#allocation3 + $0xa8] ss:$12 sps:$4 sm:$0xff]   ;;  %v9883_v1 = vcombine.low %v737_v32, %v737_v32 }
  0xb5   : > { %1785 = vmatpush1.bf16.msra.mxu0 %v9003_v7  ;;  %1742 = vmatpush1.bf16.msra.mxu1 %v9033_v17  ;;  %v9032_v38 = vld [vmem:[#allocation3 + $0x270] ss:$12 sps:$4 sm:$0xff]   ;;  %v9034_v39 = vld [vmem:[#allocation3 + $0x28c] ss:$12 sps:$4 sm:$0xff]   ;;  %v9038_v42 = vld [vmem:[#allocation3 + $0x288] ss:$12 sps:$4 sm:$0xff]  }
  0xb6   : > { %1786 = vmatprep.subr.bf16.mxu0 %v9004_v8  ;;  %1743 = vmatprep.subr.bf16.mxu1 %v9036_v19  ;;  %v9040_v43 = vld [vmem:[#allocation3 + $0x2a4] ss:$12 sps:$4 sm:$0xff]   ;;  %v9071_v44 = vld [vmem:[#allocation3 + $0xc0] ss:$12 sps:$4 sm:$0xff]   ;;  %v9075_v45 = vld [vmem:[#allocation3 + $0xdc] ss:$12 sps:$4 sm:$0xff]  }
  0xb7   : > { %1810 = vmatprep.mubr.bf16.mxu0 %v9874_v33  ;;  %v9044_v46 = vld [vmem:[#allocation3 + $0x2a0] ss:$12 sps:$4 sm:$0xff]   ;;  %v9046_v47 = vld [vmem:[#allocation3 + $0x2bc] ss:$12 sps:$4 sm:$0xff]   ;;  %v9077_v48 = vld [vmem:[#allocation3 + $0xd8] ss:$12 sps:$4 sm:$0xff]  }
  0xb8   : > { %v9081_v49 = vld [vmem:[#allocation3 + $0xf4] ss:$12 sps:$4 sm:$0xff]   ;;  %v9050_v50 = vld [vmem:[#allocation3 + $0x2b8] ss:$12 sps:$4 sm:$0xff]   ;;  %v9083_v52 = vld [vmem:[#allocation3 + $0xf0] ss:$12 sps:$4 sm:$0xff]  }
  0xb9   : > { %1787 = vmatpush1.bf16.msra.mxu0 %v9006_v11  ;;  %1744 = vmatpush1.bf16.msra.mxu1 %v9039_v22  ;;  %v9052_v51 = vld [vmem:[#allocation3 + $0x2d4] ss:$12 sps:$4 sm:$0xff]   ;;  %v9087_v53 = vld [vmem:[#allocation3 + $0x10c] ss:$12 sps:$4 sm:$0xff]   ;;  %v9056_v54 = vld [vmem:[#allocation3 + $0x2d0] ss:$12 sps:$4 sm:$0xff]  }
  0xba   : > { %1788 = vmatprep.subr.bf16.mxu0 %v9007_v14  ;;  %1745 = vmatprep.subr.bf16.mxu1 %v9042_v23  ;;  %v9058_v55 = vld [vmem:[#allocation3 + $0x2ec] ss:$12 sps:$4 sm:$0xff]   ;;  %v9089_v56 = vld [vmem:[#allocation3 + $0x108] ss:$12 sps:$4 sm:$0xff]   ;;  %v9093_v58 = vld [vmem:[#allocation3 + $0x124] ss:$12 sps:$4 sm:$0xff]  }
  0xbb   : > { %v736_v57 = vld [vmem:[%s13024_s20] sm:$0xff]  ;;  %v9095_v62 = vld [vmem:[#allocation3 + $0x120] ss:$12 sps:$4 sm:$0xff]   ;;  %v9099_v63 = vld [vmem:[#allocation3 + $0x13c] ss:$12 sps:$4 sm:$0xff]  }
  0xbc   : > { %v9880_v59 = vcombine.high %v736_v57, %v736_v57  ;;  %v9062_v60 = vld [vmem:[#allocation3 + $0x2e8] ss:$12 sps:$4 sm:$0xff]   ;;  %v9068_v61 = vld [vmem:[#allocation3 + $0x304] ss:$12 sps:$4 sm:$0xff]   ;;  %v9066_v0 = vld [vmem:[#allocation3 + $0x300] ss:$12 sps:$4 sm:$0xff]   ;;  %v9886_v15 = vcombine.low %v736_v57, %v736_v57 }
  0xbd   : > { %1789 = vmatpush1.bf16.msra.mxu0 %v9009_v16  ;;  %1746 = vmatpush1.bf16.msra.mxu1 %v9045_v25  ;;  %v9074_v2 = vld [vmem:[#allocation3 + $0x31c] ss:$12 sps:$4 sm:$0xff]   ;;  %v9101_v3 = vld [vmem:[#allocation3 + $0x138] ss:$12 sps:$4 sm:$0xff]   ;;  %v9105_v4 = vld [vmem:[#allocation3 + $0x154] ss:$12 sps:$4 sm:$0xff]  }
  0xbe   : > { %1790 = vmatprep.subr.bf16.mxu0 %v9010_v18  ;;  %1747 = vmatprep.subr.bf16.mxu1 %v9048_v27  ;;  %v9072_v5 = vld [vmem:[#allocation3 + $0x318] ss:$12 sps:$4 sm:$0xff]   ;;  %v9107_v6 = vld [vmem:[#allocation3 + $0x150] ss:$12 sps:$4 sm:$0xff]   ;;  %v9080_v7 = vld [vmem:[#allocation3 + $0x334] ss:$12 sps:$4 sm:$0xff]  }
  0xbf   : > { %1769 = vmatprep.mubr.bf16.mxu1 %v9880_v59  ;;  %v9111_v8 = vld [vmem:[#allocation3 + $0x16c] ss:$12 sps:$4 sm:$0xff]   ;;  %v9078_v9 = vld [vmem:[#allocation3 + $0x330] ss:$12 sps:$4 sm:$0xff]   ;;  %v9113_v11 = vld [vmem:[#allocation3 + $0x168] ss:$12 sps:$4 sm:$0xff]  }
  0xc0   : > { %v9086_v10 = vld [vmem:[#allocation3 + $0x34c] ss:$12 sps:$4 sm:$0xff]   ;;  %v9119_v12 = vld [vmem:[#allocation3 + $0x248] ss:$12 sps:$4 sm:$0xff]   ;;  %v9092_v14 = vld [vmem:[#allocation3 + $0x364] ss:$12 sps:$4 sm:$0xff]  }
  0xc1   : > { %1791 = vmatpush1.bf16.msra.mxu0 %v9012_v20  ;;  %1748 = vmatpush1.bf16.msra.mxu1 %v9051_v30  ;;  %v9084_v13 = vld [vmem:[#allocation3 + $0x348] ss:$12 sps:$4 sm:$0xff]   ;;  %v9124_v17 = vld [vmem:[#allocation3 + $0x260] ss:$12 sps:$4 sm:$0xff]   ;;  %v9096_v23 = vld [vmem:[#allocation3 + $0x378] ss:$12 sps:$4 sm:$0xff]  }
  0xc2   : > { %1792 = vmatprep.subr.bf16.mxu0 %v9013_v21  ;;  %1749 = vmatprep.subr.bf16.mxu1 %v9054_v31  ;;  %v9120_v16 = vld [vmem:[#allocation3 + $0x188] ss:$12 sps:$4 sm:$0xff]   ;;  %v9090_v18 = vld [vmem:[#allocation3 + $0x360] ss:$12 sps:$4 sm:$0xff]   ;;  %v9129_v21 = vld [vmem:[#allocation3 + $0x278] ss:$12 sps:$4 sm:$0xff]  }
  0xc3   : > { %v9098_v19 = vld [vmem:[#allocation3 + $0x37c] ss:$12 sps:$4 sm:$0xff]   ;;  %v9125_v20 = vld [vmem:[#allocation3 + $0x1a0] ss:$12 sps:$4 sm:$0xff]   ;;  %v9169_v57 = vld [vmem:[#allocation3 + $0x338] ss:$12 sps:$4 sm:$0xff]  }
  0xc4   : > { %v9892_v22 = vld [vmem:[%s13024_s20 + $0x10] sm:$0xff]  ;;  %v9134_v27 = vld [vmem:[#allocation3 + $0x290] ss:$12 sps:$4 sm:$0xff]   ;;  %v9139_v31 = vld [vmem:[#allocation3 + $0x2a8] ss:$12 sps:$4 sm:$0xff]  }
  0xc5   : > { %1793 = vmatpush1.bf16.msra.mxu0 %v9015_v24  ;;  %1750 = vmatpush1.bf16.msra.mxu1 %v9057_v36  ;;  %v9896_v24 = vcombine.high %v9892_v22, %v9892_v22  ;;  %v9104_v25 = vld [vmem:[#allocation3 + $0x394] ss:$12 sps:$4 sm:$0xff]   ;;  %v9135_v30 = vld [vmem:[#allocation3 + $0x1d0] ss:$12 sps:$4 sm:$0xff]  }
  0xc6   : > { %1794 = vmatprep.subr.bf16.mxu0 %v9016_v26  ;;  %1751 = vmatprep.subr.bf16.mxu1 %v9060_v37  ;;  %v9130_v26 = vld [vmem:[#allocation3 + $0x1b8] ss:$12 sps:$4 sm:$0xff]   ;;  %v9108_v32 = vld [vmem:[#allocation3 + $0x3a8] ss:$12 sps:$4 sm:$0xff]   ;;  %v9114_v36 = vld [vmem:[#allocation3 + $0x3c0] ss:$12 sps:$4 sm:$0xff]  }
  0xc7   : > { %v9123_v37 = vld [vmem:[#allocation3 + $0x3dc] ss:$12 sps:$4 sm:$0xff]  }
  0xc9   : > { %1795 = vmatpush1.bf16.msra.mxu0 %v9020_v28  ;;  %1752 = vmatpush1.bf16.msra.mxu1 %v9063_v40  ;;  %v9102_v28 = vld [vmem:[#allocation3 + $0x390] ss:$12 sps:$4 sm:$0xff]   ;;  %v9121_v40 = vld [vmem:[#allocation3 + $0x3d8] ss:$12 sps:$4 sm:$0xff]  }
  0xca   : > { %1796 = vmatprep.subr.bf16.mxu0 %v9022_v29  ;;  %1753 = vmatprep.subr.bf16.mxu1 %v9069_v41  ;;  %v9110_v29 = vld [vmem:[#allocation3 + $0x3ac] ss:$12 sps:$4 sm:$0xff]   ;;  %v9128_v41 = vld [vmem:[#allocation3 + $0x3f4] ss:$12 sps:$4 sm:$0xff]  }
  0xcd   : > { %1797 = vmatpush1.bf16.msra.mxu0 %v9026_v34  ;;  %1754 = vmatpush1.bf16.msra.mxu1 %v9071_v44  ;;  %v9116_v34 = vld [vmem:[#allocation3 + $0x3c4] ss:$12 sps:$4 sm:$0xff]  }
  0xce   : > { %1798 = vmatprep.subr.bf16.mxu0 %v9028_v35  ;;  %1755 = vmatprep.subr.bf16.mxu1 %v9075_v45  ;;  %v9144_v35 = vld [vmem:[#allocation3 + $0x2c0] ss:$12 sps:$4 sm:$0xff]   ;;  %v9126_v44 = vld [vmem:[#allocation3 + $0x3f0] ss:$12 sps:$4 sm:$0xff]  }
  0xcf   : > { %v9133_v45 = vld [vmem:[#allocation3 + $0x40c] ss:$12 sps:$4 sm:$0xff]  }
  0xd1   : > { %1799 = vmatpush1.bf16.msra.mxu0 %v9032_v38  ;;  %1756 = vmatpush1.bf16.msra.mxu1 %v9077_v48  ;;  %v9145_v38 = vld [vmem:[#allocation3 + $0x200] ss:$12 sps:$4 sm:$0xff]   ;;  %v9131_v48 = vld [vmem:[#allocation3 + $0x408] ss:$12 sps:$4 sm:$0xff]  }
  0xd2   : > { %1800 = vmatprep.subr.bf16.mxu0 %v9034_v39  ;;  %1757 = vmatprep.subr.bf16.mxu1 %v9081_v49  ;;  %v9149_v39 = vld [vmem:[#allocation3 + $0x2d8] ss:$12 sps:$4 sm:$0xff]  }
  0xd3   : > { %v9138_v49 = vld [vmem:[#allocation3 + $0x424] ss:$12 sps:$4 sm:$0xff]  }
  0xd5   : > { %1801 = vmatpush1.bf16.msra.mxu0 %v9038_v42  ;;  %1758 = vmatpush1.bf16.msra.mxu1 %v9083_v52  ;;  %v9150_v42 = vld [vmem:[#allocation3 + $0x218] ss:$12 sps:$4 sm:$0xff]   ;;  %v9136_v52 = vld [vmem:[#allocation3 + $0x420] ss:$12 sps:$4 sm:$0xff]  }
  0xd6   : > { %1802 = vmatprep.subr.bf16.mxu0 %v9040_v43  ;;  %1759 = vmatprep.subr.bf16.mxu1 %v9087_v53  ;;  %v9154_v43 = vld [vmem:[#allocation3 + $0x2f0] ss:$12 sps:$4 sm:$0xff]  }
  0xd7   : > { %v9143_v53 = vld [vmem:[#allocation3 + $0x43c] ss:$12 sps:$4 sm:$0xff]  }
  0xd9   : > { %1803 = vmatpush1.bf16.msra.mxu0 %v9044_v46  ;;  %1760 = vmatpush1.bf16.msra.mxu1 %v9089_v56  ;;  %v9155_v46 = vld [vmem:[#allocation3 + $0x230] ss:$12 sps:$4 sm:$0xff]   ;;  %v9141_v56 = vld [vmem:[#allocation3 + $0x438] ss:$12 sps:$4 sm:$0xff]  }
  0xda   : > { %1804 = vmatprep.subr.bf16.mxu0 %v9046_v47  ;;  %1761 = vmatprep.subr.bf16.mxu1 %v9093_v58  ;;  %v9160_v47 = vld [vmem:[#allocation3 + $0x3c8] ss:$12 sps:$4 sm:$0xff]  }
  0xdb   : > { %v9148_v58 = vld [vmem:[#allocation3 + $0x454] ss:$12 sps:$4 sm:$0xff]  }
  0xdd   : > { %1805 = vmatpush1.bf16.msra.mxu0 %v9050_v50  ;;  %1762 = vmatpush1.bf16.msra.mxu1 %v9095_v62  ;;  %v9161_v50 = vld [vmem:[#allocation3 + $0x308] ss:$12 sps:$4 sm:$0xff]   ;;  %v9173_v62 = vld [vmem:[#allocation3 + $0x350] ss:$12 sps:$4 sm:$0xff]  }
  0xde   : > { %1806 = vmatprep.subr.bf16.mxu0 %v9052_v51  ;;  %1763 = vmatprep.subr.bf16.mxu1 %v9099_v63  ;;  %v9164_v51 = vld [vmem:[#allocation3 + $0x3e0] ss:$12 sps:$4 sm:$0xff]  }
  0xdf   : > { %v9153_v63 = vld [vmem:[#allocation3 + $0x46c] ss:$12 sps:$4 sm:$0xff]  }
  0xe1   : > { %1807 = vmatpush1.bf16.msra.mxu0 %v9056_v54  ;;  %1764 = vmatpush1.bf16.msra.mxu1 %v9101_v3  ;;  %v9165_v54 = vld [vmem:[#allocation3 + $0x320] ss:$12 sps:$4 sm:$0xff]   ;;  %v9158_v3 = vld [vmem:[#allocation3 + $0xc8] ss:$12 sps:$4 sm:$0xff]  }
  0xe2   : > { %1808 = vmatprep.subr.bf16.mxu0 %v9058_v55  ;;  %1765 = vmatprep.subr.bf16.mxu1 %v9105_v4  ;;  %v9168_v55 = vld [vmem:[#allocation3 + $0x3f8] ss:$12 sps:$4 sm:$0xff]   ;;  %v9180_v4 = vld [vmem:[#allocation3 + $0x440] ss:$12 sps:$4 sm:$0xff]  }
  0xe5   : > { %1809 = vmatpush1.bf16.msra.mxu0 %v9062_v60  ;;  %1766 = vmatpush1.bf16.msra.mxu1 %v9107_v6  ;;  %v9172_v60 = vld [vmem:[#allocation3 + $0x410] ss:$12 sps:$4 sm:$0xff]   ;;  %v9159_v6 = vld [vmem:[#allocation3 + $0x8] ss:$12 sps:$4 sm:$0xff]  }
  0xe6   : > { %1819 = vmatprep.subr.bf16.mxu0 %v9068_v61  ;;  %1767 = vmatprep.subr.bf16.mxu1 %v9111_v8  ;;  %v9146_v61 = vld [vmem:[#allocation3 + $0x450] ss:$12 sps:$4 sm:$0xff]   ;;  %v9162_v8 = vld [vmem:[#allocation3 + $0xe0] ss:$12 sps:$4 sm:$0xff]  }
  0xe8   : > { %1811 = vmatmul.mubr.bf16.vlgmr.msra.gmra.mrb[0].mxu0 %v9883_v1 }
  0xe9   : > { %1820 = vmatpush1.bf16.msra.mxu0 %v9066_v0  ;;  %1768 = vmatpush1.bf16.msra.mxu1 %v9113_v11  ;;  %v9176_v0 = vld [vmem:[#allocation3 + $0x428] ss:$12 sps:$4 sm:$0xff]   ;;  %v9185_v11 = vld [vmem:[#allocation3 + $0x398] ss:$12 sps:$4 sm:$0xff]  }
  0xea   : > { %1821 = vmatprep.subr.bf16.mxu0 %v9074_v2  ;;  %8258 = vmatprep.subr.bf16.mxu1 %v9119_v12  ;;  %v9177_v2 = vld [vmem:[#allocation3 + $0x368] ss:$12 sps:$4 sm:$0xff]   ;;  %v9166_v12 = vld [vmem:[#allocation3 + $0xf8] ss:$12 sps:$4 sm:$0xff]  }
  0xeb   : > { %1851 = vmatprep.mubr.bf16.mxu0 %v9896_v24 }
  0xec   : > { %1770 = vmatmul.mubr.bf16.vlgmr.msra.gmra.mrb[0].mxu1 %v9886_v15 }
  0xed   : > { %1822 = vmatpush1.bf16.msra.mxu0 %v9072_v5  ;;  %8259 = vmatpush3.bf16.msra.mxu1 %v9120_v16  ;;  %v8056_v5 = vcombine.low %v9892_v22, %v9892_v22  ;;  %v9189_v16 = vld [vmem:[#allocation3 + $0x3b0] ss:$12 sps:$4 sm:$0xff]   ;;  %v9179_v22 = vld [vmem:[#allocation3 + $0x80] ss:$12 sps:$4 sm:$0xff]  }
  0xee   : > { %1823 = vmatprep.subr.bf16.mxu0 %v9080_v7  ;;  %8260 = vmatprep.subr.bf16.mxu1 %v9124_v17  ;;  %v9181_v7 = vld [vmem:[#allocation3 + $0x380] ss:$12 sps:$4 sm:$0xff]   ;;  %v9170_v17 = vld [vmem:[#allocation3 + $0x110] ss:$12 sps:$4 sm:$0xff]  }
  0xef   : > { %1932 = vmatprep.mubr.bf16.mxu1 %v9874_v33  ;;  %v9140_v33 = vld [vmem:[#allocation3 + $0x1e8] ss:$12 sps:$4 sm:$0xff]  }
  0xf1   : > { %1824 = vmatpush1.bf16.msra.mxu0 %v9078_v9  ;;  %8261 = vmatpush3.bf16.msra.mxu1 %v9125_v20  ;;  %v9184_v9 = vld [vmem:[#allocation3 + $0x458] ss:$12 sps:$4 sm:$0xff]   ;;  %v9175_v20 = vld [vmem:[#allocation3 + $0x68] ss:$12 sps:$4 sm:$0xff]  }
  0xf2   : > { %1825 = vmatprep.subr.bf16.mxu0 %v9086_v10  ;;  %8262 = vmatprep.subr.bf16.mxu1 %v9129_v21  ;;  %v9163_v10 = vld [vmem:[#allocation3 + $0x20] ss:$12 sps:$4 sm:$0xff]  }
  0xf3   : > { %v9178_v21 = vld [vmem:[#allocation3 + $0x140] ss:$12 sps:$4 sm:$0xff]  }
  0xf5   : > { %1826 = vmatpush1.bf16.msra.mxu0 %v9084_v13  ;;  %8263 = vmatpush3.bf16.msra.mxu1 %v9130_v26  ;;  %v9188_v13 = vld [vmem:[#allocation3 + $0x470] ss:$12 sps:$4 sm:$0xff]   ;;  %v9539_v26 = vmov 0.0  }
  0xf6   : > { %1827 = vmatprep.subr.bf16.mxu0 %v9092_v14  ;;  %8264 = vmatprep.subr.bf16.mxu1 %v9134_v27  ;;  %v9167_v14 = vld [vmem:[#allocation3 + $0x38] ss:$12 sps:$4 sm:$0xff]  }
  0xf9   : > { %1828 = vmatpush1.bf16.msra.mxu0 %v9090_v18  ;;  %8265 = vmatpush3.bf16.msra.mxu1 %v9135_v30  ;;  %v9171_v18 = vld [vmem:[#allocation3 + $0x50] ss:$12 sps:$4 sm:$0xff]  }
  0xfa   : > { %1829 = vmatprep.subr.bf16.mxu0 %v9098_v19  ;;  %8266 = vmatprep.subr.bf16.mxu1 %v9139_v31  ;;  %v9174_v19 = vld [vmem:[#allocation3 + $0x128] ss:$12 sps:$4 sm:$0xff]  }
  0xfd   : > { %1830 = vmatpush1.bf16.msra.mxu0 %v9096_v23  ;;  %8267 = vmatpush3.bf16.msra.mxu1 %v9140_v33  ;;  %v9183_v23 = vld [vmem:[#allocation3 + $0x98] ss:$12 sps:$4 sm:$0xff]  }
  0xfe   : > { %1831 = vmatprep.subr.bf16.mxu0 %v9104_v25  ;;  %8268 = vmatprep.subr.bf16.mxu1 %v9144_v35  ;;  %v9187_v25 = vld [vmem:[#allocation3 + $0xb0] ss:$12 sps:$4 sm:$0xff]   ;;  %v933_v35 = vlaneseq }
 0x101   : > { %1832 = vmatpush1.bf16.msra.mxu0 %v9102_v28  ;;  %8269 = vmatpush3.bf16.msra.mxu1 %v9145_v38 }
 0x102   : > { %1833 = vmatprep.subr.bf16.mxu0 %v9110_v29  ;;  %8270 = vmatprep.subr.bf16.mxu1 %v9149_v39  ;;  %v931_v39 = vld [vmem:[%s13025_s0] sm:$0x7] }
 0x105   : > { %1834 = vmatpush1.bf16.msra.mxu0 %v9108_v32  ;;  %8271 = vmatpush3.bf16.msra.mxu1 %v9150_v42 }
 0x106   : > { %1835 = vmatprep.subr.bf16.mxu0 %v9116_v34  ;;  %8272 = vmatprep.subr.bf16.mxu1 %v9154_v43 }
 0x109   : > { %1836 = vmatpush1.bf16.msra.mxu0 %v9114_v36  ;;  %8273 = vmatpush3.bf16.msra.mxu1 %v9155_v46 }
 0x10a   : > { %1837 = vmatprep.subr.bf16.mxu0 %v9123_v37  ;;  %8280 = vmatprep.subr.bf16.mxu1 %v9160_v47  ;;  %v934_v37 = vshrl.u32 %v933_v35, 7 }
 0x10c   : > { %1933 = vmatmul.mubr.bf16.vlgmr.msra.gmra.mrb[4].mxu1 %v9883_v1  ;;  %v9151_v1 = vld [vmem:[#allocation3 + $0x468] ss:$12 sps:$4 sm:$0xff]   ;;  %v935_v38 = vsub.s32 0, %v934_v37 }
 0x10d   : > { %1838 = vmatpush1.bf16.msra.mxu0 %v9121_v40  ;;  %8281 = vmatpush3.bf16.msra.mxu1 %v9161_v50  ;;  %v939_v40 = vsub.s32 1, %v934_v37  ;;  %v1980_v50 = vld [vmem:[%s12918_s3] sm:$0xff] }
 0x10e   : > { %1839 = vmatprep.subr.bf16.mxu0 %v9128_v41  ;;  %8282 = vmatprep.subr.bf16.mxu1 %v9164_v51  ;;  %v1981_v51 = vld [vmem:[%s12918_s3 + $0x8] sm:$0x3] }
 0x10f   : > { %1972 = vmatprep.mubr.bf16.mxu1 %v9896_v24  ;;  %v9186_v24 = vld [vmem:[#allocation3 + $0x170] ss:$12 sps:$4 sm:$0xff]   ;;  %v940_v41 = vrot.slane %v931_v39, %v939_v40 }
 0x111   : > { %1840 = vmatpush1.bf16.msra.mxu0 %v9126_v44  ;;  %8283 = vmatpush3.bf16.msra.mxu1 %v9165_v54 }
 0x112   : > { %1841 = vmatprep.subr.bf16.mxu0 %v9133_v45  ;;  %8284 = vmatprep.subr.bf16.mxu1 %v9168_v55 }
 0x115   : > { %1842 = vmatpush1.bf16.msra.mxu0 %v9131_v48  ;;  %8285 = vmatpush3.bf16.msra.mxu1 %v9169_v57  ;;  %v943_v57 = vsub.s32 2, %v934_v37 }
 0x116   : > { %1843 = vmatprep.subr.bf16.mxu0 %v9138_v49  ;;  %8286 = vmatprep.subr.bf16.mxu1 %v9172_v60 }
 0x117   : > { %v944_v60 = vrot.slane %v931_v39, %v943_v57 }
 0x119   : > { %1844 = vmatpush1.bf16.msra.mxu0 %v9136_v52  ;;  %8287 = vmatpush3.bf16.msra.mxu1 %v9173_v62 }
 0x11a   : > { %1845 = vmatprep.subr.bf16.mxu0 %v9143_v53  ;;  %8288 = vmatprep.subr.bf16.mxu1 %v9176_v0 }
 0x11d   : > { %1846 = vmatpush1.bf16.msra.mxu0 %v9141_v56  ;;  %8289 = vmatpush3.bf16.msra.mxu1 %v9177_v2 }
 0x11e   : > { %1847 = vmatprep.subr.bf16.mxu0 %v9148_v58  ;;  %8290 = vmatprep.subr.bf16.mxu1 %v9180_v4  ;;  %v1982_v4 = vld [vmem:[%s13026_s11] sm:$0xff] }
 0x121   : > { %1848 = vmatpush1.bf16.msra.mxu0 %v9146_v61  ;;  %8291 = vmatpush3.bf16.msra.mxu1 %v9181_v7 }
 0x122   : > { %1849 = vmatprep.subr.bf16.mxu0 %v9153_v63  ;;  %8292 = vmatprep.subr.bf16.mxu1 %v9184_v9 }
 0x125   : > { %1850 = vmatpush1.bf16.msra.mxu0 %v9151_v1  ;;  %8293 = vmatpush3.bf16.msra.mxu1 %v9185_v11  ;;  %v1986_v11 = vld [vmem:[%s13026_s11 + $0x20] sm:$0x3] }
 0x126   : > { %8236 = vmatprep.subr.bf16.mxu0 %v9158_v3  ;;  %8294 = vmatprep.subr.bf16.mxu1 %v9188_v13 }
 0x128   : > { %1852 = vmatmul.mubr.bf16.vlgmr.msra.gmra.mrb[0].mxu0 %v8056_v5 }
 0x129   : > { %8237 = vmatpush3.bf16.msra.mxu0 %v9159_v6  ;;  %1892 = vmatprep.mubr.bf16.mxu0 %v9880_v59  ;;  %v9182_v59 = vld [vmem:[#allocation3 + $0x158] ss:$12 sps:$4 sm:$0xff]  }
 0x12a   : > { %8238 = vmatprep.subr.bf16.mxu0 %v9162_v8  ;;  %8295 = vmatpush3.bf16.msra.mxu1 %v9189_v16 }
 0x12d   : > { %8239 = vmatpush3.bf16.msra.mxu0 %v9163_v10  ;;  %1973 = vmatmul.mubr.bf16.vlgmr.msra.gmra.mrb[8].mxu1 %v8056_v5  ;;  %v1983_v5 = vld [vmem:[%s13026_s11 + $0x8] sm:$0xff]  ;;  %v1985_v10 = vld [vmem:[%s13026_s11 + $0x18] sm:$0x3] }
 0x12e   : > { %8240 = vmatprep.subr.bf16.mxu0 %v9166_v12  ;;  %2059 = vmatprep.mubr.f32.mxu1 %v9539_v26 }
 0x131   : > { %8241 = vmatpush3.bf16.msra.mxu0 %v9167_v14 }
 0x132   : > { %8242 = vmatprep.subr.bf16.mxu0 %v9170_v17  ;;  %v1987_v17 = vld [vmem:[%s13026_s11 + $0x28] sm:$0x3] }
 0x135   : > { %8243 = vmatpush3.bf16.msra.mxu0 %v9171_v18  ;;  %v1984_v18 = vld [vmem:[%s13026_s11 + $0x10] sm:$0xff] }
 0x136   : > { %8244 = vmatprep.subr.bf16.mxu0 %v9174_v19 }
 0x139   : > { %8245 = vmatpush3.bf16.msra.mxu0 %v9175_v20 }
 0x13a   : > { %8246 = vmatprep.subr.bf16.mxu0 %v9178_v21 }
 0x13d   : > { %8247 = vmatpush3.bf16.msra.mxu0 %v9179_v22 }
 0x13e   : > { %8248 = vmatprep.subr.bf16.mxu0 %v9182_v59 }
 0x141   : > { %8249 = vmatpush3.bf16.msra.mxu0 %v9183_v23 }
 0x142   : > { %8250 = vmatprep.subr.bf16.mxu0 %v9186_v24 }
 0x145   : > { %8251 = vmatpush3.bf16.msra.mxu0 %v9187_v25 }
 0x148   : > { %1893 = vmatmul.mubr.bf16.vlgmr.msra.gmra.mrb[4].mxu0 %v9886_v15  ;;  %v936_v15 = vrot.slane %v931_v39, %v935_v38 }
 0x1bf   : > { %v1771_v27 = vpop.f32.mrb[0].mxu1 }
 0x1c0   : > { %v1773_v28 = vpop.f32.mrb[1].mxu1  ;;  %v1772_v42 = vadd.f32 %v1771_v27, %v936_v15 }
 0x1c1   : > { %v1775_v29 = vpop.f32.mrb[2].mxu1  ;;  %v1774_v43 = vadd.f32 %v1773_v28, %v940_v41 }
 0x1c2   : > { %v1776_v30 = vpop.f32.mrb[3].mxu1 }
 0x1df   : > { %v8274_v31 = vpop.f32.mrb[4].mxu1 }
 0x1e0   : > { %v8275_v32 = vpop.f32.mrb[5].mxu1 }
 0x1e1   : > { %v8276_v34 = vadd.f32 %v8275_v32, %v8274_v31  ;;  %v8277_v33 = vpop.f32.mrb[6].mxu1 }
 0x1e2   : > { %v8278_v36 = vpop.f32.mrb[7].mxu1 }
 0x1fb   : > { %v1853_v44 = vpop.f32.mrb[0].mxu0 }
 0x1fc   : > { %v8837_v45 = vadd.f32 %v1853_v44, %v1772_v42  ;;  %v1855_v46 = vpop.f32.mrb[1].mxu0 }
 0x1fd   : > { %v8839_v47 = vadd.f32 %v1855_v46, %v1774_v43  ;;  %v1857_v48 = vpop.f32.mrb[2].mxu0 }
 0x1fe   : > { %v1858_v49 = vpop.f32.mrb[3].mxu0 }
 0x1ff   : > { %1995 = vmatprep.subr.mxu1 %v8839_v47 }
 0x200   : > { %1996 = vmatpush1.msra.mxu1 %v8837_v45  ;;  %v8296_v52 = vpop.f32.mrb[8].mxu1 }
 0x201   : > { %8202 = vmatmul.mubr.msk.f32.vlgmr.msra.gmra.mrb[12].mxu1 %vm1988_vm0, %v1980_v50  ;;  %v8297_v53 = vpop.f32.mrb[9].mxu1 }
 0x202   : > { %2065 = vmatprep.mubr.f32.mxu1 %v9539_v26  ;;  %v8298_v54 = vadd.f32 %v8297_v53, %v8296_v52  ;;  %v8299_v55 = vpop.f32.mrb[10].mxu1 }
 0x203   : > { %v8300_v56 = vpop.f32.mrb[11].mxu1 }
 0x205   : > { %8203 = vmatmul.mubr.msk.f32.gmra.mrb[14].mxu1 %vm1988_vm0, %v1981_v51 }
 0x206   : > { %8587 = vmatprep.mubr.msk.f32.mxu1 %vm1988_vm0, %v1980_v50 }
 0x21b   : > { %v8252_v58 = vpop.f32.mrb[4].mxu0 }
 0x21c   : > { %v8253_v61 = vpop.f32.mrb[5].mxu0 }
 0x21d   : > { %v8254_v62 = vadd.f32 %v8253_v61, %v8252_v58  ;;  %v8255_v63 = vpop.f32.mrb[6].mxu0 }
 0x21e   : > { %v8256_v0 = vpop.f32.mrb[7].mxu0 }
 0x21f   : > { %v1895_v1 = vadd.f32 %v8254_v62, %v944_v60 }
 0x221   : > { %v1935_v2 = vadd.f32 %v8276_v34, %v1895_v1 }
 0x223   : > { %v1975_v3 = vadd.f32 %v8298_v54, %v1935_v2 }
 0x225   : > { %8585 = vmatprep.subr.mxu1 %v1975_v3 }
 0x226   : > { %8586 = vmatpush3.msra.mxu1 %v1975_v3 }
 0x227   : > { %8588 = vmatmul.mubr.msk.f32.vlgmr.msra.gmra.mrb[16].mxu1 %vm1988_vm0, %v1981_v51 }
 0x2d4   : > { %v2061_v6 = vpop.f32.mrb[12].mxu1 }
 0x2d5   : > { %v2062_v7 = vadd.f32 %v2061_v6, %v1982_v4  ;;  %v2063_v8 = vpop.f32.mrb[13].mxu1 }
 0x2d6   : > { %v2064_v9 = vadd.f32 %v2063_v8, %v1983_v5 }
 0x2d7   : > { %2147 = vst [vmem:[#allocation2] sm:$0xff] %v2062_v7 }
 0x2d8   : > { %2148 = vst [vmem:[#allocation2 + $0x8] sm:$0xff] %v2064_v9  ;;  %v2067_v12 = vpop.f32.mrb[14].mxu1 }
 0x2d9   : > { %v2068_v13 = vadd.f32 %v2067_v12, %v1985_v10  ;;  %v2069_v14 = vpop.f32.mrb[15].mxu1 }
 0x2da   : > { %v2070_v16 = vadd.f32 %v2069_v14, %v1986_v11 }
 0x2db   : > { %2150 = vst [vmem:[#allocation2 + $0x18] sm:$0x3] %v2068_v13 }
 0x2dc   : > { %2151 = vst [vmem:[#allocation2 + $0x20] sm:$0x3] %v2070_v16 }
 0x2fa   : > { %v8589_v19 = vpop.f32.mrb[16].mxu1 }
 0x2fb   : > { %v2144_v20 = vadd.f32 %v8589_v19, %v1987_v17  ;;  %v2138_v21 = vpop.f32.mrb[17].mxu1 }
 0x2fc   : > { %v2139_v22 = vadd.f32 %v2138_v21, %v1984_v18 }
 0x2fd   : > { %2152 = vst [vmem:[#allocation2 + $0x28] sm:$0x3] %v2144_v20 }
 0x2fe   : > { %2149 = vst [vmem:[#allocation2 + $0x10] sm:$0xff] %v2139_v22 }
 0x2ff PF: > { %v9937_v59 = vld [vmem:[#allocation2 + $0x18] sm:$0x3]  ;;  %v9939_v23 = vld [vmem:[#allocation2 + $0x20] sm:$0x3]  ;;  %vm2193_vm1 = vcmask 1041408   ;;  %v9945_v26 = vld [vmem:[#allocation2 + $0x8] sm:$0xff] }
 0x300   : > { %v9943_v25 = vld [vmem:[#allocation2] sm:$0xff]  ;;  %v2194_v27 = vsel %vm2193_vm1, %v9937_v59, 0.0  ;;  %v2195_v28 = vsel %vm2193_vm1, %v9939_v23, 0.0  ;;  %v2279_v35 = vld [vmem:[%s9844_s19 + $0x8] sm:$0xff]  ;;  %v2278_v36 = vld [vmem:[%s9844_s19] sm:$0xff]  ;;  %vm9542_vm2 = vmmov 0  }
 0x301   : > { %v2196_v30 = vadd.f32 %v2195_v28, %v2194_v27  ;;  %v2189_v31 = vadd.f32 %v9945_v26, %v9943_v25  ;;  %v2387_v37 = vunpack.c.l.s8.bf16 %v2279_v35  ;;  %v2396_v38 = vunpack.c.h.s8.bf16 %v2279_v35  ;;  %v2288_v40 = vld [vmem:[%s9844_s19 + $0x50] sm:$0xff]  ;;  %v2353_v15 = vld [vmem:[%s9844_s19 + $0x258] sm:$0xff]  ;;  %v2287_v44 = vld [vmem:[%s9844_s19 + $0x48] sm:$0xff]  ;;  %s9544_s4 = smov 96   ;;  %s13032_s21 = sld [smem:[#allocation46_spill]] }
 0x302   : > { %v2386_v39 = vunpack.c.l.s8.bf16 %v2278_v36  ;;  %v2352_v41 = vld [vmem:[%s9844_s19 + $0x250] sm:$0xff]  ;;  %v2395_v42 = vunpack.c.h.s8.bf16 %v2278_v36  ;;  %v2405_v43 = vunpack.c.l.s8.bf16 %v2288_v40  ;;  %v2533_v45 = vunpack.c.l.s8.bf16 %v2353_v15  ;;  %v2297_v51 = vld [vmem:[%s9844_s19 + $0x98] sm:$0xff]  ;;  %v2306_v57 = vld [vmem:[%s9844_s19 + $0xe0] sm:$0xff]  ;;  %s13033_s22 = sld [smem:[#allocation47_spill]]  ;;  %s13034_s1 = sld [smem:[#allocation48_spill]] }
 0x303   : > { %2602 = vmatprep.subr.bf16.mxu0 %v2387_v37  ;;  %v2542_v46 = vunpack.c.h.s8.bf16 %v2353_v15  ;;  %v2532_v47 = vunpack.c.l.s8.bf16 %v2352_v41  ;;  %v2404_v48 = vunpack.c.l.s8.bf16 %v2287_v44  ;;  %v2541_v49 = vunpack.c.h.s8.bf16 %v2352_v41  ;;  %v2296_v54 = vld [vmem:[%s9844_s19 + $0x90] sm:$0xff]  ;;  %v2305_v61 = vld [vmem:[%s9844_s19 + $0xd8] sm:$0xff]  ;;  %v2315_v0 = vld [vmem:[%s9844_s19 + $0x128] sm:$0xff]  ;;  %p8232_p4 = scmp.ne.s32.totalorder %s9723_s18, 11 }
 0x304   : > { %v9941_v24 = vld [vmem:[#allocation2 + $0x28] sm:$0x3]  ;;  %2603 = vmatpush1.bf16.msra.mxu0 %v2386_v39  ;;  %2731 = vmatprep.subr.bf16.mxu1 %v2533_v45  ;;  %v2414_v50 = vunpack.c.h.s8.bf16 %v2288_v40  ;;  %v2413_v52 = vunpack.c.h.s8.bf16 %v2287_v44  ;;  %v2423_v53 = vunpack.c.l.s8.bf16 %v2297_v51  ;;  %v2422_v55 = vunpack.c.l.s8.bf16 %v2296_v54  ;;  %v2314_v3 = vld [vmem:[%s9844_s19 + $0x120] sm:$0xff]  ;;  %v2323_v36 = vld [vmem:[%s9844_s19 + $0x168] sm:$0xff]  ;;  %s13238_s23 = sld [smem:[#allocation49_spill]] (!%p8232_p4)  ;;  %s13239_s0 = sld [smem:[#allocation50_spill]] (!%p8232_p4) }
 0x305   : > { %v2197_v29 = vsel %vm2193_vm1, %v9941_v24, 0.0  ;;  %v9955_v32 = vld [vmem:[#allocation2 + $0x10] sm:$0xff]  ;;  %2604 = vmatprep.subr.bf16.mxu0 %v2396_v38  ;;  %2732 = vmatpush1.bf16.msra.mxu1 %v2532_v47  ;;  %v2432_v56 = vunpack.c.h.s8.bf16 %v2297_v51  ;;  %v2431_v58 = vunpack.c.h.s8.bf16 %v2296_v54  ;;  %v2441_v60 = vunpack.c.l.s8.bf16 %v2306_v57  ;;  %v2371_v41 = vld [vmem:[%s9844_s19 + $0x2e8] sm:$0xff]  ;;  %v2332_v47 = vld [vmem:[%s9844_s19 + $0x1b0] sm:$0xff]  ;;  %s13243_s18 = sld [smem:[#allocation52_spill]] (!%p8232_p4)  ;;  %s13244_s12 = sld [smem:[#allocation54_spill]] (!%p8232_p4) }
 0x306   : > { %v2198_v34 = vadd.f32 %v2197_v29, %v2196_v30  ;;  %v2190_v33 = vadd.f32 %v2189_v31, %v9955_v32  ;;  %2733 = vmatprep.subr.bf16.mxu1 %v2542_v46  ;;  %v2440_v62 = vunpack.c.l.s8.bf16 %v2305_v61  ;;  %v2450_v63 = vunpack.c.h.s8.bf16 %v2306_v57  ;;  %v2362_v30 = vld [vmem:[%s9844_s19 + $0x2a0] sm:$0xff]  ;;  %v2379_v57 = vld [vmem:[%s9844_s19 + $0x328] sm:$0xff] }
 0x307   : > { %v2449_v1 = vunpack.c.h.s8.bf16 %v2305_v61  ;;  %v2459_v2 = vunpack.c.l.s8.bf16 %v2315_v0  ;;  %v2458_v4 = vunpack.c.l.s8.bf16 %v2314_v3  ;;  %v2468_v5 = vunpack.c.h.s8.bf16 %v2315_v0 }
 0x308   : > { %2199 = vadd.xlane.f32.xlu0 %v2198_v34  ;;  %2605 = vmatpush1.bf16.msra.mxu0 %v2395_v42  ;;  %v2467_v29 = vunpack.c.h.s8.bf16 %v2314_v3  ;;  %v2551_v31 = vunpack.c.l.s8.bf16 %v2362_v30  ;;  %v2361_v34 = vld [vmem:[%s9844_s19 + $0x298] sm:$0xff]  ;;  %v2476_v37 = vunpack.c.l.s8.bf16 %v2323_v36  ;;  %v2560_v38 = vunpack.c.h.s8.bf16 %v2362_v30 }
 0x309   : > { %2606 = vmatprep.subr.bf16.mxu0 %v2405_v43  ;;  %2734 = vmatpush1.bf16.msra.mxu1 %v2541_v49  ;;  %v2550_v35 = vunpack.c.l.s8.bf16 %v2361_v34  ;;  %v2559_v40 = vunpack.c.h.s8.bf16 %v2361_v34  ;;  %v2485_v15 = vunpack.c.h.s8.bf16 %v2323_v36  ;;  %v2333_v42 = vld [vmem:[%s9844_s19 + $0x1b8] sm:$0xff]  ;;  %v2370_v43 = vld [vmem:[%s9844_s19 + $0x2e0] sm:$0xff]  ;;  %v2569_v44 = vunpack.c.l.s8.bf16 %v2371_v41 }
 0x30a   : > { %2735 = vmatprep.subr.bf16.mxu1 %v2551_v31  ;;  %v2495_v45 = vunpack.c.l.s8.bf16 %v2333_v42  ;;  %v2568_v46 = vunpack.c.l.s8.bf16 %v2370_v43  ;;  %v9540_v49 = vmov 0   ;;  %v2504_v51 = vunpack.c.h.s8.bf16 %v2333_v42 }
 0x30b   : > { %2763 = vmatprep.mubr.bf16.mxu1 %v9540_v49  ;;  %v2577_v54 = vunpack.c.h.s8.bf16 %v2370_v43  ;;  %v2586_v61 = vunpack.c.l.s8.bf16 %v2379_v57  ;;  %v2284_v43 = vld [vmem:[%s9844_s19 + $0x30] sm:$0xff]  ;;  %vm9545_vm3 = vmmov 1   ;;  %vm3154_vm5 = vcmask 785408  }
 0x30c   : > { %2191 = vadd.xlane.f32.xlu0 %v2190_v33  ;;  %2607 = vmatpush1.bf16.msra.mxu0 %v2404_v48  ;;  %v2578_v48 = vunpack.c.h.s8.bf16 %v2371_v41  ;;  %vm10229_vm4 = vmpackc.low %vm2193_vm1, %vm9545_vm3  ;;  %vm3183_vm6 = vcmask 261120   ;;  %vm3365_vm7 = vcmask 1043456   ;;  %vm3381_vm8 = vcmask 1045504  }
 0x30d   : > { %2608 = vmatprep.subr.bf16.mxu0 %v2414_v50  ;;  %2736 = vmatpush1.bf16.msra.mxu1 %v2550_v35  ;;  %v2494_v50 = vunpack.c.l.s8.bf16 %v2332_v47  ;;  %vm3648_vm9 = vcmask 80896   ;;  %vm3670_vm10 = vcmask 76800   ;;  %vm4015_vm11 = vcmask 490496   ;;  %vm10710_vm12 = vmpackc.low %vm3365_vm7, %vm9545_vm3 }
 0x30e   : > { %2737 = vmatprep.subr.bf16.mxu1 %v2560_v38 }
 0x310   : > { %2609 = vmatpush1.bf16.msra.mxu0 %v2413_v52  ;;  %v2380_v52 = vld [vmem:[%s9844_s19 + $0x330] sm:$0xff] }
 0x311   : > { %2610 = vmatprep.subr.bf16.mxu0 %v2423_v53  ;;  %2738 = vmatpush1.bf16.msra.mxu1 %v2559_v40  ;;  %v2342_v53 = vld [vmem:[%s9844_s19 + $0x200] sm:$0xff] }
 0x312   : > { %2739 = vmatprep.subr.bf16.mxu1 %v2569_v44  ;;  %v2522_v0 = vunpack.c.h.s8.bf16 %v2342_v53 }
 0x314   : > { %2611 = vmatpush1.bf16.msra.mxu0 %v2422_v55  ;;  %v2503_v55 = vunpack.c.h.s8.bf16 %v2332_v47 }
 0x315   : > { %2612 = vmatprep.subr.bf16.mxu0 %v2432_v56  ;;  %2740 = vmatpush1.bf16.msra.mxu1 %v2568_v46  ;;  %v2587_v56 = vunpack.c.l.s8.bf16 %v2380_v52 }
 0x316   : > { %2741 = vmatprep.subr.bf16.mxu1 %v2578_v48 }
 0x318   : > { %2613 = vmatpush1.bf16.msra.mxu0 %v2431_v58  ;;  %v2513_v58 = vunpack.c.l.s8.bf16 %v2342_v53 }
 0x319   : > { %2614 = vmatprep.subr.bf16.mxu0 %v2441_v60  ;;  %v2341_v60 = vld [vmem:[%s9844_s19 + $0x1f8] sm:$0xff]  ;;  %2742 = vmatpush1.bf16.msra.mxu1 %v2577_v54 }
 0x31a   : > { %2743 = vmatprep.subr.bf16.mxu1 %v2587_v56  ;;  %v2521_v3 = vunpack.c.h.s8.bf16 %v2341_v60 }
 0x31c   : > { %2615 = vmatpush1.bf16.msra.mxu0 %v2440_v62  ;;  %v2512_v62 = vunpack.c.l.s8.bf16 %v2341_v60  ;;  %v2401_v60 = vunpack.c.h.s8.bf16 %v2284_v43 }
 0x31d   : > { %2616 = vmatprep.subr.bf16.mxu0 %v2450_v63  ;;  %v2596_v63 = vunpack.c.h.s8.bf16 %v2380_v52  ;;  %2744 = vmatpush1.bf16.msra.mxu1 %v2586_v61 }
 0x31f   : > { %2745 = vmatprep.subr.bf16.mxu1 %v2596_v63  ;;  %v2293_v63 = vld [vmem:[%s9844_s19 + $0x78] sm:$0xff] }
 0x320   : > { %2617 = vmatpush1.bf16.msra.mxu0 %v2449_v1  ;;  %v10017_v1 = vld [vmem:[%s9844_s19 + $0x38] sm:$0xff] }
 0x321   : > { %2618 = vmatprep.subr.bf16.mxu0 %v2459_v2  ;;  %v2595_v2 = vunpack.c.h.s8.bf16 %v2379_v57  ;;  %v2294_v57 = vld [vmem:[%s9844_s19 + $0x80] sm:$0xff] }
 0x323   : > { %2746 = vmatpush1.bf16.msra.mxu1 %v2595_v2  ;;  %v2410_v2 = vunpack.c.l.s8.bf16 %v2293_v63 }
 0x324   : > { %2619 = vmatpush1.bf16.msra.mxu0 %v2458_v4  ;;  %v2393_v4 = vunpack.c.l.s8.bf16 %v10017_v1 }
 0x325   : > { %2620 = vmatprep.subr.bf16.mxu0 %v2468_v5  ;;  %v10021_v5 = vld [vmem:[%s9844_s19 + $0x248] sm:$0xff] }
 0x326   : > { %2860 = vmatprep.subr.bf16.mxu1 %v2393_v4  ;;  %v2540_v56 = vunpack.c.h.s8.bf16 %v10021_v5  ;;  %v2420_v4 = vunpack.c.h.s8.bf16 %v2294_v57 }
 0x328   : > { %2621 = vmatpush1.bf16.msra.mxu0 %v2467_v29  ;;  %v2164_v29 = vld [vmem:[%s9838_s9 + $0x28] sm:$0xff] }
 0x395   : > { %v2200_v6 = vpop.xlane.xlu0 %2199 }
 0x396   : > { %v2203_v7 = vmul.f32 0.0026041667, %v2200_v6  ;;  %v2531_v6 = vunpack.c.l.s8.bf16 %v10021_v5 }
 0x398   : > { %v9971_v8 = vsub.f32 %v9937_v59, %v2203_v7  ;;  %v9974_v9 = vsub.f32 %v9939_v23, %v2203_v7  ;;  %v9990_v18 = vsub.f32 %v9941_v24, %v2203_v7 }
 0x399   : > { %v2192_v10 = vpop.xlane.xlu0 %2191 }
 0x39a   : > { %v2202_v11 = vmul.f32 0.0026041667, %v2192_v10  ;;  %v2213_v12 = vmul.f32 %v9971_v8, %v9971_v8  ;;  %v2214_v13 = vmul.f32 %v9974_v9, %v9974_v9  ;;  %v2215_v24 = vmul.f32 %v9990_v18, %v9990_v18 }
 0x39c   : > { %v9981_v14 = vsub.f32 %v9943_v25, %v2202_v11  ;;  %v9984_v16 = vsub.f32 %v9945_v26, %v2202_v11  ;;  %v9987_v17 = vsub.f32 %v9955_v32, %v2202_v11  ;;  %v2220_v21 = vsel %vm2193_vm1, %v2213_v12, 0.0  ;;  %v2324_v32 = vld [vmem:[%s9844_s19 + $0x170] sm:$0xff] }
 0x39d   : > { %v2221_v22 = vsel %vm2193_vm1, %v2214_v13, 0.0  ;;  %v2223_v27 = vsel %vm2193_vm1, %v2215_v24, 0.0  ;;  %v2477_v33 = vunpack.c.l.s8.bf16 %v2324_v32  ;;  %v2486_v39 = vunpack.c.h.s8.bf16 %v2324_v32  ;;  %v10034_v24 = vld [vmem:[%s9838_s9] sm:$0xff] }
 0x39e   : > { %v2210_v19 = vmul.f32 %v9981_v14, %v9981_v14  ;;  %v2211_v20 = vmul.f32 %v9984_v16, %v9984_v16  ;;  %v2212_v59 = vmul.f32 %v9987_v17, %v9987_v17  ;;  %v2222_v26 = vadd.f32 %v2221_v22, %v2220_v21 }
 0x39f   : > { %2622 = vmatprep.subr.bf16.mxu0 %v2477_v33  ;;  %v2239_v13 = vlaneseq  ;;  %v10047_v33 = vld [vmem:[%s9838_s9 + $0x18] sm:$0xff] }
 0x3a0   : > { %v2216_v23 = vadd.f32 %v2211_v20, %v2210_v19  ;;  %v2224_v28 = vadd.f32 %v2223_v27, %v2222_v26  ;;  %2623 = vmatpush1.bf16.msra.mxu0 %v2476_v37  ;;  %v2163_v26 = vld [vmem:[%s9838_s9 + $0x20] sm:$0xff] }
 0x3a1   : > { %2624 = vmatprep.subr.bf16.mxu0 %v2486_v39  ;;  %v10024_v21 = vshrl.u32 %v2239_v13, 7  ;;  %v2302_v13 = vld [vmem:[%s9844_s19 + $0xc0] sm:$0xff] }
 0x3a2   : > { %v2217_v25 = vadd.f32 %v2216_v23, %v2212_v59  ;;  %v10030_v59 = vld [vmem:[%s9838_s9 + $0x8] sm:$0xff]  ;;  %v2161_v23 = vld [vmem:[%s9838_s9 + $0x10] sm:$0xff] }
 0x3a3   : > { %v10027_v22 = vsub.s32 0, %v10024_v21 }
 0x3a4   : > { %2218 = vadd.xlane.f32.xlu1 %v2217_v25  ;;  %2625 = vmatpush1.bf16.msra.mxu0 %v2485_v15 }
 0x3a5   : > { %2626 = vmatprep.subr.bf16.mxu0 %v2495_v45  ;;  %13027 = vst [vmem:[#allocation16_spill] sm:$0xff] %v10027_v22  ;;  %v2250_v31 = vrot.slane %v2161_v23, %v10027_v22  ;;  %v2242_v34 = vrot.slane %v10034_v24, %v10027_v22  ;;  %v2268_v36 = vrot.slane %v2164_v29, %v10027_v22  ;;  %v2350_v45 = vld [vmem:[%s9844_s19 + $0x240] sm:$0xff]  ;;  %v2428_v23 = vunpack.c.l.s8.bf16 %v2302_v13 }
 0x3a6   : > { %v2260_v15 = vrot.slane %v10047_v33, %v10027_v22  ;;  %v2530_v53 = vunpack.c.l.s8.bf16 %v2350_v45  ;;  %v2539_v61 = vunpack.c.h.s8.bf16 %v2350_v45  ;;  %v2378_v29 = vld [vmem:[%s9844_s19 + $0x320] sm:$0xff] }
 0x3a8   : > { %2225 = vadd.xlane.f32.xlu1 %v2224_v28  ;;  %2627 = vmatpush1.bf16.msra.mxu0 %v2494_v50  ;;  %v2246_v28 = vrot.slane %v10030_v59, %v10027_v22  ;;  %v2392_v50 = vunpack.c.l.s8.bf16 %v2284_v43 }
 0x3a9   : > { %2628 = vmatprep.subr.bf16.mxu0 %v2504_v51 }
 0x3ac   : > { %2629 = vmatpush1.bf16.msra.mxu0 %v2503_v55  ;;  %v2402_v55 = vunpack.c.h.s8.bf16 %v10017_v1  ;;  %v2359_v1 = vld [vmem:[%s9844_s19 + $0x288] sm:$0xff] }
 0x3ad   : > { %2630 = vmatprep.subr.bf16.mxu0 %v2513_v58  ;;  %v2360_v58 = vld [vmem:[%s9844_s19 + $0x290] sm:$0xff] }
 0x3ae   : > { %v2558_v5 = vunpack.c.h.s8.bf16 %v2360_v58 }
 0x3b0   : > { %2631 = vmatpush1.bf16.msra.mxu0 %v2512_v62  ;;  %v2411_v62 = vunpack.c.l.s8.bf16 %v2294_v57  ;;  %v2289_v57 = vld [vmem:[%s9844_s19 + $0x58] sm:$0xff] }
 0x3b1   : > { %2632 = vmatprep.subr.bf16.mxu0 %v2522_v0  ;;  %v2549_v0 = vunpack.c.l.s8.bf16 %v2360_v58 }
 0x3b4   : > { %2633 = vmatpush1.bf16.msra.mxu0 %v2521_v3  ;;  %v2548_v3 = vunpack.c.l.s8.bf16 %v2359_v1 }
 0x3b5   : > { %2645 = vmatprep.subr.bf16.mxu0 %v2531_v6  ;;  %v2303_v6 = vld [vmem:[%s9844_s19 + $0xc8] sm:$0xff] }
 0x431   : > { %v2219_v7 = vpop.xlane.xlu1 %2218 }
 0x432   : > { %v2227_v10 = vmul.f32 0.0026041667, %v2219_v7  ;;  %v2369_v7 = vld [vmem:[%s9844_s19 + $0x2d8] sm:$0xff] }
 0x434   : > { %v2229_v11 = vadd.f32 1e-06, %v2227_v10  ;;  %v2419_v10 = vunpack.c.h.s8.bf16 %v2293_v63  ;;  %v2339_v63 = vld [vmem:[%s9844_s19 + $0x1e8] sm:$0xff] }
 0x435   : > { %v2226_v12 = vpop.xlane.xlu1 %2225 }
 0x436   : > { %9190 = vrsqrt.f32 %v2229_v11  ;;  %v2228_v19 = vmul.f32 0.0026041667, %v2226_v12  ;;  %v2557_v11 = vunpack.c.h.s8.bf16 %v2359_v1  ;;  %v2429_v12 = vunpack.c.l.s8.bf16 %v2303_v6 }
 0x438   : > { %v2230_v20 = vadd.f32 1e-06, %v2228_v19  ;;  %v2567_v19 = vunpack.c.l.s8.bf16 %v2369_v7 }
 0x43a   : > { %9192 = vrsqrt.f32 %v2230_v20  ;;  %v2368_v20 = vld [vmem:[%s9844_s19 + $0x2d0] sm:$0xff] }
 0x440   : > { %v9191_v25 = vpop.eup %9190 }
 0x441   : > { %v2234_v27 = vmul.f32 %v9191_v25, %v9984_v16  ;;  %v2235_v30 = vmul.f32 %v9191_v25, %v9987_v17  ;;  %v2233_v32 = vmul.f32 %v9191_v25, %v9981_v14  ;;  %v2264_v16 = vrot.slane %v2163_v26, %v10027_v22 }
 0x442   : > { %v2566_v25 = vunpack.c.l.s8.bf16 %v2368_v20  ;;  %v2438_v26 = vunpack.c.h.s8.bf16 %v2303_v6  ;;  %v2298_v6 = vld [vmem:[%s9844_s19 + $0xa0] sm:$0xff] }
 0x443   : > { %v2252_v38 = vmul.f32 %v2246_v28, %v2234_v27  ;;  %v2253_v39 = vmul.f32 %v2250_v31, %v2235_v30  ;;  %v2251_v14 = vmul.f32 %v2242_v34, %v2233_v32  ;;  %v2576_v27 = vunpack.c.h.s8.bf16 %v2369_v7 }
 0x444   : > { %v9193_v35 = vpop.eup %9192  ;;  %v2437_v30 = vunpack.c.h.s8.bf16 %v2302_v13  ;;  %v2348_v13 = vld [vmem:[%s9844_s19 + $0x230] sm:$0xff] }
 0x445   : > { %v2237_v37 = vmul.f32 %v9193_v35, %v9974_v9  ;;  %v2238_v17 = vmul.f32 %v9193_v35, %v9990_v18  ;;  %v2236_v40 = vmul.f32 %v9193_v35, %v9971_v8  ;;  %v2270_v46 = vadd.f32 %v2264_v16, %v2252_v38 }
 0x446   : > { %v2271_v9 = vadd.f32 %v2268_v36, %v2253_v39  ;;  %v2269_v18 = vadd.f32 %v2260_v15, %v2251_v14  ;;  %v2585_v35 = vunpack.c.l.s8.bf16 %v2378_v29  ;;  %v2321_v39 = vld [vmem:[%s9844_s19 + $0x158] sm:$0xff] }
 0x447   : > { %v2255_v41 = vmul.f32 %v2246_v28, %v2237_v37  ;;  %v2256_v42 = vmul.f32 %v2250_v31, %v2238_v17  ;;  %v2254_v44 = vmul.f32 %v2242_v34, %v2236_v40  ;;  %v2312_v28 = vld [vmem:[%s9844_s19 + $0x110] sm:$0xff]  ;;  %v2575_v31 = vunpack.c.h.s8.bf16 %v2368_v20  ;;  %v2311_v34 = vld [vmem:[%s9844_s19 + $0x108] sm:$0xff]  ;;  %v2281_v40 = vld [vmem:[%s9844_s19 + $0x18] sm:$0xff] }
 0x448   : > { %v2447_v32 = vunpack.c.l.s8.bf16 %v2312_v28  ;;  %v2456_v38 = vunpack.c.h.s8.bf16 %v2312_v28  ;;  %v2594_v17 = vunpack.c.h.s8.bf16 %v2378_v29  ;;  %v2455_v14 = vunpack.c.h.s8.bf16 %v2311_v34  ;;  %v2307_v28 = vld [vmem:[%s9844_s19 + $0xe8] sm:$0xff] }
 0x449   : > { %v2273_v47 = vadd.f32 %v2264_v16, %v2255_v41  ;;  %v2274_v48 = vadd.f32 %v2268_v36, %v2256_v42  ;;  %v2272_v51 = vadd.f32 %v2260_v15, %v2254_v44  ;;  %v2377_v16 = vld [vmem:[%s9844_s19 + $0x318] sm:$0xff]  ;;  %v2446_v36 = vunpack.c.l.s8.bf16 %v2311_v34  ;;  %v2320_v42 = vld [vmem:[%s9844_s19 + $0x150] sm:$0xff] }
 0x44a   : > { %v2584_v37 = vunpack.c.l.s8.bf16 %v2377_v16  ;;  %v2593_v15 = vunpack.c.h.s8.bf16 %v2377_v16  ;;  %v2465_v41 = vunpack.c.l.s8.bf16 %v2321_v39  ;;  %v2389_v43 = vunpack.c.l.s8.bf16 %v2281_v40  ;;  %v2280_v44 = vld [vmem:[%s9844_s19 + $0x10] sm:$0xff]  ;;  %v2357_v34 = vld [vmem:[%s9844_s19 + $0x278] sm:$0xff] }
 0x44b   : > { %v10058_v52 = vpack.c.bf16 %v2273_v47, %v2270_v46  ;;  %v10060_v8 = vpack.c.bf16 %v2274_v48, %v2271_v9  ;;  %v10062_v54 = vpack.c.bf16 %v2272_v51, %v2269_v18  ;;  %v2464_v45 = vunpack.c.l.s8.bf16 %v2320_v42  ;;  %v2330_v48 = vld [vmem:[%s9844_s19 + $0x1a0] sm:$0xff] }
 0x44c   : > { %v2388_v46 = vunpack.c.l.s8.bf16 %v2280_v44  ;;  %v2474_v47 = vunpack.c.h.s8.bf16 %v2321_v39  ;;  %v2398_v9 = vunpack.c.h.s8.bf16 %v2281_v40  ;;  %v2473_v18 = vunpack.c.h.s8.bf16 %v2320_v42  ;;  %v2316_v39 = vld [vmem:[%s9844_s19 + $0x130] sm:$0xff]  ;;  %v2366_v42 = vld [vmem:[%s9844_s19 + $0x2c0] sm:$0xff] }
 0x44d   : > { %2634 = vmatprep.mubr.bf16.mxu0 %v10058_v52  ;;  %2764 = vmatmul.mubr.bf16.vlgmr.msra.gmra.mrb[0].mxu1 %v10060_v8  ;;  %v2397_v51 = vunpack.c.h.s8.bf16 %v2280_v44 }
 0x44e   : > { %2861 = vmatpush1.bf16.msra.mxu1 %v2392_v50  ;;  %2635 = vmatmul.mubr.bf16.vlgmr.msra.gmra.mrb[0].mxu0 %v10062_v54  ;;  %v2290_v50 = vld [vmem:[%s9844_s19 + $0x60] sm:$0xff] }
 0x44f   : > { %2646 = vmatpush1.bf16.msra.mxu0 %v2530_v53  ;;  %2892 = vmatprep.mubr.bf16.mxu1 %v10058_v52  ;;  %v2483_v53 = vunpack.c.l.s8.bf16 %v2330_v48 }
 0x450   : > { %2862 = vmatprep.subr.bf16.mxu1 %v2402_v55  ;;  %2647 = vmatprep.subr.bf16.mxu0 %v2540_v56  ;;  %v2329_v55 = vld [vmem:[%s9844_s19 + $0x198] sm:$0xff]  ;;  %v2407_v56 = vunpack.c.l.s8.bf16 %v2290_v50 }
 0x451   : > { %2677 = vmatprep.mubr.bf16.mxu0 %v9540_v49  ;;  %v2482_v58 = vunpack.c.l.s8.bf16 %v2329_v55  ;;  %v2491_v1 = vunpack.c.h.s8.bf16 %v2329_v55  ;;  %v2375_v55 = vld [vmem:[%s9844_s19 + $0x308] sm:$0xff] }
 0x452   : > { %2863 = vmatpush1.bf16.msra.mxu1 %v2401_v60  ;;  %v2406_v60 = vunpack.c.l.s8.bf16 %v2289_v57 }
 0x453   : > { %2648 = vmatpush1.bf16.msra.mxu0 %v2539_v61  ;;  %2864 = vmatprep.subr.bf16.mxu1 %v2411_v62  ;;  %v2492_v61 = vunpack.c.h.s8.bf16 %v2330_v48  ;;  %v2416_v62 = vunpack.c.h.s8.bf16 %v2290_v50  ;;  %v2325_v48 = vld [vmem:[%s9844_s19 + $0x178] sm:$0xff] }
 0x454   : > { %2649 = vmatprep.subr.bf16.mxu0 %v2549_v0  ;;  %v2299_v0 = vld [vmem:[%s9844_s19 + $0xa8] sm:$0xff] }
 0x456   : > { %2865 = vmatpush1.bf16.msra.mxu1 %v2410_v2  ;;  %v2415_v2 = vunpack.c.h.s8.bf16 %v2289_v57 }
 0x457   : > { %2650 = vmatpush1.bf16.msra.mxu0 %v2548_v3  ;;  %2866 = vmatprep.subr.bf16.mxu1 %v2420_v4  ;;  %v2501_v3 = vunpack.c.l.s8.bf16 %v2339_v63  ;;  %v2338_v4 = vld [vmem:[%s9844_s19 + $0x1e0] sm:$0xff] }
 0x458   : > { %2651 = vmatprep.subr.bf16.mxu0 %v2558_v5  ;;  %v2425_v5 = vunpack.c.l.s8.bf16 %v2299_v0  ;;  %v2500_v7 = vunpack.c.l.s8.bf16 %v2338_v4  ;;  %v2509_v20 = vunpack.c.h.s8.bf16 %v2338_v4  ;;  %v2384_v4 = vld [vmem:[%s9844_s19 + $0x350] sm:$0xff] }
 0x45a   : > { %2867 = vmatpush1.bf16.msra.mxu1 %v2419_v10  ;;  %v2424_v10 = vunpack.c.l.s8.bf16 %v2298_v6 }
 0x45b   : > { %2652 = vmatpush1.bf16.msra.mxu0 %v2557_v11  ;;  %2868 = vmatprep.subr.bf16.mxu1 %v2429_v12  ;;  %v2510_v11 = vunpack.c.h.s8.bf16 %v2339_v63  ;;  %v2434_v12 = vunpack.c.h.s8.bf16 %v2299_v0  ;;  %v2334_v63 = vld [vmem:[%s9844_s19 + $0x1c0] sm:$0xff] }
 0x45c   : > { %2653 = vmatprep.subr.bf16.mxu0 %v2567_v19  ;;  %v2308_v19 = vld [vmem:[%s9844_s19 + $0xf0] sm:$0xff] }
 0x45e   : > { %2869 = vmatpush1.bf16.msra.mxu1 %v2428_v23  ;;  %v2433_v23 = vunpack.c.h.s8.bf16 %v2298_v6 }
 0x45f   : > { %2654 = vmatpush1.bf16.msra.mxu0 %v2566_v25  ;;  %2870 = vmatprep.subr.bf16.mxu1 %v2438_v26  ;;  %v2519_v25 = vunpack.c.l.s8.bf16 %v2348_v13  ;;  %v2347_v26 = vld [vmem:[%s9844_s19 + $0x228] sm:$0xff] }
 0x460   : > { %2655 = vmatprep.subr.bf16.mxu0 %v2576_v27  ;;  %v2443_v27 = vunpack.c.l.s8.bf16 %v2308_v19  ;;  %v2518_v29 = vunpack.c.l.s8.bf16 %v2347_v26  ;;  %v2527_v16 = vunpack.c.h.s8.bf16 %v2347_v26  ;;  %v2283_v26 = vld [vmem:[%s9844_s19 + $0x28] sm:$0xff] }
 0x462   : > { %2871 = vmatpush1.bf16.msra.mxu1 %v2437_v30  ;;  %v2442_v30 = vunpack.c.l.s8.bf16 %v2307_v28 }
 0x463   : > { %2656 = vmatpush1.bf16.msra.mxu0 %v2575_v31  ;;  %2872 = vmatprep.subr.bf16.mxu1 %v2447_v32  ;;  %v2528_v31 = vunpack.c.h.s8.bf16 %v2348_v13  ;;  %v2452_v32 = vunpack.c.h.s8.bf16 %v2308_v19  ;;  %v2343_v13 = vld [vmem:[%s9844_s19 + $0x208] sm:$0xff] }
 0x464   : > { %2657 = vmatprep.subr.bf16.mxu0 %v2585_v35  ;;  %v2317_v35 = vld [vmem:[%s9844_s19 + $0x138] sm:$0xff] }
 0x466   : > { %2873 = vmatpush1.bf16.msra.mxu1 %v2446_v36  ;;  %v2451_v36 = vunpack.c.h.s8.bf16 %v2307_v28  ;;  %v2523_v28 = vunpack.c.h.s8.bf16 %v2343_v13 }
 0x467   : > { %2658 = vmatpush1.bf16.msra.mxu0 %v2584_v37  ;;  %2874 = vmatprep.subr.bf16.mxu1 %v2456_v38  ;;  %v2537_v37 = vunpack.c.l.s8.bf16 %v2357_v34  ;;  %v2356_v38 = vld [vmem:[%s9844_s19 + $0x270] sm:$0xff] }
 0x468   : > { %2659 = vmatprep.subr.bf16.mxu0 %v2594_v17  ;;  %v2461_v17 = vunpack.c.l.s8.bf16 %v2317_v35  ;;  %v2536_v40 = vunpack.c.l.s8.bf16 %v2356_v38  ;;  %v2545_v44 = vunpack.c.h.s8.bf16 %v2356_v38 }
 0x46a   : > { %2875 = vmatpush1.bf16.msra.mxu1 %v2455_v14  ;;  %v2460_v14 = vunpack.c.l.s8.bf16 %v2316_v39 }
 0x46b   : > { %2660 = vmatpush1.bf16.msra.mxu0 %v2593_v15  ;;  %2876 = vmatprep.subr.bf16.mxu1 %v2465_v41  ;;  %v2546_v15 = vunpack.c.h.s8.bf16 %v2357_v34  ;;  %v2470_v41 = vunpack.c.h.s8.bf16 %v2317_v35  ;;  %v9541_v34 = vmov 0.0  }
 0x46c   : > { %2688 = vmatprep.subr.bf16.mxu0 %v2389_v43  ;;  %v2326_v43 = vld [vmem:[%s9844_s19 + $0x180] sm:$0xff] }
 0x46e   : > { %2678 = vmatmul.mubr.bf16.vlgmr.msra.gmra.mrb[0].mxu0 %v10060_v8  ;;  %2877 = vmatpush1.bf16.msra.mxu1 %v2464_v45  ;;  %v2469_v45 = vunpack.c.h.s8.bf16 %v2316_v39 }
 0x46f   : > { %2689 = vmatpush1.bf16.msra.mxu0 %v2388_v46  ;;  %2720 = vmatprep.mubr.bf16.mxu0 %v10058_v52  ;;  %v2555_v46 = vunpack.c.l.s8.bf16 %v2366_v42 }
 0x470   : > { %2878 = vmatprep.subr.bf16.mxu1 %v2474_v47  ;;  %2690 = vmatprep.subr.bf16.mxu0 %v2398_v9  ;;  %v2365_v47 = vld [vmem:[%s9844_s19 + $0x2b8] sm:$0xff]  ;;  %v2479_v9 = vunpack.c.l.s8.bf16 %v2326_v43 }
 0x471   : > { %v2554_v50 = vunpack.c.l.s8.bf16 %v2365_v47  ;;  %v2563_v57 = vunpack.c.h.s8.bf16 %v2365_v47  ;;  %v2300_v47 = vld [vmem:[%s9844_s19 + $0xb0] sm:$0xff] }
 0x472   : > { %2879 = vmatpush1.bf16.msra.mxu1 %v2473_v18  ;;  %v2478_v18 = vunpack.c.l.s8.bf16 %v2325_v48 }
 0x473   : > { %2691 = vmatpush1.bf16.msra.mxu0 %v2397_v51  ;;  %2880 = vmatprep.subr.bf16.mxu1 %v2483_v53  ;;  %v2564_v51 = vunpack.c.h.s8.bf16 %v2366_v42  ;;  %v2488_v53 = vunpack.c.h.s8.bf16 %v2326_v43  ;;  %v2301_v42 = vld [vmem:[%s9844_s19 + $0xb8] sm:$0xff] }
 0x474   : > { %2692 = vmatprep.subr.bf16.mxu0 %v2407_v56  ;;  %v2335_v56 = vld [vmem:[%s9844_s19 + $0x1c8] sm:$0xff] }
 0x476   : > { %2881 = vmatpush1.bf16.msra.mxu1 %v2482_v58  ;;  %v2487_v58 = vunpack.c.h.s8.bf16 %v2325_v48  ;;  %v2426_v48 = vunpack.c.l.s8.bf16 %v2300_v47 }
 0x477   : > { %2693 = vmatpush1.bf16.msra.mxu0 %v2406_v60  ;;  %2882 = vmatprep.subr.bf16.mxu1 %v2492_v61  ;;  %v2573_v60 = vunpack.c.l.s8.bf16 %v2375_v55  ;;  %v2374_v61 = vld [vmem:[%s9844_s19 + $0x300] sm:$0xff] }
 0x478   : > { %2694 = vmatprep.subr.bf16.mxu0 %v2416_v62  ;;  %v2497_v62 = vunpack.c.l.s8.bf16 %v2335_v56  ;;  %v2572_v0 = vunpack.c.l.s8.bf16 %v2374_v61  ;;  %v2581_v6 = vunpack.c.h.s8.bf16 %v2374_v61 }
 0x47a   : > { %2883 = vmatpush1.bf16.msra.mxu1 %v2491_v1  ;;  %v2496_v1 = vunpack.c.l.s8.bf16 %v2334_v63 }
 0x47b   : > { %2695 = vmatpush1.bf16.msra.mxu0 %v2415_v2  ;;  %2884 = vmatprep.subr.bf16.mxu1 %v2501_v3  ;;  %v2582_v2 = vunpack.c.h.s8.bf16 %v2375_v55  ;;  %v2506_v3 = vunpack.c.h.s8.bf16 %v2335_v56  ;;  %v2385_v55 = vld [vmem:[%s9844_s19 + $0x358] sm:$0xff] }
 0x47c   : > { %2696 = vmatprep.subr.bf16.mxu0 %v2425_v5  ;;  %v2344_v5 = vld [vmem:[%s9844_s19 + $0x210] sm:$0xff] }
 0x47e   : > { %2885 = vmatpush1.bf16.msra.mxu1 %v2500_v7  ;;  %v2505_v7 = vunpack.c.h.s8.bf16 %v2334_v63  ;;  %v2601_v63 = vunpack.c.h.s8.bf16 %v2385_v55 }
 0x47f   : > { %2697 = vmatpush1.bf16.msra.mxu0 %v2424_v10  ;;  %2886 = vmatprep.subr.bf16.mxu1 %v2510_v11  ;;  %v2591_v10 = vunpack.c.l.s8.bf16 %v2384_v4  ;;  %v2383_v11 = vld [vmem:[%s9844_s19 + $0x348] sm:$0xff] }
 0x480   : > { %2698 = vmatprep.subr.bf16.mxu0 %v2434_v12  ;;  %v2515_v12 = vunpack.c.l.s8.bf16 %v2344_v5  ;;  %v2590_v19 = vunpack.c.l.s8.bf16 %v2383_v11 }
 0x482   : > { %2887 = vmatpush1.bf16.msra.mxu1 %v2509_v20  ;;  %v2514_v20 = vunpack.c.l.s8.bf16 %v2343_v13  ;;  %v2337_v13 = vld [vmem:[%s9844_s19 + $0x1d8] sm:$0xff] }
 0x483   : > { %2699 = vmatpush1.bf16.msra.mxu0 %v2433_v23  ;;  %2888 = vmatprep.subr.bf16.mxu1 %v2519_v25  ;;  %v2600_v23 = vunpack.c.h.s8.bf16 %v2384_v4  ;;  %v2524_v25 = vunpack.c.h.s8.bf16 %v2344_v5  ;;  %v2328_v5 = vld [vmem:[%s9844_s19 + $0x190] sm:$0xff] }
 0x484   : > { %2700 = vmatprep.subr.bf16.mxu0 %v2443_v27  ;;  %v2599_v27 = vunpack.c.h.s8.bf16 %v2383_v11 }
 0x486   : > { %2889 = vmatpush1.bf16.msra.mxu1 %v2518_v29  ;;  %v2358_v29 = vld [vmem:[%s9844_s19 + $0x280] sm:$0xff] }
 0x487   : > { %2701 = vmatpush1.bf16.msra.mxu0 %v2442_v30  ;;  %2890 = vmatprep.subr.bf16.mxu1 %v2528_v31  ;;  %v2391_v30 = vunpack.c.l.s8.bf16 %v2283_v26  ;;  %v2282_v31 = vld [vmem:[%s9844_s19 + $0x20] sm:$0xff] }
 0x488   : > { %2702 = vmatprep.subr.bf16.mxu0 %v2452_v32  ;;  %v2538_v32 = vunpack.c.l.s8.bf16 %v2358_v29  ;;  %v2390_v35 = vunpack.c.l.s8.bf16 %v2282_v31  ;;  %v2399_v38 = vunpack.c.h.s8.bf16 %v2282_v31 }
 0x48a   : > { %2891 = vmatpush1.bf16.msra.mxu1 %v2527_v16  ;;  %v2400_v16 = vunpack.c.h.s8.bf16 %v2283_v26  ;;  %v2508_v26 = vunpack.c.h.s8.bf16 %v2337_v13 }
 0x48b   : > { %2703 = vmatpush1.bf16.msra.mxu0 %v2451_v36  ;;  %2903 = vmatprep.subr.bf16.mxu1 %v2537_v37  ;;  %v2292_v36 = vld [vmem:[%s9844_s19 + $0x70] sm:$0xff]  ;;  %v2547_v37 = vunpack.c.h.s8.bf16 %v2358_v29 }
 0x48c   : > { %2704 = vmatprep.subr.bf16.mxu0 %v2461_v17  ;;  %v2367_v17 = vld [vmem:[%s9844_s19 + $0x2c8] sm:$0xff]  ;;  %v2409_v39 = vunpack.c.l.s8.bf16 %v2292_v36 }
 0x48d   : > { %2893 = vmatmul.mubr.bf16.vlgmr.msra.gmra.mrb[4].mxu1 %v10062_v54  ;;  %v2565_v43 = vunpack.c.h.s8.bf16 %v2367_v17 }
 0x48e   : > { %2904 = vmatpush1.bf16.msra.mxu1 %v2536_v40  ;;  %2935 = vmatprep.mubr.bf16.mxu1 %v9540_v49  ;;  %v2291_v40 = vld [vmem:[%s9844_s19 + $0x68] sm:$0xff] }
 0x48f   : > { %2705 = vmatpush1.bf16.msra.mxu0 %v2460_v14  ;;  %2905 = vmatprep.subr.bf16.mxu1 %v2546_v15  ;;  %v2556_v14 = vunpack.c.l.s8.bf16 %v2367_v17  ;;  %v2408_v15 = vunpack.c.l.s8.bf16 %v2291_v40 }
 0x490   : > { %2706 = vmatprep.subr.bf16.mxu0 %v2470_v41  ;;  %v2418_v41 = vunpack.c.h.s8.bf16 %v2292_v36 }
 0x492   : > { %2906 = vmatpush1.bf16.msra.mxu1 %v2545_v44  ;;  %v2417_v44 = vunpack.c.h.s8.bf16 %v2291_v40 }
 0x493   : > { %2707 = vmatpush1.bf16.msra.mxu0 %v2469_v45  ;;  %2907 = vmatprep.subr.bf16.mxu1 %v2555_v46  ;;  %v2376_v45 = vld [vmem:[%s9844_s19 + $0x310] sm:$0xff]  ;;  %v2427_v46 = vunpack.c.l.s8.bf16 %v2301_v42 }
 0x494   : > { %2708 = vmatprep.subr.bf16.mxu0 %v2479_v9  ;;  %v2574_v9 = vunpack.c.l.s8.bf16 %v2376_v45 }
 0x496   : > { %2908 = vmatpush1.bf16.msra.mxu1 %v2554_v50  ;;  %v2436_v50 = vunpack.c.h.s8.bf16 %v2301_v42 }
 0x497   : > { %2709 = vmatpush1.bf16.msra.mxu0 %v2478_v18  ;;  %2909 = vmatprep.subr.bf16.mxu1 %v2564_v51  ;;  %v2310_v18 = vld [vmem:[%s9844_s19 + $0x100] sm:$0xff]  ;;  %v2583_v51 = vunpack.c.h.s8.bf16 %v2376_v45 }
 0x498   : > { %2710 = vmatprep.subr.bf16.mxu0 %v2488_v53  ;;  %v2435_v53 = vunpack.c.h.s8.bf16 %v2300_v47  ;;  %v2445_v56 = vunpack.c.l.s8.bf16 %v2310_v18  ;;  %v2454_v61 = vunpack.c.h.s8.bf16 %v2310_v18 }
 0x49a   : > { %2910 = vmatpush1.bf16.msra.mxu1 %v2563_v57  ;;  %v2309_v57 = vld [vmem:[%s9844_s19 + $0xf8] sm:$0xff] }
 0x49b   : > { %2711 = vmatpush1.bf16.msra.mxu0 %v2487_v58  ;;  %2911 = vmatprep.subr.bf16.mxu1 %v2573_v60  ;;  %v2592_v58 = vunpack.c.l.s8.bf16 %v2385_v55  ;;  %v2444_v60 = vunpack.c.l.s8.bf16 %v2309_v57 }
 0x49c   : > { %2712 = vmatprep.subr.bf16.mxu0 %v2497_v62  ;;  %v2319_v62 = vld [vmem:[%s9844_s19 + $0x148] sm:$0xff] }
 0x49d   : > { %v2472_v4 = vunpack.c.h.s8.bf16 %v2319_v62 }
 0x49e   : > { %2912 = vmatpush1.bf16.msra.mxu1 %v2572_v0  ;;  %v2453_v0 = vunpack.c.h.s8.bf16 %v2309_v57 }
 0x49f   : > { %2713 = vmatpush1.bf16.msra.mxu0 %v2496_v1  ;;  %2913 = vmatprep.subr.bf16.mxu1 %v2582_v2  ;;  %v2463_v1 = vunpack.c.l.s8.bf16 %v2319_v62  ;;  %v2318_v2 = vld [vmem:[%s9844_s19 + $0x140] sm:$0xff] }
 0x4a0   : > { %2714 = vmatprep.subr.bf16.mxu0 %v2506_v3  ;;  %v2462_v3 = vunpack.c.l.s8.bf16 %v2318_v2 }
 0x4a2   : > { %2914 = vmatpush1.bf16.msra.mxu1 %v2581_v6  ;;  %v2471_v6 = vunpack.c.h.s8.bf16 %v2318_v2  ;;  %v2295_v2 = vld [vmem:[%s9844_s19 + $0x88] sm:$0xff] }
 0x4a3   : > { %2715 = vmatpush1.bf16.msra.mxu0 %v2505_v7  ;;  %2915 = vmatprep.subr.bf16.mxu1 %v2591_v10  ;;  %v2481_v7 = vunpack.c.l.s8.bf16 %v2328_v5  ;;  %v2327_v10 = vld [vmem:[%s9844_s19 + $0x188] sm:$0xff] }
 0x4a4   : > { %2716 = vmatprep.subr.bf16.mxu0 %v2515_v12  ;;  %v2480_v11 = vunpack.c.l.s8.bf16 %v2327_v10  ;;  %v2490_v12 = vunpack.c.h.s8.bf16 %v2328_v5  ;;  %v2340_v5 = vld [vmem:[%s9844_s19 + $0x1f0] sm:$0xff] }
 0x4a6   : > { %2916 = vmatpush1.bf16.msra.mxu1 %v2590_v19  ;;  %v2489_v19 = vunpack.c.h.s8.bf16 %v2327_v10 }
 0x4a7   : > { %2717 = vmatpush1.bf16.msra.mxu0 %v2514_v20  ;;  %2917 = vmatprep.subr.bf16.mxu1 %v2600_v23  ;;  %v2499_v20 = vunpack.c.l.s8.bf16 %v2337_v13  ;;  %v2336_v23 = vld [vmem:[%s9844_s19 + $0x1d0] sm:$0xff] }
 0x4a8   : > { %2718 = vmatprep.subr.bf16.mxu0 %v2524_v25  ;;  %v2498_v25 = vunpack.c.l.s8.bf16 %v2336_v23 }
 0x4aa   : > { %2918 = vmatpush1.bf16.msra.mxu1 %v2599_v27  ;;  %v2346_v27 = vld [vmem:[%s9844_s19 + $0x220] sm:$0xff] }
 0x4ab   : > { %2719 = vmatpush1.bf16.msra.mxu0 %v2523_v28  ;;  %8590 = vmatprep.subr.bf16.mxu1 %v9541_v34  ;;  %v2507_v28 = vunpack.c.h.s8.bf16 %v2336_v23  ;;  %v2517_v29 = vunpack.c.l.s8.bf16 %v2346_v27 }
 0x4ac   : > { %2774 = vmatprep.subr.bf16.mxu0 %v2391_v30  ;;  %v2345_v30 = vld [vmem:[%s9844_s19 + $0x218] sm:$0xff] }
 0x4ad   : > { %2936 = vmatmul.mubr.bf16.vlgmr.msra.gmra.mrb[4].mxu1 %v10060_v8  ;;  %v2516_v31 = vunpack.c.l.s8.bf16 %v2345_v30 }
 0x4ae   : > { %2721 = vmatmul.mubr.bf16.vlgmr.msra.gmra.mrb[4].mxu0 %v10062_v54  ;;  %8591 = vmatpush3.bf16.msra.mxu1 %v2538_v32  ;;  %v2526_v32 = vunpack.c.h.s8.bf16 %v2346_v27 }
 0x4af   : > { %2775 = vmatpush1.bf16.msra.mxu0 %v2390_v35  ;;  %2806 = vmatprep.mubr.bf16.mxu0 %v10058_v52  ;;  %v2355_v35 = vld [vmem:[%s9844_s19 + $0x268] sm:$0xff] }
 0x4b0   : > { %8592 = vmatprep.subr.bf16.mxu1 %v9541_v34  ;;  %2776 = vmatprep.subr.bf16.mxu0 %v2400_v16  ;;  %v2525_v16 = vunpack.c.h.s8.bf16 %v2345_v30  ;;  %v2535_v36 = vunpack.c.l.s8.bf16 %v2355_v35  ;;  %v2544_v17 = vunpack.c.h.s8.bf16 %v2355_v35  ;;  %v10178_v30 = vsub.s32 4, %v10024_v21 }
 0x4b1   : > { %8606 = vmatprep.mubr.msk.bf16.mxu1 %vm9542_vm2, %v9541_v34 }
 0x4b2   : > { %8593 = vmatpush3.bf16.msra.mxu1 %v2547_v37  ;;  %v2354_v37 = vld [vmem:[%s9844_s19 + $0x260] sm:$0xff]  ;;  %13028 = vst [vmem:[#allocation17_spill] sm:$0xff] %v10178_v30 }
 0x4b3   : > { %2777 = vmatpush1.bf16.msra.mxu0 %v2399_v38  ;;  %8594 = vmatprep.subr.bf16.mxu1 %v9541_v34  ;;  %v2534_v38 = vunpack.c.l.s8.bf16 %v2354_v37  ;;  %v2543_v40 = vunpack.c.h.s8.bf16 %v2354_v37 }
 0x4b4   : > { %2778 = vmatprep.subr.bf16.mxu0 %v2409_v39  ;;  %v2364_v39 = vld [vmem:[%s9844_s19 + $0x2b0] sm:$0xff] }
 0x4b5   : > { %v2562_v42 = vunpack.c.h.s8.bf16 %v2364_v39 }
 0x4b6   : > { %8595 = vmatpush3.bf16.msra.mxu1 %v2556_v14  ;;  %v2553_v14 = vunpack.c.l.s8.bf16 %v2364_v39 }
 0x4b7   : > { %2779 = vmatpush1.bf16.msra.mxu0 %v2408_v15  ;;  %8596 = vmatprep.subr.bf16.mxu1 %v9541_v34  ;;  %v2363_v15 = vld [vmem:[%s9844_s19 + $0x2a8] sm:$0xff] }
 0x4b8   : > { %2780 = vmatprep.subr.bf16.mxu0 %v2418_v41  ;;  %v2552_v41 = vunpack.c.l.s8.bf16 %v2363_v15 }
 0x4ba   : > { %8597 = vmatpush3.bf16.msra.mxu1 %v2565_v43  ;;  %v2373_v43 = vld [vmem:[%s9844_s19 + $0x2f8] sm:$0xff] }
 0x4bb   : > { %2781 = vmatpush1.bf16.msra.mxu0 %v2417_v44  ;;  %8598 = vmatprep.subr.bf16.mxu1 %v9541_v34  ;;  %v2561_v44 = vunpack.c.h.s8.bf16 %v2363_v15  ;;  %v2571_v45 = vunpack.c.l.s8.bf16 %v2373_v43 }
 0x4bc   : > { %2782 = vmatprep.subr.bf16.mxu0 %v2427_v46  ;;  %v2372_v46 = vld [vmem:[%s9844_s19 + $0x2f0] sm:$0xff] }
 0x4bd   : > { %v2570_v47 = vunpack.c.l.s8.bf16 %v2372_v46 }
 0x4be   : > { %8599 = vmatpush3.bf16.msra.mxu1 %v2574_v9  ;;  %v2580_v9 = vunpack.c.h.s8.bf16 %v2373_v43 }
 0x4bf   : > { %2783 = vmatpush1.bf16.msra.mxu0 %v2426_v48  ;;  %8600 = vmatprep.subr.bf16.mxu1 %v9541_v34  ;;  %v2382_v48 = vld [vmem:[%s9844_s19 + $0x340] sm:$0xff] }
 0x4c0   : > { %2784 = vmatprep.subr.bf16.mxu0 %v2436_v50  ;;  %v2579_v50 = vunpack.c.h.s8.bf16 %v2372_v46  ;;  %v2589_v18 = vunpack.c.l.s8.bf16 %v2382_v48  ;;  %v2598_v55 = vunpack.c.h.s8.bf16 %v2382_v48 }
 0x4c2   : > { %8601 = vmatpush3.bf16.msra.mxu1 %v2583_v51  ;;  %v2381_v51 = vld [vmem:[%s9844_s19 + $0x338] sm:$0xff] }
 0x4c3   : > { %2785 = vmatpush1.bf16.msra.mxu0 %v2435_v53  ;;  %8602 = vmatprep.subr.bf16.mxu1 %v9541_v34  ;;  %v2588_v53 = vunpack.c.l.s8.bf16 %v2381_v51  ;;  %v2597_v57 = vunpack.c.h.s8.bf16 %v2381_v51 }
 0x4c4   : > { %2786 = vmatprep.subr.bf16.mxu0 %v2445_v56  ;;  %v2322_v56 = vld [vmem:[%s9844_s19 + $0x160] sm:$0xff] }
 0x4c5   : > { %v2475_v62 = vunpack.c.h.s8.bf16 %v2322_v56 }
 0x4c6   : > { %8603 = vmatpush3.bf16.msra.mxu1 %v2592_v58  ;;  %v2466_v58 = vunpack.c.l.s8.bf16 %v2322_v56 }
 0x4c7   : > { %2787 = vmatpush1.bf16.msra.mxu0 %v2444_v60  ;;  %8604 = vmatprep.subr.bf16.mxu1 %v9541_v34  ;;  %v2286_v60 = vld [vmem:[%s9844_s19 + $0x40] sm:$0xff] }
 0x4c8   : > { %2788 = vmatprep.subr.bf16.mxu0 %v2454_v61  ;;  %v2394_v61 = vunpack.c.l.s8.bf16 %v2286_v60 }
 0x4ca   : > { %8605 = vmatpush3.bf16.msra.mxu1 %v2601_v63  ;;  %v2331_v63 = vld [vmem:[%s9844_s19 + $0x1a8] sm:$0xff] }
 0x4cb   : > { %2789 = vmatpush1.bf16.msra.mxu0 %v2453_v0  ;;  %v2403_v0 = vunpack.c.h.s8.bf16 %v2286_v60 }
 0x4cc   : > { %2790 = vmatprep.subr.bf16.mxu0 %v2463_v1  ;;  %v2484_v1 = vunpack.c.l.s8.bf16 %v2331_v63 }
 0x4cd   : > { %8607 = vmatmul.mubr.bf16.vlgmr.msra.gmra.mrb[8].mxu1 %v10060_v8 }
 0x4ce   : > { %3835 = vmatprep.mubr.f32.mxu1 %v9541_v34 }
 0x4cf   : > { %2791 = vmatpush1.bf16.msra.mxu0 %v2462_v3  ;;  %v2412_v3 = vunpack.c.l.s8.bf16 %v2295_v2 }
 0x4d0   : > { %2792 = vmatprep.subr.bf16.mxu0 %v2472_v4  ;;  %v2493_v4 = vunpack.c.h.s8.bf16 %v2331_v63 }
 0x4d3   : > { %2793 = vmatpush1.bf16.msra.mxu0 %v2471_v6  ;;  %v2421_v6 = vunpack.c.h.s8.bf16 %v2295_v2 }
 0x4d4   : > { %2794 = vmatprep.subr.bf16.mxu0 %v2481_v7  ;;  %v2502_v7 = vunpack.c.l.s8.bf16 %v2340_v5 }
 0x4d7   : > { %2795 = vmatpush1.bf16.msra.mxu0 %v2480_v11  ;;  %v2349_v11 = vld [vmem:[%s9844_s19 + $0x238] sm:$0xff] }
 0x4d8   : > { %2796 = vmatprep.subr.bf16.mxu0 %v2490_v12 }
 0x4db   : > { %2797 = vmatpush1.bf16.msra.mxu0 %v2489_v19  ;;  %v2520_v19 = vunpack.c.l.s8.bf16 %v2349_v11 }
 0x4dc   : > { %2798 = vmatprep.subr.bf16.mxu0 %v2499_v20  ;;  %v2313_v20 = vld [vmem:[%s9844_s19 + $0x118] sm:$0xff] }
 0x4dd   : > { %v2448_v27 = vunpack.c.l.s8.bf16 %v2313_v20 }
 0x4df   : > { %2799 = vmatpush1.bf16.msra.mxu0 %v2498_v25 }
 0x4e0   : > { %2800 = vmatprep.subr.bf16.mxu0 %v2508_v26 }
 0x4e3   : > { %2801 = vmatpush1.bf16.msra.mxu0 %v2507_v28  ;;  %v2529_v28 = vunpack.c.h.s8.bf16 %v2349_v11 }
 0x4e4   : > { %2802 = vmatprep.subr.bf16.mxu0 %v2517_v29  ;;  %v2457_v29 = vunpack.c.h.s8.bf16 %v2313_v20 }
 0x4e7   : > { %2803 = vmatpush1.bf16.msra.mxu0 %v2516_v31  ;;  %v10181_v31 = vsub.s32 2, %v10024_v21 }
 0x4e8   : > { %2804 = vmatprep.subr.bf16.mxu0 %v2526_v32  ;;  %v3031_v32 = vrot.slane %v10034_v24, %v10178_v30 }
 0x4e9   : > { %13029 = vst [vmem:[#allocation18_spill] sm:$0xff] %v10181_v31  ;;  %v3049_v35 = vrot.slane %v10034_v24, %v10181_v31 }
 0x4eb   : > { %2805 = vmatpush1.bf16.msra.mxu0 %v2525_v16  ;;  %v3035_v16 = vrot.slane %v10030_v59, %v10178_v30 }
 0x4ec   : > { %2817 = vmatprep.subr.bf16.mxu0 %v2535_v36 }
 0x4ee   : > { %2807 = vmatmul.mubr.bf16.vlgmr.msra.gmra.mrb[8].mxu0 %v10062_v54 }
 0x4ef   : > { %2818 = vmatpush1.bf16.msra.mxu0 %v2534_v38  ;;  %2849 = vmatprep.mubr.bf16.mxu0 %v9540_v49 }
 0x4f0   : > { %2819 = vmatprep.subr.bf16.mxu0 %v2544_v17 }
 0x4f3   : > { %2820 = vmatpush1.bf16.msra.mxu0 %v2543_v40  ;;  %v3053_v40 = vrot.slane %v10030_v59, %v10181_v31  ;;  %v2165_v59 = vld [vmem:[%s9838_s9 + $0x30] sm:$0xff] }
 0x4f4   : > { %2821 = vmatprep.subr.bf16.mxu0 %v2553_v14 }
 0x4f7   : > { %2822 = vmatpush1.bf16.msra.mxu0 %v2552_v41 }
 0x4f8   : > { %2823 = vmatprep.subr.bf16.mxu0 %v2562_v42 }
 0x4fb   : > { %2824 = vmatpush1.bf16.msra.mxu0 %v2561_v44  ;;  %v2166_v44 = vld [vmem:[%s9838_s9 + $0x38] sm:$0xff] }
 0x4fc   : > { %2825 = vmatprep.subr.bf16.mxu0 %v2571_v45  ;;  %v3103_v45 = vrot.slane %v2165_v59, %v10178_v30  ;;  %v3107_v46 = vrot.slane %v2166_v44, %v10178_v30 }
 0x4ff   : > { %2826 = vmatpush1.bf16.msra.mxu0 %v2570_v47 }
 0x500   : > { %2827 = vmatprep.subr.bf16.mxu0 %v2580_v9  ;;  %v9326_v9 = vld [vmem:[%s9838_s9 + $0x10] sm:$0xff] }
 0x501   : > { %v3039_v48 = vrot.slane %v9326_v9, %v10178_v30 }
 0x503   : > { %2828 = vmatpush1.bf16.msra.mxu0 %v2579_v50 }
 0x504   : > { %2829 = vmatprep.subr.bf16.mxu0 %v2589_v18  ;;  %v3121_v18 = vrot.slane %v2165_v59, %v10181_v31 }
 0x507   : > { %2830 = vmatpush1.bf16.msra.mxu0 %v2588_v53 }
 0x508   : > { %2831 = vmatprep.subr.bf16.mxu0 %v2598_v55  ;;  %v3067_v55 = vrot.slane %v10047_v33, %v10178_v30 }
 0x50b   : > { %2832 = vmatpush1.bf16.msra.mxu0 %v2597_v57 }
 0x50c   : > { %8305 = vmatprep.subr.bf16.mxu0 %v2466_v58  ;;  %v3125_v58 = vrot.slane %v2166_v44, %v10181_v31  ;;  %v9328_v44 = vld [vmem:[%s9838_s9 + $0x20] sm:$0xff] }
 0x50e   : > { %2850 = vmatmul.mubr.bf16.vlgmr.msra.gmra.mrb[8].mxu0 %v10060_v8  ;;  %v2304_v8 = vld [vmem:[%s9844_s19 + $0xd0] sm:$0xff]  ;;  %s9543_s19 = smov 32  }
 0x50f   : > { %8306 = vmatpush3.bf16.msra.mxu0 %v2394_v61  ;;  %2978 = vmatprep.mubr.bf16.mxu0 %v10058_v52  ;;  %v2430_v10 = vunpack.c.l.s8.bf16 %v2304_v8  ;;  %v2511_v52 = vunpack.c.h.s8.bf16 %v2340_v5  ;;  %v2439_v12 = vunpack.c.h.s8.bf16 %v2304_v8 }
 0x510   : > { %8307 = vmatprep.subr.bf16.mxu0 %v2475_v62  ;;  %v3057_v62 = vrot.slane %v9326_v9, %v10181_v31 }
 0x513   : > { %8308 = vmatpush3.bf16.msra.mxu0 %v2403_v0 }
 0x514   : > { %8309 = vmatprep.subr.bf16.mxu0 %v2484_v1 }
 0x517   : > { %8310 = vmatpush3.bf16.msra.mxu0 %v2412_v3  ;;  %v9327_v3 = vld [vmem:[%s9838_s9 + $0x18] sm:$0xff] }
 0x518   : > { %8311 = vmatprep.subr.bf16.mxu0 %v2493_v4  ;;  %v3085_v4 = vrot.slane %v9327_v3, %v10181_v31  ;;  %v10311_v3 = vld [vmem:[%s9857_s5 + $0x10] sm:$0xff] }
 0x51b   : > { %8312 = vmatpush3.bf16.msra.mxu0 %v2421_v6 }
 0x51c   : > { %8313 = vmatprep.subr.bf16.mxu0 %v2502_v7 }
 0x51f   : > { %8314 = vmatpush3.bf16.msra.mxu0 %v2430_v10 }
 0x520   : > { %v2765_v13 = vpop.f32.mrb[0].mxu1  ;;  %8315 = vmatprep.subr.bf16.mxu0 %v2511_v52 }
 0x521   : > { %v2767_v23 = vpop.f32.mrb[1].mxu1 }
 0x522   : > { %v2769_v25 = vpop.f32.mrb[2].mxu1 }
 0x523   : > { %8316 = vmatpush3.bf16.msra.mxu0 %v2439_v12  ;;  %v10174_v26 = vpop.f32.mrb[3].mxu1 }
 0x524   : > { %8317 = vmatprep.subr.bf16.mxu0 %v2520_v19 }
 0x527   : > { %8318 = vmatpush3.bf16.msra.mxu0 %v2448_v27 }
 0x528   : > { %8319 = vmatprep.subr.bf16.mxu0 %v2529_v28 }
 0x52b   : > { %8320 = vmatpush3.bf16.msra.mxu0 %v2457_v29 }
 0x52e   : > { %2979 = vmatmul.mubr.bf16.vlgmr.msra.gmra.mrb[12].mxu0 %v10062_v54 }
 0x541   : > { %v2679_v36 = vpop.f32.mrb[0].mxu0 }
 0x542   : > { %v3040_v37 = vmul.f32 %v3031_v32, %v2679_v36  ;;  %v2681_v38 = vpop.f32.mrb[1].mxu0 }
 0x543   : > { %v2683_v17 = vpop.f32.mrb[2].mxu0  ;;  %v3041_v39 = vmul.f32 %v3035_v16, %v2681_v38 }
 0x544   : > { %v10189_v54 = vadd.f32 %v3049_v35, %v3040_v37  ;;  %v3043_v14 = vmul.f32 %v3031_v32, %v2683_v17  ;;  %v2685_v15 = vpop.f32.mrb[3].mxu0  ;;  %v10260_v17 = vld [vmem:[%s9857_s5] sm:$0xff] }
 0x545   : > { %v3044_v41 = vmul.f32 %v3035_v16, %v2685_v15  ;;  %v10201_v43 = vadd.f32 %v3053_v40, %v3041_v39  ;;  %v10263_v39 = vld [vmem:[%s9857_s5 + $0x30] sm:$0xff] }
 0x546   : > { %v10193_v24 = vadd.f32 %v3049_v35, %v3043_v14  ;;  %3175 = vrot.lane.b32.xlu1 %v10189_v54, %s9543_s19  ;;  %3142 = vrot.lane.b32.xlu0 %v10189_v54, %s9544_s4  ;;  %v3196_v15 = vmul.f32 %v10189_v54, %v10260_v17 }
 0x547   : > { %v10199_v42 = vadd.f32 %v3053_v40, %v3044_v41 }
 0x54a   : > { %3144 = vrot.lane.b32.xlu0 %v10201_v43, %s9544_s4  ;;  %3150 = vrot.lane.b32.xlu1 %v10199_v42, %s9544_s4 }
 0x54e   : > { %3177 = vrot.lane.b32.xlu0 %v10201_v43, %s9543_s19 }
 0x580   : > { %v2937_v47 = vpop.f32.mrb[4].mxu1 }
 0x581   : > { %v3112_v50 = vmul.f32 %v3103_v45, %v2937_v47  ;;  %v2722_v51 = vpop.f32.mrb[4].mxu0  ;;  %v2939_v53 = vpop.f32.mrb[5].mxu1  ;;  %v9329_v47 = vld [vmem:[%s9838_s9 + $0x28] sm:$0xff] }
 0x582   : > { %v2766_v56 = vadd.f32 %v2765_v13, %v2722_v51  ;;  %v3113_v57 = vmul.f32 %v3107_v46, %v2939_v53  ;;  %v2724_v60 = vpop.f32.mrb[5].mxu0  ;;  %v2941_v61 = vpop.f32.mrb[6].mxu1  ;;  %v3075_v9 = vrot.slane %v9329_v47, %v10178_v30  ;;  %v3093_v54 = vrot.slane %v9329_v47, %v10181_v31 }
 0x583   : > { %v2768_v63 = vadd.f32 %v2767_v23, %v2724_v60  ;;  %v3115_v0 = vmul.f32 %v3103_v45, %v2941_v61  ;;  %v2726_v1 = vpop.f32.mrb[6].mxu0  ;;  %v2943_v2 = vpop.f32.mrb[7].mxu1  ;;  %v3130_v33 = vadd.f32 %v3121_v18, %v3112_v50  ;;  %v3071_v45 = vrot.slane %v9328_v44, %v10178_v30 }
 0x584   : > { %v3042_v5 = vmul.f32 %v3039_v48, %v2766_v56  ;;  %v2770_v6 = vadd.f32 %v2769_v25, %v2726_v1  ;;  %v3116_v7 = vmul.f32 %v3107_v46, %v2943_v2  ;;  %v2728_v8 = vpop.f32.mrb[7].mxu0  ;;  %v3131_v12 = vadd.f32 %v3125_v58, %v3113_v57  ;;  %v10308_v2 = vld [vmem:[%s9857_s5 + $0x8] sm:$0xff] }
 0x585   : > { %v3076_v10 = vmul.f32 %v3067_v55, %v2768_v63  ;;  %v3133_v52 = vadd.f32 %v3121_v18, %v3115_v0  ;;  %v2772_v11 = vadd.f32 %v10174_v26, %v2728_v8  ;;  %v3089_v46 = vrot.slane %v9328_v44, %v10181_v31 }
 0x586   : > { %v3134_v13 = vadd.f32 %v3125_v58, %v3116_v7  ;;  %v10223_v19 = vadd.f32 %v3057_v62, %v3042_v5  ;;  %v3045_v28 = vmul.f32 %v3039_v48, %v2770_v6  ;;  %v10315_v5 = vld [vmem:[%s9857_s5 + $0x40] sm:$0xff]  ;;  %v10320_v7 = vld [vmem:[%s9857_s5 + $0x68] sm:$0xff] }
 0x587   : > { %v8727_v20 = vpack.c.bf16 %v3133_v52, %v3130_v33  ;;  %v10225_v23 = vadd.f32 %v3085_v4, %v3076_v10  ;;  %v3079_v26 = vmul.f32 %v3067_v55, %v2772_v11  ;;  %v3197_v52 = vmul.f32 %v10201_v43, %v10308_v2 }
 0x588   : > { %v8724_v25 = vpack.c.bf16 %v3134_v13, %v3131_v12  ;;  %3146 = vrot.lane.b32.xlu1 %v10223_v19, %s9544_s4  ;;  %v10247_v32 = vadd.f32 %v3057_v62, %v3045_v28  ;;  %v3198_v11 = vmul.f32 %v10223_v19, %v10311_v3 }
 0x589   : > { %3238 = vrot.lane.b32.xlu0 %v10225_v23, %s9544_s4  ;;  %v10245_v29 = vadd.f32 %v3085_v4, %v3079_v26  ;;  %v2178_v4 = vld [vmem:[%s9857_s5 + $0x38] sm:$0xff] }
 0x58a   : > { %8726 = vmatprep.subr.msk.bf16.mxu1 %vm10229_vm4, %v8724_v25 }
 0x58b   : > { %8729 = vmatpush1.bf16.msk.msra.mxu1 %vm10229_vm4, %v8727_v20  ;;  %v10332_v20 = vld [vmem:[%s9857_s5 + $0x70] sm:$0xff] }
 0x58c   : > { %3169 = vrot.lane.b32.xlu1 %v10223_v19, %s9543_s19 }
 0x58d   : > { %3270 = vrot.lane.b32.xlu0 %v10225_v23, %s9543_s19 }
 0x590   : > { %3244 = vrot.lane.b32.xlu1 %v10245_v29, %s9544_s4 }
 0x591   : > { %3152 = vrot.lane.b32.xlu0 %v10247_v32, %s9544_s4 }
 0x595   : > { %3274 = vrot.lane.b32.xlu0 %v10245_v29, %s9543_s19 }
 0x5a0   : > { %v10255_v35 = vpop.f32.mrb[8].mxu1 }
 0x5a1   : > { %v8608_v16 = vpop.f32.mrb[9].mxu1 }
 0x5a2   : > { %v10257_v36 = vpop.f32.mrb[10].mxu1 }
 0x5a3   : > { %v8609_v37 = vpop.f32.mrb[11].mxu1 }
 0x5b8   : > { %v3143_v38 = vpop.permute.xlu0 %3142  ;;  %v10295_v61 = vpop.permute.xlu1 %3175 }
 0x5bc   : > { %v3145_v40 = vpop.permute.xlu0 %3144  ;;  %v10303_v0 = vpop.permute.xlu1 %3150 }
 0x5bd   : > { %v3155_v14 = vsel %vm3154_vm5, %v3143_v38, %v3145_v40 }
 0x5be   : > { %v3202_v41 = vmul.f32 %v3155_v14, %v10263_v39  ;;  %v10343_v14 = vld [vmem:[%s13032_s21 + $0x8] sm:$0xff] }
 0x5c0   : > { %v10269_v59 = vadd.f32 %v3202_v41, %v3196_v15  ;;  %v3178_v1 = vpop.permute.xlu0 %3177 }
 0x5c1   : > { %v3184_v8 = vsel %vm3183_vm6, %v10295_v61, %v3178_v1 }
 0x5c2   : > { %v3215_v25 = vmul.f32 %v3184_v8, %v10320_v7 }
 0x5e1   : > { %v2851_v48 = vpop.f32.mrb[8].mxu0 }
 0x5e2   : > { %v3077_v50 = vmul.f32 %v3071_v45, %v2851_v48  ;;  %v2853_v18 = vpop.f32.mrb[9].mxu0 }
 0x5e3   : > { %v2855_v51 = vpop.f32.mrb[10].mxu0  ;;  %v3078_v55 = vmul.f32 %v3075_v9, %v2853_v18 }
 0x5e4   : > { %v10276_v53 = vadd.f32 %v3089_v46, %v3077_v50  ;;  %v2857_v56 = vpop.f32.mrb[11].mxu0  ;;  %v3080_v58 = vmul.f32 %v3071_v45, %v2855_v51 }
 0x5e5   : > { %v10283_v57 = vadd.f32 %v3093_v54, %v3078_v55  ;;  %v3081_v62 = vmul.f32 %v3075_v9, %v2857_v56 }
 0x5e6   : > { %3240 = vrot.lane.b32.xlu0 %v10276_v53, %s9544_s4  ;;  %3272 = vrot.lane.b32.xlu1 %v10276_v53, %s9543_s19  ;;  %v10289_v60 = vadd.f32 %v3089_v46, %v3080_v58 }
 0x5e7   : > { %v10301_v63 = vadd.f32 %v3093_v54, %v3081_v62 }
 0x5ea   : > { %3264 = vrot.lane.b32.xlu0 %v10283_v57, %s9543_s19  ;;  %3242 = vrot.lane.b32.xlu1 %v10283_v57, %s9544_s4 }
 0x5ee   : > { %3148 = vrot.lane.b32.xlu0 %v10193_v24, %s9544_s4  ;;  %3246 = vrot.lane.b32.xlu1 %v10289_v60, %s9544_s4 }
 0x5f2   : > { %3181 = vrot.lane.b32.xlu0 %v10199_v42, %s9543_s19  ;;  %3276 = vrot.lane.b32.xlu1 %v10289_v60, %s9543_s19 }
 0x5f6   : > { %3248 = vrot.lane.b32.xlu1 %v10301_v63, %s9544_s4 }
 0x5fa   : > { %v3147_v6 = vpop.permute.xlu1 %3146  ;;  %3266 = vrot.lane.b32.xlu1 %v10301_v63, %s9543_s19 }
 0x5fb   : > { %v3156_v33 = vsel %vm3154_vm5, %v3145_v40, %v3147_v6  ;;  %v3167_v10 = vsel %vm3154_vm5, %v3147_v6, %v3143_v38  ;;  %v2167_v40 = vld [vmem:[%s9838_s9 + $0x40] sm:$0xff]  ;;  %v3239_v6 = vpop.permute.xlu0 %3238 }
 0x5fc   : > { %v3203_v12 = vmul.f32 %v3156_v33, %v2178_v4  ;;  %v3204_v13 = vmul.f32 %v3167_v10, %v10315_v5  ;;  %v3111_v46 = vrot.slane %v2167_v40, %v10178_v30  ;;  %v3129_v55 = vrot.slane %v2167_v40, %v10181_v31  ;;  %v11719_v30 = vld [vmem:[%s9867_s2 + $0x1d0] sm:$0xff] }
 0x5fd   : > { %v3290_v40 = vmul.f32 %v10225_v23, %v10260_v17  ;;  %v2183_v23 = vld [vmem:[%s9857_s5 + $0x60] sm:$0xff]  ;;  %13081 = vst [vmem:[#allocation40_spill] sm:$0xff] %v11719_v30 }
 0x5fe   : > { %v3209_v26 = vadd.f32 %v3203_v12, %v3197_v52  ;;  %v3210_v28 = vadd.f32 %v3204_v13, %v3198_v11  ;;  %v3170_v16 = vpop.permute.xlu1 %3169  ;;  %3179 = vrot.lane.b32.xlu1 %v10193_v24, %s9543_s19 }
 0x5ff   : > { %v3185_v37 = vsel %vm3183_vm6, %v3178_v1, %v3170_v16  ;;  %v3271_v8 = vpop.permute.xlu0 %3270  ;;  %v3194_v17 = vsel %vm3183_vm6, %v3170_v16, %v10295_v61  ;;  %v10395_v61 = vld [vmem:[%s9857_s5 + $0x58] sm:$0xff] }
 0x600   : > { %v3221_v38 = vadd.f32 %v3215_v25, %v3209_v26  ;;  %v3216_v43 = vmul.f32 %v3185_v37, %v10332_v20  ;;  %v10364_v37 = vld [vmem:[%s9857_s5 + $0x18] sm:$0xff] }
 0x601   : > { %v8321_v19 = vpop.f32.mrb[12].mxu0 }
 0x602   : > { %v10345_v15 = vmul.f32 0.125, %v3221_v38  ;;  %v10347_v41 = vadd.f32 %v3216_v43, %v3210_v28  ;;  %v8322_v44 = vpop.f32.mrb[13].mxu0  ;;  %3171 = vrot.lane.b32.xlu1 %v10247_v32, %s9543_s19  ;;  %v3245_v33 = vpop.permute.xlu1 %3244  ;;  %v2175_v43 = vld [vmem:[%s9857_s5 + $0x20] sm:$0xff] }
 0x603   : > { %v8323_v45 = vadd.f32 %v8322_v44, %v8321_v19  ;;  %v8324_v47 = vpop.f32.mrb[14].mxu0  ;;  %v10359_v10 = vpop.permute.xlu0 %3152  ;;  %v3293_v44 = vmul.f32 %v10245_v29, %v10364_v37 }
 0x604   : > { %v8325_v9 = vpop.f32.mrb[15].mxu0  ;;  %v3407_v48 = vmul.f32 %v10343_v14, %v10345_v15  ;;  %v3158_v29 = vsel %vm3154_vm5, %v10303_v0, %v10359_v10 }
 0x605   : > { %v3022_v50 = vadd.f32 %v8323_v45, %v10255_v35  ;;  %v8326_v18 = vadd.f32 %v8325_v9, %v8324_v47  ;;  %v3291_v45 = vmul.f32 %v10276_v53, %v10308_v2  ;;  %v3294_v9 = vmul.f32 %v10289_v60, %v2175_v43 }
 0x606   : > { %3502 = vmatprep.mubr.f32.mxu0 %v3407_v48 }
 0x607   : > { %v3114_v51 = vmul.f32 %v3111_v46, %v3022_v50  ;;  %v3025_v54 = vadd.f32 %v8326_v18, %v10257_v36  ;;  %v3275_v52 = vpop.permute.xlu0 %3274 }
 0x609   : > { %v3117_v56 = vmul.f32 %v3111_v46, %v3025_v54  ;;  %v3132_v58 = vadd.f32 %v3129_v55, %v3114_v51  ;;  %v2180_v46 = vld [vmem:[%s9857_s5 + $0x48] sm:$0xff] }
 0x60a   : > { %v10392_v51 = vld [vmem:[%s9857_s5 + $0x28] sm:$0xff] }
 0x60b   : > { %v3135_v62 = vadd.f32 %v3129_v55, %v3117_v56  ;;  %v2187_v55 = vld [vmem:[%s9857_s5 + $0x80] sm:$0xff] }
 0x60d   : > { %v10357_v1 = vpack.c.bf16 %v3135_v62, %v3132_v58  ;;  %v3214_v58 = vmul.f32 %v3194_v17, %v2183_v23 }
 0x658   : > { %v3273_v35 = vpop.permute.xlu1 %3272  ;;  %v3241_v12 = vpop.permute.xlu0 %3240 }
 0x659   : > { %v3250_v25 = vsel %vm3154_vm5, %v3239_v6, %v3241_v12  ;;  %v3278_v2 = vsel %vm3183_vm6, %v3271_v8, %v3273_v35 }
 0x65a   : > { %v3296_v53 = vmul.f32 %v3250_v25, %v10263_v39  ;;  %v2186_v25 = vld [vmem:[%s9857_s5 + $0x78] sm:$0xff] }
 0x65c   : > { %v3243_v11 = vpop.permute.xlu1 %3242  ;;  %v3265_v26 = vpop.permute.xlu0 %3264 }
 0x65d   : > { %v3251_v36 = vsel %vm3154_vm5, %v3241_v12, %v3243_v11  ;;  %v3262_v19 = vsel %vm3154_vm5, %v3243_v11, %v3239_v6  ;;  %v3288_v48 = vsel %vm3183_vm6, %v3265_v26, %v3271_v8  ;;  %v3302_v11 = vadd.f32 %v3296_v53, %v3290_v40 }
 0x65e   : > { %v3297_v28 = vmul.f32 %v3251_v36, %v2178_v4  ;;  %v3292_v4 = vmul.f32 %v10283_v57, %v10311_v3  ;;  %v2181_v57 = vld [vmem:[%s9857_s5 + $0x50] sm:$0xff]  ;;  %v3279_v3 = vsel %vm3183_vm6, %v3273_v35, %v3265_v26  ;;  %v3298_v50 = vmul.f32 %v3262_v19, %v10315_v5  ;;  %v10409_v26 = vld [vmem:[%s9857_s5 + $0x88] sm:$0xff] }
 0x65f   : > { %v3295_v5 = vmul.f32 %v10301_v63, %v10392_v51  ;;  %v3206_v35 = vmul.f32 %v3158_v29, %v2181_v57  ;;  %v3309_v12 = vmul.f32 %v3278_v2, %v10320_v7  ;;  %v3308_v36 = vmul.f32 %v3288_v48, %v2183_v23 }
 0x660   : > { %v3247_v13 = vpop.permute.xlu1 %3246  ;;  %v3303_v60 = vadd.f32 %v3297_v28, %v3291_v45  ;;  %v10401_v62 = vpop.permute.xlu0 %3148  ;;  %v3200_v53 = vmul.f32 %v10199_v42, %v2175_v43 }
 0x661   : > { %v3252_v47 = vsel %vm3154_vm5, %v3245_v33, %v3247_v13  ;;  %v3314_v2 = vadd.f32 %v3308_v36, %v3302_v11  ;;  %v3367_v36 = vrot.slane %v10345_v15, 4 }
 0x662   : > { %v3299_v16 = vmul.f32 %v3252_v47, %v2180_v46  ;;  %v3212_v48 = vadd.f32 %v3206_v35, %v3200_v53 }
 0x664   : > { %v3277_v38 = vpop.permute.xlu1 %3276  ;;  %v3305_v47 = vadd.f32 %v3299_v16, %v3293_v44 }
 0x665   : > { %v3280_v39 = vsel %vm3183_vm6, %v3275_v52, %v3277_v38 }
 0x666   : > { %v3312_v28 = vmul.f32 %v3280_v39, %v2187_v55 }
 0x668   : > { %v3249_v18 = vpop.permute.xlu1 %3248 }
 0x669   : > { %v3253_v54 = vsel %vm3154_vm5, %v3247_v13, %v3249_v18  ;;  %v3263_v56 = vsel %vm3154_vm5, %v3249_v18, %v3245_v33  ;;  %v3310_v13 = vmul.f32 %v3279_v3, %v10332_v20  ;;  %v3304_v33 = vadd.f32 %v3298_v50, %v3292_v4  ;;  %v10419_v4 = vpop.permute.xlu0 %3181 }
 0x66a   : > { %v3300_v6 = vmul.f32 %v3253_v54, %v2181_v57  ;;  %v3301_v8 = vmul.f32 %v3263_v56, %v10395_v61  ;;  %v3315_v18 = vadd.f32 %v3309_v12, %v3303_v60  ;;  %v3157_v20 = vsel %vm3154_vm5, %v10401_v62, %v10303_v0 }
 0x66b   : > { %v3220_v3 = vadd.f32 %v3214_v58, %v10269_v59  ;;  %v3205_v60 = vmul.f32 %v3157_v20, %v2180_v46  ;;  %v3199_v0 = vmul.f32 %v10193_v24, %v10364_v37  ;;  %v10432_v46 = vld [vmem:[%s13032_s21] sm:$0xff]  ;;  %v3351_v37 = vrot.slane %v10345_v15, 6 }
 0x66c   : > { %v3306_v19 = vadd.f32 %v3300_v6, %v3294_v9  ;;  %v3267_v45 = vpop.permute.xlu1 %3266  ;;  %v3307_v29 = vadd.f32 %v3301_v8, %v3295_v5  ;;  %v10437_v24 = vld [vmem:[%s13032_s21 + $0x20] sm:$0xff] }
 0x66d   : > { %v3281_v63 = vsel %vm3183_vm6, %v3277_v38, %v3267_v45  ;;  %v3289_v17 = vsel %vm3183_vm6, %v3267_v45, %v3275_v52  ;;  %v3316_v52 = vadd.f32 %v3310_v13, %v3304_v33  ;;  %v10426_v56 = vmul.f32 0.125, %v3220_v3  ;;  %v10451_v33 = vld [vmem:[%s13032_s21 + $0x18] sm:$0xff] }
 0x66e   : > { %v3311_v40 = vmul.f32 %v3289_v17, %v2186_v25  ;;  %v3313_v7 = vmul.f32 %v3281_v63, %v10409_v26  ;;  %v3318_v23 = vadd.f32 %v3312_v28, %v3306_v19  ;;  %v3211_v59 = vadd.f32 %v3205_v60, %v3199_v0  ;;  %v10460_v45 = vld [vmem:[%s13032_s21 + $0x38] sm:$0xff]  ;;  %v10505_v0 = vld [vmem:[%s13032_s21 + $0x68] sm:$0xff] }
 0x66f   : > { %v3406_v11 = vmul.f32 %v10432_v46, %v10426_v56  ;;  %v3350_v28 = vrot.slane %v10426_v56, 6 }
 0x670   : > { %v3317_v44 = vadd.f32 %v3311_v40, %v3305_v47  ;;  %v3319_v9 = vadd.f32 %v3313_v7, %v3307_v29  ;;  %v3180_v38 = vpop.permute.xlu1 %3179  ;;  %v8716_v57 = vpack.c.bf16 %v3318_v23, %v3315_v18  ;;  %v10473_v40 = vld [vmem:[%s13032_s21 + $0x30] sm:$0xff]  ;;  %v3366_v7 = vrot.slane %v10426_v56, 4 }
 0x671   : > { %v3186_v50 = vsel %vm3183_vm6, %v3180_v38, %v10419_v4  ;;  %v3383_v23 = vrot.slane %v10345_v15, 2 }
 0x672   : > { %v8718_v42 = vpack.c.bf16 %v3317_v44, %v3314_v2  ;;  %v3218_v43 = vmul.f32 %v3186_v50, %v2187_v55  ;;  %8717 = vmatprep.subr.bf16.mxu0 %v8716_v57  ;;  %v8720_v16 = vpack.c.bf16 %v3319_v9, %v3316_v52  ;;  %v3168_v2 = vsel %vm3154_vm5, %v10359_v10, %v10401_v62 }
 0x673   : > { %v3382_v62 = vrot.slane %v10426_v56, 2  ;;  %v3207_v50 = vmul.f32 %v3168_v2, %v10395_v61  ;;  %v3201_v61 = vmul.f32 %v10247_v32, %v10392_v51  ;;  %v10522_v32 = vld [vmem:[%s13032_s21 + $0x80] sm:$0xff] }
 0x674   : > { %v3224_v39 = vadd.f32 %v3218_v43, %v3212_v48  ;;  %v3172_v54 = vpop.permute.xlu1 %3171  ;;  %8719 = vmatpush1.bf16.xpose.msra.mxu0 %v8718_v42  ;;  %v10499_v42 = vld [vmem:[%s13032_s21 + $0x48] sm:$0xff]  ;;  %v10577_v2 = vld [vmem:[%s13032_s21 + $0x40] sm:$0xff] }
 0x675   : > { %v3195_v5 = vsel %vm3183_vm6, %v3172_v54, %v3180_v38  ;;  %8721 = vmatprep.subr.bf16.mxu0 %v8720_v16  ;;  %v10486_v38 = vld [vmem:[%s13032_s21 + $0x50] sm:$0xff]  ;;  %v3187_v48 = vsel %vm3183_vm6, %v10419_v4, %v3172_v54 }
 0x676   : > { %v3230_v58 = vmul.f32 0.125, %v3224_v39  ;;  %v3217_v6 = vmul.f32 %v3195_v5, %v2186_v25  ;;  %v3219_v39 = vmul.f32 %v3187_v48, %v10409_v26  ;;  %v3213_v5 = vadd.f32 %v3207_v50, %v3201_v61  ;;  %v10592_v48 = vld [vmem:[%s13032_s21 + $0x70] sm:$0xff]  ;;  %v10615_v61 = vld [vmem:[%s13032_s21 + $0xb8] sm:$0xf] }
 0x678   : > { %v3223_v55 = vadd.f32 %v3217_v6, %v3211_v59  ;;  %v10441_v8 = vsel %vm2193_vm1, %v3230_v58, %v3351_v37  ;;  %v3355_v35 = vrot.slane %v3230_v58, 6  ;;  %v3371_v25 = vrot.slane %v3230_v58, 4 }
 0x679   : > { %v3410_v12 = vmul.f32 %v10441_v8, %v10437_v24  ;;  %v3387_v3 = vrot.slane %v3230_v58, 2  ;;  %v10516_v58 = vld [vmem:[%s13032_s21 + $0x60] sm:$0xff]  ;;  %v3225_v51 = vadd.f32 %v3219_v39, %v3213_v5 }
 0x67a   : > { %v3229_v13 = vmul.f32 0.125, %v3223_v55  ;;  %v10455_v19 = vsel %vm2193_vm1, %v3351_v37, %v3355_v35  ;;  %v3372_v18 = vsel %vm3365_vm7, %v3367_v36, %v3371_v25  ;;  %v3422_v37 = vmul.f32 %v10522_v32, %v10345_v15  ;;  %v10530_v55 = vld [vmem:[%s13032_s21 + $0x78] sm:$0xff]  ;;  %v10545_v25 = vld [vmem:[%s13032_s21 + $0x90] sm:$0xff] }
 0x67b   : > { %3503 = vmatmul.mubr.f32.vlgmr.msra.gmra.mrb[16].mxu0 %v3406_v11  ;;  %v3401_v47 = vsel %vm3365_vm7, %v10455_v19, %v3367_v36  ;;  %v3404_v57 = vsel %vm3381_vm8, %v3372_v18, %v3383_v23  ;;  %v3388_v4 = vsel %vm3381_vm8, %v3383_v23, %v3387_v3  ;;  %v10535_v35 = vld [vmem:[%s13032_s21 + $0x98] sm:$0xff]  ;;  %v3231_v11 = vmul.f32 0.125, %v3225_v51  ;;  %v10571_v23 = vld [vmem:[%s13032_s21 + $0x28] sm:$0xff] }
 0x67c   : > { %3507 = vmatprep.mubr.f32.mxu0 %v3410_v12  ;;  %8723 = vmatpush3.bf16.xpose.msra.mxu0 %v8720_v16  ;;  %v3397_v63 = vsel %vm2193_vm1, %v3229_v13, %v3350_v28  ;;  %v3353_v17 = vrot.slane %v3229_v13, 6  ;;  %v3369_v53 = vrot.slane %v3229_v13, 4  ;;  %v3413_v20 = vmul.f32 %v3401_v47, %v10460_v45 }
 0x67d   : > { %8732 = vmatprep.subr.msk.bf16.mxu0 %vm10229_vm4, %v10357_v1  ;;  %v3409_v29 = vmul.f32 %v3397_v63, %v10451_v33  ;;  %v3416_v60 = vmul.f32 %v3404_v57, %v10486_v38  ;;  %v3385_v16 = vrot.slane %v3229_v13, 2  ;;  %v3419_v59 = vmul.f32 %v3388_v4, %v10505_v0  ;;  %v10550_v13 = vld [vmem:[%s13032_s21 + $0xb0] sm:$0xf]  ;;  %v10608_v4 = vld [vmem:[%s13032_s21 + $0xa0] sm:$0xff] }
 0x67e   : > { %v3354_v44 = vsel %vm2193_vm1, %v3350_v28, %v3353_v17  ;;  %v3370_v52 = vsel %vm3365_vm7, %v3366_v7, %v3369_v53  ;;  %v3421_v12 = vmul.f32 %v10530_v55, %v10426_v56  ;;  %v3228_v36 = vmul.f32 0.125, %v10347_v41  ;;  %v10563_v17 = vld [vmem:[%s13032_s21 + $0x10] sm:$0xff] }
 0x67f   : > { %3508 = vmatmul.mubr.f32.gmra.mrb[18].mxu0 %v3409_v29  ;;  %v3400_v9 = vsel %vm3365_vm7, %v3354_v44, %v3366_v7  ;;  %v3403_v43 = vsel %vm3381_vm8, %v3370_v52, %v3382_v62  ;;  %v3386_v6 = vsel %vm3381_vm8, %v3382_v62, %v3385_v16  ;;  %v3425_v15 = vmul.f32 %v10441_v8, %v10535_v35  ;;  %v10558_v8 = vld [vmem:[%s13032_s21 + $0xa8] sm:$0xf] }
 0x680   : > { %3512 = vmatprep.mubr.f32.mxu0 %v3413_v20  ;;  %v3412_v10 = vmul.f32 %v3400_v9, %v10473_v40  ;;  %v3415_v54 = vmul.f32 %v3403_v43, %v10499_v42  ;;  %v3418_v26 = vmul.f32 %v3386_v6, %v10516_v58  ;;  %v3357_v28 = vrot.slane %v3231_v11, 6  ;;  %v10603_v16 = vld [vmem:[%s13032_s21 + $0x88] sm:$0xff] }
 0x681   : > { %v3424_v56 = vmul.f32 %v3397_v63, %v10545_v25  ;;  %v3428_v41 = vmul.f32 %v10455_v19, %v10550_v13  ;;  %v3352_v47 = vrot.slane %v3228_v36, 6  ;;  %v3373_v18 = vrot.slane %v3231_v11, 4 }
 0x682   : > { %v3427_v63 = vmul.f32 %v3354_v44, %v10558_v8  ;;  %v3368_v7 = vrot.slane %v3228_v36, 4  ;;  %v3408_v19 = vmul.f32 %v10563_v17, %v3228_v36  ;;  %v3389_v9 = vrot.slane %v3231_v11, 2 }
 0x683   : > { %3513 = vmatmul.mubr.f32.gmra.mrb[20].mxu0 %v3412_v10  ;;  %v3358_v29 = vsel %vm2193_vm1, %v3352_v47, %v3357_v28  ;;  %v3399_v53 = vsel %vm2193_vm1, %v3231_v11, %v3352_v47  ;;  %v3384_v57 = vrot.slane %v3228_v36, 2  ;;  %v10586_v10 = vld [vmem:[%s13032_s21 + $0x58] sm:$0xff]  ;;  %v3423_v27 = vmul.f32 %v10603_v16, %v3228_v36  ;;  %v3431_v47 = vld [vmem:[%s13033_s22 + $0x8] sm:$0xff] }
 0x684   : > { %3517 = vmatprep.mubr.f32.mxu0 %v3416_v60  ;;  %v3402_v20 = vsel %vm3365_vm7, %v3358_v29, %v3368_v7  ;;  %v3374_v44 = vsel %vm3365_vm7, %v3368_v7, %v3373_v18  ;;  %v3411_v52 = vmul.f32 %v3399_v53, %v10571_v23  ;;  %v3429_v39 = vmul.f32 %v3358_v29, %v10615_v61  ;;  %v3430_v29 = vld [vmem:[%s13033_s22] sm:$0xff] }
 0x685   : > { %v3414_v3 = vmul.f32 %v3402_v20, %v10577_v2  ;;  %v3405_v62 = vsel %vm3381_vm8, %v3374_v44, %v3384_v57  ;;  %v3390_v50 = vsel %vm3381_vm8, %v3384_v57, %v3389_v9  ;;  %v3432_v44 = vld [vmem:[%s13033_s22 + $0x10] sm:$0xff] }
 0x686   : > { %v3417_v60 = vmul.f32 %v3405_v62, %v10586_v10  ;;  %v3420_v43 = vmul.f32 %v3390_v50, %v10592_v48 }
 0x687   : > { %3518 = vmatmul.mubr.f32.gmra.mrb[22].mxu0 %v3415_v54 }
 0x688   : > { %3522 = vmatprep.mubr.f32.mxu0 %v3419_v59 }
 0x68b   : > { %3523 = vmatmul.mubr.f32.gmra.mrb[24].mxu0 %v3418_v26 }
 0x68c   : > { %3527 = vmatprep.mubr.f32.mxu0 %v3422_v37 }
 0x68f   : > { %3528 = vmatmul.mubr.f32.gmra.mrb[26].mxu0 %v3421_v12 }
 0x690   : > { %3532 = vmatprep.mubr.f32.mxu0 %v3425_v15 }
 0x693   : > { %3533 = vmatmul.mubr.f32.gmra.mrb[28].mxu0 %v3424_v56 }
 0x694   : > { %3537 = vmatprep.mubr.f32.mxu0 %v3428_v41 }
 0x697   : > { %3538 = vmatmul.mubr.f32.gmra.mrb[30].mxu0 %v3427_v63 }
 0x698   : > { %8614 = vmatprep.mubr.f32.mxu0 %v3408_v19 }
 0x69b   : > { %8615 = vmatmul.mubr.f32.vlgmr.msra.gmra.mrb[32].mxu0 %v3411_v52 }
 0x69c   : > { %8735 = vmatpush3.bf16.msk.msra.mxu0 %vm10229_vm4, %v10357_v1  ;;  %8617 = vmatprep.mubr.f32.mxu0 %v3414_v3  ;;  %v3426_v1 = vmul.f32 %v3399_v53, %v10608_v4  ;;  %v3433_v53 = vld [vmem:[%s13033_s22 + $0x18] sm:$0xff] }
 0x69f   : > { %8618 = vmatmul.mubr.f32.gmra.mrb[34].mxu0 %v3417_v60  ;;  %v3435_v60 = vld [vmem:[%s13033_s22 + $0x28] sm:$0xff] }
 0x6a0   : > { %8620 = vmatprep.mubr.f32.mxu0 %v3420_v43 }
 0x6a3   : > { %8621 = vmatmul.mubr.f32.gmra.mrb[36].mxu0 %v3423_v27 }
 0x6a4   : > { %8623 = vmatprep.mubr.f32.mxu0 %v3426_v1  ;;  %v3434_v1 = vld [vmem:[%s13033_s22 + $0x20] sm:$0xff] }
 0x6a7   : > { %8624 = vmatmul.mubr.f32.gmra.mrb[38].mxu0 %v3429_v39 }
 0x74e   : > { %v3504_v54 = vpop.f32.mrb[16].mxu0 }
 0x74f   : > { %v3506_v5 = vpop.f32.mrb[17].mxu0  ;;  %v3505_v19 = vadd.f32 %v3504_v54, %v3430_v29 }
 0x752   : > { %v3509_v59 = vpop.f32.mrb[18].mxu0 }
 0x753   : > { %v3511_v6 = vpop.f32.mrb[19].mxu0  ;;  %v3510_v7 = vadd.f32 %v3509_v59, %v3431_v47 }
 0x756   : > { %v3514_v51 = vpop.f32.mrb[20].mxu0 }
 0x757   : > { %v3516_v26 = vpop.f32.mrb[21].mxu0  ;;  %v3515_v50 = vadd.f32 %v3514_v51, %v3432_v44  ;;  %v3437_v51 = vld [vmem:[%s13033_s22 + $0x38] sm:$0xf] }
 0x75a   : > { %v3519_v37 = vpop.f32.mrb[22].mxu0 }
 0x75b   : > { %v3521_v11 = vpop.f32.mrb[23].mxu0  ;;  %v3520_v3 = vadd.f32 %v3519_v37, %v3433_v53 }
 0x75c   : > { %v3436_v11 = vld [vmem:[%s13033_s22 + $0x30] sm:$0xff] }
 0x75e   : > { %v3524_v12 = vpop.f32.mrb[24].mxu0 }
 0x75f   : > { %v3526_v36 = vpop.f32.mrb[25].mxu0  ;;  %v3525_v6 = vadd.f32 %v3524_v12, %v3434_v1 }
 0x762   : > { %v3529_v15 = vpop.f32.mrb[26].mxu0 }
 0x763   : > { %v3531_v28 = vpop.f32.mrb[27].mxu0  ;;  %v3530_v59 = vadd.f32 %v3529_v15, %v3435_v60 }
 0x766   : > { %v3534_v56 = vpop.f32.mrb[28].mxu0 }
 0x767   : > { %v3536_v41 = vpop.f32.mrb[29].mxu0  ;;  %v3535_v15 = vadd.f32 %v3534_v56, %v3436_v11 }
 0x76a   : > { %v3539_v18 = vpop.f32.mrb[30].mxu0 }
 0x76b   : > { %v3541_v63 = vpop.f32.mrb[31].mxu0  ;;  %v3540_v47 = vadd.f32 %v3539_v18, %v3437_v51 }
 0x76e   : > { %v8616_v20 = vpop.f32.mrb[32].mxu0 }
 0x76f   : > { %v3615_v9 = vadd.f32 %v8616_v20, %v3510_v7  ;;  %v3609_v57 = vpop.f32.mrb[33].mxu0 }
 0x770   : > { %v3610_v52 = vadd.f32 %v3609_v57, %v3505_v19 }
 0x771   : > { %v3652_v62 = vsel %vm3648_vm9, %v3615_v9, -inf }
 0x772   : > { %v8619_v43 = vpop.f32.mrb[34].mxu0  ;;  %3653 = vmax.xlane.f32.xlu1 %v3652_v62  ;;  %v3649_v27 = vsel %vm3648_vm9, %v3610_v52, -inf }
 0x773   : > { %v3625_v39 = vadd.f32 %v8619_v43, %v3520_v3  ;;  %v3619_v54 = vpop.f32.mrb[35].mxu0  ;;  %3650 = vmax.xlane.f32.xlu0 %v3649_v27 }
 0x774   : > { %v3620_v5 = vadd.f32 %v3619_v54, %v3515_v50 }
 0x775   : > { %v3658_v63 = vsel %vm3648_vm9, %v3625_v39, -inf }
 0x776   : > { %v8622_v26 = vpop.f32.mrb[36].mxu0  ;;  %v3655_v37 = vsel %vm3648_vm9, %v3620_v5, -inf }
 0x777   : > { %v3635_v36 = vadd.f32 %v8622_v26, %v3530_v59  ;;  %v3629_v28 = vpop.f32.mrb[37].mxu0  ;;  %3656 = vmax.xlane.f32.xlu0 %v3655_v37 }
 0x778   : > { %v3630_v41 = vadd.f32 %v3629_v28, %v3525_v6 }
 0x779   : > { %v3664_v29 = vsel %vm3648_vm9, %v3635_v36, -inf }
 0x77a   : > { %v8625_v12 = vpop.f32.mrb[38].mxu0  ;;  %3665 = vmax.xlane.f32.xlu1 %v3664_v29  ;;  %v3661_v44 = vsel %vm3648_vm9, %v3630_v41, -inf }
 0x77b   : > { %v3645_v7 = vadd.f32 %v8625_v12, %v3540_v47  ;;  %v3639_v19 = vpop.f32.mrb[39].mxu0  ;;  %3659 = vmax.xlane.f32.xlu0 %v3658_v63 }
 0x77c   : > { %v3640_v53 = vadd.f32 %v3639_v19, %v3535_v15 }
 0x77d   : > { %v3671_v20 = vsel %vm3670_vm10, %v3645_v7, -inf }
 0x77e   : > { %3672 = vmax.xlane.f32.xlu1 %v3671_v20  ;;  %v3667_v18 = vsel %vm3648_vm9, %v3640_v53, -inf }
 0x77f   : > { %3662 = vmax.xlane.f32.xlu0 %v3661_v44 }
 0x783   : > { %3668 = vmax.xlane.f32.xlu0 %v3667_v18 }
 0x7ff   : > { %v3654_v57 = vpop.xlane.xlu1 %3653 }
 0x800   : > { %v3675_v56 = vsub.f32 %v3615_v9, %v3654_v57  ;;  %v3651_v3 = vpop.xlane.xlu0 %3650 }
 0x801   : > { %v3674_v62 = vsub.f32 %v3610_v52, %v3651_v3 }
 0x802   : > { %v3684_v50 = vmul.f32 1.442695, %v3675_v56 }
 0x803   : > { %v3682_v60 = vmul.f32 1.442695, %v3674_v62 }
 0x804   : > { %9194 = vpow2.f32 %v3684_v50  ;;  %v3657_v43 = vpop.xlane.xlu0 %3656 }
 0x805   : > { %9196 = vpow2.f32 %v3682_v60  ;;  %v3676_v27 = vsub.f32 %v3620_v5, %v3657_v43 }
 0x807   : > { %v3686_v1 = vmul.f32 1.442695, %v3676_v27  ;;  %v3666_v54 = vpop.xlane.xlu1 %3665 }
 0x808   : > { %v3679_v59 = vsub.f32 %v3635_v36, %v3666_v54  ;;  %v3660_v6 = vpop.xlane.xlu0 %3659 }
 0x809   : > { %9198 = vpow2.f32 %v3686_v1  ;;  %v3677_v51 = vsub.f32 %v3625_v39, %v3660_v6 }
 0x80a   : > { %v3692_v26 = vmul.f32 1.442695, %v3679_v59 }
 0x80b   : > { %v3688_v37 = vmul.f32 1.442695, %v3677_v51  ;;  %v3673_v11 = vpop.xlane.xlu1 %3672 }
 0x80c   : > { %v3681_v28 = vsub.f32 %v3645_v7, %v3673_v11  ;;  %v3663_v47 = vpop.xlane.xlu0 %3662 }
 0x80d   : > { %9200 = vpow2.f32 %v3688_v37  ;;  %v3678_v9 = vsub.f32 %v3630_v41, %v3663_v47 }
 0x80e   : > { %v9195_v52 = vpop.eup %9194  ;;  %9202 = vpow2.f32 %v3692_v26  ;;  %v3696_v15 = vmul.f32 1.442695, %v3681_v28 }
 0x80f   : > { %v9197_v29 = vpop.eup %9196  ;;  %v3690_v12 = vmul.f32 1.442695, %v3678_v9  ;;  %v3701_v5 = vsel %vm3648_vm9, %v9195_v52, 0.0 }
 0x810   : > { %3702 = vadd.xlane.f32.xlu1 %v3701_v5  ;;  %v3669_v63 = vpop.xlane.xlu0 %3668  ;;  %v3698_v36 = vsel %vm3648_vm9, %v9197_v29, 0.0 }
 0x811   : > { %9204 = vpow2.f32 %v3690_v12  ;;  %v3680_v39 = vsub.f32 %v3640_v53, %v3669_v63  ;;  %3699 = vadd.xlane.f32.xlu0 %v3698_v36 }
 0x812   : > { %9206 = vpow2.f32 %v3696_v15 }
 0x813   : > { %v9199_v19 = vpop.eup %9198  ;;  %v3694_v7 = vmul.f32 1.442695, %v3680_v39 }
 0x814   : > { %v3704_v20 = vsel %vm3648_vm9, %v9199_v19, 0.0 }
 0x815   : > { %9208 = vpow2.f32 %v3694_v7  ;;  %3705 = vadd.xlane.f32.xlu0 %v3704_v20 }
 0x817   : > { %v9201_v41 = vpop.eup %9200 }
 0x818   : > { %v3707_v44 = vsel %vm3648_vm9, %v9201_v41, 0.0  ;;  %v9203_v18 = vpop.eup %9202 }
 0x819   : > { %3708 = vadd.xlane.f32.xlu1 %v3707_v44  ;;  %v3713_v56 = vsel %vm3648_vm9, %v9203_v18, 0.0 }
 0x81b   : > { %v9205_v57 = vpop.eup %9204 }
 0x81c   : > { %v3710_v3 = vsel %vm3648_vm9, %v9205_v57, 0.0  ;;  %v9207_v62 = vpop.eup %9206 }
 0x81d   : > { %3714 = vadd.xlane.f32.xlu1 %v3713_v56  ;;  %3711 = vadd.xlane.f32.xlu0 %v3710_v3  ;;  %v3719_v50 = vsel %vm3670_vm10, %v9207_v62, 0.0 }
 0x81f   : > { %v9209_v53 = vpop.eup %9208 }
 0x820   : > { %v3716_v60 = vsel %vm3648_vm9, %v9209_v53, 0.0 }
 0x821   : > { %3720 = vadd.xlane.f32.xlu1 %v3719_v50  ;;  %3717 = vadd.xlane.f32.xlu0 %v3716_v60 }
 0x89d   : > { %v3703_v43 = vpop.xlane.xlu1 %3702 }
 0x89e   : > { %9210 = vrcp.f32 %v3703_v43  ;;  %v3700_v27 = vpop.xlane.xlu0 %3699 }
 0x89f   : > { %9212 = vrcp.f32 %v3700_v27 }
 0x8a2   : > { %v3706_v1 = vpop.xlane.xlu0 %3705 }
 0x8a3   : > { %9214 = vrcp.f32 %v3706_v1 }
 0x8a6   : > { %v3709_v54 = vpop.xlane.xlu1 %3708 }
 0x8a7   : > { %9216 = vrcp.f32 %v3709_v54 }
 0x8a8   : > { %v9211_v59 = vpop.eup %9210 }
 0x8a9   : > { %v9213_v6 = vpop.eup %9212  ;;  %v3731_v11 = vmul.f32 %v9211_v59, %v9195_v52 }
 0x8aa   : > { %v3730_v51 = vmul.f32 %v9213_v6, %v9197_v29  ;;  %v3715_v26 = vpop.xlane.xlu1 %3714  ;;  %v3712_v37 = vpop.xlane.xlu0 %3711 }
 0x8ab   : > { %9218 = vrcp.f32 %v3715_v26 }
 0x8ac   : > { %9220 = vrcp.f32 %v3712_v37  ;;  %8208 = vmatmul.mubr.msk.f32.vlgmr.msra.gmra.mrb[12].mxu1 %vm3648_vm9, %v3730_v51  ;;  %8630 = vmatprep.mubr.msk.f32.mxu0 %vm3648_vm9, %v3730_v51 }
 0x8ad   : > { %v9215_v28 = vpop.eup %9214  ;;  %8631 = vmatmul.mubr.msk.f32.vlgmr.msra.gmra.mrb[40].mxu0 %vm3648_vm9, %v3731_v11  ;;  %3841 = vmatprep.mubr.f32.mxu1 %v9541_v34 }
 0x8ae   : > { %v3721_v47 = vpop.xlane.xlu1 %3720  ;;  %v3718_v9 = vpop.xlane.xlu0 %3717  ;;  %v3732_v15 = vmul.f32 %v9215_v28, %v9199_v19 }
 0x8af   : > { %9222 = vrcp.f32 %v3721_v47 }
 0x8b0   : > { %9224 = vrcp.f32 %v3718_v9  ;;  %8209 = vmatmul.mubr.msk.f32.gmra.mrb[14].mxu1 %vm3648_vm9, %v3731_v11  ;;  %8633 = vmatprep.mubr.msk.f32.mxu0 %vm3648_vm9, %v3732_v15 }
 0x8b1   : > { %v9217_v52 = vpop.eup %9216  ;;  %3847 = vmatprep.mubr.f32.mxu1 %v9541_v34 }
 0x8b2   : > { %v3733_v29 = vmul.f32 %v9217_v52, %v9201_v41  ;;  %v10685_v41 = vld [vmem:[%s13034_s1] sm:$0xff] }
 0x8b4   : > { %8210 = vmatmul.mubr.msk.f32.gmra.mrb[16].mxu1 %vm3648_vm9, %v3732_v15  ;;  %8634 = vmatmul.mubr.msk.f32.gmra.mrb[42].mxu0 %vm3648_vm9, %v3733_v29 }
 0x8b5   : > { %v9219_v12 = vpop.eup %9218  ;;  %3853 = vmatprep.mubr.f32.mxu1 %v9541_v34 }
 0x8b6   : > { %v9221_v5 = vpop.eup %9220  ;;  %v3735_v63 = vmul.f32 %v9219_v12, %v9203_v18 }
 0x8b7   : > { %v3734_v36 = vmul.f32 %v9221_v5, %v9205_v57 }
 0x8b8   : > { %8211 = vmatmul.mubr.msk.f32.gmra.mrb[18].mxu1 %vm3648_vm9, %v3733_v29 }
 0x8b9   : > { %v9223_v39 = vpop.eup %9222  ;;  %8636 = vmatprep.mubr.msk.f32.mxu0 %vm3648_vm9, %v3734_v36  ;;  %3859 = vmatprep.mubr.f32.mxu1 %v9541_v34 }
 0x8ba   : > { %v9225_v19 = vpop.eup %9224  ;;  %8637 = vmatmul.mubr.msk.f32.gmra.mrb[44].mxu0 %vm3648_vm9, %v3735_v63  ;;  %v3737_v7 = vmul.f32 %v9223_v39, %v9207_v62 }
 0x8bb   : > { %v3736_v20 = vmul.f32 %v9225_v19, %v9209_v53 }
 0x8bc   : > { %8212 = vmatmul.mubr.msk.f32.gmra.mrb[20].mxu1 %vm3648_vm9, %v3734_v36  ;;  %v4200_v36 = vld [vmem:[%s9846_s29 + $0x70] sm:$0xff] }
 0x8bd   : > { %8639 = vmatprep.mubr.msk.f32.mxu0 %vm3648_vm9, %v3736_v20  ;;  %3865 = vmatprep.mubr.f32.mxu1 %v9541_v34 }
 0x8be   : > { %8640 = vmatmul.mubr.msk.f32.gmra.mrb[46].mxu0 %vm3648_vm9, %v3737_v7 }
 0x8bf   : > { %4095 = vmatprep.mubr.f32.mxu0 %v9541_v34 }
 0x8c0   : > { %8213 = vmatmul.mubr.msk.f32.gmra.mrb[22].mxu1 %vm3648_vm9, %v3735_v63 }
 0x8c1   : > { %3871 = vmatprep.mubr.f32.mxu1 %v9541_v34 }
 0x8c4   : > { %8214 = vmatmul.mubr.msk.f32.gmra.mrb[24].mxu1 %vm3648_vm9, %v3736_v20 }
 0x8c5   : > { %3877 = vmatprep.mubr.f32.mxu1 %v9541_v34 }
 0x8c8   : > { %8215 = vmatmul.mubr.msk.f32.gmra.mrb[26].mxu1 %vm3648_vm9, %v3737_v7 }
 0x8c9   : > { %8658 = vmatprep.mubr.msk.f32.mxu1 %vm4015_vm11, %v10685_v41 }
 0x97f   : > { %v3837_v44 = vpop.f32.mrb[12].mxu1 }
 0x980   : > { %v3839_v18 = vpop.f32.mrb[13].mxu1  ;;  %v8632_v57 = vpop.f32.mrb[40].mxu0  ;;  %v3989_v50 = vmul.f32 %v3837_v44, %v10432_v46 }
 0x981   : > { %v3994_v56 = vmul.f32 %v8632_v57, %v10571_v23  ;;  %v3950_v3 = vpop.f32.mrb[41].mxu0  ;;  %v3990_v1 = vmul.f32 %v3839_v18, %v10343_v14  ;;  %v4248_v18 = vunpack.c.l.s8.bf16 %v4200_v36  ;;  %v4188_v57 = vld [vmem:[%s9846_s29 + $0x10] sm:$0xff] }
 0x982   : > { %v3991_v62 = vmul.f32 %v3950_v3, %v10563_v17 }
 0x983   : > { %v3843_v53 = vpop.f32.mrb[14].mxu1 }
 0x984   : > { %v8754_v60 = vpack.c.bf16 %v3994_v56, %v3991_v62  ;;  %v3992_v43 = vmul.f32 %v3843_v53, %v10451_v33  ;;  %v3845_v27 = vpop.f32.mrb[15].mxu1  ;;  %v4224_v62 = vunpack.c.l.s8.bf16 %v4188_v57  ;;  %v4203_v53 = vld [vmem:[%s9846_s29 + $0x88] sm:$0xff] }
 0x985   : > { %v3993_v54 = vmul.f32 %v3845_v27, %v10437_v24 }
 0x986   : > { %v8738_v59 = vpack.c.bf16 %v3992_v43, %v3989_v50  ;;  %8755 = vmatprep.subr.bf16.mxu1 %v8754_v60 }
 0x987   : > { %v8736_v6 = vpack.c.bf16 %v3993_v54, %v3990_v1  ;;  %v3849_v51 = vpop.f32.mrb[16].mxu1  ;;  %v8635_v26 = vpop.f32.mrb[42].mxu0  ;;  %8757 = vmatpush3.bf16.msra.mxu1 %v8754_v60  ;;  %v4187_v1 = vld [vmem:[%s9846_s29 + $0x8] sm:$0xff]  ;;  %v4227_v54 = vunpack.c.h.s8.bf16 %v4188_v57  ;;  %v4202_v57 = vld [vmem:[%s9846_s29 + $0x80] sm:$0xff] }
 0x988   : > { %v4000_v23 = vmul.f32 %v8635_v26, %v10586_v10  ;;  %v3851_v17 = vpop.f32.mrb[17].mxu1  ;;  %v3960_v37 = vpop.f32.mrb[43].mxu0  ;;  %v3995_v14 = vmul.f32 %v3849_v51, %v10473_v40  ;;  %v4254_v51 = vunpack.c.l.s8.bf16 %v4203_v53  ;;  %v4191_v26 = vld [vmem:[%s9846_s29 + $0x28] sm:$0xff] }
 0x989   : > { %v3997_v46 = vmul.f32 %v3960_v37, %v10577_v2  ;;  %8737 = vmatprep.subr.bf16.mxu0 %v8736_v6  ;;  %v3996_v47 = vmul.f32 %v3851_v17, %v10460_v45  ;;  %v4223_v37 = vunpack.c.l.s8.bf16 %v4187_v1 }
 0x98a   : > { %8739 = vmatpush1.bf16.msra.mxu0 %v8738_v59 }
 0x98b   : > { %v8758_v33 = vpack.c.bf16 %v4000_v23, %v3997_v46  ;;  %v3855_v11 = vpop.f32.mrb[18].mxu1  ;;  %v4186_v46 = vld [vmem:[%s9846_s29] sm:$0xff] }
 0x98c   : > { %v3998_v24 = vmul.f32 %v3855_v11, %v10499_v42  ;;  %v3857_v28 = vpop.f32.mrb[19].mxu1  ;;  %v4190_v11 = vld [vmem:[%s9846_s29 + $0x20] sm:$0xff] }
 0x98d   : > { %v3999_v9 = vmul.f32 %v3857_v28, %v10486_v38  ;;  %v8638_v15 = vpop.f32.mrb[44].mxu0  ;;  %8759 = vmatprep.subr.bf16.mxu1 %v8758_v33  ;;  %v4194_v28 = vld [vmem:[%s9846_s29 + $0x40] sm:$0xff] }
 0x98e   : > { %v8742_v10 = vpack.c.bf16 %v3998_v24, %v3995_v14  ;;  %v4006_v52 = vmul.f32 %v8638_v15, %v10603_v16  ;;  %v3970_v2 = vpop.f32.mrb[45].mxu0  ;;  %8761 = vmatpush3.bf16.msra.mxu1 %v8758_v33  ;;  %v4226_v33 = vunpack.c.h.s8.bf16 %v4187_v1  ;;  %v4233_v14 = vunpack.c.h.s8.bf16 %v4191_v26  ;;  %v4189_v15 = vld [vmem:[%s9846_s29 + $0x18] sm:$0xff]  ;;  %v4208_v1 = vld [vmem:[%s9846_s29 + $0xb0] sm:$0xff] }
 0x98f   : > { %v8740_v29 = vpack.c.bf16 %v3999_v9, %v3996_v47  ;;  %v4003_v12 = vmul.f32 %v3970_v2, %v10592_v48  ;;  %v3861_v5 = vpop.f32.mrb[20].mxu1  ;;  %v4225_v47 = vunpack.c.h.s8.bf16 %v4186_v46  ;;  %v4229_v9 = vunpack.c.l.s8.bf16 %v4190_v11 }
 0x990   : > { %v3863_v40 = vpop.f32.mrb[21].mxu1  ;;  %v4001_v19 = vmul.f32 %v3861_v5, %v10516_v58  ;;  %v4232_v2 = vunpack.c.h.s8.bf16 %v4190_v11  ;;  %v4231_v5 = vunpack.c.h.s8.bf16 %v4189_v15 }
 0x991   : > { %v8762_v63 = vpack.c.bf16 %v4006_v52, %v4003_v12  ;;  %v8641_v42 = vpop.f32.mrb[46].mxu0  ;;  %8741 = vmatprep.subr.bf16.mxu0 %v8740_v29  ;;  %v4193_v29 = vld [vmem:[%s9846_s29 + $0x38] sm:$0xff]  ;;  %v4239_v12 = vunpack.c.h.s8.bf16 %v4194_v28 }
 0x992   : > { %v4012_v45 = vmul.f32 %v8641_v42, %v10615_v61  ;;  %v3980_v38 = vpop.f32.mrb[47].mxu0  ;;  %8743 = vmatpush1.bf16.msra.mxu0 %v8742_v10  ;;  %v4002_v61 = vmul.f32 %v3863_v40, %v10505_v0  ;;  %v4251_v0 = vunpack.c.h.s8.bf16 %v4200_v36  ;;  %v4236_v10 = vunpack.c.l.s8.bf16 %v4194_v28 }
 0x993   : > { %v4009_v39 = vmul.f32 %v3980_v38, %v10608_v4  ;;  %8763 = vmatprep.subr.bf16.mxu1 %v8762_v63  ;;  %v3867_v16 = vpop.f32.mrb[22].mxu1  ;;  %v4235_v40 = vunpack.c.l.s8.bf16 %v4193_v29  ;;  %v4196_v38 = vld [vmem:[%s9846_s29 + $0x50] sm:$0xff] }
 0x994   : > { %v4004_v7 = vmul.f32 %v3867_v16, %v10530_v55  ;;  %8765 = vmatpush3.bf16.msra.mxu1 %v8762_v63  ;;  %v3869_v48 = vpop.f32.mrb[23].mxu1  ;;  %v4192_v63 = vld [vmem:[%s9846_s29 + $0x30] sm:$0xff]  ;;  %v4195_v16 = vld [vmem:[%s9846_s29 + $0x48] sm:$0xff] }
 0x995   : > { %v8766_v44 = vpack.c.bf16 %v4012_v45, %v4009_v39  ;;  %v4005_v4 = vmul.f32 %v3869_v48, %v10522_v32  ;;  %v4014_v32 = vld [vmem:[%s13034_s1 + $0x8] sm:$0x3]  ;;  %v4234_v42 = vunpack.c.l.s8.bf16 %v4192_v63  ;;  %v4238_v45 = vunpack.c.h.s8.bf16 %v4193_v29  ;;  %v4199_v48 = vld [vmem:[%s9846_s29 + $0x68] sm:$0xff] }
 0x996   : > { %v8746_v56 = vpack.c.bf16 %v4004_v7, %v4001_v19  ;;  %v4237_v36 = vunpack.c.h.s8.bf16 %v4192_v63  ;;  %v4241_v39 = vunpack.c.l.s8.bf16 %v4196_v38  ;;  %v4240_v19 = vunpack.c.l.s8.bf16 %v4195_v16 }
 0x997   : > { %v8744_v58 = vpack.c.bf16 %v4005_v4, %v4002_v61  ;;  %8768 = vmatprep.subr.msk.bf16.mxu1 %vm10710_vm12, %v8766_v44  ;;  %v3873_v55 = vpop.f32.mrb[24].mxu1  ;;  %v4244_v7 = vunpack.c.h.s8.bf16 %v4196_v38  ;;  %v4243_v20 = vunpack.c.h.s8.bf16 %v4195_v16  ;;  %v4247_v61 = vunpack.c.l.s8.bf16 %v4199_v48  ;;  %v4215_v38 = vld [vmem:[%s9846_s29 + $0xe8] sm:$0xff] }
 0x998   : > { %8771 = vmatpush3.bf16.msk.msra.mxu1 %vm10710_vm12, %v8766_v44  ;;  %v3875_v3 = vpop.f32.mrb[25].mxu1  ;;  %v4007_v60 = vmul.f32 %v3873_v55, %v10545_v25  ;;  %v4230_v25 = vunpack.c.l.s8.bf16 %v4191_v26  ;;  %v4198_v44 = vld [vmem:[%s9846_s29 + $0x60] sm:$0xff]  ;;  %v4201_v55 = vld [vmem:[%s9846_s29 + $0x78] sm:$0xff] }
 0x999   : > { %8745 = vmatprep.subr.bf16.mxu0 %v8744_v58  ;;  %8366 = vmatprep.subr.bf16.mxu1 %v4248_v18  ;;  %v4008_v59 = vmul.f32 %v3875_v3, %v10535_v35  ;;  %v4222_v35 = vunpack.c.l.s8.bf16 %v4186_v46  ;;  %v4246_v4 = vunpack.c.l.s8.bf16 %v4198_v44  ;;  %v4250_v18 = vunpack.c.h.s8.bf16 %v4199_v48  ;;  %v4197_v26 = vld [vmem:[%s9846_s29 + $0x58] sm:$0xff] }
 0x99a   : > { %8747 = vmatpush1.bf16.msra.mxu0 %v8746_v56  ;;  %v4249_v56 = vunpack.c.h.s8.bf16 %v4198_v44  ;;  %v4253_v58 = vunpack.c.l.s8.bf16 %v4202_v57  ;;  %v4252_v3 = vunpack.c.l.s8.bf16 %v4201_v55  ;;  %v4281_v48 = vunpack.c.h.s8.bf16 %v4215_v38  ;;  %v4218_v44 = vld [vmem:[%s9846_s29 + $0x100] sm:$0xff] }
 0x99b   : > { %v3879_v50 = vpop.f32.mrb[26].mxu1  ;;  %8659 = vmatmul.mubr.msk.f32.vlgmr.msra.gmra.mrb[28].mxu1 %vm4015_vm11, %v4014_v32 }
 0x99c   : > { %v4010_v43 = vmul.f32 %v3879_v50, %v10558_v8  ;;  %v3881_v27 = vpop.f32.mrb[27].mxu1  ;;  %8367 = vmatpush3.bf16.msra.mxu1 %v4224_v62  ;;  %v4257_v8 = vunpack.c.h.s8.bf16 %v4203_v53  ;;  %v4256_v62 = vunpack.c.h.s8.bf16 %v4202_v57  ;;  %v4204_v50 = vld [vmem:[%s9846_s29 + $0x90] sm:$0xff] }
 0x99d   : > { %v4011_v6 = vmul.f32 %v3881_v27, %v10550_v13  ;;  %8368 = vmatprep.subr.bf16.mxu1 %v4251_v0  ;;  %v4206_v13 = vld [vmem:[%s9846_s29 + $0xa0] sm:$0xff]  ;;  %v4205_v0 = vld [vmem:[%s9846_s29 + $0x98] sm:$0xff]  ;;  %v4261_v27 = vunpack.c.h.s8.bf16 %v4204_v50 }
 0x99e   : > { %v8751_v23 = vpack.c.bf16 %v4010_v43, %v4007_v60  ;;  %v4260_v24 = vunpack.c.l.s8.bf16 %v4206_v13  ;;  %v4263_v52 = vunpack.c.h.s8.bf16 %v4206_v13  ;;  %v4259_v53 = vunpack.c.l.s8.bf16 %v4205_v0 }
 0x99f   : > { %v8748_v17 = vpack.c.bf16 %v4011_v6, %v4008_v59  ;;  %v4258_v60 = vunpack.c.l.s8.bf16 %v4204_v50  ;;  %v4262_v43 = vunpack.c.h.s8.bf16 %v4205_v0  ;;  %v4265_v59 = vunpack.c.l.s8.bf16 %v4208_v1  ;;  %v4221_v0 = vld [vmem:[%s9846_s29 + $0x118] sm:$0xff] }
 0x9a0   : > { %8369 = vmatpush3.bf16.msra.mxu1 %v4227_v54  ;;  %v4209_v54 = vld [vmem:[%s9846_s29 + $0xb8] sm:$0xff] }
 0x9a1   : > { %8750 = vmatprep.subr.msk.bf16.mxu0 %vm10710_vm12, %v8748_v17  ;;  %8370 = vmatprep.subr.bf16.mxu1 %v4254_v51  ;;  %v4266_v6 = vunpack.c.l.s8.bf16 %v4209_v54  ;;  %v4207_v51 = vld [vmem:[%s9846_s29 + $0xa8] sm:$0xff]  ;;  %v4242_v17 = vunpack.c.l.s8.bf16 %v4197_v26  ;;  %v4269_v46 = vunpack.c.h.s8.bf16 %v4209_v54 }
 0x9a2   : > { %8753 = vmatpush1.bf16.msk.msra.mxu0 %vm10710_vm12, %v8751_v23  ;;  %v4264_v23 = vunpack.c.l.s8.bf16 %v4207_v51 }
 0x9a3   : > { %4294 = vmatprep.subr.bf16.mxu0 %v4223_v37  ;;  %v4268_v37 = vunpack.c.h.s8.bf16 %v4208_v1 }
 0x9a4   : > { %8371 = vmatpush3.bf16.msra.mxu1 %v4230_v25  ;;  %v4267_v25 = vunpack.c.h.s8.bf16 %v4207_v51 }
 0x9a5   : > { %8227 = vmatmul.mubr.msk.f32.vlgmr.msra.gmra.mrb[48].mxu0 %vm4015_vm11, %v10685_v41  ;;  %8372 = vmatprep.subr.bf16.mxu1 %v4257_v8  ;;  %v4228_v41 = vunpack.c.l.s8.bf16 %v4189_v15  ;;  %v4245_v8 = vunpack.c.h.s8.bf16 %v4197_v26  ;;  %v10787_v26 = vld [vmem:[%s9838_s9 + $0x48] sm:$0xff] }
 0x9a6   : > { %4101 = vmatprep.mubr.f32.mxu0 %v9541_v34  ;;  %4295 = vmatpush1.bf16.msra.mxu0 %v4222_v35  ;;  %v4211_v35 = vld [vmem:[%s9846_s29 + $0xc8] sm:$0xff] }
 0x9a7   : > { %4296 = vmatprep.subr.bf16.mxu0 %v4226_v33  ;;  %v4271_v13 = vunpack.c.l.s8.bf16 %v4211_v35 }
 0x9a8   : > { %8373 = vmatpush3.bf16.msra.mxu1 %v4233_v14 }
 0x9a9   : > { %8228 = vmatmul.mubr.msk.f32.gmra.mrb[50].mxu0 %vm4015_vm11, %v4014_v32  ;;  %8374 = vmatprep.subr.bf16.mxu1 %v4260_v24  ;;  %v4255_v32 = vunpack.c.h.s8.bf16 %v4201_v55  ;;  %v4287_v55 = vunpack.c.h.s8.bf16 %v4218_v44 }
 0x9aa   : > { %4297 = vmatpush1.bf16.msra.mxu0 %v4225_v47  ;;  %v4210_v47 = vld [vmem:[%s9846_s29 + $0xc0] sm:$0xff] }
 0x9ab   : > { %4298 = vmatprep.subr.bf16.mxu0 %v4229_v9  ;;  %v4212_v9 = vld [vmem:[%s9846_s29 + $0xd0] sm:$0xff] }
 0x9ac   : > { %8375 = vmatpush3.bf16.msra.mxu1 %v4236_v10  ;;  %v4272_v29 = vunpack.c.l.s8.bf16 %v4212_v9  ;;  %v4275_v63 = vunpack.c.h.s8.bf16 %v4212_v9 }
 0x9ad   : > { %8376 = vmatprep.subr.bf16.mxu1 %v4263_v52 }
 0x9ae   : > { %4299 = vmatpush1.bf16.msra.mxu0 %v4228_v41 }
 0x9af   : > { %4300 = vmatprep.subr.bf16.mxu0 %v4232_v2  ;;  %v4270_v2 = vunpack.c.l.s8.bf16 %v4210_v47 }
 0x9b0   : > { %8377 = vmatpush3.bf16.msra.mxu1 %v4239_v12  ;;  %v4274_v12 = vunpack.c.h.s8.bf16 %v4211_v35 }
 0x9b1   : > { %8378 = vmatprep.subr.bf16.mxu1 %v4266_v6 }
 0x9b2   : > { %4301 = vmatpush1.bf16.msra.mxu0 %v4231_v5  ;;  %v4214_v5 = vld [vmem:[%s9846_s29 + $0xe0] sm:$0xff] }
 0x9b3   : > { %4302 = vmatprep.subr.bf16.mxu0 %v4235_v40  ;;  %v4273_v40 = vunpack.c.h.s8.bf16 %v4210_v47  ;;  %v4280_v16 = vunpack.c.h.s8.bf16 %v4214_v5 }
 0x9b4   : > { %8379 = vmatpush3.bf16.msra.mxu1 %v4242_v17  ;;  %v10796_v17 = vld [vmem:[%s9838_s9 + $0x58] sm:$0xff] }
 0x9b5   : > { %8380 = vmatprep.subr.bf16.mxu1 %v4269_v46  ;;  %v4473_v35 = vrot.slane %v10796_v17, %v10181_v31 }
 0x9b6   : > { %4303 = vmatpush1.bf16.msra.mxu0 %v4234_v42  ;;  %v4277_v42 = vunpack.c.l.s8.bf16 %v4214_v5  ;;  %v9335_v5 = vld [vmem:[%s9838_s9 + $0x20] sm:$0xff] }
 0x9b7   : > { %4304 = vmatprep.subr.bf16.mxu0 %v4238_v45  ;;  %v4213_v45 = vld [vmem:[%s9846_s29 + $0xd8] sm:$0xff] }
 0x9b8   : > { %8381 = vmatpush3.bf16.msra.mxu1 %v4245_v8 }
 0x9b9   : > { %8661 = vmatprep.subr.bf16.mxu1 %v9541_v34 }
 0x9ba   : > { %4305 = vmatpush1.bf16.msra.mxu0 %v4237_v36  ;;  %v4276_v36 = vunpack.c.l.s8.bf16 %v4213_v45 }
 0x9bb   : > { %4306 = vmatprep.subr.bf16.mxu0 %v4241_v39  ;;  %v4278_v39 = vunpack.c.l.s8.bf16 %v4215_v38 }
 0x9be   : > { %4307 = vmatpush1.bf16.msra.mxu0 %v4240_v19  ;;  %v4217_v19 = vld [vmem:[%s9846_s29 + $0xf8] sm:$0xff] }
 0x9bf   : > { %4308 = vmatprep.subr.bf16.mxu0 %v4244_v7  ;;  %v4279_v7 = vunpack.c.h.s8.bf16 %v4213_v45  ;;  %v4286_v57 = vunpack.c.h.s8.bf16 %v4217_v19 }
 0x9c2   : > { %4309 = vmatpush1.bf16.msra.mxu0 %v4243_v20  ;;  %v4283_v20 = vunpack.c.l.s8.bf16 %v4217_v19 }
 0x9c3   : > { %4310 = vmatprep.subr.bf16.mxu0 %v4247_v61  ;;  %v4216_v61 = vld [vmem:[%s9846_s29 + $0xf0] sm:$0xff] }
 0x9c6   : > { %4311 = vmatpush1.bf16.msra.mxu0 %v4246_v4  ;;  %v4282_v4 = vunpack.c.l.s8.bf16 %v4216_v61 }
 0x9c7   : > { %4312 = vmatprep.subr.bf16.mxu0 %v4250_v18  ;;  %v4284_v18 = vunpack.c.l.s8.bf16 %v4218_v44 }
 0x9ca   : > { %4313 = vmatpush1.bf16.msra.mxu0 %v4249_v56  ;;  %v4220_v56 = vld [vmem:[%s9846_s29 + $0x110] sm:$0xff] }
 0x9cb   : > { %4314 = vmatprep.subr.bf16.mxu0 %v4253_v58  ;;  %v4285_v58 = vunpack.c.h.s8.bf16 %v4216_v61  ;;  %v4292_v50 = vunpack.c.h.s8.bf16 %v4220_v56 }
 0x9ce   : > { %4315 = vmatpush1.bf16.msra.mxu0 %v4252_v3  ;;  %v4289_v3 = vunpack.c.l.s8.bf16 %v4220_v56  ;;  %v9336_v56 = vld [vmem:[#allocation2] sm:$0xff] }
 0x9cf   : > { %4316 = vmatprep.subr.bf16.mxu0 %v4256_v62  ;;  %v4219_v62 = vld [vmem:[%s9846_s29 + $0x108] sm:$0xff] }
 0x9d2   : > { %4317 = vmatpush1.bf16.msra.mxu0 %v4255_v32  ;;  %v4288_v32 = vunpack.c.l.s8.bf16 %v4219_v62 }
 0x9d3   : > { %4318 = vmatprep.subr.bf16.mxu0 %v4259_v53  ;;  %v4290_v53 = vunpack.c.l.s8.bf16 %v4221_v0 }
 0x9d6   : > { %4319 = vmatpush1.bf16.msra.mxu0 %v4258_v60  ;;  %v4291_v60 = vunpack.c.h.s8.bf16 %v4219_v62 }
 0x9d7   : > { %4320 = vmatprep.subr.bf16.mxu0 %v4262_v43  ;;  %v4293_v43 = vunpack.c.h.s8.bf16 %v4221_v0  ;;  %v9337_v0 = vld [vmem:[#allocation2 + $0x8] sm:$0xff] }
 0x9da   : > { %4321 = vmatpush1.bf16.msra.mxu0 %v4261_v27 }
 0x9db   : > { %4322 = vmatprep.subr.bf16.mxu0 %v4265_v59 }
 0x9de   : > { %4323 = vmatpush1.bf16.msra.mxu0 %v4264_v23  ;;  %v10790_v23 = vsub.s32 1, %v10024_v21 }
 0x9df   : > { %4324 = vmatprep.subr.bf16.mxu0 %v4268_v37  ;;  %v4465_v37 = vrot.slane %v10787_v26, %v10181_v31 }
 0x9e0   : > { %13037 = vst [vmem:[#allocation19_spill] sm:$0xff] %v10790_v23 }
 0x9e2   : > { %4325 = vmatpush1.bf16.msra.mxu0 %v4267_v25  ;;  %v9330_v25 = vld [vmem:[%s9838_s9] sm:$0xff] }
 0x9e3   : > { %4337 = vmatprep.subr.bf16.mxu0 %v4271_v13  ;;  %v4483_v8 = vrot.slane %v9330_v25, %v10790_v23 }
 0xa6e   : > { %v8660_v33 = vpop.f32.mrb[28].mxu1 }
 0xa6f   : > { %v4174_v11 = vpop.f32.mrb[29].mxu1 }
 0xa70   : > { %v10761_v14 = vpack.c.bf16 %v8660_v33, %v4174_v11  ;;  %v9331_v11 = vld [vmem:[%s9838_s9 + $0x8] sm:$0xff] }
 0xa78   : > { %v4097_v24 = vpop.f32.mrb[48].mxu0 }
 0xa79   : > { %v4099_v28 = vpop.f32.mrb[49].mxu0 }
 0xa7c   : > { %v4103_v15 = vpop.f32.mrb[50].mxu0 }
 0xa7d   : > { %v4183_v10 = vpack.c.bf16 %v4103_v15, %v4097_v24  ;;  %v4105_v52 = vpop.f32.mrb[51].mxu0  ;;  %v9333_v15 = vld [vmem:[%s9838_s9 + $0x10] sm:$0xff] }
 0xa7e   : > { %v4184_v41 = vpack.c.bf16 %v4105_v52, %v4099_v28  ;;  %v9332_v28 = vld [vmem:[%s9838_s9 + $0x18] sm:$0xff] }
 0xa7f   : > { %v4501_v47 = vrot.slane %v9332_v28, %v10790_v23 }
 0xa80   : > { %4326 = vmatprep.mubr.bf16.mxu0 %v4184_v41  ;;  %4412 = vmatprep.mubr.bf16.mxu1 %v4184_v41 }
 0xa81   : > { %4327 = vmatmul.mubr.bf16.vlgmr.msra.gmra.mrb[52].mxu0 %v4183_v10  ;;  %4413 = vmatmul.mubr.bf16.vlgmr.msra.gmra.mrb[32].mxu1 %v4183_v10  ;;  %v4491_v10 = vrot.slane %v9333_v15, %v10790_v23  ;;  %v4611_v15 = vld [vmem:[%s9862_s7 + $0x10] sm:$0xff] }
 0xa82   : > { %4338 = vmatpush1.bf16.msra.mxu0 %v4270_v2  ;;  %8662 = vmatpush3.bf16.msra.mxu1 %v4272_v29  ;;  %v9334_v2 = vld [vmem:[%s9838_s9 + $0x28] sm:$0xff] }
 0xa83   : > { %4339 = vmatprep.subr.bf16.mxu0 %v4274_v12  ;;  %8663 = vmatprep.subr.bf16.mxu1 %v9541_v34  ;;  %v4509_v29 = vrot.slane %v9334_v2, %v10790_v23  ;;  %v4622_v2 = vld [vmem:[%s9862_s7 + $0x68] sm:$0xff] }
 0xa84   : > { %4369 = vmatprep.mubr.bf16.mxu0 %v9540_v49  ;;  %8677 = vmatprep.mubr.msk.bf16.mxu1 %vm9542_vm2, %v9541_v34 }
 0xa86   : > { %4340 = vmatpush1.bf16.msra.mxu0 %v4273_v40  ;;  %8664 = vmatpush3.bf16.msra.mxu1 %v4275_v63  ;;  %v4505_v40 = vrot.slane %v9335_v5, %v10790_v23  ;;  %v4767_v5 = vunpack.c.h.s8.bf16 %v4611_v15 }
 0xa87   : > { %4341 = vmatprep.subr.bf16.mxu0 %v4277_v42  ;;  %8665 = vmatprep.subr.bf16.mxu1 %v9541_v34 }
 0xa8a   : > { %4342 = vmatpush1.bf16.msra.mxu0 %v4276_v36  ;;  %8666 = vmatpush3.bf16.msra.mxu1 %v4278_v39 }
 0xa8b   : > { %4343 = vmatprep.subr.bf16.mxu0 %v4280_v16  ;;  %8667 = vmatprep.subr.bf16.mxu1 %v9541_v34 }
 0xa8e   : > { %4344 = vmatpush1.bf16.msra.mxu0 %v4279_v7  ;;  %8668 = vmatpush3.bf16.msra.mxu1 %v4281_v48 }
 0xa8f   : > { %4345 = vmatprep.subr.bf16.mxu0 %v4283_v20  ;;  %8669 = vmatprep.subr.bf16.mxu1 %v9541_v34 }
 0xa92   : > { %4346 = vmatpush1.bf16.msra.mxu0 %v4282_v4  ;;  %8670 = vmatpush3.bf16.msra.mxu1 %v4284_v18 }
 0xa93   : > { %4347 = vmatprep.subr.bf16.mxu0 %v4286_v57  ;;  %8671 = vmatprep.subr.bf16.mxu1 %v9541_v34 }
 0xa96   : > { %4348 = vmatpush1.bf16.msra.mxu0 %v4285_v58  ;;  %8672 = vmatpush3.bf16.msra.mxu1 %v4287_v55 }
 0xa97   : > { %4349 = vmatprep.subr.bf16.mxu0 %v4289_v3  ;;  %8673 = vmatprep.subr.bf16.mxu1 %v9541_v34 }
 0xa9a   : > { %4350 = vmatpush1.bf16.msra.mxu0 %v4288_v32  ;;  %8674 = vmatpush3.bf16.msra.mxu1 %v4290_v53 }
 0xa9b   : > { %4351 = vmatprep.subr.bf16.mxu0 %v4292_v50  ;;  %8675 = vmatprep.subr.bf16.mxu1 %v9541_v34  ;;  %v10793_v34 = vld [vmem:[%s9838_s9 + $0x50] sm:$0xff]  ;;  %v9338_v50 = vld [vmem:[#allocation2 + $0x18] sm:$0x3] }
 0xa9c   : > { %v4469_v46 = vrot.slane %v10793_v34, %v10181_v31 }
 0xa9e   : > { %4352 = vmatpush1.bf16.msra.mxu0 %v4291_v60  ;;  %8676 = vmatpush3.bf16.msra.mxu1 %v4293_v43 }
 0xaa1   : > { %4370 = vmatmul.mubr.bf16.vlgmr.msra.gmra.mrb[52].mxu0 %v10761_v14  ;;  %8678 = vmatmul.mubr.bf16.vlgmr.msra.gmra.mrb[36].mxu1 %v10761_v14  ;;  %v4487_v14 = vrot.slane %v9331_v11, %v10790_v23  ;;  %v4610_v11 = vld [vmem:[%s9862_s7 + $0x8] sm:$0xff] }
 0xaa2   : > { %v4754_v28 = vunpack.c.l.s8.bf16 %v4610_v11 }
 0xaa4   : > { %5041 = vmatprep.subr.bf16.mxu1 %v4754_v28  ;;  %v4657_v28 = vld [vmem:[%s9862_s7 + $0x180] sm:$0xff] }
 0xb54   : > { %v8382_v27 = vpop.f32.mrb[32].mxu1 }
 0xb55   : > { %v8383_v1 = vpop.f32.mrb[33].mxu1 }
 0xb56   : > { %v8384_v54 = vadd.f32 %v8383_v1, %v8382_v27  ;;  %v8385_v59 = vpop.f32.mrb[34].mxu1  ;;  %v9339_v27 = vld [vmem:[#allocation2 + $0x10] sm:$0xff] }
 0xb57   : > { %v8386_v6 = vpop.f32.mrb[35].mxu1 }
 0xb58   : > { %v8387_v51 = vadd.f32 %v8386_v6, %v8385_v59 }
 0xb74   : > { %v4371_v13 = vpop.f32.mrb[52].mxu0  ;;  %v4455_v33 = vpop.f32.mrb[36].mxu1 }
 0xb75   : > { %v4474_v24 = vmul.f32 %v4465_v37, %v4371_v13  ;;  %v4456_v9 = vadd.f32 %v8384_v54, %v4455_v33  ;;  %v4373_v52 = vpop.f32.mrb[53].mxu0  ;;  %v8679_v41 = vpop.f32.mrb[37].mxu1  ;;  %v9340_v54 = vld [vmem:[#allocation2 + $0x20] sm:$0x3] }
 0xb76   : > { %v4475_v12 = vmul.f32 %v4469_v46, %v4373_v52  ;;  %v4375_v63 = vpop.f32.mrb[54].mxu0  ;;  %v4458_v42 = vpop.f32.mrb[38].mxu1  ;;  %v4755_v52 = vunpack.c.l.s8.bf16 %v4611_v15 }
 0xb77   : > { %v4492_v45 = vadd.f32 %v4483_v8, %v4474_v24  ;;  %v4476_v38 = vmul.f32 %v4473_v35, %v4456_v9  ;;  %v4477_v36 = vmul.f32 %v4465_v37, %v4375_v63  ;;  %v4459_v39 = vadd.f32 %v8387_v51, %v4458_v42  ;;  %v4377_v16 = vpop.f32.mrb[55].mxu0  ;;  %v8680_v19 = vpop.f32.mrb[39].mxu1  ;;  %v9341_v51 = vld [vmem:[#allocation2 + $0x28] sm:$0x3]  ;;  %v4609_v24 = vld [vmem:[%s9862_s7] sm:$0xff] }
 0xb78   : > { %v4493_v7 = vadd.f32 %v4487_v14, %v4475_v12  ;;  %v4478_v48 = vmul.f32 %v4469_v46, %v4377_v16  ;;  %v4753_v9 = vunpack.c.l.s8.bf16 %v4609_v24  ;;  %v4765_v12 = vunpack.c.h.s8.bf16 %v4609_v24  ;;  %v4621_v42 = vld [vmem:[%s9862_s7 + $0x60] sm:$0xff]  ;;  %v4634_v19 = vld [vmem:[%s9862_s7 + $0xc8] sm:$0xff] }
 0xb79   : > { %v4510_v20 = vmul.f32 %v4501_v47, %v4492_v45  ;;  %v4494_v61 = vadd.f32 %v4491_v10, %v4476_v38  ;;  %v4495_v44 = vadd.f32 %v4483_v8, %v4477_v36  ;;  %v4479_v4 = vmul.f32 %v4473_v35, %v4459_v39  ;;  %v4623_v45 = vld [vmem:[%s9862_s7 + $0x70] sm:$0xff] }
 0xb7a   : > { %v4511_v18 = vmul.f32 %v4505_v40, %v4493_v7  ;;  %v4496_v57 = vadd.f32 %v4487_v14, %v4478_v48  ;;  %v4612_v14 = vld [vmem:[%s9862_s7 + $0x18] sm:$0xff]  ;;  %5042 = vmatpush1.bf16.msra.mxu1 %v4753_v9  ;;  %v4777_v38 = vunpack.c.l.s8.bf16 %v4621_v42  ;;  %v4779_v36 = vunpack.c.l.s8.bf16 %v4623_v45 }
 0xb7b   : > { %v10816_v58 = vadd.f32 %v9336_v56, %v4510_v20  ;;  %v4512_v55 = vmul.f32 %v4509_v29, %v4494_v61  ;;  %v4513_v3 = vmul.f32 %v4501_v47, %v4495_v44  ;;  %v4497_v62 = vadd.f32 %v4491_v10, %v4479_v4  ;;  %v4636_v7 = vld [vmem:[%s9862_s7 + $0xd8] sm:$0xff]  ;;  %v4633_v4 = vld [vmem:[%s9862_s7 + $0xc0] sm:$0xff] }
 0xb7c   : > { %v10818_v32 = vadd.f32 %v9337_v0, %v4511_v18  ;;  %v4514_v53 = vmul.f32 %v4505_v40, %v4496_v57  ;;  %v4756_v47 = vunpack.c.l.s8.bf16 %v4612_v14  ;;  %v4766_v10 = vunpack.c.h.s8.bf16 %v4610_v11  ;;  %v4635_v18 = vld [vmem:[%s9862_s7 + $0xd0] sm:$0xff]  ;;  %v4648_v0 = vld [vmem:[%s9862_s7 + $0x138] sm:$0xff] }
 0xb7d   : > { %13038 = vst [vmem:[#allocation20_spill] sm:$0xff] %v10816_v58  ;;  %v10820_v60 = vadd.f32 %v9338_v50, %v4513_v3  ;;  %v4515_v43 = vmul.f32 %v4509_v29, %v4497_v62  ;;  %v10822_v1 = vadd.f32 %v9339_v27, %v4512_v55  ;;  %v4768_v41 = vunpack.c.h.s8.bf16 %v4612_v14  ;;  %v4624_v29 = vld [vmem:[%s9862_s7 + $0x78] sm:$0xff]  ;;  %v4646_v62 = vld [vmem:[%s9862_s7 + $0x128] sm:$0xff] }
 0xb7e   : > { %13039 = vst [vmem:[#allocation21_spill] sm:$0xff] %v10818_v32  ;;  %v10824_v59 = vadd.f32 %v9340_v54, %v4514_v53  ;;  %v4522_v6 = vadd.f32 %v10818_v32, %v10816_v58  ;;  %5127 = vmatprep.subr.bf16.mxu0 %v4756_v47  ;;  %5043 = vmatprep.subr.bf16.mxu1 %v4766_v10  ;;  %v4778_v40 = vunpack.c.l.s8.bf16 %v4622_v2  ;;  %v4780_v63 = vunpack.c.l.s8.bf16 %v4624_v29  ;;  %v4645_v54 = vld [vmem:[%s9862_s7 + $0x120] sm:$0xff]  ;;  %v4659_v47 = vld [vmem:[%s9862_s7 + $0x190] sm:$0xff] }
 0xb7f   : > { %13040 = vst [vmem:[#allocation22_spill] sm:$0xff] %v10820_v60  ;;  %13041 = vst [vmem:[#allocation23_spill] sm:$0xff] %v10822_v1  ;;  %v10828_v37 = vadd.f32 %v9341_v51, %v4515_v43  ;;  %v4526_v46 = vsel %vm2193_vm1, %v10820_v60, 0.0  ;;  %5128 = vmatpush1.bf16.msra.mxu0 %v4755_v52  ;;  %5044 = vmatpush1.bf16.msra.mxu1 %v4765_v12  ;;  %v4790_v39 = vunpack.c.h.s8.bf16 %v4622_v2  ;;  %v4792_v16 = vunpack.c.h.s8.bf16 %v4624_v29 }
 0xb80   : > { %13042 = vst [vmem:[#allocation24_spill] sm:$0xff] %v10824_v59  ;;  %v4523_v25 = vadd.f32 %v4522_v6, %v10822_v1  ;;  %v4527_v8 = vsel %vm2193_vm1, %v10824_v59, 0.0  ;;  %5129 = vmatprep.subr.bf16.mxu0 %v4768_v41  ;;  %5045 = vmatprep.subr.bf16.mxu1 %v4778_v40  ;;  %v4789_v48 = vunpack.c.h.s8.bf16 %v4621_v42  ;;  %v4791_v20 = vunpack.c.h.s8.bf16 %v4623_v45  ;;  %v4647_v6 = vld [vmem:[%s9862_s7 + $0x130] sm:$0xff] }
 0xb81   : > { %13043 = vst [vmem:[#allocation25_spill] sm:$0xff] %v10828_v37  ;;  %v4528_v35 = vadd.f32 %v4527_v8, %v4526_v46  ;;  %v4529_v13 = vsel %vm2193_vm1, %v10828_v37, 0.0  ;;  %v4802_v61 = vunpack.c.l.s8.bf16 %v4634_v19  ;;  %v4804_v44 = vunpack.c.l.s8.bf16 %v4636_v7 }
 0xb82   : > { %4524 = vadd.xlane.f32.xlu1 %v4523_v25  ;;  %v4801_v57 = vunpack.c.l.s8.bf16 %v4633_v4  ;;  %v4803_v56 = vunpack.c.l.s8.bf16 %v4635_v18  ;;  %v4814_v55 = vunpack.c.h.s8.bf16 %v4634_v19  ;;  %v4816_v3 = vunpack.c.h.s8.bf16 %v4636_v7 }
 0xb83   : > { %v4530_v33 = vadd.f32 %v4529_v13, %v4528_v35  ;;  %5130 = vmatpush1.bf16.msra.mxu0 %v4767_v5  ;;  %5046 = vmatpush1.bf16.msra.mxu1 %v4777_v38  ;;  %v4813_v53 = vunpack.c.h.s8.bf16 %v4633_v4  ;;  %v4815_v50 = vunpack.c.h.s8.bf16 %v4635_v18  ;;  %v4826_v43 = vunpack.c.l.s8.bf16 %v4646_v62  ;;  %v4658_v35 = vld [vmem:[%s9862_s7 + $0x188] sm:$0xff]  ;;  %v4660_v13 = vld [vmem:[%s9862_s7 + $0x198] sm:$0xff] }
 0xb84   : > { %5131 = vmatprep.subr.bf16.mxu0 %v4780_v63  ;;  %5047 = vmatprep.subr.bf16.mxu1 %v4790_v39  ;;  %v4828_v27 = vunpack.c.l.s8.bf16 %v4648_v0  ;;  %v4825_v51 = vunpack.c.l.s8.bf16 %v4645_v54  ;;  %v4827_v46 = vunpack.c.l.s8.bf16 %v4647_v6  ;;  %v4838_v25 = vunpack.c.h.s8.bf16 %v4646_v62  ;;  %v4670_v62 = vld [vmem:[%s9862_s7 + $0x1e8] sm:$0xff] }
 0xb85   : > { %4531 = vadd.xlane.f32.xlu0 %v4530_v33  ;;  %v4840_v8 = vunpack.c.h.s8.bf16 %v4648_v0  ;;  %v4837_v33 = vunpack.c.h.s8.bf16 %v4645_v54  ;;  %v4839_v11 = vunpack.c.h.s8.bf16 %v4647_v6  ;;  %v4850_v14 = vunpack.c.l.s8.bf16 %v4658_v35  ;;  %v4672_v0 = vld [vmem:[%s9862_s7 + $0x1f8] sm:$0xff] }
 0xb86   : > { %v4852_v24 = vunpack.c.l.s8.bf16 %v4660_v13  ;;  %v4849_v9 = vunpack.c.l.s8.bf16 %v4657_v28  ;;  %v4851_v15 = vunpack.c.l.s8.bf16 %v4659_v47  ;;  %v4862_v10 = vunpack.c.h.s8.bf16 %v4658_v35  ;;  %v4682_v35 = vld [vmem:[%s9862_s7 + $0x248] sm:$0xff] }
 0xb87   : > { %5132 = vmatpush1.bf16.msra.mxu0 %v4779_v36  ;;  %5048 = vmatpush1.bf16.msra.mxu1 %v4789_v48  ;;  %v4864_v52 = vunpack.c.h.s8.bf16 %v4660_v13  ;;  %v4684_v13 = vld [vmem:[%s9862_s7 + $0x258] sm:$0xff] }
 0xb88   : > { %5133 = vmatprep.subr.bf16.mxu0 %v4792_v16  ;;  %5049 = vmatprep.subr.bf16.mxu1 %v4802_v61 }
 0xb8b   : > { %5134 = vmatpush1.bf16.msra.mxu0 %v4791_v20  ;;  %5050 = vmatpush1.bf16.msra.mxu1 %v4801_v57 }
 0xb8c   : > { %5135 = vmatprep.subr.bf16.mxu0 %v4804_v44  ;;  %5051 = vmatprep.subr.bf16.mxu1 %v4814_v55  ;;  %v4861_v55 = vunpack.c.h.s8.bf16 %v4657_v28 }
 0xb8f   : > { %5136 = vmatpush1.bf16.msra.mxu0 %v4803_v56  ;;  %5052 = vmatpush1.bf16.msra.mxu1 %v4813_v53  ;;  %v4874_v53 = vunpack.c.l.s8.bf16 %v4670_v62 }
 0xb90   : > { %5137 = vmatprep.subr.bf16.mxu0 %v4816_v3  ;;  %5053 = vmatprep.subr.bf16.mxu1 %v4826_v43  ;;  %v4863_v3 = vunpack.c.h.s8.bf16 %v4659_v47  ;;  %v4669_v43 = vld [vmem:[%s9862_s7 + $0x1e0] sm:$0xff] }
 0xb91   : > { %v4873_v54 = vunpack.c.l.s8.bf16 %v4669_v43 }
 0xb93   : > { %5138 = vmatpush1.bf16.msra.mxu0 %v4815_v50  ;;  %5054 = vmatpush1.bf16.msra.mxu1 %v4825_v51  ;;  %v4876_v50 = vunpack.c.l.s8.bf16 %v4672_v0  ;;  %v4886_v51 = vunpack.c.h.s8.bf16 %v4670_v62 }
 0xb94   : > { %5139 = vmatprep.subr.bf16.mxu0 %v4828_v27  ;;  %5055 = vmatprep.subr.bf16.mxu1 %v4838_v25  ;;  %v4671_v27 = vld [vmem:[%s9862_s7 + $0x1f0] sm:$0xff]  ;;  %v4885_v25 = vunpack.c.h.s8.bf16 %v4669_v43  ;;  %v9342_v43 = vld [vmem:[%s9838_s9 + $0x30] sm:$0xff] }
 0xb95   : > { %v4875_v6 = vunpack.c.l.s8.bf16 %v4671_v27 }
 0xb97   : > { %5140 = vmatpush1.bf16.msra.mxu0 %v4827_v46  ;;  %5056 = vmatpush1.bf16.msra.mxu1 %v4837_v33  ;;  %v4888_v46 = vunpack.c.h.s8.bf16 %v4672_v0  ;;  %v4898_v33 = vunpack.c.l.s8.bf16 %v4682_v35 }
 0xb98   : > { %5141 = vmatprep.subr.bf16.mxu0 %v4840_v8  ;;  %5057 = vmatprep.subr.bf16.mxu1 %v4850_v14  ;;  %v4887_v8 = vunpack.c.h.s8.bf16 %v4671_v27  ;;  %v4681_v14 = vld [vmem:[%s9862_s7 + $0x240] sm:$0xff]  ;;  %v4573_v27 = vrot.slane %v9342_v43, %v10027_v22 }
 0xb99   : > { %v4897_v28 = vunpack.c.l.s8.bf16 %v4681_v14 }
 0xb9b   : > { %5142 = vmatpush1.bf16.msra.mxu0 %v4839_v11  ;;  %5058 = vmatpush1.bf16.msra.mxu1 %v4849_v9  ;;  %v4900_v11 = vunpack.c.l.s8.bf16 %v4684_v13  ;;  %v4910_v9 = vunpack.c.h.s8.bf16 %v4682_v35  ;;  %v4595_v35 = vrot.slane %v10793_v34, %v10027_v22 }
 0xb9c   : > { %5143 = vmatprep.subr.bf16.mxu0 %v4852_v24  ;;  %5059 = vmatprep.subr.bf16.mxu1 %v4862_v10  ;;  %v4683_v24 = vld [vmem:[%s9862_s7 + $0x250] sm:$0xff]  ;;  %v4694_v10 = vld [vmem:[%s9862_s7 + $0x2a8] sm:$0xff] }
 0xb9d   : > { %v4899_v47 = vunpack.c.l.s8.bf16 %v4683_v24 }
 0xb9f   : > { %5144 = vmatpush1.bf16.msra.mxu0 %v4851_v15  ;;  %5060 = vmatpush1.bf16.msra.mxu1 %v4861_v55  ;;  %v4912_v15 = vunpack.c.h.s8.bf16 %v4684_v13 }
 0xba0   : > { %5145 = vmatprep.subr.bf16.mxu0 %v4864_v52  ;;  %5061 = vmatprep.subr.bf16.mxu1 %v4874_v53  ;;  %v4696_v52 = vld [vmem:[%s9862_s7 + $0x2b8] sm:$0xff] }
 0xba3   : > { %5146 = vmatpush1.bf16.msra.mxu0 %v4863_v3  ;;  %5062 = vmatpush1.bf16.msra.mxu1 %v4873_v54  ;;  %v9343_v54 = vld [vmem:[%s9838_s9 + $0x38] sm:$0xff] }
 0xba4   : > { %5147 = vmatprep.subr.bf16.mxu0 %v4876_v50  ;;  %5063 = vmatprep.subr.bf16.mxu1 %v4886_v51 }
 0xba7   : > { %5148 = vmatpush1.bf16.msra.mxu0 %v4875_v6  ;;  %5064 = vmatpush1.bf16.msra.mxu1 %v4885_v25  ;;  %v4577_v6 = vrot.slane %v9343_v54, %v10027_v22 }
 0xba8   : > { %5149 = vmatprep.subr.bf16.mxu0 %v4888_v46  ;;  %5065 = vmatprep.subr.bf16.mxu1 %v4898_v33 }
 0xbab   : > { %5150 = vmatpush1.bf16.msra.mxu0 %v4887_v8  ;;  %5066 = vmatpush1.bf16.msra.mxu1 %v4897_v28  ;;  %v4591_v8 = vrot.slane %v10787_v26, %v10027_v22  ;;  %v4707_v28 = vld [vmem:[%s9862_s7 + $0x310] sm:$0xff] }
 0xbac   : > { %5151 = vmatprep.subr.bf16.mxu0 %v4900_v11  ;;  %5067 = vmatprep.subr.bf16.mxu1 %v4910_v9 }
 0xbaf   : > { %5152 = vmatpush1.bf16.msra.mxu0 %v4899_v47 }
 0xbb0   : > { %5153 = vmatprep.subr.bf16.mxu0 %v4912_v15 }
 0xc0f   : > { %v4525_v41 = vpop.xlane.xlu1 %4524 }
 0xc10   : > { %v4533_v2 = vmul.f32 0.0026041667, %v4525_v41  ;;  %v4909_v41 = vunpack.c.h.s8.bf16 %v4681_v14 }
 0xc12   : > { %v10858_v29 = vsub.f32 %v10816_v58, %v4533_v2  ;;  %v10861_v12 = vsub.f32 %v10818_v32, %v4533_v2  ;;  %v10864_v5 = vsub.f32 %v10822_v1, %v4533_v2  ;;  %v4532_v40 = vpop.xlane.xlu0 %4531  ;;  %v4911_v2 = vunpack.c.h.s8.bf16 %v4683_v24  ;;  %5068 = vmatpush1.bf16.msra.mxu1 %v4909_v41 }
 0xc13   : > { %v4534_v63 = vmul.f32 0.0026041667, %v4532_v40  ;;  %v4922_v40 = vunpack.c.l.s8.bf16 %v4694_v10 }
 0xc14   : > { %v4541_v42 = vmul.f32 %v10858_v29, %v10858_v29  ;;  %v4542_v45 = vmul.f32 %v10861_v12, %v10861_v12  ;;  %v4543_v16 = vmul.f32 %v10864_v5, %v10864_v5  ;;  %5154 = vmatpush1.bf16.msra.mxu0 %v4911_v2  ;;  %v4718_v2 = vld [vmem:[%s9862_s7 + $0x368] sm:$0xff] }
 0xc15   : > { %v10871_v38 = vsub.f32 %v10820_v60, %v4534_v63  ;;  %v10874_v36 = vsub.f32 %v10824_v59, %v4534_v63  ;;  %v10877_v39 = vsub.f32 %v10828_v37, %v4534_v63  ;;  %v4924_v63 = vunpack.c.l.s8.bf16 %v4696_v52  ;;  %5069 = vmatprep.subr.bf16.mxu1 %v4922_v40  ;;  %v4720_v40 = vld [vmem:[%s9862_s7 + $0x378] sm:$0xff] }
 0xc16   : > { %v4547_v19 = vadd.f32 %v4542_v45, %v4541_v42  ;;  %v4693_v42 = vld [vmem:[%s9862_s7 + $0x2a0] sm:$0xff]  ;;  %v4695_v45 = vld [vmem:[%s9862_s7 + $0x2b0] sm:$0xff] }
 0xc17   : > { %v4544_v7 = vmul.f32 %v10871_v38, %v10871_v38  ;;  %v4545_v48 = vmul.f32 %v10874_v36, %v10874_v36  ;;  %v4546_v20 = vmul.f32 %v10877_v39, %v10877_v39  ;;  %5155 = vmatprep.subr.bf16.mxu0 %v4924_v63 }
 0xc18   : > { %v4548_v61 = vadd.f32 %v4547_v19, %v4543_v16  ;;  %v4921_v16 = vunpack.c.l.s8.bf16 %v4693_v42  ;;  %v4923_v19 = vunpack.c.l.s8.bf16 %v4695_v45 }
 0xc19   : > { %v4551_v44 = vsel %vm2193_vm1, %v4544_v7, 0.0  ;;  %v4552_v4 = vsel %vm2193_vm1, %v4545_v48, 0.0  ;;  %v4554_v57 = vsel %vm2193_vm1, %v4546_v20, 0.0  ;;  %v4934_v7 = vunpack.c.h.s8.bf16 %v4694_v10 }
 0xc1a   : > { %4549 = vadd.xlane.f32.xlu0 %v4548_v61  ;;  %v4553_v18 = vadd.f32 %v4552_v4, %v4551_v44  ;;  %v4936_v48 = vunpack.c.h.s8.bf16 %v4696_v52  ;;  %5070 = vmatpush1.bf16.msra.mxu1 %v4921_v16  ;;  %v4933_v20 = vunpack.c.h.s8.bf16 %v4693_v42  ;;  %v4935_v61 = vunpack.c.h.s8.bf16 %v4695_v45  ;;  %v4706_v44 = vld [vmem:[%s9862_s7 + $0x308] sm:$0xff]  ;;  %v4708_v4 = vld [vmem:[%s9862_s7 + $0x318] sm:$0xff] }
 0xc1b   : > { %5156 = vmatpush1.bf16.msra.mxu0 %v4923_v19  ;;  %5071 = vmatprep.subr.bf16.mxu1 %v4934_v7  ;;  %v4947_v52 = vunpack.c.l.s8.bf16 %v4707_v28  ;;  %v4958_v41 = vunpack.c.h.s8.bf16 %v4706_v44  ;;  %v4959_v42 = vunpack.c.h.s8.bf16 %v4707_v28  ;;  %v4970_v45 = vunpack.c.l.s8.bf16 %v4718_v2  ;;  %v4717_v19 = vld [vmem:[%s9862_s7 + $0x360] sm:$0xff]  ;;  %v4719_v7 = vld [vmem:[%s9862_s7 + $0x370] sm:$0xff] }
 0xc1c   : > { %v4555_v56 = vadd.f32 %v4554_v57, %v4553_v18  ;;  %5157 = vmatprep.subr.bf16.mxu0 %v4936_v48  ;;  %v4946_v18 = vunpack.c.l.s8.bf16 %v4706_v44  ;;  %v4948_v57 = vunpack.c.l.s8.bf16 %v4708_v4  ;;  %v4972_v16 = vunpack.c.l.s8.bf16 %v4720_v40 }
 0xc1d   : > { %v4969_v48 = vunpack.c.l.s8.bf16 %v4717_v19  ;;  %v4984_v44 = vunpack.c.h.s8.bf16 %v4720_v40  ;;  %v4613_v40 = vld [vmem:[%s9862_s7 + $0x20] sm:$0xff] }
 0xc1e   : > { %4556 = vadd.xlane.f32.xlu1 %v4555_v56  ;;  %5072 = vmatpush1.bf16.msra.mxu1 %v4933_v20  ;;  %v4971_v20 = vunpack.c.l.s8.bf16 %v4719_v7 }
 0xc1f   : > { %5158 = vmatpush1.bf16.msra.mxu0 %v4935_v61  ;;  %5084 = vmatprep.subr.bf16.mxu1 %v4946_v18  ;;  %v4982_v61 = vunpack.c.h.s8.bf16 %v4718_v2  ;;  %v4732_v18 = vld [vmem:[%s9862_s7 + $0x3d8] sm:$0xff] }
 0xc20   : > { %5170 = vmatprep.subr.bf16.mxu0 %v4948_v57  ;;  %v4981_v57 = vunpack.c.h.s8.bf16 %v4717_v19  ;;  %v5008_v54 = vunpack.c.h.s8.bf16 %v4732_v18 }
 0xca7   : > { %v4550_v56 = vpop.xlane.xlu0 %4549 }
 0xca8   : > { %v4558_v55 = vmul.f32 0.0026041667, %v4550_v56  ;;  %v4983_v56 = vunpack.c.h.s8.bf16 %v4719_v7 }
 0xcaa   : > { %v4560_v3 = vadd.f32 1e-06, %v4558_v55 }
 0xcab   : > { %v4557_v62 = vpop.xlane.xlu1 %4556 }
 0xcac   : > { %9226 = vrsqrt.f32 %v4560_v3  ;;  %v4559_v0 = vmul.f32 0.0026041667, %v4557_v62  ;;  %v4996_v3 = vunpack.c.l.s8.bf16 %v4732_v18  ;;  %v4729_v62 = vld [vmem:[%s9862_s7 + $0x3c0] sm:$0xff] }
 0xcad   : > { %v4625_v18 = vld [vmem:[%s9862_s7 + $0x80] sm:$0xff] }
 0xcae   : > { %v4561_v53 = vadd.f32 1e-06, %v4559_v0  ;;  %v4731_v0 = vld [vmem:[%s9862_s7 + $0x3d0] sm:$0xff] }
 0xcaf   : > { %v4995_v43 = vunpack.c.l.s8.bf16 %v4731_v0 }
 0xcb0   : > { %9228 = vrsqrt.f32 %v4561_v53  ;;  %v4993_v53 = vunpack.c.l.s8.bf16 %v4729_v62 }
 0xcb6   : > { %v10904_v50 = vpop.eup %9226 }
 0xcb7   : > { %v4565_v51 = vmul.f32 %v10904_v50, %v10861_v12  ;;  %v4564_v46 = vmul.f32 %v10904_v50, %v10858_v29  ;;  %v4705_v29 = vld [vmem:[%s9862_s7 + $0x300] sm:$0xff] }
 0xcb8   : > { %v4957_v63 = vunpack.c.h.s8.bf16 %v4705_v29 }
 0xcb9   : > { %v4583_v33 = vmul.f32 %v4577_v6, %v4565_v51  ;;  %v4582_v14 = vmul.f32 %v4573_v27, %v4564_v46  ;;  %v4744_v51 = vld [vmem:[%s9862_s7 + $0x438] sm:$0xff]  ;;  %v5005_v46 = vunpack.c.h.s8.bf16 %v4729_v62 }
 0xcba   : > { %v10914_v25 = vpop.eup %9228 }
 0xcbb   : > { %v4568_v13 = vmul.f32 %v10914_v25, %v10874_v36  ;;  %v4567_v11 = vmul.f32 %v10914_v25, %v10871_v38  ;;  %v4601_v47 = vadd.f32 %v4595_v35, %v4583_v33  ;;  %v4600_v26 = vadd.f32 %v4591_v8, %v4582_v14  ;;  %v4741_v33 = vld [vmem:[%s9862_s7 + $0x420] sm:$0xff] }
 0xcbc   : > { %v4945_v36 = vunpack.c.l.s8.bf16 %v4705_v29  ;;  %v4960_v38 = vunpack.c.h.s8.bf16 %v4708_v4  ;;  %v4730_v4 = vld [vmem:[%s9862_s7 + $0x3c8] sm:$0xff]  ;;  %v4569_v14 = vmul.f32 %v10914_v25, %v10877_v39  ;;  %v5017_v28 = vunpack.c.l.s8.bf16 %v4741_v33 }
 0xcbd   : > { %v4586_v12 = vmul.f32 %v4577_v6, %v4568_v13  ;;  %v4585_v24 = vmul.f32 %v4573_v27, %v4567_v11  ;;  %v4994_v55 = vunpack.c.l.s8.bf16 %v4730_v4  ;;  %v5006_v27 = vunpack.c.h.s8.bf16 %v4730_v4  ;;  %v4742_v6 = vld [vmem:[%s9862_s7 + $0x428] sm:$0xff]  ;;  %v4743_v11 = vld [vmem:[%s9862_s7 + $0x430] sm:$0xff] }
 0xcbe   : > { %v5020_v13 = vunpack.c.l.s8.bf16 %v4744_v51  ;;  %v5031_v25 = vunpack.c.h.s8.bf16 %v4743_v11 }
 0xcbf   : > { %v4604_v9 = vadd.f32 %v4595_v35, %v4586_v12  ;;  %v4603_v15 = vadd.f32 %v4591_v8, %v4585_v24  ;;  %v5007_v8 = vunpack.c.h.s8.bf16 %v4731_v0  ;;  %v5018_v35 = vunpack.c.l.s8.bf16 %v4742_v6  ;;  %v9344_v24 = vld [vmem:[%s9838_s9 + $0x40] sm:$0xff] }
 0xcc0   : > { %v4566_v12 = vmul.f32 %v10904_v50, %v10864_v5  ;;  %v4581_v29 = vrot.slane %v9344_v24, %v10027_v22  ;;  %v4599_v5 = vrot.slane %v10796_v17, %v10027_v22  ;;  %v5029_v50 = vunpack.c.h.s8.bf16 %v4741_v33 }
 0xcc1   : > { %v10926_v10 = vpack.c.bf16 %v4604_v9, %v4601_v47  ;;  %v10928_v34 = vpack.c.bf16 %v4603_v15, %v4600_v26  ;;  %v5019_v47 = vunpack.c.l.s8.bf16 %v4743_v11  ;;  %v5030_v9 = vunpack.c.h.s8.bf16 %v4742_v6 }
 0xcc2   : > { %v5032_v26 = vunpack.c.h.s8.bf16 %v4744_v51  ;;  %v4587_v15 = vmul.f32 %v4581_v29, %v4569_v14  ;;  %v4584_v39 = vmul.f32 %v4581_v29, %v4566_v12  ;;  %v4637_v51 = vld [vmem:[%s9862_s7 + $0xe0] sm:$0xff]  ;;  %v4650_v14 = vld [vmem:[%s9862_s7 + $0x148] sm:$0xff]  ;;  %v4652_v12 = vld [vmem:[%s9862_s7 + $0x158] sm:$0xff] }
 0xcc3   : > { %5073 = vmatprep.mubr.bf16.mxu1 %v10926_v10  ;;  %5159 = vmatprep.mubr.bf16.mxu0 %v10926_v10  ;;  %v4817_v24 = vunpack.c.h.s8.bf16 %v4637_v51 }
 0xcc4   : > { %5074 = vmatmul.mubr.bf16.vlgmr.msra.gmra.mrb[40].mxu1 %v10928_v34  ;;  %5160 = vmatmul.mubr.bf16.vlgmr.msra.gmra.mrb[56].mxu0 %v10928_v34 }
 0xcc5   : > { %5085 = vmatpush1.bf16.msra.mxu1 %v4945_v36  ;;  %5171 = vmatpush1.bf16.msra.mxu0 %v4947_v52  ;;  %v4614_v36 = vld [vmem:[%s9862_s7 + $0x28] sm:$0xff]  ;;  %v4616_v52 = vld [vmem:[%s9862_s7 + $0x38] sm:$0xff] }
 0xcc6   : > { %5086 = vmatprep.subr.bf16.mxu1 %v4958_v41  ;;  %5172 = vmatprep.subr.bf16.mxu0 %v4960_v38  ;;  %v4605_v41 = vadd.f32 %v4599_v5, %v4587_v15  ;;  %v4758_v38 = vunpack.c.l.s8.bf16 %v4614_v36  ;;  %v4760_v2 = vunpack.c.l.s8.bf16 %v4616_v52  ;;  %v4770_v19 = vunpack.c.h.s8.bf16 %v4614_v36 }
 0xcc7   : > { %5116 = vmatprep.mubr.bf16.mxu1 %v9540_v49  ;;  %5202 = vmatprep.mubr.bf16.mxu0 %v9540_v49  ;;  %v4772_v7 = vunpack.c.h.s8.bf16 %v4616_v52  ;;  %v4842_v52 = vunpack.c.h.s8.bf16 %v4650_v14 }
 0xcc9   : > { %5087 = vmatpush1.bf16.msra.mxu1 %v4957_v63  ;;  %5173 = vmatpush1.bf16.msra.mxu0 %v4959_v42  ;;  %v4615_v63 = vld [vmem:[%s9862_s7 + $0x30] sm:$0xff]  ;;  %v4602_v42 = vadd.f32 %v4599_v5, %v4584_v39  ;;  %v4844_v39 = vunpack.c.h.s8.bf16 %v4652_v12  ;;  %v4662_v5 = vld [vmem:[%s9862_s7 + $0x1a8] sm:$0xff] }
 0xcca   : > { %5088 = vmatprep.subr.bf16.mxu1 %v4970_v45  ;;  %5174 = vmatprep.subr.bf16.mxu0 %v4972_v16  ;;  %v4757_v45 = vunpack.c.l.s8.bf16 %v4613_v40  ;;  %v4759_v17 = vunpack.c.l.s8.bf16 %v4615_v63 }
 0xccb   : > { %v10960_v16 = vpack.c.bf16 %v4605_v41, %v4602_v42 }
 0xccd   : > { %5089 = vmatpush1.bf16.msra.mxu1 %v4969_v48  ;;  %5175 = vmatpush1.bf16.msra.mxu0 %v4971_v20  ;;  %v4626_v48 = vld [vmem:[%s9862_s7 + $0x88] sm:$0xff]  ;;  %v4628_v20 = vld [vmem:[%s9862_s7 + $0x98] sm:$0xff] }
 0xcce   : > { %5090 = vmatprep.subr.bf16.mxu1 %v4982_v61  ;;  %5176 = vmatprep.subr.bf16.mxu0 %v4984_v44  ;;  %v4769_v61 = vunpack.c.h.s8.bf16 %v4613_v40  ;;  %v4771_v44 = vunpack.c.h.s8.bf16 %v4615_v63  ;;  %v4782_v4 = vunpack.c.l.s8.bf16 %v4626_v48  ;;  %v4794_v62 = vunpack.c.h.s8.bf16 %v4626_v48  ;;  %v4663_v63 = vld [vmem:[%s9862_s7 + $0x1b0] sm:$0xff]  ;;  %v4676_v48 = vld [vmem:[%s9862_s7 + $0x218] sm:$0xff] }
 0xccf   : > { %v4796_v0 = vunpack.c.h.s8.bf16 %v4628_v20 }
 0xcd1   : > { %5091 = vmatpush1.bf16.msra.mxu1 %v4981_v57  ;;  %5177 = vmatpush1.bf16.msra.mxu0 %v4983_v56  ;;  %v4784_v57 = vunpack.c.l.s8.bf16 %v4628_v20  ;;  %v4627_v56 = vld [vmem:[%s9862_s7 + $0x90] sm:$0xff] }
 0xcd2   : > { %5092 = vmatprep.subr.bf16.mxu1 %v4994_v55  ;;  %5178 = vmatprep.subr.bf16.mxu0 %v4996_v3  ;;  %v4781_v55 = vunpack.c.l.s8.bf16 %v4625_v18  ;;  %v4783_v3 = vunpack.c.l.s8.bf16 %v4627_v56 }
 0xcd5   : > { %5093 = vmatpush1.bf16.msra.mxu1 %v4993_v53  ;;  %5179 = vmatpush1.bf16.msra.mxu0 %v4995_v43  ;;  %v4638_v53 = vld [vmem:[%s9862_s7 + $0xe8] sm:$0xff]  ;;  %v4640_v43 = vld [vmem:[%s9862_s7 + $0xf8] sm:$0xff] }
 0xcd6   : > { %5094 = vmatprep.subr.bf16.mxu1 %v5006_v27  ;;  %5180 = vmatprep.subr.bf16.mxu0 %v5008_v54  ;;  %v4793_v27 = vunpack.c.h.s8.bf16 %v4625_v18  ;;  %v4795_v54 = vunpack.c.h.s8.bf16 %v4627_v56  ;;  %v4806_v6 = vunpack.c.l.s8.bf16 %v4638_v53  ;;  %v4818_v33 = vunpack.c.h.s8.bf16 %v4638_v53  ;;  %v4688_v53 = vld [vmem:[%s9862_s7 + $0x278] sm:$0xff] }
 0xcd7   : > { %v4820_v11 = vunpack.c.h.s8.bf16 %v4640_v43  ;;  %v4880_v18 = vunpack.c.l.s8.bf16 %v4676_v48 }
 0xcd9   : > { %5095 = vmatpush1.bf16.msra.mxu1 %v5005_v46  ;;  %5181 = vmatpush1.bf16.msra.mxu0 %v5007_v8  ;;  %v4808_v46 = vunpack.c.l.s8.bf16 %v4640_v43  ;;  %v4639_v8 = vld [vmem:[%s9862_s7 + $0xf0] sm:$0xff] }
 0xcda   : > { %5096 = vmatprep.subr.bf16.mxu1 %v5018_v35  ;;  %5182 = vmatprep.subr.bf16.mxu0 %v5020_v13  ;;  %v4805_v35 = vunpack.c.l.s8.bf16 %v4637_v51  ;;  %v4807_v13 = vunpack.c.l.s8.bf16 %v4639_v8  ;;  %v4819_v29 = vunpack.c.h.s8.bf16 %v4639_v8  ;;  %v4904_v51 = vunpack.c.l.s8.bf16 %v4688_v53 }
 0xcdd   : > { %5097 = vmatpush1.bf16.msra.mxu1 %v5017_v28  ;;  %5183 = vmatpush1.bf16.msra.mxu0 %v5019_v47  ;;  %v4830_v28 = vunpack.c.l.s8.bf16 %v4650_v14  ;;  %v4649_v47 = vld [vmem:[%s9862_s7 + $0x140] sm:$0xff]  ;;  %v4700_v14 = vld [vmem:[%s9862_s7 + $0x2d8] sm:$0xff] }
 0xcde   : > { %5098 = vmatprep.subr.bf16.mxu1 %v5030_v9  ;;  %5184 = vmatprep.subr.bf16.mxu0 %v5032_v26  ;;  %v4832_v9 = vunpack.c.l.s8.bf16 %v4652_v12  ;;  %v4651_v26 = vld [vmem:[%s9862_s7 + $0x150] sm:$0xff]  ;;  %v4829_v15 = vunpack.c.l.s8.bf16 %v4649_v47 }
 0xcdf   : > { %v4831_v36 = vunpack.c.l.s8.bf16 %v4651_v26  ;;  %v4843_v41 = vunpack.c.h.s8.bf16 %v4651_v26 }
 0xce1   : > { %5099 = vmatpush1.bf16.msra.mxu1 %v5029_v50  ;;  %5185 = vmatpush1.bf16.msra.mxu0 %v5031_v25  ;;  %v4664_v50 = vld [vmem:[%s9862_s7 + $0x1b8] sm:$0xff]  ;;  %v4841_v25 = vunpack.c.h.s8.bf16 %v4649_v47  ;;  %v4928_v47 = vunpack.c.l.s8.bf16 %v4700_v14 }
 0xce2   : > { %5213 = vmatprep.subr.bf16.mxu1 %v4758_v38  ;;  %5299 = vmatprep.subr.bf16.mxu0 %v4760_v2  ;;  %v4854_v38 = vunpack.c.l.s8.bf16 %v4662_v5  ;;  %v4661_v2 = vld [vmem:[%s9862_s7 + $0x1a0] sm:$0xff]  ;;  %v4856_v40 = vunpack.c.l.s8.bf16 %v4664_v50 }
 0xce3   : > { %v4853_v42 = vunpack.c.l.s8.bf16 %v4661_v2  ;;  %v4865_v20 = vunpack.c.h.s8.bf16 %v4661_v2 }
 0xce4   : > { %5117 = vmatmul.mubr.bf16.vlgmr.msra.gmra.mrb[40].mxu1 %v10960_v16  ;;  %5203 = vmatmul.mubr.bf16.vlgmr.msra.gmra.mrb[56].mxu0 %v10960_v16 }
 0xce5   : > { %5214 = vmatpush1.bf16.msra.mxu1 %v4757_v45  ;;  %5245 = vmatprep.mubr.bf16.mxu1 %v10926_v10  ;;  %v4855_v45 = vunpack.c.l.s8.bf16 %v4663_v63 }
 0xce6   : > { %5300 = vmatpush1.bf16.msra.mxu0 %v4759_v17  ;;  %5331 = vmatprep.mubr.bf16.mxu0 %v10926_v10  ;;  %v4866_v17 = vunpack.c.h.s8.bf16 %v4662_v5  ;;  %v4712_v5 = vld [vmem:[%s9862_s7 + $0x338] sm:$0xff] }
 0xce7   : > { %5215 = vmatprep.subr.bf16.mxu1 %v4770_v19  ;;  %5301 = vmatprep.subr.bf16.mxu0 %v4772_v7  ;;  %v4868_v19 = vunpack.c.h.s8.bf16 %v4664_v50  ;;  %v4674_v7 = vld [vmem:[%s9862_s7 + $0x208] sm:$0xff]  ;;  %v4952_v2 = vunpack.c.l.s8.bf16 %v4712_v5 }
 0xce9   : > { %5216 = vmatpush1.bf16.msra.mxu1 %v4769_v61  ;;  %v4867_v61 = vunpack.c.h.s8.bf16 %v4663_v63 }
 0xcea   : > { %5302 = vmatpush1.bf16.msra.mxu0 %v4771_v44  ;;  %5217 = vmatprep.subr.bf16.mxu1 %v4782_v4  ;;  %v4878_v44 = vunpack.c.l.s8.bf16 %v4674_v7  ;;  %v4673_v4 = vld [vmem:[%s9862_s7 + $0x200] sm:$0xff] }
 0xceb   : > { %5303 = vmatprep.subr.bf16.mxu0 %v4784_v57  ;;  %v4675_v57 = vld [vmem:[%s9862_s7 + $0x210] sm:$0xff]  ;;  %v4877_v56 = vunpack.c.l.s8.bf16 %v4673_v4  ;;  %v4889_v43 = vunpack.c.h.s8.bf16 %v4673_v4 }
 0xced   : > { %5218 = vmatpush1.bf16.msra.mxu1 %v4781_v55  ;;  %v4879_v55 = vunpack.c.l.s8.bf16 %v4675_v57 }
 0xcee   : > { %5304 = vmatpush1.bf16.msra.mxu0 %v4783_v3  ;;  %5219 = vmatprep.subr.bf16.mxu1 %v4794_v62  ;;  %v4890_v3 = vunpack.c.h.s8.bf16 %v4674_v7  ;;  %v4892_v62 = vunpack.c.h.s8.bf16 %v4676_v48  ;;  %v4724_v7 = vld [vmem:[%s9862_s7 + $0x398] sm:$0xff] }
 0xcef   : > { %5305 = vmatprep.subr.bf16.mxu0 %v4796_v0  ;;  %v4686_v0 = vld [vmem:[%s9862_s7 + $0x268] sm:$0xff]  ;;  %v4976_v4 = vunpack.c.l.s8.bf16 %v4724_v7 }
 0xcf1   : > { %5220 = vmatpush1.bf16.msra.mxu1 %v4793_v27  ;;  %v4891_v27 = vunpack.c.h.s8.bf16 %v4675_v57 }
 0xcf2   : > { %5306 = vmatpush1.bf16.msra.mxu0 %v4795_v54  ;;  %5221 = vmatprep.subr.bf16.mxu1 %v4806_v6  ;;  %v4902_v54 = vunpack.c.l.s8.bf16 %v4686_v0  ;;  %v4685_v6 = vld [vmem:[%s9862_s7 + $0x260] sm:$0xff] }
 0xcf3   : > { %5307 = vmatprep.subr.bf16.mxu0 %v4808_v46  ;;  %v4687_v46 = vld [vmem:[%s9862_s7 + $0x270] sm:$0xff]  ;;  %v4901_v8 = vunpack.c.l.s8.bf16 %v4685_v6  ;;  %v4913_v12 = vunpack.c.h.s8.bf16 %v4685_v6 }
 0xcf5   : > { %5222 = vmatpush1.bf16.msra.mxu1 %v4805_v35  ;;  %v4903_v35 = vunpack.c.l.s8.bf16 %v4687_v46 }
 0xcf6   : > { %5308 = vmatpush1.bf16.msra.mxu0 %v4807_v13  ;;  %5223 = vmatprep.subr.bf16.mxu1 %v4818_v33  ;;  %v4914_v13 = vunpack.c.h.s8.bf16 %v4686_v0  ;;  %v4916_v33 = vunpack.c.h.s8.bf16 %v4688_v53  ;;  %v4736_v0 = vld [vmem:[%s9862_s7 + $0x3f8] sm:$0xff] }
 0xcf7   : > { %5309 = vmatprep.subr.bf16.mxu0 %v4820_v11  ;;  %v4698_v11 = vld [vmem:[%s9862_s7 + $0x2c8] sm:$0xff]  ;;  %v5000_v6 = vunpack.c.l.s8.bf16 %v4736_v0 }
 0xcf9   : > { %5224 = vmatpush1.bf16.msra.mxu1 %v4817_v24  ;;  %v4915_v24 = vunpack.c.h.s8.bf16 %v4687_v46 }
 0xcfa   : > { %5310 = vmatpush1.bf16.msra.mxu0 %v4819_v29  ;;  %5225 = vmatprep.subr.bf16.mxu1 %v4830_v28  ;;  %v4926_v29 = vunpack.c.l.s8.bf16 %v4698_v11  ;;  %v4697_v28 = vld [vmem:[%s9862_s7 + $0x2c0] sm:$0xff] }
 0xcfb   : > { %5311 = vmatprep.subr.bf16.mxu0 %v4832_v9  ;;  %v4699_v9 = vld [vmem:[%s9862_s7 + $0x2d0] sm:$0xff]  ;;  %v4925_v26 = vunpack.c.l.s8.bf16 %v4697_v28  ;;  %v4937_v50 = vunpack.c.h.s8.bf16 %v4697_v28 }
 0xcfd   : > { %5226 = vmatpush1.bf16.msra.mxu1 %v4829_v15  ;;  %v4927_v15 = vunpack.c.l.s8.bf16 %v4699_v9 }
 0xcfe   : > { %5312 = vmatpush1.bf16.msra.mxu0 %v4831_v36  ;;  %5227 = vmatprep.subr.bf16.mxu1 %v4842_v52  ;;  %v4938_v36 = vunpack.c.h.s8.bf16 %v4698_v11  ;;  %v4940_v52 = vunpack.c.h.s8.bf16 %v4700_v14  ;;  %v4748_v11 = vld [vmem:[%s9862_s7 + $0x458] sm:$0xff] }
 0xcff   : > { %5313 = vmatprep.subr.bf16.mxu0 %v4844_v39  ;;  %v4710_v39 = vld [vmem:[%s9862_s7 + $0x328] sm:$0xff]  ;;  %v5024_v28 = vunpack.c.l.s8.bf16 %v4748_v11 }
 0xd01   : > { %5228 = vmatpush1.bf16.msra.mxu1 %v4841_v25  ;;  %v4939_v25 = vunpack.c.h.s8.bf16 %v4699_v9 }
 0xd02   : > { %5314 = vmatpush1.bf16.msra.mxu0 %v4843_v41  ;;  %5229 = vmatprep.subr.bf16.mxu1 %v4854_v38  ;;  %v4950_v41 = vunpack.c.l.s8.bf16 %v4710_v39  ;;  %v4709_v38 = vld [vmem:[%s9862_s7 + $0x320] sm:$0xff] }
 0xd03   : > { %5315 = vmatprep.subr.bf16.mxu0 %v4856_v40  ;;  %v4711_v40 = vld [vmem:[%s9862_s7 + $0x330] sm:$0xff]  ;;  %v4949_v63 = vunpack.c.l.s8.bf16 %v4709_v38  ;;  %v4961_v48 = vunpack.c.h.s8.bf16 %v4709_v38 }
 0xd05   : > { %5230 = vmatpush1.bf16.msra.mxu1 %v4853_v42  ;;  %v4951_v42 = vunpack.c.l.s8.bf16 %v4711_v40 }
 0xd06   : > { %5316 = vmatpush1.bf16.msra.mxu0 %v4855_v45  ;;  %5231 = vmatprep.subr.bf16.mxu1 %v4866_v17  ;;  %v4962_v45 = vunpack.c.h.s8.bf16 %v4710_v39  ;;  %v4964_v17 = vunpack.c.h.s8.bf16 %v4712_v5  ;;  %v4620_v39 = vld [vmem:[%s9862_s7 + $0x58] sm:$0xff] }
 0xd07   : > { %5317 = vmatprep.subr.bf16.mxu0 %v4868_v19  ;;  %v4722_v19 = vld [vmem:[%s9862_s7 + $0x388] sm:$0xff]  ;;  %v4764_v38 = vunpack.c.l.s8.bf16 %v4620_v39 }
 0xd09   : > { %5232 = vmatpush1.bf16.msra.mxu1 %v4865_v20  ;;  %v4963_v20 = vunpack.c.h.s8.bf16 %v4711_v40 }
 0xd0a   : > { %5318 = vmatpush1.bf16.msra.mxu0 %v4867_v61  ;;  %5233 = vmatprep.subr.bf16.mxu1 %v4878_v44  ;;  %v4974_v61 = vunpack.c.l.s8.bf16 %v4722_v19  ;;  %v4721_v44 = vld [vmem:[%s9862_s7 + $0x380] sm:$0xff] }
 0xd0b   : > { %5319 = vmatprep.subr.bf16.mxu0 %v4880_v18  ;;  %v4723_v18 = vld [vmem:[%s9862_s7 + $0x390] sm:$0xff]  ;;  %v4973_v57 = vunpack.c.l.s8.bf16 %v4721_v44  ;;  %v4985_v53 = vunpack.c.h.s8.bf16 %v4721_v44 }
 0xd0d   : > { %5234 = vmatpush1.bf16.msra.mxu1 %v4877_v56  ;;  %v4975_v56 = vunpack.c.l.s8.bf16 %v4723_v18 }
 0xd0e   : > { %5320 = vmatpush1.bf16.msra.mxu0 %v4879_v55  ;;  %5235 = vmatprep.subr.bf16.mxu1 %v4890_v3  ;;  %v4986_v55 = vunpack.c.h.s8.bf16 %v4722_v19  ;;  %v4988_v3 = vunpack.c.h.s8.bf16 %v4724_v7  ;;  %v4632_v19 = vld [vmem:[%s9862_s7 + $0xb8] sm:$0xff] }
 0xd0f   : > { %5321 = vmatprep.subr.bf16.mxu0 %v4892_v62  ;;  %v4734_v62 = vld [vmem:[%s9862_s7 + $0x3e8] sm:$0xff]  ;;  %v4788_v44 = vunpack.c.l.s8.bf16 %v4632_v19 }
 0xd11   : > { %5236 = vmatpush1.bf16.msra.mxu1 %v4889_v43  ;;  %v4987_v43 = vunpack.c.h.s8.bf16 %v4723_v18 }
 0xd12   : > { %5322 = vmatpush1.bf16.msra.mxu0 %v4891_v27  ;;  %5237 = vmatprep.subr.bf16.mxu1 %v4902_v54  ;;  %v4998_v27 = vunpack.c.l.s8.bf16 %v4734_v62  ;;  %v4733_v54 = vld [vmem:[%s9862_s7 + $0x3e0] sm:$0xff] }
 0xd13   : > { %5323 = vmatprep.subr.bf16.mxu0 %v4904_v51  ;;  %v4735_v51 = vld [vmem:[%s9862_s7 + $0x3f0] sm:$0xff]  ;;  %v4997_v46 = vunpack.c.l.s8.bf16 %v4733_v54  ;;  %v5009_v14 = vunpack.c.h.s8.bf16 %v4733_v54 }
 0xd14   : > { %v4643_v54 = vld [vmem:[%s9862_s7 + $0x110] sm:$0xff] }
 0xd15   : > { %5238 = vmatpush1.bf16.msra.mxu1 %v4901_v8  ;;  %v4999_v8 = vunpack.c.l.s8.bf16 %v4735_v51 }
 0xd16   : > { %5324 = vmatpush1.bf16.msra.mxu0 %v4903_v35  ;;  %5239 = vmatprep.subr.bf16.mxu1 %v4914_v13  ;;  %v5010_v35 = vunpack.c.h.s8.bf16 %v4734_v62  ;;  %v5012_v13 = vunpack.c.h.s8.bf16 %v4736_v0  ;;  %v4644_v62 = vld [vmem:[%s9862_s7 + $0x118] sm:$0xff] }
 0xd17   : > { %5325 = vmatprep.subr.bf16.mxu0 %v4916_v33  ;;  %v4746_v33 = vld [vmem:[%s9862_s7 + $0x448] sm:$0xff] }
 0xd19   : > { %5240 = vmatpush1.bf16.msra.mxu1 %v4913_v12  ;;  %v5011_v12 = vunpack.c.h.s8.bf16 %v4735_v51  ;;  %v4811_v51 = vunpack.c.l.s8.bf16 %v4643_v54 }
 0xd1a   : > { %5326 = vmatpush1.bf16.msra.mxu0 %v4915_v24  ;;  %5241 = vmatprep.subr.bf16.mxu1 %v4926_v29  ;;  %v5022_v24 = vunpack.c.l.s8.bf16 %v4746_v33  ;;  %v4745_v29 = vld [vmem:[%s9862_s7 + $0x440] sm:$0xff] }
 0xd1b   : > { %5327 = vmatprep.subr.bf16.mxu0 %v4928_v47  ;;  %v4747_v47 = vld [vmem:[%s9862_s7 + $0x450] sm:$0xff]  ;;  %v5021_v9 = vunpack.c.l.s8.bf16 %v4745_v29  ;;  %v5033_v5 = vunpack.c.h.s8.bf16 %v4745_v29 }
 0xd1c   : > { %v4655_v29 = vld [vmem:[%s9862_s7 + $0x170] sm:$0xff] }
 0xd1d   : > { %5242 = vmatpush1.bf16.msra.mxu1 %v4925_v26  ;;  %v5023_v26 = vunpack.c.l.s8.bf16 %v4747_v47 }
 0xd1e   : > { %5328 = vmatpush1.bf16.msra.mxu0 %v4927_v15  ;;  %5243 = vmatprep.subr.bf16.mxu1 %v4938_v36  ;;  %v5034_v15 = vunpack.c.h.s8.bf16 %v4746_v33  ;;  %v5036_v36 = vunpack.c.h.s8.bf16 %v4748_v11  ;;  %v4823_v11 = vunpack.c.h.s8.bf16 %v4643_v54 }
 0xd1f   : > { %5329 = vmatprep.subr.bf16.mxu0 %v4940_v52  ;;  %v4618_v52 = vld [vmem:[%s9862_s7 + $0x48] sm:$0xff] }
 0xd21   : > { %5244 = vmatpush1.bf16.msra.mxu1 %v4937_v50  ;;  %v5035_v50 = vunpack.c.h.s8.bf16 %v4747_v47  ;;  %v4835_v47 = vunpack.c.l.s8.bf16 %v4655_v29 }
 0xd22   : > { %5330 = vmatpush1.bf16.msra.mxu0 %v4939_v25  ;;  %5256 = vmatprep.subr.bf16.mxu1 %v4950_v41  ;;  %v4762_v25 = vunpack.c.l.s8.bf16 %v4618_v52  ;;  %v4617_v41 = vld [vmem:[%s9862_s7 + $0x40] sm:$0xff] }
 0xd23   : > { %5342 = vmatprep.subr.bf16.mxu0 %v4952_v2  ;;  %v4619_v2 = vld [vmem:[%s9862_s7 + $0x50] sm:$0xff]  ;;  %v4761_v40 = vunpack.c.l.s8.bf16 %v4617_v41  ;;  %v4773_v7 = vunpack.c.h.s8.bf16 %v4617_v41 }
 0xd24   : > { %5246 = vmatmul.mubr.bf16.vlgmr.msra.gmra.mrb[44].mxu1 %v10928_v34  ;;  %v4667_v41 = vld [vmem:[%s9862_s7 + $0x1d0] sm:$0xff] }
 0xd25   : > { %5332 = vmatmul.mubr.bf16.vlgmr.msra.gmra.mrb[60].mxu0 %v10928_v34  ;;  %5257 = vmatpush1.bf16.msra.mxu1 %v4949_v63  ;;  %v4763_v63 = vunpack.c.l.s8.bf16 %v4619_v2 }
 0xd26   : > { %5343 = vmatpush1.bf16.msra.mxu0 %v4951_v42  ;;  %5258 = vmatprep.subr.bf16.mxu1 %v4962_v45  ;;  %v4774_v42 = vunpack.c.h.s8.bf16 %v4618_v52  ;;  %v4630_v45 = vld [vmem:[%s9862_s7 + $0xa8] sm:$0xff] }
 0xd27   : > { %5344 = vmatprep.subr.bf16.mxu0 %v4964_v17  ;;  %5288 = vmatprep.mubr.bf16.mxu1 %v9540_v49  ;;  %v4776_v17 = vunpack.c.h.s8.bf16 %v4620_v39  ;;  %v4847_v39 = vunpack.c.h.s8.bf16 %v4655_v29 }
 0xd28   : > { %5374 = vmatprep.mubr.bf16.mxu0 %v9540_v49 }
 0xd29   : > { %5259 = vmatpush1.bf16.msra.mxu1 %v4961_v48  ;;  %v4775_v48 = vunpack.c.h.s8.bf16 %v4619_v2  ;;  %v4859_v2 = vunpack.c.l.s8.bf16 %v4667_v41 }
 0xd2a   : > { %5345 = vmatpush1.bf16.msra.mxu0 %v4963_v20  ;;  %5260 = vmatprep.subr.bf16.mxu1 %v4974_v61  ;;  %v4786_v20 = vunpack.c.l.s8.bf16 %v4630_v45  ;;  %v4629_v61 = vld [vmem:[%s9862_s7 + $0xa0] sm:$0xff] }
 0xd2b   : > { %5346 = vmatprep.subr.bf16.mxu0 %v4976_v4  ;;  %v4631_v4 = vld [vmem:[%s9862_s7 + $0xb0] sm:$0xff]  ;;  %v4785_v18 = vunpack.c.l.s8.bf16 %v4629_v61  ;;  %v4797_v0 = vunpack.c.h.s8.bf16 %v4629_v61 }
 0xd2c   : > { %v4679_v61 = vld [vmem:[%s9862_s7 + $0x230] sm:$0xff] }
 0xd2d   : > { %5261 = vmatpush1.bf16.msra.mxu1 %v4973_v57  ;;  %v4787_v57 = vunpack.c.l.s8.bf16 %v4631_v4 }
 0xd2e   : > { %5347 = vmatpush1.bf16.msra.mxu0 %v4975_v56  ;;  %5262 = vmatprep.subr.bf16.mxu1 %v4986_v55  ;;  %v4798_v56 = vunpack.c.h.s8.bf16 %v4630_v45  ;;  %v4800_v55 = vunpack.c.h.s8.bf16 %v4632_v19  ;;  %v4680_v45 = vld [vmem:[%s9862_s7 + $0x238] sm:$0xff]  ;;  %v4871_v19 = vunpack.c.h.s8.bf16 %v4667_v41 }
 0xd2f   : > { %5348 = vmatprep.subr.bf16.mxu0 %v4988_v3  ;;  %v4642_v3 = vld [vmem:[%s9862_s7 + $0x108] sm:$0xff] }
 0xd31   : > { %5263 = vmatpush1.bf16.msra.mxu1 %v4985_v53  ;;  %v4810_v53 = vunpack.c.l.s8.bf16 %v4642_v3 }
 0xd32   : > { %5349 = vmatpush1.bf16.msra.mxu0 %v4987_v43  ;;  %5264 = vmatprep.subr.bf16.mxu1 %v4998_v27  ;;  %v4641_v43 = vld [vmem:[%s9862_s7 + $0x100] sm:$0xff]  ;;  %v4812_v27 = vunpack.c.l.s8.bf16 %v4644_v62 }
 0xd33   : > { %5350 = vmatprep.subr.bf16.mxu0 %v5000_v6  ;;  %v4809_v6 = vunpack.c.l.s8.bf16 %v4641_v43  ;;  %v4821_v33 = vunpack.c.h.s8.bf16 %v4641_v43  ;;  %v4691_v43 = vld [vmem:[%s9862_s7 + $0x290] sm:$0xff] }
 0xd34   : > { %v4907_v54 = vunpack.c.l.s8.bf16 %v4691_v43 }
 0xd35   : > { %5265 = vmatpush1.bf16.msra.mxu1 %v4997_v46  ;;  %v4822_v46 = vunpack.c.h.s8.bf16 %v4642_v3 }
 0xd36   : > { %5351 = vmatpush1.bf16.msra.mxu0 %v4999_v8  ;;  %5266 = vmatprep.subr.bf16.mxu1 %v5010_v35  ;;  %v4824_v8 = vunpack.c.h.s8.bf16 %v4644_v62  ;;  %v4654_v35 = vld [vmem:[%s9862_s7 + $0x168] sm:$0xff]  ;;  %v4895_v62 = vunpack.c.h.s8.bf16 %v4679_v61 }
 0xd37   : > { %5352 = vmatprep.subr.bf16.mxu0 %v5012_v13  ;;  %v4656_v13 = vld [vmem:[%s9862_s7 + $0x178] sm:$0xff] }
 0xd39   : > { %5267 = vmatpush1.bf16.msra.mxu1 %v5009_v14  ;;  %v4834_v14 = vunpack.c.l.s8.bf16 %v4654_v35 }
 0xd3a   : > { %5353 = vmatpush1.bf16.msra.mxu0 %v5011_v12  ;;  %5268 = vmatprep.subr.bf16.mxu1 %v5022_v24  ;;  %v4653_v12 = vld [vmem:[%s9862_s7 + $0x160] sm:$0xff]  ;;  %v4836_v24 = vunpack.c.l.s8.bf16 %v4656_v13 }
 0xd3b   : > { %5354 = vmatprep.subr.bf16.mxu0 %v5024_v28  ;;  %v4833_v28 = vunpack.c.l.s8.bf16 %v4653_v12  ;;  %v4845_v52 = vunpack.c.h.s8.bf16 %v4653_v12  ;;  %v4703_v12 = vld [vmem:[%s9862_s7 + $0x2f0] sm:$0xff] }
 0xd3c   : > { %v4931_v29 = vunpack.c.l.s8.bf16 %v4703_v12 }
 0xd3d   : > { %5269 = vmatpush1.bf16.msra.mxu1 %v5021_v9  ;;  %v4846_v9 = vunpack.c.h.s8.bf16 %v4654_v35 }
 0xd3e   : > { %5355 = vmatpush1.bf16.msra.mxu0 %v5023_v26  ;;  %5270 = vmatprep.subr.bf16.mxu1 %v5034_v15  ;;  %v4848_v26 = vunpack.c.h.s8.bf16 %v4656_v13  ;;  %v4666_v15 = vld [vmem:[%s9862_s7 + $0x1c8] sm:$0xff]  ;;  %v4919_v13 = vunpack.c.h.s8.bf16 %v4691_v43 }
 0xd3f   : > { %5356 = vmatprep.subr.bf16.mxu0 %v5036_v36  ;;  %v4668_v36 = vld [vmem:[%s9862_s7 + $0x1d8] sm:$0xff] }
 0xd41   : > { %5271 = vmatpush1.bf16.msra.mxu1 %v5033_v5  ;;  %v4858_v5 = vunpack.c.l.s8.bf16 %v4666_v15 }
 0xd42   : > { %5357 = vmatpush1.bf16.msra.mxu0 %v5035_v50  ;;  %5385 = vmatprep.subr.bf16.mxu1 %v4762_v25  ;;  %v4665_v50 = vld [vmem:[%s9862_s7 + $0x1c0] sm:$0xff]  ;;  %v4860_v25 = vunpack.c.l.s8.bf16 %v4668_v36 }
 0xd43   : > { %5471 = vmatprep.subr.bf16.mxu0 %v4764_v38  ;;  %v4857_v38 = vunpack.c.l.s8.bf16 %v4665_v50 }
 0xd44   : > { %5289 = vmatmul.mubr.bf16.vlgmr.msra.gmra.mrb[44].mxu1 %v10960_v16 }
 0xd45   : > { %5375 = vmatmul.mubr.bf16.vlgmr.msra.gmra.mrb[60].mxu0 %v10960_v16  ;;  %5386 = vmatpush1.bf16.msra.mxu1 %v4761_v40  ;;  %v4870_v40 = vunpack.c.h.s8.bf16 %v4666_v15 }
 0xd46   : > { %5417 = vmatprep.mubr.bf16.mxu1 %v10926_v10  ;;  %5472 = vmatpush1.bf16.msra.mxu0 %v4763_v63  ;;  %v4872_v63 = vunpack.c.h.s8.bf16 %v4668_v36  ;;  %v4943_v36 = vunpack.c.h.s8.bf16 %v4703_v12 }
 0xd47   : > { %5503 = vmatprep.mubr.bf16.mxu0 %v10926_v10  ;;  %5387 = vmatprep.subr.bf16.mxu1 %v4774_v42  ;;  %v4799_v10 = vunpack.c.h.s8.bf16 %v4631_v4  ;;  %v4678_v42 = vld [vmem:[%s9862_s7 + $0x228] sm:$0xff]  ;;  %v4883_v4 = vunpack.c.l.s8.bf16 %v4679_v61 }
 0xd48   : > { %5473 = vmatprep.subr.bf16.mxu0 %v4776_v17  ;;  %v4869_v17 = vunpack.c.h.s8.bf16 %v4665_v50  ;;  %v4715_v50 = vld [vmem:[%s9862_s7 + $0x350] sm:$0xff] }
 0xd49   : > { %5388 = vmatpush1.bf16.msra.mxu1 %v4773_v7  ;;  %v4882_v7 = vunpack.c.l.s8.bf16 %v4678_v42  ;;  %v4955_v41 = vunpack.c.l.s8.bf16 %v4715_v50 }
 0xd4a   : > { %5474 = vmatpush1.bf16.msra.mxu0 %v4775_v48  ;;  %5389 = vmatprep.subr.bf16.mxu1 %v4786_v20  ;;  %v4677_v48 = vld [vmem:[%s9862_s7 + $0x220] sm:$0xff]  ;;  %v4884_v20 = vunpack.c.l.s8.bf16 %v4680_v45 }
 0xd4b   : > { %5475 = vmatprep.subr.bf16.mxu0 %v4788_v44  ;;  %v4881_v44 = vunpack.c.l.s8.bf16 %v4677_v48  ;;  %v4893_v3 = vunpack.c.h.s8.bf16 %v4677_v48  ;;  %v4727_v48 = vld [vmem:[%s9862_s7 + $0x3b0] sm:$0xff] }
 0xd4d   : > { %5390 = vmatpush1.bf16.msra.mxu1 %v4785_v18  ;;  %v4894_v18 = vunpack.c.h.s8.bf16 %v4678_v42 }
 0xd4e   : > { %5476 = vmatpush1.bf16.msra.mxu0 %v4787_v57  ;;  %5391 = vmatprep.subr.bf16.mxu1 %v4798_v56  ;;  %v4896_v57 = vunpack.c.h.s8.bf16 %v4680_v45  ;;  %v4690_v56 = vld [vmem:[%s9862_s7 + $0x288] sm:$0xff]  ;;  %v4967_v45 = vunpack.c.h.s8.bf16 %v4715_v50  ;;  %v6605_v50 = vld [vmem:[%s9867_s2 + $0x20] sm:$0xff] }
 0xd4f   : > { %5477 = vmatprep.subr.bf16.mxu0 %v4800_v55  ;;  %v4692_v55 = vld [vmem:[%s9862_s7 + $0x298] sm:$0xff] }
 0xd51   : > { %5392 = vmatpush1.bf16.msra.mxu1 %v4797_v0  ;;  %v4906_v0 = vunpack.c.l.s8.bf16 %v4690_v56 }
 0xd52   : > { %5478 = vmatpush1.bf16.msra.mxu0 %v4799_v10  ;;  %5393 = vmatprep.subr.bf16.mxu1 %v4810_v53  ;;  %v4689_v10 = vld [vmem:[%s9862_s7 + $0x280] sm:$0xff]  ;;  %v4908_v53 = vunpack.c.l.s8.bf16 %v4692_v55 }
 0xd53   : > { %5479 = vmatprep.subr.bf16.mxu0 %v4812_v27  ;;  %v4905_v27 = vunpack.c.l.s8.bf16 %v4689_v10  ;;  %v4917_v35 = vunpack.c.h.s8.bf16 %v4689_v10 }
 0xd55   : > { %5394 = vmatpush1.bf16.msra.mxu1 %v4809_v6  ;;  %v4918_v6 = vunpack.c.h.s8.bf16 %v4690_v56  ;;  %v4991_v56 = vunpack.c.h.s8.bf16 %v4727_v48 }
 0xd56   : > { %5480 = vmatpush1.bf16.msra.mxu0 %v4811_v51  ;;  %5395 = vmatprep.subr.bf16.mxu1 %v4822_v46  ;;  %v4920_v51 = vunpack.c.h.s8.bf16 %v4692_v55  ;;  %v4702_v46 = vld [vmem:[%s9862_s7 + $0x2e8] sm:$0xff]  ;;  %v4737_v55 = vld [vmem:[%s9862_s7 + $0x400] sm:$0xff] }
 0xd57   : > { %5481 = vmatprep.subr.bf16.mxu0 %v4824_v8  ;;  %v4704_v8 = vld [vmem:[%s9862_s7 + $0x2f8] sm:$0xff] }
 0xd59   : > { %5396 = vmatpush1.bf16.msra.mxu1 %v4821_v33  ;;  %v4930_v33 = vunpack.c.l.s8.bf16 %v4702_v46 }
 0xd5a   : > { %5482 = vmatpush1.bf16.msra.mxu0 %v4823_v11  ;;  %5397 = vmatprep.subr.bf16.mxu1 %v4834_v14  ;;  %v4701_v11 = vld [vmem:[%s9862_s7 + $0x2e0] sm:$0xff]  ;;  %v4932_v14 = vunpack.c.l.s8.bf16 %v4704_v8 }
 0xd5b   : > { %5483 = vmatprep.subr.bf16.mxu0 %v4836_v24  ;;  %v4929_v24 = vunpack.c.l.s8.bf16 %v4701_v11  ;;  %v4941_v15 = vunpack.c.h.s8.bf16 %v4701_v11 }
 0xd5d   : > { %5398 = vmatpush1.bf16.msra.mxu1 %v4833_v28  ;;  %v4942_v28 = vunpack.c.h.s8.bf16 %v4702_v46 }
 0xd5e   : > { %5484 = vmatpush1.bf16.msra.mxu0 %v4835_v47  ;;  %5399 = vmatprep.subr.bf16.mxu1 %v4846_v9  ;;  %v4944_v47 = vunpack.c.h.s8.bf16 %v4704_v8  ;;  %v4714_v9 = vld [vmem:[%s9862_s7 + $0x348] sm:$0xff]  ;;  %v4749_v8 = vld [vmem:[%s9862_s7 + $0x460] sm:$0xff] }
 0xd5f   : > { %5485 = vmatprep.subr.bf16.mxu0 %v4848_v26  ;;  %v4716_v26 = vld [vmem:[%s9862_s7 + $0x358] sm:$0xff] }
 0xd61   : > { %5400 = vmatpush1.bf16.msra.mxu1 %v4845_v52  ;;  %v4954_v52 = vunpack.c.l.s8.bf16 %v4714_v9 }
 0xd62   : > { %5486 = vmatpush1.bf16.msra.mxu0 %v4847_v39  ;;  %5401 = vmatprep.subr.bf16.mxu1 %v4858_v5  ;;  %v4713_v39 = vld [vmem:[%s9862_s7 + $0x340] sm:$0xff]  ;;  %v4956_v5 = vunpack.c.l.s8.bf16 %v4716_v26 }
 0xd63   : > { %5487 = vmatprep.subr.bf16.mxu0 %v4860_v25  ;;  %v4953_v25 = vunpack.c.l.s8.bf16 %v4713_v39  ;;  %v4965_v42 = vunpack.c.h.s8.bf16 %v4713_v39 }
 0xd65   : > { %5402 = vmatpush1.bf16.msra.mxu1 %v4857_v38  ;;  %v4966_v38 = vunpack.c.h.s8.bf16 %v4714_v9 }
 0xd66   : > { %5488 = vmatpush1.bf16.msra.mxu0 %v4859_v2  ;;  %5403 = vmatprep.subr.bf16.mxu1 %v4870_v40  ;;  %v4968_v2 = vunpack.c.h.s8.bf16 %v4716_v26  ;;  %v4726_v40 = vld [vmem:[%s9862_s7 + $0x3a8] sm:$0xff]  ;;  %v6601_v26 = vld [vmem:[%s9867_s2] sm:$0xff] }
 0xd67   : > { %5489 = vmatprep.subr.bf16.mxu0 %v4872_v63  ;;  %v4728_v63 = vld [vmem:[%s9862_s7 + $0x3b8] sm:$0xff]  ;;  %v4990_v61 = vunpack.c.h.s8.bf16 %v4726_v40 }
 0xd69   : > { %5404 = vmatpush1.bf16.msra.mxu1 %v4869_v17  ;;  %v4978_v17 = vunpack.c.l.s8.bf16 %v4726_v40  ;;  %v6604_v40 = vld [vmem:[%s9867_s2 + $0x18] sm:$0xff] }
 0xd6a   : > { %5490 = vmatpush1.bf16.msra.mxu0 %v4871_v19  ;;  %5405 = vmatprep.subr.bf16.mxu1 %v4882_v7  ;;  %v4725_v19 = vld [vmem:[%s9862_s7 + $0x3a0] sm:$0xff]  ;;  %v4980_v7 = vunpack.c.l.s8.bf16 %v4728_v63 }
 0xd6b   : > { %5491 = vmatprep.subr.bf16.mxu0 %v4884_v20  ;;  %v4977_v20 = vunpack.c.l.s8.bf16 %v4725_v19 }
 0xd6d   : > { %5406 = vmatpush1.bf16.msra.mxu1 %v4881_v44  ;;  %v4992_v44 = vunpack.c.h.s8.bf16 %v4728_v63 }
 0xd6e   : > { %5492 = vmatpush1.bf16.msra.mxu0 %v4883_v4  ;;  %5407 = vmatprep.subr.bf16.mxu1 %v4894_v18  ;;  %v4738_v4 = vld [vmem:[%s9862_s7 + $0x408] sm:$0xff]  ;;  %v4740_v18 = vld [vmem:[%s9862_s7 + $0x418] sm:$0xff] }
 0xd6f   : > { %5493 = vmatprep.subr.bf16.mxu0 %v4896_v57  ;;  %v4989_v57 = vunpack.c.h.s8.bf16 %v4725_v19  ;;  %v5016_v43 = vunpack.c.h.s8.bf16 %v4740_v18  ;;  %v6755_v19 = vunpack.c.h.s8.bf16 %v6605_v50 }
 0xd71   : > { %5408 = vmatpush1.bf16.msra.mxu1 %v4893_v3  ;;  %v5004_v3 = vunpack.c.l.s8.bf16 %v4740_v18 }
 0xd72   : > { %5494 = vmatpush1.bf16.msra.mxu0 %v4895_v62  ;;  %5409 = vmatprep.subr.bf16.mxu1 %v4906_v0  ;;  %v4739_v62 = vld [vmem:[%s9862_s7 + $0x410] sm:$0xff]  ;;  %v5001_v0 = vunpack.c.l.s8.bf16 %v4737_v55 }
 0xd73   : > { %5495 = vmatprep.subr.bf16.mxu0 %v4908_v53  ;;  %v5003_v10 = vunpack.c.l.s8.bf16 %v4739_v62  ;;  %v5014_v53 = vunpack.c.h.s8.bf16 %v4738_v4 }
 0xd75   : > { %5410 = vmatpush1.bf16.msra.mxu1 %v4905_v27  ;;  %v4750_v27 = vld [vmem:[%s9862_s7 + $0x468] sm:$0xff] }
 0xd76   : > { %5496 = vmatpush1.bf16.msra.mxu0 %v4907_v54  ;;  %5411 = vmatprep.subr.bf16.mxu1 %v4918_v6  ;;  %v4752_v54 = vld [vmem:[%s9862_s7 + $0x478] sm:$0xff]  ;;  %v5013_v6 = vunpack.c.h.s8.bf16 %v4737_v55  ;;  %v5026_v46 = vunpack.c.l.s8.bf16 %v4750_v27  ;;  %v11088_v55 = vsub.s32 3, %v10024_v21 }
 0xd77   : > { %5497 = vmatprep.subr.bf16.mxu0 %v4920_v51  ;;  %v5015_v51 = vunpack.c.h.s8.bf16 %v4739_v62  ;;  %v5040_v12 = vunpack.c.h.s8.bf16 %v4752_v54 }
 0xd79   : > { %5412 = vmatpush1.bf16.msra.mxu1 %v4917_v35  ;;  %v5028_v35 = vunpack.c.l.s8.bf16 %v4752_v54 }
 0xd7a   : > { %5498 = vmatpush1.bf16.msra.mxu0 %v4919_v13  ;;  %5413 = vmatprep.subr.bf16.mxu1 %v4930_v33  ;;  %v4751_v13 = vld [vmem:[%s9862_s7 + $0x470] sm:$0xff]  ;;  %v5025_v33 = vunpack.c.l.s8.bf16 %v4749_v8  ;;  %s13237_s7 = sld [smem:[#allocation51_spill]] (!%p8232_p4) }
 0xd7b   : > { %5499 = vmatprep.subr.bf16.mxu0 %v4932_v14  ;;  %v5027_v11 = vunpack.c.l.s8.bf16 %v4751_v13  ;;  %v5038_v14 = vunpack.c.h.s8.bf16 %v4750_v27  ;;  %v9346_v27 = vld [vmem:[%s9838_s9 + $0x10] sm:$0xff] }
 0xd7d   : > { %5414 = vmatpush1.bf16.msra.mxu1 %v4929_v24  ;;  %v6602_v24 = vld [vmem:[%s9867_s2 + $0x8] sm:$0xff] }
 0xd7e   : > { %5500 = vmatpush1.bf16.msra.mxu0 %v4931_v29  ;;  %5415 = vmatprep.subr.bf16.mxu1 %v4942_v28  ;;  %v6615_v29 = vld [vmem:[%s9867_s2 + $0x70] sm:$0xff]  ;;  %v5037_v28 = vunpack.c.h.s8.bf16 %v4749_v8  ;;  %v6746_v9 = vunpack.c.l.s8.bf16 %v6602_v24  ;;  %v6749_v39 = vunpack.c.h.s8.bf16 %v6602_v24 }
 0xd7f   : > { %5501 = vmatprep.subr.bf16.mxu0 %v4944_v47  ;;  %v5039_v47 = vunpack.c.h.s8.bf16 %v4751_v13 }
 0xd81   : > { %5416 = vmatpush1.bf16.msra.mxu1 %v4941_v15  ;;  %v6771_v15 = vunpack.c.l.s8.bf16 %v6615_v29 }
 0xd82   : > { %5502 = vmatpush1.bf16.msra.mxu0 %v4943_v36  ;;  %5428 = vmatprep.subr.bf16.mxu1 %v4954_v52  ;;  %v6603_v36 = vld [vmem:[%s9867_s2 + $0x10] sm:$0xff]  ;;  %v6745_v52 = vunpack.c.l.s8.bf16 %v6601_v26 }
 0xd83   : > { %5514 = vmatprep.subr.bf16.mxu0 %v4956_v5  ;;  %v6747_v5 = vunpack.c.l.s8.bf16 %v6603_v36  ;;  %v6750_v63 = vunpack.c.h.s8.bf16 %v6603_v36 }
 0xd84   : > { %5418 = vmatmul.mubr.bf16.vlgmr.msra.gmra.mrb[48].mxu1 %v10928_v34 }
 0xd85   : > { %5504 = vmatmul.mubr.bf16.vlgmr.msra.gmra.mrb[64].mxu0 %v10928_v34  ;;  %5429 = vmatpush1.bf16.msra.mxu1 %v4953_v25  ;;  %v4979_v34 = vunpack.c.l.s8.bf16 %v4727_v48  ;;  %v6774_v25 = vunpack.c.h.s8.bf16 %v6615_v29 }
 0xd86   : > { %5515 = vmatpush1.bf16.msra.mxu0 %v4955_v41  ;;  %5430 = vmatprep.subr.bf16.mxu1 %v4966_v38  ;;  %v6618_v41 = vld [vmem:[%s9867_s2 + $0x88] sm:$0xff]  ;;  %v6748_v38 = vunpack.c.h.s8.bf16 %v6601_v26 }
 0xd87   : > { %5516 = vmatprep.subr.bf16.mxu0 %v4968_v2  ;;  %5460 = vmatprep.mubr.bf16.mxu1 %v9540_v49  ;;  %v6752_v2 = vunpack.c.l.s8.bf16 %v6605_v50  ;;  %v6780_v48 = vunpack.c.h.s8.bf16 %v6618_v41 }
 0xd88   : > { %5546 = vmatprep.mubr.bf16.mxu0 %v9540_v49  ;;  %v5002_v49 = vunpack.c.l.s8.bf16 %v4738_v4 }
 0xd89   : > { %5431 = vmatpush1.bf16.msra.mxu1 %v4965_v42  ;;  %v6777_v42 = vunpack.c.l.s8.bf16 %v6618_v41 }
 0xd8a   : > { %5517 = vmatpush1.bf16.msra.mxu0 %v4967_v45  ;;  %5432 = vmatprep.subr.bf16.mxu1 %v4978_v17  ;;  %v6606_v45 = vld [vmem:[%s9867_s2 + $0x28] sm:$0xff]  ;;  %v6751_v17 = vunpack.c.l.s8.bf16 %v6604_v40 }
 0xd8b   : > { %5518 = vmatprep.subr.bf16.mxu0 %v4980_v7  ;;  %v6608_v7 = vld [vmem:[%s9867_s2 + $0x38] sm:$0xff]  ;;  %v6756_v4 = vunpack.c.h.s8.bf16 %v6606_v45 }
 0xd8d   : > { %5433 = vmatpush1.bf16.msra.mxu1 %v4977_v20  ;;  %v6621_v20 = vld [vmem:[%s9867_s2 + $0xa0] sm:$0xff] }
 0xd8e   : > { %5519 = vmatpush1.bf16.msra.mxu0 %v4979_v34  ;;  %5434 = vmatprep.subr.bf16.mxu1 %v4990_v61  ;;  %v6754_v34 = vunpack.c.h.s8.bf16 %v6604_v40  ;;  %v6758_v61 = vunpack.c.l.s8.bf16 %v6608_v7  ;;  %v6783_v18 = vunpack.c.l.s8.bf16 %v6621_v20 }
 0xd8f   : > { %5520 = vmatprep.subr.bf16.mxu0 %v4992_v44  ;;  %v6607_v44 = vld [vmem:[%s9867_s2 + $0x30] sm:$0xff] }
 0xd90   : > { %v6760_v8 = vunpack.c.h.s8.bf16 %v6607_v44 }
 0xd91   : > { %5435 = vmatpush1.bf16.msra.mxu1 %v4989_v57  ;;  %v6609_v57 = vld [vmem:[%s9867_s2 + $0x40] sm:$0xff] }
 0xd92   : > { %5521 = vmatpush1.bf16.msra.mxu0 %v4991_v56  ;;  %5436 = vmatprep.subr.bf16.mxu1 %v5002_v49  ;;  %v11085_v56 = vsub.s32 5, %v10024_v21  ;;  %v6757_v49 = vunpack.c.l.s8.bf16 %v6607_v44  ;;  %v6759_v62 = vunpack.c.l.s8.bf16 %v6609_v57 }
 0xd93   : > { %5522 = vmatprep.subr.bf16.mxu0 %v5004_v3  ;;  %v6761_v3 = vunpack.c.h.s8.bf16 %v6608_v7 }
 0xd94   : > { %v11095_v54 = vrot.slane %v9346_v27, %v11085_v56 }
 0xd95   : > { %5437 = vmatpush1.bf16.msra.mxu1 %v5001_v0  ;;  %v6611_v0 = vld [vmem:[%s9867_s2 + $0x50] sm:$0xff] }
 0xd96   : > { %5523 = vmatpush1.bf16.msra.mxu0 %v5003_v10  ;;  %5438 = vmatprep.subr.bf16.mxu1 %v5014_v53  ;;  %v6786_v10 = vunpack.c.h.s8.bf16 %v6621_v20  ;;  %v9345_v53 = vld [vmem:[%s9838_s9] sm:$0xff] }
 0xd97   : > { %5524 = vmatprep.subr.bf16.mxu0 %v5016_v43  ;;  %v5560_v43 = vrot.slane %v9345_v53, %v11085_v56  ;;  %v11107_v13 = vrot.slane %v9345_v53, %v11088_v55 }
 0xd99   : > { %5439 = vmatpush1.bf16.msra.mxu1 %v5013_v6  ;;  %v9347_v6 = vld [vmem:[%s9838_s9 + $0x8] sm:$0xff] }
 0xd9a   : > { %5525 = vmatpush1.bf16.msra.mxu0 %v5015_v51  ;;  %5440 = vmatprep.subr.bf16.mxu1 %v5026_v46  ;;  %v11099_v21 = vrot.slane %v9347_v6, %v11085_v56  ;;  %v9348_v51 = vld [vmem:[%s9838_s9 + $0x18] sm:$0xff]  ;;  %v11114_v29 = vrot.slane %v9347_v6, %v11088_v55 }
 0xd9b   : > { %5526 = vmatprep.subr.bf16.mxu0 %v5028_v35  ;;  %v11103_v46 = vrot.slane %v9348_v51, %v11085_v56  ;;  %v6624_v35 = vld [vmem:[%s9867_s2 + $0xb8] sm:$0xff] }
 0xd9d   : > { %5441 = vmatpush1.bf16.msra.mxu1 %v5025_v33  ;;  %v11110_v33 = vrot.slane %v9346_v27, %v11088_v55 }
 0xd9e   : > { %5527 = vmatpush1.bf16.msra.mxu0 %v5027_v11  ;;  %5442 = vmatprep.subr.bf16.mxu1 %v5038_v14  ;;  %v6764_v11 = vunpack.c.l.s8.bf16 %v6611_v0  ;;  %v6610_v14 = vld [vmem:[%s9867_s2 + $0x48] sm:$0xff] }
 0xd9f   : > { %5528 = vmatprep.subr.bf16.mxu0 %v5040_v12 }
 0xda1   : > { %5443 = vmatpush1.bf16.msra.mxu1 %v5037_v28  ;;  %v11117_v28 = vrot.slane %v9348_v51, %v11088_v55 }
 0xda2   : > { %5529 = vmatpush1.bf16.msra.mxu0 %v5039_v47  ;;  %7033 = vmatprep.subr.bf16.mxu1 %v6746_v9  ;;  %v6762_v47 = vunpack.c.h.s8.bf16 %v6609_v57 }
 0xda3   : > { %8397 = vmatprep.subr.bf16.mxu0 %v6771_v15 }
 0xda4   : > { %5461 = vmatmul.mubr.bf16.vlgmr.msra.gmra.mrb[48].mxu1 %v10960_v16 }
 0xda5   : > { %5547 = vmatmul.mubr.bf16.vlgmr.msra.gmra.mrb[64].mxu0 %v10960_v16  ;;  %7034 = vmatpush1.bf16.msra.mxu1 %v6745_v52  ;;  %v6753_v16 = vunpack.c.l.s8.bf16 %v6606_v45  ;;  %v6789_v52 = vunpack.c.l.s8.bf16 %v6624_v35  ;;  %v6767_v45 = vunpack.c.h.s8.bf16 %v6611_v0 }
 0xda6   : > { %7035 = vmatprep.subr.bf16.mxu1 %v6749_v39  ;;  %8398 = vmatpush3.bf16.msra.mxu0 %v6747_v5  ;;  %v6612_v39 = vld [vmem:[%s9867_s2 + $0x58] sm:$0xff] }
 0xda7   : > { %8399 = vmatprep.subr.bf16.mxu0 %v6774_v25  ;;  %v6765_v7 = vunpack.c.l.s8.bf16 %v6612_v39  ;;  %v6768_v0 = vunpack.c.h.s8.bf16 %v6612_v39 }
 0xda9   : > { %7036 = vmatpush1.bf16.msra.mxu1 %v6748_v38  ;;  %v6763_v38 = vunpack.c.l.s8.bf16 %v6610_v14 }
 0xdaa   : > { %7037 = vmatprep.subr.bf16.mxu1 %v6752_v2  ;;  %8400 = vmatpush3.bf16.msra.mxu0 %v6750_v63 }
 0xdab   : > { %8401 = vmatprep.subr.bf16.mxu0 %v6777_v42 }
 0xdad   : > { %7038 = vmatpush1.bf16.msra.mxu1 %v6751_v17 }
 0xdae   : > { %7039 = vmatprep.subr.bf16.mxu1 %v6755_v19  ;;  %8402 = vmatpush3.bf16.msra.mxu0 %v6753_v16  ;;  %v6614_v16 = vld [vmem:[%s9867_s2 + $0x68] sm:$0xff] }
 0xdaf   : > { %8403 = vmatprep.subr.bf16.mxu0 %v6780_v48 }
 0xdb1   : > { %7040 = vmatpush1.bf16.msra.mxu1 %v6754_v34  ;;  %v6792_v34 = vunpack.c.h.s8.bf16 %v6624_v35 }
 0xdb2   : > { %7041 = vmatprep.subr.bf16.mxu1 %v6758_v61  ;;  %8404 = vmatpush3.bf16.msra.mxu0 %v6756_v4  ;;  %v11143_v61 = vld [vmem:[%s9867_s2 + $0x130] sm:$0xff] }
 0xdb3   : > { %8405 = vmatprep.subr.bf16.mxu0 %v6783_v18  ;;  %v6766_v18 = vunpack.c.h.s8.bf16 %v6610_v14  ;;  %v6819_v6 = vunpack.c.l.s8.bf16 %v11143_v61 }
 0xdb5   : > { %7042 = vmatpush1.bf16.msra.mxu1 %v6757_v49 }
 0xdb6   : > { %7043 = vmatprep.subr.bf16.mxu1 %v6761_v3  ;;  %8406 = vmatpush3.bf16.msra.mxu0 %v6759_v62  ;;  %v6770_v3 = vunpack.c.l.s8.bf16 %v6614_v16  ;;  %v6613_v62 = vld [vmem:[%s9867_s2 + $0x60] sm:$0xff] }
 0xdb7   : > { %v5118_v12 = vpop.f32.mrb[40].mxu1  ;;  %v5204_v24 = vpop.f32.mrb[56].mxu0  ;;  %8407 = vmatprep.subr.bf16.mxu0 %v6786_v10 }
 0xdb8   : > { %v5605_v9 = vmul.f32 %v5560_v43, %v5118_v12  ;;  %v5607_v26 = vmul.f32 %v11095_v54, %v5204_v24  ;;  %v5120_v15 = vpop.f32.mrb[41].mxu1  ;;  %v5206_v36 = vpop.f32.mrb[57].mxu0 }
 0xdb9   : > { %v5606_v5 = vmul.f32 %v11099_v21, %v5120_v15  ;;  %v5608_v50 = vmul.f32 %v11103_v46, %v5206_v36  ;;  %v5122_v25 = vpop.f32.mrb[42].mxu1  ;;  %v5208_v41 = vpop.f32.mrb[58].mxu0  ;;  %7044 = vmatpush1.bf16.msra.mxu1 %v6760_v8 }
 0xdba   : > { %v11124_v2 = vadd.f32 %v11107_v13, %v5605_v9  ;;  %v11127_v40 = vadd.f32 %v11110_v33, %v5607_v26  ;;  %v5124_v63 = vpop.f32.mrb[43].mxu1  ;;  %v5210_v42 = vpop.f32.mrb[59].mxu0  ;;  %7045 = vmatprep.subr.bf16.mxu1 %v6764_v11  ;;  %8408 = vmatpush3.bf16.msra.mxu0 %v6762_v47  ;;  %v5617_v27 = vmul.f32 %v5560_v43, %v5122_v25  ;;  %v6769_v43 = vunpack.c.l.s8.bf16 %v6613_v62 }
 0xdbb   : > { %v11130_v17 = vadd.f32 %v11114_v29, %v5606_v5  ;;  %v11133_v19 = vadd.f32 %v11117_v28, %v5608_v50  ;;  %8409 = vmatprep.subr.bf16.mxu0 %v6789_v52  ;;  %v5619_v35 = vmul.f32 %v11095_v54, %v5208_v41  ;;  %v5618_v11 = vmul.f32 %v11099_v21, %v5124_v63  ;;  %v6617_v52 = vld [vmem:[%s9867_s2 + $0x80] sm:$0xff] }
 0xdbc   : > { %v11137_v48 = vmul.f32 0.70710677, %v11124_v2  ;;  %v11140_v20 = vmul.f32 0.70710677, %v11127_v40  ;;  %v5620_v24 = vmul.f32 %v11103_v46, %v5210_v42  ;;  %v6773_v26 = vunpack.c.h.s8.bf16 %v6614_v16  ;;  %v11211_v16 = vld [vmem:[%s9867_s2 + $0x90] sm:$0xff] }
 0xdbd   : > { %v11146_v44 = vmul.f32 0.70710677, %v11130_v17  ;;  %v11149_v4 = vmul.f32 0.70710677, %v11133_v19  ;;  %7046 = vmatpush1.bf16.msra.mxu1 %v6763_v38  ;;  %v11174_v54 = vadd.f32 %v11107_v13, %v5617_v27  ;;  %v11177_v21 = vadd.f32 %v11110_v33, %v5619_v35  ;;  %v6616_v33 = vld [vmem:[%s9867_s2 + $0x78] sm:$0xff]  ;;  %v11220_v27 = vld [vmem:[%s9867_s2 + $0xb0] sm:$0xff] }
 0xdbe   : > { %v11152_v57 = vand.u32 2147483647, %v11137_v48  ;;  %v11155_v49 = vand.u32 2147483647, %v11140_v20  ;;  %7047 = vmatprep.subr.bf16.mxu1 %v6767_v45  ;;  %8410 = vmatpush3.bf16.msra.mxu0 %v6765_v7  ;;  %v11180_v46 = vadd.f32 %v11114_v29, %v5618_v11  ;;  %v11183_v39 = vadd.f32 %v11117_v28, %v5620_v24  ;;  %v11208_v45 = vld [vmem:[%s9867_s2 + $0x98] sm:$0xff] }
 0xdbf   : > { %v11159_v10 = vand.u32 2147483647, %v11146_v44  ;;  %v11162_v53 = vand.u32 2147483647, %v11149_v4  ;;  %8411 = vmatprep.subr.bf16.mxu0 %v6792_v34  ;;  %v6772_v5 = vunpack.c.h.s8.bf16 %v6613_v62  ;;  %v11186_v50 = vmul.f32 0.70710677, %v11174_v54 }
 0xdc0   : > { %v5773_v51 = vmul.f32 0.5, %v11152_v57  ;;  %v5775_v8 = vmul.f32 0.5, %v11155_v49  ;;  %v6776_v13 = vunpack.c.l.s8.bf16 %v6617_v52  ;;  %v11190_v29 = vmul.f32 0.70710677, %v11177_v21 }
 0xdc1   : > { %v5774_v14 = vmul.f32 0.5, %v11159_v10  ;;  %v5776_v12 = vmul.f32 0.5, %v11162_v53  ;;  %7048 = vmatpush1.bf16.msra.mxu1 %v6766_v18  ;;  %v11193_v25 = vmul.f32 0.70710677, %v11180_v46  ;;  %v11196_v28 = vand.u32 2147483647, %v11186_v50 }
 0xdc2   : > { %v5797_v47 = vadd.f32 1.0, %v5773_v51  ;;  %v5799_v9 = vadd.f32 1.0, %v5775_v8  ;;  %7049 = vmatprep.subr.bf16.mxu1 %v6770_v3  ;;  %8412 = vmatpush3.bf16.msra.mxu0 %v6768_v0  ;;  %v11199_v41 = vmul.f32 0.70710677, %v11183_v39  ;;  %v11202_v38 = vand.u32 2147483647, %v11190_v29 }
 0xdc3   : > { %v5798_v15 = vadd.f32 1.0, %v5774_v14  ;;  %v5800_v36 = vadd.f32 1.0, %v5776_v12  ;;  %8419 = vmatprep.subr.bf16.mxu0 %v6819_v6  ;;  %v11205_v63 = vand.u32 2147483647, %v11193_v25  ;;  %v6775_v42 = vunpack.c.l.s8.bf16 %v6616_v33  ;;  %v11223_v6 = vld [vmem:[%s9867_s2 + $0xa8] sm:$0xff] }
 0xdc4   : > { %9230 = vrcp.f32 %v5797_v47  ;;  %v5785_v7 = vmul.f32 0.5, %v11196_v28  ;;  %v11215_v34 = vand.u32 2147483647, %v11199_v41  ;;  %v6779_v18 = vunpack.c.h.s8.bf16 %v6617_v52  ;;  %v11231_v47 = vld [vmem:[%s9867_s2 + $0xc8] sm:$0xff] }
 0xdc5   : > { %9232 = vrcp.f32 %v5799_v9  ;;  %7050 = vmatpush1.bf16.msra.mxu1 %v6769_v43  ;;  %v5787_v3 = vmul.f32 0.5, %v11202_v38  ;;  %v5786_v62 = vmul.f32 0.5, %v11205_v63  ;;  %v6778_v0 = vunpack.c.h.s8.bf16 %v6616_v33  ;;  %v11234_v9 = vld [vmem:[%s9867_s2 + $0xc0] sm:$0xff] }
 0xdc6   : > { %9234 = vrcp.f32 %v5798_v15  ;;  %7051 = vmatprep.subr.bf16.mxu1 %v6773_v26  ;;  %v5809_v51 = vadd.f32 1.0, %v5785_v7  ;;  %v5788_v8 = vmul.f32 0.5, %v11215_v34  ;;  %v6782_v35 = vunpack.c.l.s8.bf16 %v11208_v45 }
 0xdc7   : > { %9236 = vrcp.f32 %v5800_v36  ;;  %v6781_v11 = vunpack.c.l.s8.bf16 %v11211_v16  ;;  %v5811_v14 = vadd.f32 1.0, %v5787_v3  ;;  %v5810_v12 = vadd.f32 1.0, %v5786_v62 }
 0xdc8   : > { %v6785_v24 = vunpack.c.h.s8.bf16 %v11208_v45  ;;  %9238 = vrcp.f32 %v5809_v51  ;;  %v5812_v15 = vadd.f32 1.0, %v5788_v8  ;;  %v6788_v36 = vunpack.c.l.s8.bf16 %v11220_v27 }
 0xdc9   : > { %7052 = vmatpush1.bf16.msra.mxu1 %v6772_v5  ;;  %v11241_v5 = vld [vmem:[%s9867_s2 + $0xd0] sm:$0xff]  ;;  %9240 = vrcp.f32 %v5811_v14  ;;  %v6301_v43 = vsub.f32 0.0, %v11152_v57  ;;  %v6304_v14 = vsub.f32 0.0, %v11162_v53  ;;  %v13045_v37 = vunpack.c.l.s8.bf16 %v11223_v6 }
 0xdca   : > { %7053 = vmatprep.subr.bf16.mxu1 %v6776_v13  ;;  %9242 = vrcp.f32 %v5810_v12  ;;  %v9349_v12 = vld [vmem:[%s9838_s9 + $0x20] sm:$0xff]  ;;  %vm6469_vm13 = vcmp.ge.f32.partialorder %v11137_v48, 0.0  ;;  %vm6471_vm14 = vcmp.ge.f32.partialorder %v11140_v20, 0.0  ;;  %vm6470_vm15 = vcmp.ge.f32.partialorder %v11146_v44, 0.0 }
 0xdcb   : > { %9244 = vrcp.f32 %v5812_v15  ;;  %v6302_v15 = vsub.f32 0.0, %v11159_v10  ;;  %vm6472_vm0 = vcmp.ge.f32.partialorder %v11149_v4, 0.0  ;;  %v5704_v44 = vmul.f32 0.5, %v11133_v19 }
 0xdcc   : > { %vm6481_vm2 = vcmp.ge.f32.partialorder %v11186_v50, 0.0  ;;  %vm6483_vm3 = vcmp.ge.f32.partialorder %v11190_v29, 0.0  ;;  %vm6482_vm4 = vcmp.ge.f32.partialorder %v11193_v25, 0.0  ;;  %vm6484_vm5 = vcmp.ge.f32.partialorder %v11199_v41, 0.0 }
 0xdcd   : > { %7054 = vmatpush1.bf16.msra.mxu1 %v6775_v42 }
 0xdce   : > { %v11236_v26 = vpop.eup %9230  ;;  %7055 = vmatprep.subr.bf16.mxu1 %v6779_v18  ;;  %v11269_v18 = vrot.slane %v9349_v12, %v11085_v56 }
 0xdcf   : > { %v11243_v13 = vpop.eup %9232  ;;  %v5869_v33 = vmul.f32 0.17087276, %v11236_v26 }
 0xdd0   : > { %v11248_v7 = vpop.eup %9234  ;;  %v5871_v3 = vmul.f32 0.17087276, %v11243_v13 }
 0xdd1   : > { %v11253_v51 = vpop.eup %9236  ;;  %v5893_v8 = vadd.f32 -0.82215226, %v5869_v33  ;;  %v5870_v52 = vmul.f32 0.17087276, %v11248_v7  ;;  %7056 = vmatpush1.bf16.msra.mxu1 %v6778_v0  ;;  %v6303_v33 = vsub.f32 0.0, %v11155_v49 }
 0xdd2   : > { %v5895_v42 = vadd.f32 -0.82215226, %v5871_v3  ;;  %v5872_v45 = vmul.f32 0.17087276, %v11253_v51  ;;  %7057 = vmatprep.subr.bf16.mxu1 %v6782_v35  ;;  %v11284_v32 = vpop.eup %9238 }
 0xdd3   : > { %v5917_v62 = vmul.f32 %v11236_v26, %v5893_v8  ;;  %v5894_v22 = vadd.f32 -0.82215226, %v5870_v52  ;;  %v11272_v8 = vrot.slane %v9349_v12, %v11088_v55 }
 0xdd4   : > { %v5919_v0 = vmul.f32 %v11243_v13, %v5895_v42  ;;  %v5896_v3 = vadd.f32 -0.82215226, %v5872_v45  ;;  %v11293_v45 = vpop.eup %9240 }
 0xdd5   : > { %v5941_v31 = vadd.f32 1.4885159, %v5917_v62  ;;  %v5918_v35 = vmul.f32 %v11248_v7, %v5894_v22  ;;  %7058 = vmatpush1.bf16.msra.mxu1 %v6781_v11  ;;  %v11279_v22 = vmul.f32 %v6301_v43, %v11152_v57  ;;  %v11282_v11 = vmul.f32 %v6303_v33, %v11155_v49 }
 0xdd6   : > { %v5943_v59 = vadd.f32 1.4885159, %v5919_v0  ;;  %v5920_v52 = vmul.f32 %v11253_v51, %v5896_v3  ;;  %7059 = vmatprep.subr.bf16.mxu1 %v6785_v24  ;;  %v11288_v0 = vmul.f32 %v6302_v15, %v11159_v10  ;;  %v11291_v3 = vmul.f32 %v6304_v14, %v11162_v53 }
 0xdd7   : > { %v5965_v62 = vmul.f32 %v11236_v26, %v5941_v31  ;;  %v5942_v60 = vadd.f32 1.4885159, %v5918_v35  ;;  %v5881_v49 = vmul.f32 0.17087276, %v11284_v32  ;;  %v13044_v33 = vunpack.c.h.s8.bf16 %v11211_v16 }
 0xdd8   : > { %v5967_v12 = vmul.f32 %v11243_v13, %v5943_v59  ;;  %v5944_v24 = vadd.f32 1.4885159, %v5920_v52  ;;  %v11300_v59 = vpop.eup %9242  ;;  %v5883_v53 = vmul.f32 0.17087276, %v11293_v45 }
 0xdd9   : > { %v5989_v31 = vadd.f32 -1.135204, %v5965_v62  ;;  %v5966_v57 = vmul.f32 %v11248_v7, %v5942_v60  ;;  %7060 = vmatpush1.bf16.msra.mxu1 %v13044_v33  ;;  %v11305_v35 = vpop.eup %9244  ;;  %v5905_v62 = vadd.f32 -0.82215226, %v5881_v49  ;;  %v5882_v42 = vmul.f32 0.17087276, %v11300_v59 }
 0xdda   : > { %v5991_v10 = vadd.f32 -1.135204, %v5967_v12  ;;  %v5968_v15 = vmul.f32 %v11253_v51, %v5944_v24  ;;  %7061 = vmatprep.subr.bf16.mxu1 %v6788_v36  ;;  %v5907_v43 = vadd.f32 -0.82215226, %v5883_v53  ;;  %v5884_v12 = vmul.f32 0.17087276, %v11305_v35 }
 0xddb   : > { %v6013_v60 = vmul.f32 %v11236_v26, %v5989_v31  ;;  %v5990_v52 = vadd.f32 -1.135204, %v5966_v57  ;;  %v5929_v14 = vmul.f32 %v11284_v32, %v5905_v62  ;;  %v5906_v36 = vadd.f32 -0.82215226, %v5882_v42 }
 0xddc   : > { %v6015_v16 = vmul.f32 %v11243_v13, %v5991_v10  ;;  %v5992_v33 = vadd.f32 -1.135204, %v5968_v15  ;;  %v5931_v49 = vmul.f32 %v11293_v45, %v5907_v43  ;;  %v5908_v1 = vadd.f32 -0.82215226, %v5884_v12 }
 0xddd   : > { %v6037_v24 = vadd.f32 0.27886808, %v6013_v60  ;;  %v6014_v58 = vmul.f32 %v11248_v7, %v5990_v52  ;;  %7062 = vmatpush1.bf16.msra.mxu1 %v13045_v37  ;;  %v13046_v10 = vunpack.c.h.s8.bf16 %v11220_v27  ;;  %v5953_v60 = vadd.f32 1.4885159, %v5929_v14 }
 0xdde   : > { %v6039_v31 = vadd.f32 0.27886808, %v6015_v16  ;;  %v6016_v57 = vmul.f32 %v11253_v51, %v5992_v33  ;;  %v5930_v52 = vmul.f32 %v11300_v59, %v5906_v36  ;;  %v5955_v23 = vadd.f32 1.4885159, %v5931_v49 }
 0xddf   : > { %7063 = vmatprep.subr.bf16.mxu1 %v13046_v10  ;;  %v6061_v15 = vmul.f32 %v11236_v26, %v6037_v24  ;;  %v6038_v53 = vadd.f32 0.27886808, %v6014_v58  ;;  %v5932_v37 = vmul.f32 %v11305_v35, %v5908_v1  ;;  %v5977_v43 = vmul.f32 %v11284_v32, %v5953_v60 }
 0xde0   : > { %v6063_v42 = vmul.f32 %v11243_v13, %v6039_v31  ;;  %v6040_v62 = vadd.f32 0.27886808, %v6016_v57  ;;  %v5954_v12 = vadd.f32 1.4885159, %v5930_v52  ;;  %v13047_v27 = vunpack.c.h.s8.bf16 %v11223_v6 }
 0xde1   : > { %v6085_v16 = vadd.f32 -0.18628806, %v6061_v15  ;;  %v6062_v33 = vmul.f32 %v11248_v7, %v6038_v53  ;;  %v5979_v14 = vmul.f32 %v11293_v45, %v5955_v23  ;;  %v5956_v36 = vadd.f32 1.4885159, %v5932_v37 }
 0xde2   : > { %7064 = vmatpush1.bf16.msra.mxu1 %v13047_v27  ;;  %v6087_v24 = vadd.f32 -0.18628806, %v6063_v42  ;;  %v6064_v58 = vmul.f32 %v11253_v51, %v6040_v62  ;;  %v13048_v31 = vunpack.c.l.s8.bf16 %v11231_v47  ;;  %v6001_v49 = vadd.f32 -1.135204, %v5977_v43 }
 0xde3   : > { %v6109_v1 = vmul.f32 %v11236_v26, %v6085_v16  ;;  %v6086_v57 = vadd.f32 -0.18628806, %v6062_v33  ;;  %v5978_v10 = vmul.f32 %v11300_v59, %v5954_v12  ;;  %v6003_v6 = vadd.f32 -1.135204, %v5979_v14 }
 0xde4   : > { %7076 = vmatprep.subr.bf16.mxu1 %v13048_v31  ;;  %v6111_v15 = vmul.f32 %v11243_v13, %v6087_v24  ;;  %v6088_v53 = vadd.f32 -0.18628806, %v6064_v58  ;;  %v5980_v60 = vmul.f32 %v11305_v35, %v5956_v36  ;;  %v6025_v23 = vmul.f32 %v11284_v32, %v6001_v49 }
 0xde5   : > { %v6133_v52 = vadd.f32 0.09678418, %v6109_v1  ;;  %v6110_v42 = vmul.f32 %v11248_v7, %v6086_v57  ;;  %v6002_v62 = vadd.f32 -1.135204, %v5978_v10  ;;  %v6027_v16 = vmul.f32 %v11293_v45, %v6003_v6 }
 0xde6   : > { %v6135_v37 = vadd.f32 0.09678418, %v6111_v15  ;;  %v6112_v27 = vmul.f32 %v11253_v51, %v6088_v53  ;;  %v6004_v33 = vadd.f32 -1.135204, %v5980_v60  ;;  %v6049_v24 = vadd.f32 0.27886808, %v6025_v23 }
 0xde7   : > { %v6157_v43 = vmul.f32 %v11236_v26, %v6133_v52  ;;  %v6134_v12 = vadd.f32 0.09678418, %v6110_v42  ;;  %v6026_v58 = vmul.f32 %v11300_v59, %v6002_v62  ;;  %v6051_v31 = vadd.f32 0.27886808, %v6027_v16 }
 0xde8   : > { %v6159_v14 = vmul.f32 %v11243_v13, %v6135_v37  ;;  %v6136_v36 = vadd.f32 0.09678418, %v6112_v27  ;;  %v6028_v1 = vmul.f32 %v11305_v35, %v6004_v33  ;;  %v6073_v10 = vmul.f32 %v11284_v32, %v6049_v24 }
 0xde9   : > { %v6181_v57 = vadd.f32 0.37409195, %v6157_v43  ;;  %v6158_v49 = vmul.f32 %v11248_v7, %v6134_v12  ;;  %v6050_v15 = vadd.f32 0.27886808, %v6026_v58  ;;  %v6075_v60 = vmul.f32 %v11293_v45, %v6051_v31 }
 0xdea   : > { %v6183_v53 = vadd.f32 0.37409195, %v6159_v14  ;;  %v6160_v6 = vmul.f32 %v11253_v51, %v6136_v36  ;;  %v6052_v52 = vadd.f32 0.27886808, %v6028_v1  ;;  %v6097_v62 = vadd.f32 -0.18628806, %v6073_v10 }
 0xdeb   : > { %v6205_v42 = vmul.f32 %v11236_v26, %v6181_v57  ;;  %v6182_v23 = vadd.f32 0.37409195, %v6158_v49  ;;  %v6074_v37 = vmul.f32 %v11300_v59, %v6050_v15  ;;  %v6099_v33 = vadd.f32 -0.18628806, %v6075_v60 }
 0xdec   : > { %v6207_v27 = vmul.f32 %v11243_v13, %v6183_v53  ;;  %v6184_v16 = vadd.f32 0.37409195, %v6160_v6  ;;  %v6076_v43 = vmul.f32 %v11305_v35, %v6052_v52  ;;  %v6121_v58 = vmul.f32 %v11284_v32, %v6097_v62 }
 0xded   : > { %v6229_v12 = vadd.f32 1.0000237, %v6205_v42  ;;  %v6206_v24 = vmul.f32 %v11248_v7, %v6182_v23  ;;  %v6098_v14 = vadd.f32 -0.18628806, %v6074_v37  ;;  %v6123_v1 = vmul.f32 %v11293_v45, %v6099_v33 }
 0xdee   : > { %v6231_v36 = vadd.f32 1.0000237, %v6207_v27  ;;  %v6208_v31 = vmul.f32 %v11253_v51, %v6184_v16  ;;  %v6100_v57 = vadd.f32 -0.18628806, %v6076_v43  ;;  %v6145_v15 = vadd.f32 0.09678418, %v6121_v58 }
 0xdef   : > { %v6253_v49 = vmul.f32 %v11236_v26, %v6229_v12  ;;  %v6230_v10 = vadd.f32 1.0000237, %v6206_v24  ;;  %v6122_v53 = vmul.f32 %v11300_v59, %v6098_v14  ;;  %v6147_v52 = vadd.f32 0.09678418, %v6123_v1 }
 0xdf0   : > { %v6255_v6 = vmul.f32 %v11243_v13, %v6231_v36  ;;  %v6232_v60 = vadd.f32 1.0000237, %v6208_v31  ;;  %v6124_v42 = vmul.f32 %v11305_v35, %v6100_v57  ;;  %v6169_v37 = vmul.f32 %v11284_v32, %v6145_v15 }
 0xdf1   : > { %v6277_v23 = vadd.f32 -1.2655122, %v6253_v49  ;;  %v6254_v62 = vmul.f32 %v11248_v7, %v6230_v10  ;;  %v6146_v27 = vadd.f32 0.09678418, %v6122_v53  ;;  %v6171_v43 = vmul.f32 %v11293_v45, %v6147_v52 }
 0xdf2   : > { %v6279_v16 = vadd.f32 -1.2655122, %v6255_v6  ;;  %v6256_v33 = vmul.f32 %v11253_v51, %v6232_v60  ;;  %v6148_v12 = vadd.f32 0.09678418, %v6124_v42  ;;  %v6193_v14 = vadd.f32 0.37409195, %v6169_v37 }
 0xdf3   : > { %v6349_v24 = vadd.f32 %v11279_v22, %v6277_v23  ;;  %v6278_v58 = vadd.f32 -1.2655122, %v6254_v62  ;;  %v6170_v36 = vmul.f32 %v11300_v59, %v6146_v27  ;;  %v6195_v57 = vadd.f32 0.37409195, %v6171_v43 }
 0xdf4   : > { %v6351_v31 = vadd.f32 %v11282_v11, %v6279_v16  ;;  %v6280_v1 = vadd.f32 -1.2655122, %v6256_v33  ;;  %v6172_v49 = vmul.f32 %v11305_v35, %v6148_v12  ;;  %v6217_v53 = vmul.f32 %v11284_v32, %v6193_v14 }
 0xdf5   : > { %v6373_v10 = vmul.f32 1.442695, %v6349_v24  ;;  %v6350_v15 = vadd.f32 %v11288_v0, %v6278_v58  ;;  %v6194_v6 = vadd.f32 0.37409195, %v6170_v36  ;;  %v6219_v22 = vmul.f32 %v11293_v45, %v6195_v57 }
 0xdf6   : > { %v6377_v60 = vmul.f32 1.442695, %v6351_v31  ;;  %v6352_v52 = vadd.f32 %v11291_v3, %v6280_v1  ;;  %v6196_v42 = vadd.f32 0.37409195, %v6172_v49  ;;  %v6241_v62 = vadd.f32 1.0000237, %v6217_v53 }
 0xdf7   : > { %9246 = vpow2.f32 %v6373_v10  ;;  %v6375_v23 = vmul.f32 1.442695, %v6350_v15  ;;  %v6218_v11 = vmul.f32 %v11300_v59, %v6194_v6  ;;  %v6243_v27 = vadd.f32 1.0000237, %v6219_v22  ;;  %v9350_v1 = vld [vmem:[%s9838_s9 + $0x30] sm:$0xff]  ;;  %v9351_v6 = vld [vmem:[%s9838_s9 + $0x28] sm:$0xff] }
 0xdf8   : > { %9248 = vpow2.f32 %v6377_v60  ;;  %v6379_v37 = vmul.f32 1.442695, %v6352_v52  ;;  %v6220_v0 = vmul.f32 %v11305_v35, %v6196_v42  ;;  %v6265_v16 = vmul.f32 %v11284_v32, %v6241_v62  ;;  %v9352_v42 = vld [vmem:[%s9838_s9 + $0x38] sm:$0xff]  ;;  %v11399_v62 = vld [vmem:[%s9867_s2 + $0xe0] sm:$0xff] }
 0xdf9   : > { %9250 = vpow2.f32 %v6375_v23  ;;  %v6242_v33 = vadd.f32 1.0000237, %v6218_v11  ;;  %v6314_v3 = vsub.f32 0.0, %v11205_v63  ;;  %v6267_v43 = vmul.f32 %v11293_v45, %v6243_v27  ;;  %v11402_v11 = vld [vmem:[%s9867_s2 + $0x148] sm:$0xff] }
 0xdfa   : > { %9252 = vpow2.f32 %v6379_v37  ;;  %v6244_v12 = vadd.f32 1.0000237, %v6220_v0  ;;  %v6316_v24 = vsub.f32 0.0, %v11215_v34  ;;  %v6289_v58 = vadd.f32 -1.2655122, %v6265_v16  ;;  %v11409_v16 = vld [vmem:[%s9867_s2 + $0xd8] sm:$0xff] }
 0xdfb   : > { %v13049_v14 = vsub.f32 0.0, %v11196_v28  ;;  %v6266_v31 = vmul.f32 %v11300_v59, %v6242_v33  ;;  %v11383_v57 = vrot.slane %v9350_v1, %v11085_v56  ;;  %v6291_v49 = vadd.f32 -1.2655122, %v6267_v43  ;;  %v11412_v33 = vld [vmem:[%s9867_s2 + $0xe8] sm:$0xff] }
 0xdfc   : > { %v13050_v10 = vsub.f32 0.0, %v11202_v38  ;;  %v6268_v53 = vmul.f32 %v11305_v35, %v6244_v12  ;;  %v11391_v60 = vrot.slane %v9351_v6, %v11085_v56  ;;  %v6338_v22 = vmul.f32 %v6314_v3, %v11205_v63 }
 0xdfd   : > { %v6337_v36 = vmul.f32 %v13049_v14, %v11196_v28  ;;  %v6290_v52 = vadd.f32 -1.2655122, %v6266_v31  ;;  %v11396_v23 = vrot.slane %v9352_v42, %v11085_v56  ;;  %v6340_v27 = vmul.f32 %v6316_v24, %v11215_v34 }
 0xdfe   : > { %v6339_v15 = vmul.f32 %v13050_v10, %v11202_v38  ;;  %v6292_v37 = vadd.f32 -1.2655122, %v6268_v53  ;;  %v11406_v0 = vrot.slane %v9350_v1, %v11088_v55  ;;  %v11415_v43 = vrot.slane %v9351_v6, %v11088_v55 }
 0xdff   : > { %v6361_v28 = vadd.f32 %v6337_v36, %v6289_v58  ;;  %v6362_v3 = vadd.f32 %v6338_v22, %v6290_v52  ;;  %v11418_v12 = vrot.slane %v9352_v42, %v11088_v55  ;;  %v6800_v34 = vunpack.c.l.s8.bf16 %v11399_v62  ;;  %v11430_v52 = vld [vmem:[%s9867_s2 + $0x160] sm:$0xff] }
 0xe00   : > { %v6363_v38 = vadd.f32 %v6339_v15, %v6291_v49  ;;  %v6364_v14 = vadd.f32 %v6340_v27, %v6292_v37  ;;  %v6825_v24 = vunpack.c.l.s8.bf16 %v11402_v11  ;;  %v11436_v27 = vld [vmem:[%s9867_s2 + $0xf0] sm:$0xff]  ;;  %v5703_v49 = vmul.f32 0.5, %v11127_v40 }
 0xe01   : > { %v6397_v63 = vmul.f32 1.442695, %v6361_v28  ;;  %v9247_v36 = vpop.eup %9246  ;;  %v6399_v31 = vmul.f32 1.442695, %v6362_v3  ;;  %v11427_v28 = vld [vmem:[%s9867_s2 + $0xf8] sm:$0xff]  ;;  %v11459_v40 = vld [vmem:[%s9867_s2 + $0x110] sm:$0xff] }
 0xe02   : > { %v6401_v58 = vmul.f32 1.442695, %v6363_v38  ;;  %v9249_v10 = vpop.eup %9248  ;;  %v6421_v15 = vmul.f32 %v9247_v36, %v11236_v26  ;;  %v6403_v53 = vmul.f32 1.442695, %v6364_v14 }
 0xe03   : > { %9254 = vpow2.f32 %v6397_v63  ;;  %v9251_v22 = vpop.eup %9250  ;;  %v6423_v42 = vmul.f32 %v9249_v10, %v11243_v13  ;;  %v11439_v63 = vld [vmem:[%s9867_s2 + $0x100] sm:$0xff]  ;;  %v11606_v13 = vld [vmem:[%s9867_s2 + $0x190] sm:$0xff] }
 0xe04   : > { %9256 = vpow2.f32 %v6401_v58  ;;  %v9253_v26 = vpop.eup %9252  ;;  %v6445_v3 = vsub.f32 1.0, %v6421_v15  ;;  %v6422_v58 = vmul.f32 %v9251_v22, %v11248_v7  ;;  %v5701_v22 = vmul.f32 0.5, %v11124_v2 }
 0xe05   : > { %9258 = vpow2.f32 %v6399_v31  ;;  %v6447_v36 = vsub.f32 1.0, %v6423_v42  ;;  %v6424_v6 = vmul.f32 %v9253_v26, %v11253_v51  ;;  %v5702_v2 = vmul.f32 0.5, %v11130_v17 }
 0xe06   : > { %9260 = vpow2.f32 %v6403_v53  ;;  %v6493_v10 = vsub.f32 0.0, %v6445_v3  ;;  %v6446_v37 = vsub.f32 1.0, %v6422_v58 }
 0xe07   : > { %v6495_v15 = vsub.f32 0.0, %v6447_v36  ;;  %v6448_v53 = vsub.f32 1.0, %v6424_v6 }
 0xe08   : > { %v6517_v42 = vsel %vm6469_vm13, %v6445_v3, %v6493_v10  ;;  %v6494_v51 = vsub.f32 0.0, %v6446_v37 }
 0xe09   : > { %v6541_v26 = vadd.f32 1.0, %v6517_v42  ;;  %v6519_v31 = vsel %vm6471_vm14, %v6447_v36, %v6495_v15  ;;  %v6496_v58 = vsub.f32 0.0, %v6448_v53 }
 0xe0a   : > { %v6543_v48 = vadd.f32 1.0, %v6519_v31  ;;  %v6518_v6 = vsel %vm6470_vm15, %v6446_v37, %v6494_v51  ;;  %v11462_v31 = vld [vmem:[%s9867_s2 + $0x178] sm:$0xff]  ;;  %v5715_v51 = vmul.f32 0.5, %v11177_v21 }
 0xe0b   : > { %v6565_v38 = vmul.f32 %v6541_v26, %v5701_v22  ;;  %v6542_v20 = vadd.f32 1.0, %v6518_v6  ;;  %v6520_v3 = vsel %vm6472_vm0, %v6448_v53, %v6496_v58  ;;  %v11468_v53 = vld [vmem:[%s9867_s2 + $0x108] sm:$0xff]  ;;  %v13059_v58 = vunpack.c.h.s8.bf16 %v11234_v9 }
 0xe0c   : > { %v6567_v10 = vmul.f32 %v6543_v48, %v5703_v49  ;;  %v6544_v42 = vadd.f32 1.0, %v6520_v3  ;;  %v11471_v49 = vld [vmem:[%s9867_s2 + $0x118] sm:$0xff] }
 0xe0d   : > { %v9255_v7 = vpop.eup %9254  ;;  %v6566_v22 = vmul.f32 %v6542_v20, %v5702_v2  ;;  %v11590_v2 = vld [vmem:[%s9867_s2 + $0x1f0] sm:$0xff] }
 0xe0e   : > { %v9257_v36 = vpop.eup %9256  ;;  %v6433_v15 = vmul.f32 %v9255_v7, %v11284_v32  ;;  %v6568_v7 = vmul.f32 %v6544_v42, %v5704_v44  ;;  %v5713_v42 = vmul.f32 0.5, %v11174_v54  ;;  %v5714_v54 = vmul.f32 0.5, %v11180_v46  ;;  %v11555_v46 = vld [vmem:[%s9867_s2 + $0x170] sm:$0xff] }
 0xe0f   : > { %v9259_v4 = vpop.eup %9258  ;;  %v6435_v37 = vmul.f32 %v9257_v36, %v11293_v45 }
 0xe10   : > { %v9261_v19 = vpop.eup %9260  ;;  %v6457_v26 = vsub.f32 1.0, %v6433_v15  ;;  %v6434_v32 = vmul.f32 %v9259_v4, %v11300_v59 }
 0xe11   : > { %v6459_v48 = vsub.f32 1.0, %v6435_v37  ;;  %v6436_v6 = vmul.f32 %v9261_v19, %v11305_v35 }
 0xe12   : > { %v6505_v20 = vsub.f32 0.0, %v6457_v26  ;;  %v6458_v3 = vsub.f32 1.0, %v6434_v32 }
 0xe13   : > { %v6507_v15 = vsub.f32 0.0, %v6459_v48  ;;  %v6460_v59 = vsub.f32 1.0, %v6436_v6 }
 0xe14   : > { %v6529_v35 = vsel %vm6481_vm2, %v6457_v26, %v6505_v20  ;;  %v6506_v4 = vsub.f32 0.0, %v6458_v3  ;;  %v11489_v20 = vld [vmem:[%s9867_s2 + $0x128] sm:$0xff] }
 0xe15   : > { %v6553_v37 = vadd.f32 1.0, %v6529_v35  ;;  %v6531_v19 = vsel %vm6483_vm3, %v6459_v48, %v6507_v15  ;;  %v6508_v32 = vsub.f32 0.0, %v6460_v59  ;;  %v5716_v48 = vmul.f32 0.5, %v11183_v39  ;;  %v11494_v35 = vld [vmem:[%s9867_s2 + $0x120] sm:$0xff] }
 0xe16   : > { %v6555_v50 = vadd.f32 1.0, %v6531_v19  ;;  %v6530_v6 = vsel %vm6482_vm4, %v6458_v3, %v6506_v4 }
 0xe17   : > { %v6577_v44 = vmul.f32 %v6553_v37, %v5713_v42  ;;  %v6554_v36 = vadd.f32 1.0, %v6530_v6  ;;  %v6532_v26 = vsel %vm6484_vm5, %v6460_v59, %v6508_v32  ;;  %v5290_v41 = vpop.f32.mrb[44].mxu1  ;;  %v11503_v32 = vld [vmem:[%s9867_s2 + $0x140] sm:$0xff] }
 0xe18   : > { %v6579_v29 = vmul.f32 %v6555_v50, %v5715_v51  ;;  %v6556_v15 = vadd.f32 1.0, %v6532_v26  ;;  %v5609_v42 = vmul.f32 %v11269_v18, %v5290_v41  ;;  %v5376_v51 = vpop.f32.mrb[60].mxu0  ;;  %v5292_v4 = vpop.f32.mrb[45].mxu1  ;;  %v11509_v26 = vld [vmem:[%s9867_s2 + $0x138] sm:$0xff] }
 0xe19   : > { %v6578_v21 = vmul.f32 %v6554_v36, %v5714_v54  ;;  %v6589_v19 = vpack.c.bf16 %v6577_v44, %v6565_v38  ;;  %v5611_v38 = vmul.f32 %v11383_v57, %v5376_v51  ;;  %v5610_v36 = vmul.f32 %v11391_v60, %v5292_v4  ;;  %v5378_v44 = vpop.f32.mrb[61].mxu0  ;;  %v5294_v6 = vpop.f32.mrb[46].mxu1 }
 0xe1a   : > { %v6580_v59 = vmul.f32 %v6556_v15, %v5716_v48  ;;  %v11500_v37 = vpack.c.bf16 %v6579_v29, %v6567_v10  ;;  %v11512_v15 = vadd.f32 %v11272_v8, %v5609_v42  ;;  %v5612_v10 = vmul.f32 %v11396_v23, %v5378_v44  ;;  %v5380_v29 = vpop.f32.mrb[62].mxu0  ;;  %v11529_v42 = vld [vmem:[%s9867_s2 + $0x158] sm:$0xff]  ;;  %v11532_v44 = vld [vmem:[%s9867_s2 + $0x150] sm:$0xff] }
 0xe1b   : > { %v6590_v50 = vpack.c.bf16 %v6578_v21, %v6566_v22  ;;  %v11515_v22 = vpop.f32.mrb[47].mxu1  ;;  %v11519_v41 = vadd.f32 %v11406_v0, %v5611_v38  ;;  %v11522_v51 = vadd.f32 %v11415_v43, %v5610_v36  ;;  %v11524_v4 = vpop.f32.mrb[63].mxu0  ;;  %v13053_v21 = vunpack.c.l.s8.bf16 %v11234_v9  ;;  %v11558_v36 = vld [vmem:[%s9867_s2 + $0x168] sm:$0xff]  ;;  %v11696_v9 = vld [vmem:[%s9867_s2 + $0x1c0] sm:$0xff] }
 0xe1c   : > { %v6592_v48 = vpack.c.bf16 %v6580_v59, %v6568_v7  ;;  %v11538_v38 = vadd.f32 %v11418_v12, %v5612_v10  ;;  %v13054_v59 = vunpack.c.l.s8.bf16 %v11241_v5  ;;  %v5621_v39 = vmul.f32 %v11269_v18, %v5294_v6 }
 0xe1d   : > { %7065 = vmatprep.mubr.bf16.mxu1 %v6590_v50  ;;  %7323 = vmatprep.mubr.bf16.mxu0 %v6590_v50  ;;  %13051 = vst [vmem:[#allocation26_spill] sm:$0xff] %v11522_v51  ;;  %v11535_v50 = vmul.f32 0.70710677, %v11512_v15  ;;  %v11547_v54 = vmul.f32 0.70710677, %v11519_v41  ;;  %v13057_v6 = vunpack.c.h.s8.bf16 %v11231_v47  ;;  %v13058_v10 = vunpack.c.h.s8.bf16 %v11143_v61 }
 0xe1e   : > { %7066 = vmatmul.mubr.bf16.vlgmr.msra.gmra.mrb[52].mxu1 %v6589_v19  ;;  %7324 = vmatmul.mubr.bf16.vlgmr.msra.gmra.mrb[68].mxu0 %v6589_v19  ;;  %13052 = vst [vmem:[#allocation27_spill] sm:$0xff] %v11538_v38  ;;  %v11550_v19 = vmul.f32 0.70710677, %v11522_v51  ;;  %v13060_v7 = vunpack.c.h.s8.bf16 %v11241_v5  ;;  %v11599_v17 = vadd.f32 %v11272_v8, %v5621_v39  ;;  %v5623_v61 = vmul.f32 %v11383_v57, %v5380_v29 }
 0xe1f   : > { %7077 = vmatpush1.bf16.msra.mxu1 %v13053_v21  ;;  %8420 = vmatpush3.bf16.msra.mxu0 %v13054_v59  ;;  %v11561_v21 = vand.u32 2147483647, %v11535_v50  ;;  %v11564_v59 = vmul.f32 0.70710677, %v11538_v38  ;;  %v11573_v3 = vand.u32 2147483647, %v11547_v54  ;;  %v13092_v38 = vunpack.c.h.s8.bf16 %v11462_v31 }
 0xe20   : > { %13055 = vst [vmem:[#allocation28_spill] sm:$0xff] %v11550_v19  ;;  %7108 = vmatprep.mubr.bf16.mxu1 %v6592_v48  ;;  %7364 = vmatprep.mubr.bf16.mxu0 %v6592_v48  ;;  %v11576_v48 = vand.u32 2147483647, %v11550_v19  ;;  %13061 = vst [vmem:[#allocation30_spill] sm:$0xff] %v11599_v17  ;;  %vm6473_vm6 = vcmp.ge.f32.partialorder %v11535_v50, 0.0  ;;  %vm6475_vm7 = vcmp.ge.f32.partialorder %v11547_v54, 0.0 }
 0xe21   : > { %13056 = vst [vmem:[#allocation29_spill] sm:$0xff] %v11564_v59  ;;  %7078 = vmatprep.subr.bf16.mxu1 %v13057_v6  ;;  %8421 = vmatprep.subr.bf16.mxu0 %v13058_v10  ;;  %v5777_v18 = vmul.f32 0.5, %v11561_v21  ;;  %v11582_v47 = vand.u32 2147483647, %v11564_v59  ;;  %v11587_v6 = vld [vmem:[%s9867_s2 + $0x188] sm:$0xff]  ;;  %v5779_v45 = vmul.f32 0.5, %v11573_v3 }
 0xe22   : > { %v5778_v25 = vmul.f32 0.5, %v11576_v48  ;;  %v11603_v10 = vld [vmem:[%s9867_s2 + $0x180] sm:$0xff] }
 0xe23   : > { %7079 = vmatpush1.bf16.msra.mxu1 %v13059_v58  ;;  %8422 = vmatpush3.bf16.msra.mxu0 %v13060_v7  ;;  %v5801_v14 = vadd.f32 1.0, %v5777_v18  ;;  %v5780_v1 = vmul.f32 0.5, %v11582_v47  ;;  %v5803_v8 = vadd.f32 1.0, %v5779_v45  ;;  %v11623_v45 = vadd.f32 %v11406_v0, %v5623_v61  ;;  %v11632_v18 = vld [vmem:[%s9867_s2 + $0x1a0] sm:$0xff]  ;;  %v11643_v61 = vld [vmem:[%s9867_s2 + $0x208] sm:$0xff] }
 0xe24   : > { %7080 = vmatprep.subr.bf16.mxu1 %v6800_v34  ;;  %8423 = vmatprep.subr.bf16.mxu0 %v6825_v24  ;;  %v5802_v57 = vadd.f32 1.0, %v5778_v25  ;;  %v11620_v24 = vmul.f32 0.70710677, %v11599_v17  ;;  %v5622_v25 = vmul.f32 %v11391_v60, %v11515_v22  ;;  %v13066_v7 = vunpack.c.h.s8.bf16 %v11399_v62  ;;  %v12028_v50 = vld [vmem:[%s9867_s2 + $0x200] sm:$0xff] }
 0xe25   : > { %9262 = vrcp.f32 %v5801_v14  ;;  %v5804_v29 = vadd.f32 1.0, %v5780_v1  ;;  %13063 = vst [vmem:[#allocation32_spill] sm:$0xff] %v11623_v45  ;;  %v13064_v14 = vunpack.c.l.s8.bf16 %v11409_v16  ;;  %v13065_v1 = vunpack.c.l.s8.bf16 %v11412_v33 }
 0xe26   : > { %9264 = vrcp.f32 %v5803_v8  ;;  %13062 = vst [vmem:[#allocation31_spill] sm:$0xff] %v11620_v24  ;;  %v5624_v8 = vmul.f32 %v11396_v23, %v11524_v4  ;;  %v13067_v0 = vunpack.c.h.s8.bf16 %v11402_v11  ;;  %v11652_v23 = vand.u32 2147483647, %v11620_v24 }
 0xe27   : > { %7081 = vmatpush1.bf16.msra.mxu1 %v13064_v14  ;;  %8424 = vmatpush3.bf16.msra.mxu0 %v13065_v1  ;;  %9266 = vrcp.f32 %v5802_v57  ;;  %v11646_v14 = vld [vmem:[%s9867_s2 + $0x198] sm:$0xff]  ;;  %v11649_v1 = vld [vmem:[%s9867_s2 + $0x1a8] sm:$0xff]  ;;  %v11657_v4 = vmul.f32 0.70710677, %v11623_v45  ;;  %v11660_v57 = vadd.f32 %v11415_v43, %v5622_v25  ;;  %v13071_v60 = vunpack.c.h.s8.bf16 %v11409_v16  ;;  %v11693_v43 = vld [vmem:[%s9867_s2 + $0x1b0] sm:$0xff] }
 0xe28   : > { %7082 = vmatprep.subr.bf16.mxu1 %v13066_v7  ;;  %8425 = vmatprep.subr.bf16.mxu0 %v13067_v0  ;;  %9268 = vrcp.f32 %v5804_v29  ;;  %v11663_v7 = vadd.f32 %v11418_v12, %v5624_v8  ;;  %v5789_v29 = vmul.f32 0.5, %v11652_v23  ;;  %v13072_v62 = vunpack.c.h.s8.bf16 %v11412_v33  ;;  %v11675_v12 = vld [vmem:[%s9867_s2 + $0x1b8] sm:$0xff]  ;;  %v11678_v8 = vld [vmem:[%s9867_s2 + $0x220] sm:$0xff]  ;;  %13077 = vst [vmem:[#allocation38_spill] sm:$0xff] %v11693_v43 }
 0xe29   : > { %13068 = vst [vmem:[#allocation33_spill] sm:$0xff] %v11657_v4  ;;  %13069 = vst [vmem:[#allocation34_spill] sm:$0xff] %v11660_v57  ;;  %v11681_v0 = vand.u32 2147483647, %v11657_v4  ;;  %v11684_v5 = vmul.f32 0.70710677, %v11660_v57  ;;  %v13075_v16 = vunpack.c.l.s8.bf16 %v11427_v28  ;;  %v13076_v33 = vunpack.c.l.s8.bf16 %v11430_v52 }
 0xe2a   : > { %13070 = vst [vmem:[#allocation35_spill] sm:$0xff] %v11663_v7  ;;  %13073 = vst [vmem:[#allocation36_spill] sm:$0xff] %v11675_v12  ;;  %v5813_v25 = vadd.f32 1.0, %v5789_v29  ;;  %v11699_v58 = vmul.f32 0.70710677, %v11663_v7  ;;  %v13079_v34 = vunpack.c.l.s8.bf16 %v11436_v27  ;;  %v13080_v11 = vunpack.c.l.s8.bf16 %v11439_v63  ;;  %v11731_v7 = vld [vmem:[%s9867_s2 + $0x238] sm:$0xff] }
 0xe2b   : > { %7083 = vmatpush1.bf16.msra.mxu1 %v13071_v60  ;;  %8426 = vmatpush3.bf16.msra.mxu0 %v13072_v62  ;;  %13074 = vst [vmem:[#allocation37_spill] sm:$0xff] %v11684_v5  ;;  %v5791_v22 = vmul.f32 0.5, %v11681_v0  ;;  %v11747_v4 = vld [vmem:[%s9867_s2 + $0x1d8] sm:$0xff]  ;;  %v13086_v43 = vunpack.c.h.s8.bf16 %v11439_v63  ;;  %v6305_v12 = vsub.f32 0.0, %v11561_v21  ;;  %v6308_v30 = vsub.f32 0.0, %v11582_v47 }
 0xe2c   : > { %7084 = vmatprep.subr.bf16.mxu1 %v13075_v16  ;;  %8427 = vmatprep.subr.bf16.mxu0 %v13076_v33  ;;  %13078 = vst [vmem:[#allocation39_spill] sm:$0xff] %v11699_v58  ;;  %v11705_v33 = vand.u32 2147483647, %v11684_v5  ;;  %9270 = vrcp.f32 %v5813_v25  ;;  %v11710_v29 = vand.u32 2147483647, %v11699_v58  ;;  %v13082_v58 = vunpack.c.h.s8.bf16 %v11427_v28 }
 0xe2d   : > { %v5815_v62 = vadd.f32 1.0, %v5791_v22  ;;  %v13085_v28 = vunpack.c.h.s8.bf16 %v11436_v27  ;;  %v13087_v16 = vunpack.c.l.s8.bf16 %v11459_v40 }
 0xe2e   : > { %v5790_v25 = vmul.f32 0.5, %v11705_v33  ;;  %v5792_v22 = vmul.f32 0.5, %v11710_v29 }
 0xe2f   : > { %7085 = vmatpush1.bf16.msra.mxu1 %v13079_v34  ;;  %8428 = vmatpush3.bf16.msra.mxu0 %v13080_v11  ;;  %v11721_v60 = vpop.eup %9262  ;;  %v13083_v34 = vunpack.c.h.s8.bf16 %v11430_v52  ;;  %9272 = vrcp.f32 %v5815_v62 }
 0xe30   : > { %7086 = vmatprep.subr.bf16.mxu1 %v13082_v58  ;;  %v11733_v39 = vpop.eup %9264  ;;  %v5873_v5 = vmul.f32 0.17087276, %v11721_v60  ;;  %v11740_v58 = vld [vmem:[%s9867_s2 + $0x1c8] sm:$0xff]  ;;  %v5814_v11 = vadd.f32 1.0, %v5790_v25  ;;  %v5816_v57 = vadd.f32 1.0, %v5792_v22 }
 0xe31   : > { %8429 = vmatprep.subr.bf16.mxu0 %v13083_v34  ;;  %13084 = vst [vmem:[#allocation41_spill] sm:$0xff] %v11740_v58  ;;  %v11742_v52 = vpop.eup %9266  ;;  %v5875_v34 = vmul.f32 0.17087276, %v11733_v39 }
 0xe32   : > { %v11749_v45 = vpop.eup %9268  ;;  %v5897_v24 = vadd.f32 -0.82215226, %v5873_v5  ;;  %v5874_v17 = vmul.f32 0.17087276, %v11742_v52  ;;  %9274 = vrcp.f32 %v5814_v11  ;;  %v13088_v5 = vunpack.c.l.s8.bf16 %v11462_v31 }
 0xe33   : > { %7087 = vmatpush1.bf16.msra.mxu1 %v13085_v28  ;;  %8430 = vmatpush3.bf16.msra.mxu0 %v13086_v43  ;;  %v5899_v62 = vadd.f32 -0.82215226, %v5875_v34  ;;  %v5876_v25 = vmul.f32 0.17087276, %v11749_v45  ;;  %9276 = vrcp.f32 %v5816_v57  ;;  %v11776_v57 = vld [vmem:[%s9867_s2 + $0x2b0] sm:$0xff] }
 0xe34   : > { %7088 = vmatprep.subr.bf16.mxu1 %v13087_v16  ;;  %8431 = vmatprep.subr.bf16.mxu0 %v13088_v5  ;;  %v5921_v27 = vmul.f32 %v11721_v60, %v5897_v24  ;;  %v5898_v28 = vadd.f32 -0.82215226, %v5874_v17  ;;  %v6307_v5 = vsub.f32 0.0, %v11573_v3  ;;  %v13089_v24 = vunpack.c.l.s8.bf16 %v11468_v53 }
 0xe35   : > { %v5923_v43 = vmul.f32 %v11733_v39, %v5899_v62  ;;  %v5900_v34 = vadd.f32 -0.82215226, %v5876_v25  ;;  %v13090_v17 = vunpack.c.l.s8.bf16 %v11471_v49  ;;  %v6306_v25 = vsub.f32 0.0, %v11576_v48 }
 0xe36   : > { %v5945_v16 = vadd.f32 1.4885159, %v5921_v27  ;;  %v5922_v22 = vmul.f32 %v11742_v52, %v5898_v28  ;;  %v13091_v27 = vunpack.c.h.s8.bf16 %v11459_v40  ;;  %v11785_v63 = vpop.eup %9270  ;;  %v11797_v28 = vmul.f32 %v6307_v5, %v11573_v3 }
 0xe37   : > { %7089 = vmatpush1.bf16.msra.mxu1 %v13089_v24  ;;  %8432 = vmatpush3.bf16.msra.mxu0 %v13090_v17  ;;  %v5947_v62 = vadd.f32 1.4885159, %v5923_v43  ;;  %v5924_v11 = vmul.f32 %v11749_v45, %v5900_v34  ;;  %v5885_v40 = vmul.f32 0.17087276, %v11785_v63  ;;  %v13094_v43 = vunpack.c.h.s8.bf16 %v11471_v49 }
 0xe38   : > { %7090 = vmatprep.subr.bf16.mxu1 %v13091_v27  ;;  %8433 = vmatprep.subr.bf16.mxu0 %v13092_v38  ;;  %v5969_v24 = vmul.f32 %v11721_v60, %v5945_v16  ;;  %v5946_v17 = vadd.f32 1.4885159, %v5922_v22  ;;  %v11794_v38 = vmul.f32 %v6305_v12, %v11561_v21  ;;  %v13093_v16 = vunpack.c.h.s8.bf16 %v11468_v53 }
 0xe39   : > { %v5971_v59 = vmul.f32 %v11733_v39, %v5947_v62  ;;  %v5948_v34 = vadd.f32 1.4885159, %v5924_v11  ;;  %v11804_v11 = vpop.eup %9272  ;;  %v11807_v27 = vmul.f32 %v6306_v25, %v11576_v48  ;;  %v5909_v12 = vadd.f32 -0.82215226, %v5885_v40 }
 0xe3a   : > { %v5993_v31 = vadd.f32 -1.135204, %v5969_v24  ;;  %v5970_v22 = vmul.f32 %v11742_v52, %v5946_v17  ;;  %v13095_v3 = vunpack.c.l.s8.bf16 %v11489_v20  ;;  %v13096_v5 = vunpack.c.l.s8.bf16 %v11590_v2 }
 0xe3b   : > { %7091 = vmatpush1.bf16.msra.mxu1 %v13093_v16  ;;  %8434 = vmatpush3.bf16.msra.mxu0 %v13094_v43  ;;  %v5995_v62 = vadd.f32 -1.135204, %v5971_v59  ;;  %v5972_v21 = vmul.f32 %v11749_v45, %v5948_v34  ;;  %v11816_v49 = vmul.f32 %v6308_v30, %v11582_v47  ;;  %v5887_v59 = vmul.f32 0.17087276, %v11804_v11 }
 0xe3c   : > { %7092 = vmatprep.subr.bf16.mxu1 %v13095_v3  ;;  %8441 = vmatprep.subr.bf16.mxu0 %v13096_v5  ;;  %v6017_v53 = vmul.f32 %v11721_v60, %v5993_v31  ;;  %v5994_v24 = vadd.f32 -1.135204, %v5970_v22  ;;  %v11819_v17 = vpop.eup %9274  ;;  %v5933_v43 = vmul.f32 %v11785_v63, %v5909_v12  ;;  %v13097_v16 = vunpack.c.l.s8.bf16 %v11494_v35 }
 0xe3d   : > { %v6019_v48 = vmul.f32 %v11733_v39, %v5995_v62  ;;  %v5996_v25 = vadd.f32 -1.135204, %v5972_v21  ;;  %v11825_v40 = vpop.eup %9276  ;;  %v5911_v30 = vadd.f32 -0.82215226, %v5887_v59  ;;  %v5886_v47 = vmul.f32 0.17087276, %v11819_v17 }
 0xe3e   : > { %7365 = vmatmul.mubr.bf16.vlgmr.msra.gmra.mrb[72].mxu0 %v11500_v37  ;;  %v6041_v31 = vadd.f32 0.27886808, %v6017_v53  ;;  %v6018_v22 = vmul.f32 %v11742_v52, %v5994_v24  ;;  %v13098_v62 = vunpack.c.l.s8.bf16 %v11606_v13  ;;  %v5957_v3 = vadd.f32 1.4885159, %v5933_v43 }
 0xe3f   : > { %7093 = vmatpush1.bf16.msra.mxu1 %v13097_v16  ;;  %v6043_v21 = vadd.f32 0.27886808, %v6019_v48  ;;  %v6020_v12 = vmul.f32 %v11749_v45, %v5996_v25  ;;  %v5888_v5 = vmul.f32 0.17087276, %v11825_v40  ;;  %v13099_v34 = vunpack.c.h.s8.bf16 %v11489_v20 }
 0xe40   : > { %8442 = vmatpush3.bf16.msra.mxu0 %v13098_v62  ;;  %v13100_v53 = vunpack.c.h.s8.bf16 %v11590_v2  ;;  %v6065_v24 = vmul.f32 %v11721_v60, %v6041_v31  ;;  %v6042_v59 = vadd.f32 0.27886808, %v6018_v22  ;;  %v5935_v16 = vmul.f32 %v11804_v11, %v5911_v30 }
 0xe41   : > { %7094 = vmatprep.subr.bf16.mxu1 %v13099_v34  ;;  %v5910_v58 = vadd.f32 -0.82215226, %v5886_v47  ;;  %v6067_v62 = vmul.f32 %v11733_v39, %v6043_v21  ;;  %v6044_v48 = vadd.f32 0.27886808, %v6020_v12  ;;  %v5981_v25 = vmul.f32 %v11785_v63, %v5957_v3 }
 0xe42   : > { %8443 = vmatprep.subr.bf16.mxu0 %v13100_v53  ;;  %v5912_v43 = vadd.f32 -0.82215226, %v5888_v5  ;;  %v6089_v51 = vadd.f32 -0.18628806, %v6065_v24  ;;  %v6066_v19 = vmul.f32 %v11742_v52, %v6042_v59  ;;  %v5959_v20 = vadd.f32 1.4885159, %v5935_v16 }
 0xe43   : > { %v5934_v34 = vmul.f32 %v11819_v17, %v5910_v58  ;;  %v13101_v2 = vunpack.c.h.s8.bf16 %v11494_v35  ;;  %v13102_v31 = vunpack.c.h.s8.bf16 %v11606_v13  ;;  %v6091_v22 = vadd.f32 -0.18628806, %v6067_v62 }
 0xe44   : > { %v6068_v30 = vmul.f32 %v11749_v45, %v6044_v48  ;;  %v6005_v47 = vadd.f32 -1.135204, %v5981_v25  ;;  %v5936_v21 = vmul.f32 %v11825_v40, %v5912_v43  ;;  %v13103_v12 = vunpack.c.l.s8.bf16 %v11503_v32 }
 0xe45   : > { %7095 = vmatpush1.bf16.msra.mxu1 %v13101_v2  ;;  %8444 = vmatpush3.bf16.msra.mxu0 %v13102_v31  ;;  %v13104_v3 = vunpack.c.l.s8.bf16 %v11643_v61  ;;  %v6113_v58 = vmul.f32 %v11721_v60, %v6089_v51  ;;  %v6090_v5 = vadd.f32 -0.18628806, %v6066_v19  ;;  %v5983_v35 = vmul.f32 %v11804_v11, %v5959_v20 }
 0xe46   : > { %7096 = vmatprep.subr.bf16.mxu1 %v13103_v12  ;;  %v5958_v53 = vadd.f32 1.4885159, %v5934_v34  ;;  %v6115_v13 = vmul.f32 %v11733_v39, %v6091_v22  ;;  %v6092_v24 = vadd.f32 -0.18628806, %v6068_v30  ;;  %v6029_v59 = vmul.f32 %v11785_v63, %v6005_v47 }
 0xe47   : > { %8445 = vmatprep.subr.bf16.mxu0 %v13104_v3  ;;  %v5960_v16 = vadd.f32 1.4885159, %v5936_v21  ;;  %v6137_v62 = vadd.f32 0.09678418, %v6113_v58  ;;  %v6114_v48 = vmul.f32 %v11742_v52, %v6090_v5  ;;  %v6007_v25 = vadd.f32 -1.135204, %v5983_v35 }
 0xe48   : > { %v5982_v43 = vmul.f32 %v11819_v17, %v5958_v53  ;;  %v13105_v2 = vunpack.c.l.s8.bf16 %v11509_v26  ;;  %v13106_v51 = vunpack.c.l.s8.bf16 %v11649_v1  ;;  %v6139_v19 = vadd.f32 0.09678418, %v6115_v13 }
 0xe49   : > { %v6116_v20 = vmul.f32 %v11749_v45, %v6092_v24  ;;  %v6053_v34 = vadd.f32 0.27886808, %v6029_v59  ;;  %v5984_v31 = vmul.f32 %v11825_v40, %v5960_v16  ;;  %v13107_v22 = vunpack.c.h.s8.bf16 %v11503_v32 }
 0xe4a   : > { %7097 = vmatpush1.bf16.msra.mxu1 %v13105_v2  ;;  %8446 = vmatpush3.bf16.msra.mxu0 %v13106_v51  ;;  %v13108_v30 = vunpack.c.h.s8.bf16 %v11643_v61  ;;  %v6161_v47 = vmul.f32 %v11721_v60, %v6137_v62  ;;  %v6138_v21 = vadd.f32 0.09678418, %v6114_v48  ;;  %v6031_v12 = vmul.f32 %v11804_v11, %v6007_v25 }
 0xe4b   : > { %7098 = vmatprep.subr.bf16.mxu1 %v13107_v22  ;;  %v6006_v3 = vadd.f32 -1.135204, %v5982_v43  ;;  %v6163_v58 = vmul.f32 %v11733_v39, %v6139_v19  ;;  %v6140_v5 = vadd.f32 0.09678418, %v6116_v20  ;;  %v6077_v35 = vmul.f32 %v11785_v63, %v6053_v34 }
 0xe4c   : > { %8447 = vmatprep.subr.bf16.mxu0 %v13108_v30  ;;  %v6008_v53 = vadd.f32 -1.135204, %v5984_v31  ;;  %v6185_v13 = vadd.f32 0.37409195, %v6161_v47  ;;  %v6162_v24 = vmul.f32 %v11742_v52, %v6138_v21  ;;  %v6055_v32 = vadd.f32 0.27886808, %v6031_v12 }
 0xe4d   : > { %v6030_v59 = vmul.f32 %v11819_v17, %v6006_v3  ;;  %v13109_v61 = vunpack.c.h.s8.bf16 %v11509_v26  ;;  %v13110_v16 = vunpack.c.h.s8.bf16 %v11649_v1  ;;  %v6187_v62 = vadd.f32 0.37409195, %v6163_v58 }
 0xe4e   : > { %v6164_v48 = vmul.f32 %v11749_v45, %v6140_v5  ;;  %v6101_v25 = vadd.f32 -0.18628806, %v6077_v35  ;;  %v6032_v43 = vmul.f32 %v11825_v40, %v6008_v53  ;;  %v13111_v2 = vunpack.c.l.s8.bf16 %v11529_v42 }
 0xe4f   : > { %7099 = vmatpush1.bf16.msra.mxu1 %v13109_v61  ;;  %8448 = vmatpush3.bf16.msra.mxu0 %v13110_v16  ;;  %v13112_v51 = vunpack.c.l.s8.bf16 %v11678_v8  ;;  %v6209_v19 = vmul.f32 %v11721_v60, %v6185_v13  ;;  %v6186_v20 = vadd.f32 0.37409195, %v6162_v24  ;;  %v6079_v26 = vmul.f32 %v11804_v11, %v6055_v32 }
 0xe50   : > { %7100 = vmatprep.subr.bf16.mxu1 %v13111_v2  ;;  %v6054_v34 = vadd.f32 0.27886808, %v6030_v59  ;;  %v6211_v1 = vmul.f32 %v11733_v39, %v6187_v62  ;;  %v6188_v31 = vadd.f32 0.37409195, %v6164_v48  ;;  %v6125_v22 = vmul.f32 %v11785_v63, %v6101_v25 }
 0xe51   : > { %8449 = vmatprep.subr.bf16.mxu0 %v13112_v51  ;;  %v6056_v30 = vadd.f32 0.27886808, %v6032_v43  ;;  %v6233_v47 = vadd.f32 1.0000237, %v6209_v19  ;;  %v6210_v21 = vmul.f32 %v11742_v52, %v6186_v20  ;;  %v6103_v12 = vadd.f32 -0.18628806, %v6079_v26 }
 0xe52   : > { %v6078_v3 = vmul.f32 %v11819_v17, %v6054_v34  ;;  %v13113_v58 = vunpack.c.l.s8.bf16 %v11532_v44  ;;  %v13114_v5 = vunpack.c.l.s8.bf16 %v11696_v9  ;;  %v6235_v35 = vadd.f32 1.0000237, %v6211_v1 }
 0xe53   : > { %v6212_v53 = vmul.f32 %v11749_v45, %v6188_v31  ;;  %v6149_v13 = vadd.f32 0.09678418, %v6125_v22  ;;  %v6080_v24 = vmul.f32 %v11825_v40, %v6056_v30  ;;  %v13115_v32 = vunpack.c.h.s8.bf16 %v11529_v42 }
 0xe54   : > { %7101 = vmatpush1.bf16.msra.mxu1 %v13113_v58  ;;  %8450 = vmatpush3.bf16.msra.mxu0 %v13114_v5  ;;  %v13116_v59 = vunpack.c.h.s8.bf16 %v11678_v8  ;;  %v6257_v61 = vmul.f32 %v11721_v60, %v6233_v47  ;;  %v6234_v16 = vadd.f32 1.0000237, %v6210_v21  ;;  %v6127_v62 = vmul.f32 %v11804_v11, %v6103_v12 }
 0xe55   : > { %7102 = vmatprep.subr.bf16.mxu1 %v13115_v32  ;;  %v6102_v48 = vadd.f32 -0.18628806, %v6078_v3  ;;  %v6259_v25 = vmul.f32 %v11733_v39, %v6235_v35  ;;  %v6236_v43 = vadd.f32 1.0000237, %v6212_v53  ;;  %v6173_v2 = vmul.f32 %v11785_v63, %v6149_v13 }
 0xe56   : > { %8451 = vmatprep.subr.bf16.mxu0 %v13116_v59  ;;  %v6104_v51 = vadd.f32 -0.18628806, %v6080_v24  ;;  %v6281_v19 = vadd.f32 -1.2655122, %v6257_v61  ;;  %v6258_v20 = vmul.f32 %v11742_v52, %v6234_v16  ;;  %v6151_v42 = vadd.f32 0.09678418, %v6127_v62 }
 0xe57   : > { %v6126_v26 = vmul.f32 %v11819_v17, %v6102_v48  ;;  %v13117_v8 = vunpack.c.h.s8.bf16 %v11532_v44  ;;  %v13118_v34 = vunpack.c.h.s8.bf16 %v11696_v9  ;;  %v6283_v1 = vadd.f32 -1.2655122, %v6259_v25 }
 0xe58   : > { %v6260_v31 = vmul.f32 %v11749_v45, %v6236_v43  ;;  %v6197_v22 = vadd.f32 0.37409195, %v6173_v2  ;;  %v6128_v30 = vmul.f32 %v11825_v40, %v6104_v51  ;;  %v13119_v47 = vunpack.c.l.s8.bf16 %v11555_v46 }
 0xe59   : > { %7103 = vmatpush1.bf16.msra.mxu1 %v13117_v8  ;;  %8452 = vmatpush3.bf16.msra.mxu0 %v13118_v34  ;;  %v13120_v21 = vunpack.c.l.s8.bf16 %v11731_v7  ;;  %v6353_v12 = vadd.f32 %v11794_v38, %v6281_v19  ;;  %v6282_v3 = vadd.f32 -1.2655122, %v6258_v20  ;;  %v6175_v44 = vmul.f32 %v11804_v11, %v6151_v42  ;;  %v11938_v42 = vld [vmem:[%s9867_s2 + $0x1e8] sm:$0xff] }
 0xe5a   : > { %7104 = vmatprep.subr.bf16.mxu1 %v13119_v47  ;;  %v6150_v58 = vadd.f32 0.09678418, %v6126_v26  ;;  %v6355_v9 = vadd.f32 %v11797_v28, %v6283_v1  ;;  %v6284_v5 = vadd.f32 -1.2655122, %v6260_v31  ;;  %v6221_v35 = vmul.f32 %v11785_v63, %v6197_v22  ;;  %v11947_v1 = vld [vmem:[%s9867_s2 + $0x1e0] sm:$0xff] }
 0xe5b   : > { %8453 = vmatprep.subr.bf16.mxu0 %v13120_v21  ;;  %v6152_v53 = vadd.f32 0.09678418, %v6128_v30  ;;  %v6381_v13 = vmul.f32 1.442695, %v6353_v12  ;;  %v6354_v24 = vadd.f32 %v11807_v27, %v6282_v3  ;;  %v6199_v32 = vadd.f32 0.37409195, %v6175_v44 }
 0xe5c   : > { %v6174_v59 = vmul.f32 %v11819_v17, %v6150_v58  ;;  %v13121_v61 = vunpack.c.l.s8.bf16 %v11558_v36  ;;  %v13122_v38 = vunpack.c.l.s8.bf16 %v11747_v4  ;;  %v6385_v16 = vmul.f32 1.442695, %v6355_v9 }
 0xe5d   : > { %v6356_v28 = vadd.f32 %v11816_v49, %v6284_v5  ;;  %v6245_v62 = vadd.f32 1.0000237, %v6221_v35  ;;  %v6176_v48 = vmul.f32 %v11825_v40, %v6152_v53  ;;  %v13123_v25 = vunpack.c.h.s8.bf16 %v11555_v46 }
 0xe5e   : > { %7105 = vmatpush1.bf16.msra.mxu1 %v13121_v61  ;;  %8454 = vmatpush3.bf16.msra.mxu0 %v13122_v38  ;;  %v13124_v27 = vunpack.c.h.s8.bf16 %v11731_v7  ;;  %9278 = vpow2.f32 %v6381_v13  ;;  %v6383_v43 = vmul.f32 1.442695, %v6354_v24  ;;  %v6223_v2 = vmul.f32 %v11804_v11, %v6199_v32 }
 0xe5f   : > { %7106 = vmatprep.subr.bf16.mxu1 %v13123_v25  ;;  %v6198_v51 = vadd.f32 0.37409195, %v6174_v59  ;;  %9280 = vpow2.f32 %v6385_v16  ;;  %v6387_v19 = vmul.f32 1.442695, %v6356_v28  ;;  %v6269_v20 = vmul.f32 %v11785_v63, %v6245_v62  ;;  %v9353_v25 = vld [vmem:[%s9838_s9 + $0x40] sm:$0xff] }
 0xe60   : > { %8455 = vmatprep.subr.bf16.mxu0 %v13124_v27  ;;  %v6200_v49 = vadd.f32 0.37409195, %v6176_v48  ;;  %9282 = vpow2.f32 %v6383_v43  ;;  %v6247_v46 = vadd.f32 1.0000237, %v6223_v2  ;;  %v6319_v26 = vsub.f32 0.0, %v11681_v0 }
 0xe61   : > { %v6222_v7 = vmul.f32 %v11819_v17, %v6198_v51  ;;  %v13125_v8 = vunpack.c.h.s8.bf16 %v11558_v36  ;;  %v13126_v34 = vunpack.c.h.s8.bf16 %v11747_v4  ;;  %9284 = vpow2.f32 %v6387_v19  ;;  %v11958_v36 = vld [vmem:[%s9867_s2 + $0x250] sm:$0xff] }
 0xe62   : > { %v6293_v31 = vadd.f32 -1.2655122, %v6269_v20  ;;  %v13127_v22 = vsub.f32 0.0, %v11652_v23  ;;  %v6224_v47 = vmul.f32 %v11825_v40, %v6200_v49  ;;  %v13128_v21 = vunpack.c.l.s8.bf16 %v11587_v6 }
 0xe63   : > { %7107 = vmatpush1.bf16.msra.mxu1 %v13125_v8  ;;  %8456 = vmatpush3.bf16.msra.mxu0 %v13126_v34  ;;  %v13129_v12 = vunpack.c.l.s8.bf16 %v11776_v57  ;;  %v6271_v4 = vmul.f32 %v11804_v11, %v6247_v46  ;;  %v6246_v3 = vadd.f32 1.0000237, %v6222_v7  ;;  %v6318_v44 = vsub.f32 0.0, %v11705_v33  ;;  %v9354_v46 = vld [vmem:[%s9838_s9 + $0x50] sm:$0xff] }
 0xe64   : > { %v6341_v30 = vmul.f32 %v13127_v22, %v11652_v23  ;;  %7119 = vmatprep.subr.bf16.mxu1 %v13128_v21  ;;  %v6866_v58 = vunpack.c.l.s8.bf16 %v11938_v42  ;;  %v6248_v5 = vadd.f32 1.0000237, %v6224_v47  ;;  %v6320_v23 = vsub.f32 0.0, %v11710_v29  ;;  %v9355_v21 = vld [vmem:[%s9838_s9 + $0x48] sm:$0xff] }
 0xe65   : > { %8463 = vmatprep.subr.bf16.mxu0 %v13129_v12  ;;  %v6865_v35 = vunpack.c.l.s8.bf16 %v11947_v1  ;;  %v6295_v53 = vadd.f32 -1.2655122, %v6271_v4  ;;  %v6343_v13 = vmul.f32 %v6319_v26, %v11681_v0  ;;  %v6270_v24 = vmul.f32 %v11819_v17, %v6246_v3 }
 0xe66   : > { %v6365_v9 = vadd.f32 %v6341_v30, %v6293_v31  ;;  %7109 = vmatmul.mubr.bf16.vlgmr.msra.gmra.mrb[52].mxu1 %v11500_v37  ;;  %v13130_v32 = vunpack.c.l.s8.bf16 %v11603_v10  ;;  %v6891_v59 = vunpack.c.l.s8.bf16 %v11958_v36  ;;  %v6272_v38 = vmul.f32 %v11825_v40, %v6248_v5 }
 0xe67   : > { %v13131_v16 = vunpack.c.h.s8.bf16 %v11587_v6  ;;  %v6869_v37 = vunpack.c.h.s8.bf16 %v11938_v42  ;;  %v6918_v28 = vunpack.c.h.s8.bf16 %v11776_v57  ;;  %v6367_v62 = vadd.f32 %v6343_v13, %v6295_v53  ;;  %v9356_v53 = vld [vmem:[%s9838_s9 + $0x58] sm:$0xff] }
 0xe68   : > { %7120 = vmatpush1.bf16.msra.mxu1 %v13130_v32  ;;  %v6405_v61 = vmul.f32 1.442695, %v6365_v9  ;;  %v6294_v0 = vadd.f32 -1.2655122, %v6270_v24  ;;  %v6342_v48 = vmul.f32 %v6318_v44, %v11705_v33  ;;  %v11979_v27 = vrot.slane %v9353_v25, %v11085_v56  ;;  %v9279_v51 = vpop.eup %9278 }
 0xe69   : > { %7121 = vmatprep.subr.bf16.mxu1 %v13131_v16  ;;  %v6296_v43 = vadd.f32 -1.2655122, %v6272_v38  ;;  %v6344_v2 = vmul.f32 %v6320_v23, %v11710_v29  ;;  %v11983_v6 = vrot.slane %v9353_v25, %v11088_v55  ;;  %v6409_v19 = vmul.f32 1.442695, %v6367_v62  ;;  %v9281_v7 = vpop.eup %9280  ;;  %v13136_v25 = vld [vmem:[#allocation28_spill] sm:$0xff] }
 0xe6a   : > { %9286 = vpow2.f32 %v6405_v61  ;;  %v6366_v20 = vadd.f32 %v6342_v48, %v6294_v0  ;;  %v13132_v49 = vunpack.c.h.s8.bf16 %v11603_v10  ;;  %v11989_v33 = vrot.slane %v9354_v46, %v11085_v56  ;;  %v9283_v10 = vpop.eup %9282 }
 0xe6b   : > { %v11992_v26 = vrot.slane %v9354_v46, %v11088_v55  ;;  %v6425_v29 = vmul.f32 %v9279_v51, %v11721_v60  ;;  %v6368_v8 = vadd.f32 %v6344_v2, %v6296_v43  ;;  %v13133_v34 = vunpack.c.l.s8.bf16 %v11632_v18  ;;  %v9285_v4 = vpop.eup %9284  ;;  %v13138_v51 = vld [vmem:[#allocation26_spill] sm:$0xff]  ;;  %v12035_v46 = vld [vmem:[%s9867_s2 + $0x2c8] sm:$0xff] }
 0xe6c   : > { %7122 = vmatpush1.bf16.msra.mxu1 %v13132_v49  ;;  %v6868_v31 = vunpack.c.h.s8.bf16 %v11947_v1  ;;  %v6894_v22 = vunpack.c.h.s8.bf16 %v11958_v36  ;;  %v6427_v30 = vmul.f32 %v9281_v7, %v11733_v39  ;;  %9288 = vpow2.f32 %v6409_v19  ;;  %v12038_v7 = vld [vmem:[%s9867_s2 + $0x1f8] sm:$0xff] }
 0xe6d   : > { %7123 = vmatprep.subr.bf16.mxu1 %v13133_v34  ;;  %v6407_v47 = vmul.f32 1.442695, %v6366_v20  ;;  %v12002_v12 = vrot.slane %v9355_v21, %v11085_v56  ;;  %v6449_v60 = vsub.f32 1.0, %v6425_v29  ;;  %v6411_v3 = vmul.f32 1.442695, %v6368_v8  ;;  %v13140_v20 = vld [vmem:[#allocation36_spill] sm:$0xff] }
 0xe6e   : > { %v6426_v44 = vmul.f32 %v9283_v10, %v11742_v52  ;;  %v12006_v9 = vrot.slane %v9355_v21, %v11088_v55  ;;  %v6451_v5 = vsub.f32 1.0, %v6427_v30  ;;  %v13134_v23 = vunpack.c.l.s8.bf16 %v11646_v14  ;;  %v12042_v10 = vld [vmem:[%s9867_s2 + $0x268] sm:$0xff] }
 0xe6f   : > { %9290 = vpow2.f32 %v6407_v47  ;;  %v6428_v39 = vmul.f32 %v9285_v4, %v11749_v45  ;;  %v12013_v13 = vrot.slane %v9356_v53, %v11085_v56  ;;  %v6497_v24 = vsub.f32 0.0, %v6449_v60  ;;  %v13142_v47 = vld [vmem:[#allocation27_spill] sm:$0xff] }
 0xe70   : > { %7124 = vmatpush1.bf16.msra.mxu1 %v13134_v23  ;;  %9292 = vpow2.f32 %v6411_v3  ;;  %v13135_v32 = vunpack.c.h.s8.bf16 %v11632_v18  ;;  %v6450_v52 = vsub.f32 1.0, %v6426_v44  ;;  %v12018_v61 = vrot.slane %v9356_v53, %v11088_v55 }
 0xe71   : > { %v5705_v38 = vmul.f32 0.5, %v11512_v15  ;;  %v6499_v16 = vsub.f32 0.0, %v6451_v5  ;;  %v6452_v45 = vsub.f32 1.0, %v6428_v39  ;;  %v6521_v62 = vsel %vm6473_vm6, %v6449_v60, %v6497_v24 }
 0xe72   : > { %7125 = vmatprep.subr.bf16.mxu1 %v13135_v32  ;;  %v5707_v56 = vmul.f32 0.5, %v11519_v41  ;;  %v6498_v18 = vsub.f32 0.0, %v6450_v52  ;;  %v6545_v0 = vadd.f32 1.0, %v6521_v62  ;;  %vm6474_vm8 = vcmp.ge.f32.partialorder %v13136_v25, 0.0  ;;  %v13139_v41 = vld [vmem:[#allocation29_spill] sm:$0xff]  ;;  %v12068_v25 = vld [vmem:[%s9867_s2 + $0x2e0] sm:$0xff] }
 0xe73   : > { %v6523_v48 = vsel %vm6475_vm7, %v6451_v5, %v6499_v16  ;;  %v13137_v55 = vunpack.c.h.s8.bf16 %v11646_v14  ;;  %v6500_v15 = vsub.f32 0.0, %v6452_v45  ;;  %v5706_v19 = vmul.f32 0.5, %v13138_v51  ;;  %v13143_v5 = vld [vmem:[#allocation38_spill] sm:$0xff] }
 0xe74   : > { %v9287_v43 = vpop.eup %9286  ;;  %v6547_v2 = vadd.f32 1.0, %v6523_v48  ;;  %vm6476_vm10 = vcmp.ge.f32.partialorder %v13139_v41, 0.0  ;;  %v13141_v54 = vunpack.c.l.s8.bf16 %v13140_v20  ;;  %v6522_v49 = vsel %vm6474_vm8, %v6450_v52, %v6498_v18  ;;  %v12077_v41 = vld [vmem:[%s9867_s2 + $0x280] sm:$0xff] }
 0xe75   : > { %7126 = vmatpush1.bf16.msra.mxu1 %v13137_v55  ;;  %v6569_v14 = vmul.f32 %v6545_v0, %v5705_v38  ;;  %v6437_v29 = vmul.f32 %v9287_v43, %v11785_v63  ;;  %v6546_v8 = vadd.f32 1.0, %v6522_v49  ;;  %v6524_v34 = vsel %vm6476_vm10, %v6452_v45, %v6500_v15  ;;  %v12062_v45 = vld [vmem:[%s9867_s2 + $0x218] sm:$0xff]  ;;  %v13147_v15 = vld [vmem:[#allocation31_spill] sm:$0xff] }
 0xe76   : > { %7127 = vmatprep.subr.bf16.mxu1 %v13141_v54  ;;  %v12044_v30 = vmul.f32 %v6547_v2, %v5707_v56  ;;  %v5708_v21 = vmul.f32 0.5, %v13142_v47  ;;  %v6548_v4 = vadd.f32 1.0, %v6524_v34  ;;  %v6872_v60 = vunpack.c.l.s8.bf16 %v12028_v50  ;;  %v9289_v3 = vpop.eup %9288  ;;  %v13146_v56 = vld [vmem:[#allocation30_spill] sm:$0xff]  ;;  %v13148_v54 = vld [vmem:[#allocation32_spill] sm:$0xff] }
 0xe77   : > { %v6461_v44 = vsub.f32 1.0, %v6437_v29  ;;  %v13144_v23 = vunpack.c.l.s8.bf16 %v13143_v5  ;;  %v12050_v39 = vmul.f32 %v6546_v8, %v5706_v19  ;;  %v6921_v63 = vunpack.c.l.s8.bf16 %v12035_v46  ;;  %v12074_v19 = vld [vmem:[%s9867_s2 + $0x210] sm:$0xff] }
 0xe78   : > { %v6871_v53 = vunpack.c.l.s8.bf16 %v12038_v7  ;;  %v6439_v24 = vmul.f32 %v9289_v3, %v11804_v11  ;;  %v13145_v32 = vunpack.c.h.s8.bf16 %v13140_v20  ;;  %v12057_v52 = vmul.f32 %v6548_v4, %v5708_v21  ;;  %v13150_v4 = vld [vmem:[#allocation40_spill] sm:$0xff] }
 0xe79   : > { %7128 = vmatpush1.bf16.msra.mxu1 %v13144_v23  ;;  %v6897_v38 = vunpack.c.l.s8.bf16 %v12042_v10  ;;  %v6875_v16 = vunpack.c.h.s8.bf16 %v12028_v50  ;;  %v9291_v62 = vpop.eup %9290  ;;  %v5717_v18 = vmul.f32 0.5, %v13146_v56  ;;  %v6509_v0 = vsub.f32 0.0, %v6461_v44  ;;  %v12277_v50 = vld [vmem:[%s9867_s2 + $0x2a0] sm:$0xff] }
 0xe7a   : > { %7129 = vmatprep.subr.bf16.mxu1 %v13145_v32  ;;  %v6924_v48 = vunpack.c.h.s8.bf16 %v12035_v46  ;;  %v6874_v11 = vunpack.c.h.s8.bf16 %v12038_v7  ;;  %v9293_v55 = vpop.eup %9292  ;;  %vm6485_vm11 = vcmp.ge.f32.partialorder %v13147_v15, 0.0  ;;  %v6463_v43 = vsub.f32 1.0, %v6439_v24  ;;  %v13152_v24 = vld [vmem:[#allocation33_spill] sm:$0xff] }
 0xe7b   : > { %v6438_v2 = vmul.f32 %v9291_v62, %v11819_v17  ;;  %v6533_v20 = vsel %vm6485_vm11, %v6461_v44, %v6509_v0  ;;  %v5719_v49 = vmul.f32 0.5, %v13148_v54  ;;  %v13149_v29 = vunpack.c.h.s8.bf16 %v13143_v5  ;;  %v13155_v54 = vld [vmem:[#allocation35_spill] sm:$0xff] }
 0xe7c   : > { %v6440_v8 = vmul.f32 %v9293_v55, %v11825_v40  ;;  %v6557_v47 = vadd.f32 1.0, %v6533_v20  ;;  %v6511_v21 = vsub.f32 0.0, %v6463_v43  ;;  %v13151_v17 = vunpack.c.l.s8.bf16 %v13150_v4  ;;  %v13153_v40 = vld [vmem:[#allocation34_spill] sm:$0xff]  ;;  %v13154_v20 = vld [vmem:[#allocation37_spill] sm:$0xff] }
 0xe7d   : > { %7130 = vmatpush1.bf16.msra.mxu1 %v13149_v29  ;;  %v6462_v3 = vsub.f32 1.0, %v6438_v2  ;;  %vm6487_vm12 = vcmp.ge.f32.partialorder %v13152_v24, 0.0  ;;  %v5718_v0 = vmul.f32 0.5, %v13153_v40  ;;  %vm6486_vm13 = vcmp.ge.f32.partialorder %v13154_v20, 0.0  ;;  %v13156_v29 = vld [vmem:[#allocation41_spill] sm:$0xff]  ;;  %v5462_v20 = vpop.f32.mrb[48].mxu1 }
 0xe7e   : > { %7131 = vmatprep.subr.bf16.mxu1 %v13151_v17  ;;  %v6464_v44 = vsub.f32 1.0, %v6440_v8  ;;  %v6581_v62 = vmul.f32 %v6557_v47, %v5717_v18  ;;  %v6535_v56 = vsel %vm6487_vm12, %v6463_v43, %v6511_v21  ;;  %v5720_v2 = vmul.f32 0.5, %v13155_v54  ;;  %v13158_v8 = vld [vmem:[#allocation39_spill] sm:$0xff]  ;;  %v12188_v47 = vld [vmem:[%s9867_s2 + $0x260] sm:$0xff] }
 0xe7f   : > { %v6510_v55 = vsub.f32 0.0, %v6462_v3  ;;  %v6559_v15 = vadd.f32 1.0, %v6535_v56  ;;  %v13157_v17 = vunpack.c.l.s8.bf16 %v13156_v29  ;;  %vm6488_vm14 = vcmp.ge.f32.partialorder %v13158_v8, 0.0 }
 0xe80   : > { %v6512_v24 = vsub.f32 0.0, %v6464_v44  ;;  %v13159_v32 = vunpack.c.h.s8.bf16 %v13150_v4  ;;  %v12098_v43 = vpack.c.bf16 %v6581_v62, %v6569_v14  ;;  %v5613_v8 = vmul.f32 %v11979_v27, %v5462_v20  ;;  %v5548_v4 = vpop.f32.mrb[64].mxu0  ;;  %v12109_v62 = vld [vmem:[%s9867_s2 + $0x2f8] sm:$0xff] }
 0xe81   : > { %7132 = vmatpush1.bf16.msra.mxu1 %v13157_v17  ;;  %v6534_v18 = vsel %vm6486_vm13, %v6462_v3, %v6510_v55  ;;  %v6583_v21 = vmul.f32 %v6559_v15, %v5719_v49  ;;  %v12103_v17 = vld [vmem:[%s9867_s2 + $0x230] sm:$0xff]  ;;  %v13160_v49 = vunpack.c.h.s8.bf16 %v13156_v29  ;;  %v5615_v55 = vmul.f32 %v11989_v33, %v5548_v4  ;;  %v12201_v3 = vld [vmem:[%s9867_s2 + $0x258] sm:$0xff] }
 0xe82   : > { %7133 = vmatprep.subr.bf16.mxu1 %v13159_v32  ;;  %v6558_v56 = vadd.f32 1.0, %v6534_v18  ;;  %v6536_v40 = vsel %vm6488_vm14, %v6464_v44, %v6512_v24  ;;  %v5464_v32 = vpop.f32.mrb[49].mxu1  ;;  %v5550_v24 = vpop.f32.mrb[65].mxu0  ;;  %v12124_v29 = vadd.f32 %v11983_v6, %v5613_v8  ;;  %v13168_v46 = vunpack.c.h.s8.bf16 %v12042_v10 }
 0xe83   : > { %v6560_v5 = vadd.f32 1.0, %v6536_v40  ;;  %v5614_v15 = vmul.f32 %v12002_v12, %v5464_v32  ;;  %v5466_v18 = vpop.f32.mrb[50].mxu1  ;;  %v12116_v40 = vld [vmem:[%s9867_s2 + $0x228] sm:$0xff]  ;;  %v12119_v20 = vpack.c.bf16 %v6583_v21, %v12044_v30  ;;  %v12135_v21 = vadd.f32 %v11992_v26, %v5615_v55 }
 0xe84   : > { %v6582_v44 = vmul.f32 %v6558_v56, %v5718_v0  ;;  %v5616_v0 = vmul.f32 %v12013_v13, %v5550_v24  ;;  %v5552_v56 = vpop.f32.mrb[66].mxu0  ;;  %v12127_v4 = vpop.f32.mrb[51].mxu1  ;;  %v12145_v24 = vmul.f32 0.70710677, %v12124_v29  ;;  %v13170_v10 = vunpack.c.l.s8.bf16 %v12068_v25 }
 0xe85   : > { %7134 = vmatpush1.bf16.msra.mxu1 %v13160_v49  ;;  %v6584_v14 = vmul.f32 %v6560_v5, %v5720_v2  ;;  %v12131_v49 = vld [vmem:[%s9867_s2 + $0x298] sm:$0xff]  ;;  %v5554_v5 = vpop.f32.mrb[67].mxu0  ;;  %v12155_v55 = vmul.f32 0.70710677, %v12135_v21  ;;  %v12163_v2 = vld [vmem:[%s9867_s2 + $0x240] sm:$0xff]  ;;  %v5627_v57 = vmul.f32 %v11989_v33, %v5552_v56  ;;  %v12222_v56 = vld [vmem:[%s9867_s2 + $0x270] sm:$0xff] }
 0xe86   : > { %7135 = vmatprep.subr.bf16.mxu1 %v6866_v58  ;;  %v6594_v30 = vpack.c.bf16 %v6582_v44, %v12050_v39  ;;  %v12138_v58 = vadd.f32 %v12006_v9, %v5614_v15  ;;  %v12148_v32 = vadd.f32 %v12018_v61, %v5616_v0  ;;  %v12152_v44 = vld [vmem:[%s9867_s2 + $0x248] sm:$0xff]  ;;  %v12169_v0 = vand.u32 2147483647, %v12145_v24  ;;  %v12325_v33 = vld [vmem:[%s9867_s2 + $0x3a0] sm:$0xff] }
 0xe87   : > { %v12142_v8 = vpack.c.bf16 %v6584_v14, %v12057_v52  ;;  %v5625_v39 = vmul.f32 %v11979_v27, %v5466_v18  ;;  %vm6477_vm15 = vcmp.ge.f32.partialorder %v12145_v24, 0.0  ;;  %vm6479_vm0 = vcmp.ge.f32.partialorder %v12155_v55, 0.0 }
 0xe88   : > { %7151 = vmatprep.mubr.bf16.mxu1 %v6594_v30  ;;  %7405 = vmatprep.mubr.bf16.mxu0 %v6594_v30  ;;  %v12158_v15 = vmul.f32 0.70710677, %v12138_v58  ;;  %v12172_v30 = vmul.f32 0.70710677, %v12148_v32 }
 0xe89   : > { %7136 = vmatpush1.bf16.msra.mxu1 %v6865_v35  ;;  %7406 = vmatmul.mubr.bf16.vlgmr.msra.gmra.mrb[76].mxu0 %v12098_v43  ;;  %v12180_v35 = vand.u32 2147483647, %v12155_v55 }
 0xe8a   : > { %8464 = vmatpush3.bf16.msra.mxu0 %v6891_v59  ;;  %7446 = vmatprep.mubr.bf16.mxu0 %v12142_v8  ;;  %v12183_v14 = vand.u32 2147483647, %v12158_v15  ;;  %v5781_v59 = vmul.f32 0.5, %v12169_v0  ;;  %v12196_v52 = vand.u32 2147483647, %v12172_v30  ;;  %vm6478_vm2 = vcmp.ge.f32.partialorder %v12158_v15, 0.0 }
 0xe8b   : > { %7137 = vmatprep.subr.bf16.mxu1 %v6869_v37  ;;  %8465 = vmatprep.subr.bf16.mxu0 %v6918_v28  ;;  %v5783_v54 = vmul.f32 0.5, %v12180_v35  ;;  %v13172_v37 = vunpack.c.l.s8.bf16 %v12077_v41  ;;  %vm6480_vm3 = vcmp.ge.f32.partialorder %v12172_v30, 0.0  ;;  %v5712_v15 = vmul.f32 0.5, %v12148_v32 }
 0xe8c   : > { %v5782_v42 = vmul.f32 0.5, %v12183_v14  ;;  %v5805_v28 = vadd.f32 1.0, %v5781_v59  ;;  %v5784_v27 = vmul.f32 0.5, %v12196_v52 }
 0xe8d   : > { %7138 = vmatpush1.bf16.msra.mxu1 %v6868_v31  ;;  %v5807_v34 = vadd.f32 1.0, %v5783_v54  ;;  %v12219_v31 = vld [vmem:[%s9867_s2 + $0x278] sm:$0xff]  ;;  %v12225_v54 = vadd.f32 %v11983_v6, %v5625_v39  ;;  %v12274_v39 = vld [vmem:[%s9867_s2 + $0x370] sm:$0xff] }
 0xe8e   : > { %8466 = vmatpush3.bf16.msra.mxu0 %v6894_v22  ;;  %v5806_v51 = vadd.f32 1.0, %v5782_v42  ;;  %7139 = vmatprep.subr.bf16.mxu1 %v6872_v60  ;;  %9294 = vrcp.f32 %v5805_v28  ;;  %v5808_v59 = vadd.f32 1.0, %v5784_v27  ;;  %v12231_v22 = vadd.f32 %v11992_v26, %v5627_v57  ;;  %v12237_v28 = vld [vmem:[%s9867_s2 + $0x290] sm:$0xff] }
 0xe8f   : > { %13161 = vst [vmem:[#allocation28_spill] sm:$0xff] %v12225_v54  ;;  %8467 = vmatprep.subr.bf16.mxu0 %v6921_v63  ;;  %9296 = vrcp.f32 %v5807_v34  ;;  %v5626_v60 = vmul.f32 %v12002_v12, %v12127_v4  ;;  %v5628_v42 = vmul.f32 %v12013_v13, %v5554_v5  ;;  %v12240_v6 = vmul.f32 0.70710677, %v12225_v54  ;;  %v12247_v34 = vld [vmem:[%s9867_s2 + $0x288] sm:$0xff] }
 0xe90   : > { %13162 = vst [vmem:[#allocation26_spill] sm:$0xff] %v12231_v22  ;;  %9298 = vrcp.f32 %v5806_v51  ;;  %v12250_v12 = vmul.f32 0.70710677, %v12231_v22  ;;  %v12261_v51 = vld [vmem:[%s9867_s2 + $0x2a8] sm:$0xff] }
 0xe91   : > { %7140 = vmatpush1.bf16.msra.mxu1 %v6871_v53  ;;  %9300 = vrcp.f32 %v5808_v59  ;;  %v12253_v13 = vadd.f32 %v12006_v9, %v5626_v60  ;;  %v12264_v4 = vand.u32 2147483647, %v12240_v6  ;;  %v12267_v5 = vadd.f32 %v12018_v61, %v5628_v42  ;;  %v12312_v60 = vld [vmem:[%s9867_s2 + $0x328] sm:$0xff] }
 0xe92   : > { %13163 = vst [vmem:[#allocation29_spill] sm:$0xff] %v12250_v12  ;;  %8468 = vmatpush3.bf16.msra.mxu0 %v6897_v38  ;;  %7141 = vmatprep.subr.bf16.mxu1 %v6875_v16  ;;  %v12280_v16 = vand.u32 2147483647, %v12250_v12  ;;  %v13169_v9 = vunpack.c.l.s8.bf16 %v12062_v45  ;;  %vm6489_vm4 = vcmp.ge.f32.partialorder %v12240_v6, 0.0 }
 0xe93   : > { %13164 = vst [vmem:[#allocation36_spill] sm:$0xff] %v12253_v13  ;;  %13165 = vst [vmem:[#allocation27_spill] sm:$0xff] %v12267_v5  ;;  %8469 = vmatprep.subr.bf16.mxu0 %v6924_v48  ;;  %v12283_v57 = vmul.f32 0.70710677, %v12253_v13  ;;  %v12288_v48 = vld [vmem:[%s9867_s2 + $0x310] sm:$0xff]  ;;  %v5793_v27 = vmul.f32 0.5, %v12264_v4 }
 0xe94   : > { %v12292_v59 = vmul.f32 0.70710677, %v12267_v5  ;;  %v5795_v38 = vmul.f32 0.5, %v12280_v16  ;;  %v13174_v5 = vunpack.c.h.s8.bf16 %v12068_v25  ;;  %v13175_v25 = vunpack.c.h.s8.bf16 %v12074_v19 }
 0xe95   : > { %13166 = vst [vmem:[#allocation38_spill] sm:$0xff] %v12283_v57  ;;  %7142 = vmatpush1.bf16.msra.mxu1 %v6874_v11  ;;  %v12300_v61 = vand.u32 2147483647, %v12283_v57  ;;  %v12309_v11 = vld [vmem:[%s9867_s2 + $0x388] sm:$0xff]  ;;  %v5817_v42 = vadd.f32 1.0, %v5793_v27  ;;  %v13178_v57 = vunpack.c.l.s8.bf16 %v12109_v62  ;;  %v13189_v54 = vunpack.c.l.s8.bf16 %v12288_v48 }
 0xe96   : > { %13167 = vst [vmem:[#allocation30_spill] sm:$0xff] %v12292_v59  ;;  %8470 = vmatpush3.bf16.msra.mxu0 %v13168_v46  ;;  %7143 = vmatprep.subr.bf16.mxu1 %v13169_v9  ;;  %v12315_v26 = vand.u32 2147483647, %v12292_v59  ;;  %v5819_v63 = vadd.f32 1.0, %v5795_v38  ;;  %v12335_v9 = vld [vmem:[%s9867_s2 + $0x340] sm:$0xff] }
 0xe97   : > { %8471 = vmatprep.subr.bf16.mxu0 %v13170_v10  ;;  %v5794_v36 = vmul.f32 0.5, %v12300_v61  ;;  %9302 = vrcp.f32 %v5817_v42  ;;  %v13171_v10 = vunpack.c.l.s8.bf16 %v12074_v19  ;;  %v13173_v42 = vunpack.c.h.s8.bf16 %v12062_v45 }
 0xe98   : > { %v12327_v27 = vpop.eup %9294  ;;  %v5796_v23 = vmul.f32 0.5, %v12315_v26  ;;  %9304 = vrcp.f32 %v5819_v63 }
 0xe99   : > { %7144 = vmatpush1.bf16.msra.mxu1 %v13171_v10  ;;  %v12337_v46 = vpop.eup %9296  ;;  %v5877_v1 = vmul.f32 0.17087276, %v12327_v27  ;;  %v5818_v7 = vadd.f32 1.0, %v5794_v36 }
 0xe9a   : > { %8472 = vmatpush3.bf16.msra.mxu0 %v13172_v37  ;;  %7145 = vmatprep.subr.bf16.mxu1 %v13173_v42  ;;  %v12345_v53 = vpop.eup %9298  ;;  %v5879_v38 = vmul.f32 0.17087276, %v12337_v46  ;;  %v5820_v18 = vadd.f32 1.0, %v5796_v23  ;;  %v12371_v42 = vld [vmem:[%s9867_s2 + $0x358] sm:$0xff]  ;;  %v6310_v23 = vsub.f32 0.0, %v12183_v14 }
 0xe9b   : > { %8473 = vmatprep.subr.bf16.mxu0 %v13174_v5  ;;  %v12352_v13 = vpop.eup %9300  ;;  %v5901_v37 = vadd.f32 -0.82215226, %v5877_v1  ;;  %v5878_v45 = vmul.f32 0.17087276, %v12345_v53  ;;  %9306 = vrcp.f32 %v5818_v7  ;;  %v12361_v5 = vld [vmem:[%s9867_s2 + $0x3b8] sm:$0xff]  ;;  %v6309_v1 = vsub.f32 0.0, %v12169_v0 }
 0xe9c   : > { %v5903_v10 = vadd.f32 -0.82215226, %v5879_v38  ;;  %v5880_v59 = vmul.f32 0.17087276, %v12352_v13  ;;  %9308 = vrcp.f32 %v5820_v18  ;;  %v13176_v7 = vunpack.c.h.s8.bf16 %v12077_v41  ;;  %v13225_v6 = vld [vmem:[#allocation38_spill] sm:$0xff] }
 0xe9d   : > { %7146 = vmatpush1.bf16.msra.mxu1 %v13175_v25  ;;  %v5925_v36 = vmul.f32 %v12327_v27, %v5901_v37  ;;  %v5902_v63 = vadd.f32 -0.82215226, %v5878_v45  ;;  %v13177_v38 = vunpack.c.l.s8.bf16 %v12103_v17  ;;  %v6311_v25 = vsub.f32 0.0, %v12180_v35 }
 0xe9e   : > { %8474 = vmatpush3.bf16.msra.mxu0 %v13176_v7  ;;  %v5927_v19 = vmul.f32 %v12337_v46, %v5903_v10  ;;  %v5904_v37 = vadd.f32 -0.82215226, %v5880_v59  ;;  %v6312_v7 = vsub.f32 0.0, %v12196_v52  ;;  %v13179_v10 = vunpack.c.l.s8.bf16 %v12116_v40 }
 0xe9f   : > { %7147 = vmatprep.subr.bf16.mxu1 %v13177_v38  ;;  %8475 = vmatprep.subr.bf16.mxu0 %v13178_v57  ;;  %v5949_v45 = vadd.f32 1.4885159, %v5925_v36  ;;  %v5926_v41 = vmul.f32 %v12345_v53, %v5902_v63  ;;  %v12388_v57 = vmul.f32 %v6309_v1, %v12169_v0  ;;  %v13180_v36 = vunpack.c.l.s8.bf16 %v12131_v49 }
 0xea0   : > { %v5951_v18 = vadd.f32 1.4885159, %v5927_v19  ;;  %v5928_v22 = vmul.f32 %v12352_v13, %v5904_v37  ;;  %v13181_v19 = vunpack.c.h.s8.bf16 %v12103_v17  ;;  %v12399_v59 = vmul.f32 %v6311_v25, %v12180_v35 }
 0xea1   : > { %7148 = vmatpush1.bf16.msra.mxu1 %v13179_v10  ;;  %v5973_v12 = vmul.f32 %v12327_v27, %v5949_v45  ;;  %v5950_v63 = vadd.f32 1.4885159, %v5926_v41  ;;  %v12395_v38 = vpop.eup %9302  ;;  %v12402_v45 = vmul.f32 %v6310_v23, %v12183_v14  ;;  %v13182_v1 = vunpack.c.h.s8.bf16 %v12109_v62 }
 0xea2   : > { %8476 = vmatpush3.bf16.msra.mxu0 %v13180_v36  ;;  %7149 = vmatprep.subr.bf16.mxu1 %v13181_v19  ;;  %v5975_v10 = vmul.f32 %v12337_v46, %v5951_v18  ;;  %v5952_v0 = vadd.f32 1.4885159, %v5928_v22  ;;  %v12406_v41 = vpop.eup %9304  ;;  %v12410_v19 = vmul.f32 %v6312_v7, %v12196_v52  ;;  %v5889_v18 = vmul.f32 0.17087276, %v12395_v38 }
 0xea3   : > { %8477 = vmatprep.subr.bf16.mxu0 %v13182_v1  ;;  %v5997_v17 = vadd.f32 -1.135204, %v5973_v12  ;;  %v5974_v36 = vmul.f32 %v12345_v53, %v5950_v63  ;;  %v5891_v22 = vmul.f32 0.17087276, %v12406_v41  ;;  %v13183_v62 = vunpack.c.h.s8.bf16 %v12116_v40 }
 0xea4   : > { %v5999_v37 = vadd.f32 -1.135204, %v5975_v10  ;;  %v5976_v35 = vmul.f32 %v12352_v13, %v5952_v0  ;;  %v5913_v63 = vadd.f32 -0.82215226, %v5889_v18  ;;  %v13184_v7 = vunpack.c.h.s8.bf16 %v12131_v49 }
 0xea5   : > { %7150 = vmatpush1.bf16.msra.mxu1 %v13183_v62  ;;  %v12418_v23 = vpop.eup %9306  ;;  %v6021_v12 = vmul.f32 %v12327_v27, %v5997_v17  ;;  %v5998_v25 = vadd.f32 -1.135204, %v5974_v36  ;;  %v13185_v10 = vunpack.c.l.s8.bf16 %v12152_v44  ;;  %v5915_v62 = vadd.f32 -0.82215226, %v5891_v22 }
 0xea6   : > { %8478 = vmatpush3.bf16.msra.mxu0 %v13184_v7  ;;  %v12426_v0 = vpop.eup %9308  ;;  %v6023_v1 = vmul.f32 %v12337_v46, %v5999_v37  ;;  %v6000_v40 = vadd.f32 -1.135204, %v5976_v35  ;;  %v5890_v14 = vmul.f32 0.17087276, %v12418_v23  ;;  %v13186_v17 = vunpack.c.l.s8.bf16 %v12274_v39 }
 0xea7   : > { %7162 = vmatprep.subr.bf16.mxu1 %v13185_v10  ;;  %v6045_v36 = vadd.f32 0.27886808, %v6021_v12  ;;  %v6022_v18 = vmul.f32 %v12345_v53, %v5998_v25  ;;  %v5937_v49 = vmul.f32 %v12395_v38, %v5913_v63  ;;  %v5892_v7 = vmul.f32 0.17087276, %v12426_v0 }
 0xea8   : > { %8485 = vmatprep.subr.bf16.mxu0 %v13186_v17  ;;  %7152 = vmatmul.mubr.bf16.vlgmr.msra.gmra.mrb[52].mxu1 %v12098_v43  ;;  %v6047_v10 = vadd.f32 0.27886808, %v6023_v1  ;;  %v6024_v52 = vmul.f32 %v12352_v13, %v6000_v40  ;;  %v5939_v37 = vmul.f32 %v12406_v41, %v5915_v62  ;;  %v5914_v35 = vadd.f32 -0.82215226, %v5890_v14 }
 0xea9   : > { %7447 = vmatmul.mubr.bf16.vlgmr.msra.gmra.mrb[80].mxu0 %v12119_v20  ;;  %v13187_v22 = vunpack.c.l.s8.bf16 %v12163_v2  ;;  %v6069_v12 = vmul.f32 %v12327_v27, %v6045_v36  ;;  %v6046_v25 = vadd.f32 0.27886808, %v6022_v18  ;;  %v5961_v17 = vadd.f32 1.4885159, %v5937_v49  ;;  %7194 = vmatprep.mubr.bf16.mxu1 %v12142_v8 }
 0xeaa   : > { %v5916_v63 = vadd.f32 -0.82215226, %v5892_v7  ;;  %v13188_v43 = vunpack.c.h.s8.bf16 %v12152_v44  ;;  %v6071_v1 = vmul.f32 %v12337_v46, %v6047_v10  ;;  %v6048_v40 = vadd.f32 0.27886808, %v6024_v52  ;;  %8486 = vmatpush3.bf16.msra.mxu0 %v13189_v54 }
 0xeab   : > { %7163 = vmatpush1.bf16.msra.mxu1 %v13187_v22  ;;  %v5963_v62 = vadd.f32 1.4885159, %v5939_v37  ;;  %v5938_v14 = vmul.f32 %v12418_v23, %v5914_v35  ;;  %v6093_v22 = vadd.f32 -0.18628806, %v6069_v12  ;;  %v6070_v36 = vmul.f32 %v12345_v53, %v6046_v25 }
 0xeac   : > { %7164 = vmatprep.subr.bf16.mxu1 %v13188_v43  ;;  %v5985_v18 = vmul.f32 %v12395_v38, %v5961_v17  ;;  %v5940_v49 = vmul.f32 %v12426_v0, %v5916_v63  ;;  %v13190_v8 = vunpack.c.h.s8.bf16 %v12274_v39  ;;  %v6095_v44 = vadd.f32 -0.18628806, %v6071_v1 }
 0xead   : > { %v6072_v7 = vmul.f32 %v12352_v13, %v6048_v40  ;;  %v5987_v52 = vmul.f32 %v12406_v41, %v5963_v62  ;;  %v5962_v10 = vadd.f32 1.4885159, %v5938_v14  ;;  %v13191_v37 = vunpack.c.h.s8.bf16 %v12163_v2 }
 0xeae   : > { %8487 = vmatprep.subr.bf16.mxu0 %v13190_v8  ;;  %v6117_v54 = vmul.f32 %v12327_v27, %v6093_v22  ;;  %v6094_v35 = vadd.f32 -0.18628806, %v6070_v36  ;;  %v6009_v12 = vadd.f32 -1.135204, %v5985_v18  ;;  %v5964_v25 = vadd.f32 1.4885159, %v5940_v49 }
 0xeaf   : > { %7165 = vmatpush1.bf16.msra.mxu1 %v13191_v37  ;;  %v13192_v17 = vunpack.c.l.s8.bf16 %v12188_v47  ;;  %v6119_v39 = vmul.f32 %v12337_v46, %v6095_v44  ;;  %v6096_v63 = vadd.f32 -0.18628806, %v6072_v7  ;;  %v6011_v43 = vadd.f32 -1.135204, %v5987_v52 }
 0xeb0   : > { %v5986_v1 = vmul.f32 %v12418_v23, %v5962_v10  ;;  %v13193_v40 = vunpack.c.h.s8.bf16 %v12288_v48  ;;  %v6141_v62 = vadd.f32 0.09678418, %v6117_v54  ;;  %v6118_v2 = vmul.f32 %v12345_v53, %v6094_v35 }
 0xeb1   : > { %7166 = vmatprep.subr.bf16.mxu1 %v13192_v17  ;;  %v6033_v14 = vmul.f32 %v12395_v38, %v6009_v12  ;;  %v5988_v22 = vmul.f32 %v12426_v0, %v5964_v25  ;;  %v13194_v36 = vunpack.c.l.s8.bf16 %v12309_v11  ;;  %v6143_v18 = vadd.f32 0.09678418, %v6119_v39 }
 0xeb2   : > { %8488 = vmatpush3.bf16.msra.mxu0 %v13193_v40  ;;  %v6120_v49 = vmul.f32 %v12352_v13, %v6096_v63  ;;  %v6035_v8 = vmul.f32 %v12406_v41, %v6011_v43  ;;  %v6010_v44 = vadd.f32 -1.135204, %v5986_v1  ;;  %v13195_v7 = vunpack.c.l.s8.bf16 %v12201_v3 }
 0xeb3   : > { %8489 = vmatprep.subr.bf16.mxu0 %v13194_v36  ;;  %v6165_v48 = vmul.f32 %v12327_v27, %v6141_v62  ;;  %v6142_v52 = vadd.f32 0.09678418, %v6118_v2  ;;  %v6057_v10 = vadd.f32 0.27886808, %v6033_v14  ;;  %v6012_v37 = vadd.f32 -1.135204, %v5988_v22 }
 0xeb4   : > { %7167 = vmatpush1.bf16.msra.mxu1 %v13195_v7  ;;  %v13196_v54 = vunpack.c.h.s8.bf16 %v12188_v47  ;;  %v6167_v35 = vmul.f32 %v12337_v46, %v6143_v18  ;;  %v6144_v12 = vadd.f32 0.09678418, %v6120_v49  ;;  %v6059_v25 = vadd.f32 0.27886808, %v6035_v8 }
 0xeb5   : > { %v6034_v17 = vmul.f32 %v12418_v23, %v6010_v44  ;;  %v13197_v39 = vunpack.c.l.s8.bf16 %v12312_v60  ;;  %v6189_v63 = vadd.f32 0.37409195, %v6165_v48  ;;  %v6166_v43 = vmul.f32 %v12345_v53, %v6142_v52 }
 0xeb6   : > { %7168 = vmatprep.subr.bf16.mxu1 %v13196_v54  ;;  %v6081_v1 = vmul.f32 %v12395_v38, %v6057_v10  ;;  %v6036_v40 = vmul.f32 %v12426_v0, %v6012_v37  ;;  %v13198_v62 = vunpack.c.h.s8.bf16 %v12309_v11  ;;  %v6191_v47 = vadd.f32 0.37409195, %v6167_v35 }
 0xeb7   : > { %8490 = vmatpush3.bf16.msra.mxu0 %v13197_v39  ;;  %v6168_v2 = vmul.f32 %v12352_v13, %v6144_v12  ;;  %v6083_v14 = vmul.f32 %v12406_v41, %v6059_v25  ;;  %v6058_v22 = vadd.f32 0.27886808, %v6034_v17  ;;  %v13199_v36 = vunpack.c.h.s8.bf16 %v12201_v3 }
 0xeb8   : > { %8491 = vmatprep.subr.bf16.mxu0 %v13198_v62  ;;  %v6213_v18 = vmul.f32 %v12327_v27, %v6189_v63  ;;  %v6190_v49 = vadd.f32 0.37409195, %v6166_v43  ;;  %v6105_v8 = vadd.f32 -0.18628806, %v6081_v1  ;;  %v6060_v44 = vadd.f32 0.27886808, %v6036_v40 }
 0xeb9   : > { %7169 = vmatpush1.bf16.msra.mxu1 %v13199_v36  ;;  %v13200_v7 = vunpack.c.l.s8.bf16 %v12219_v31  ;;  %v6215_v11 = vmul.f32 %v12337_v46, %v6191_v47  ;;  %v6192_v48 = vadd.f32 0.37409195, %v6168_v2  ;;  %v6107_v52 = vadd.f32 -0.18628806, %v6083_v14 }
 0xeba   : > { %v6082_v10 = vmul.f32 %v12418_v23, %v6058_v22  ;;  %v13201_v37 = vunpack.c.h.s8.bf16 %v12312_v60  ;;  %v6237_v54 = vadd.f32 1.0000237, %v6213_v18  ;;  %v6214_v3 = vmul.f32 %v12345_v53, %v6190_v49 }
 0xebb   : > { %7170 = vmatprep.subr.bf16.mxu1 %v13200_v7  ;;  %v6129_v35 = vmul.f32 %v12395_v38, %v6105_v8  ;;  %v6084_v12 = vmul.f32 %v12426_v0, %v6060_v44  ;;  %v13202_v25 = vunpack.c.l.s8.bf16 %v12325_v33  ;;  %v6239_v17 = vadd.f32 1.0000237, %v6215_v11 }
 0xebc   : > { %8492 = vmatpush3.bf16.msra.mxu0 %v13201_v37  ;;  %v6216_v39 = vmul.f32 %v12352_v13, %v6192_v48  ;;  %v6131_v63 = vmul.f32 %v12406_v41, %v6107_v52  ;;  %v6106_v43 = vadd.f32 -0.18628806, %v6082_v10  ;;  %v13203_v1 = vunpack.c.l.s8.bf16 %v12222_v56 }
 0xebd   : > { %8493 = vmatprep.subr.bf16.mxu0 %v13202_v25  ;;  %v6261_v60 = vmul.f32 %v12327_v27, %v6237_v54  ;;  %v6238_v40 = vadd.f32 1.0000237, %v6214_v3  ;;  %v6153_v62 = vadd.f32 0.09678418, %v6129_v35  ;;  %v6108_v47 = vadd.f32 -0.18628806, %v6084_v12 }
 0xebe   : > { %7171 = vmatpush1.bf16.msra.mxu1 %v13203_v1  ;;  %v13204_v2 = vunpack.c.h.s8.bf16 %v12219_v31  ;;  %v6263_v14 = vmul.f32 %v12337_v46, %v6239_v17  ;;  %v6240_v22 = vadd.f32 1.0000237, %v6216_v39  ;;  %v6155_v36 = vadd.f32 0.09678418, %v6131_v63 }
 0xebf   : > { %v6130_v18 = vmul.f32 %v12418_v23, %v6106_v43  ;;  %v13205_v49 = vunpack.c.l.s8.bf16 %v12335_v9  ;;  %v6285_v8 = vadd.f32 -1.2655122, %v6261_v60  ;;  %v6262_v44 = vmul.f32 %v12345_v53, %v6238_v40 }
 0xec0   : > { %7172 = vmatprep.subr.bf16.mxu1 %v13204_v2  ;;  %v6177_v7 = vmul.f32 %v12395_v38, %v6153_v62  ;;  %v6132_v11 = vmul.f32 %v12426_v0, %v6108_v47  ;;  %v13206_v48 = vunpack.c.h.s8.bf16 %v12325_v33  ;;  %v6287_v31 = vadd.f32 -1.2655122, %v6263_v14 }
 0xec1   : > { %8494 = vmatpush3.bf16.msra.mxu0 %v13205_v49  ;;  %v6264_v52 = vmul.f32 %v12352_v13, %v6240_v22  ;;  %v6179_v10 = vmul.f32 %v12406_v41, %v6155_v36  ;;  %v6154_v37 = vadd.f32 0.09678418, %v6130_v18  ;;  %v13207_v54 = vunpack.c.h.s8.bf16 %v12222_v56 }
 0xec2   : > { %8495 = vmatprep.subr.bf16.mxu0 %v13206_v48  ;;  %v6357_v3 = vadd.f32 %v12388_v57, %v6285_v8  ;;  %v6286_v35 = vadd.f32 -1.2655122, %v6262_v44  ;;  %v6201_v12 = vadd.f32 0.37409195, %v6177_v7  ;;  %v6156_v25 = vadd.f32 0.09678418, %v6132_v11 }
 0xec3   : > { %7173 = vmatpush1.bf16.msra.mxu1 %v13207_v54  ;;  %v13208_v17 = vunpack.c.l.s8.bf16 %v12237_v28  ;;  %v6359_v33 = vadd.f32 %v12399_v59, %v6287_v31  ;;  %v6288_v39 = vadd.f32 -1.2655122, %v6264_v52  ;;  %v6203_v63 = vadd.f32 0.37409195, %v6179_v10 }
 0xec4   : > { %v6178_v43 = vmul.f32 %v12418_v23, %v6154_v37  ;;  %v13209_v1 = vunpack.c.h.s8.bf16 %v12335_v9  ;;  %v6389_v56 = vmul.f32 1.442695, %v6357_v3  ;;  %v6358_v60 = vadd.f32 %v12402_v45, %v6286_v35  ;;  %v12539_v9 = vld [vmem:[%s9867_s2 + $0x430] sm:$0xff] }
 0xec5   : > { %7174 = vmatprep.subr.bf16.mxu1 %v13208_v17  ;;  %v6225_v57 = vmul.f32 %v12395_v38, %v6201_v12  ;;  %v6180_v40 = vmul.f32 %v12426_v0, %v6156_v25  ;;  %v13210_v62 = vunpack.c.l.s8.bf16 %v12361_v5  ;;  %v6393_v47 = vmul.f32 1.442695, %v6359_v33 }
 0xec6   : > { %8496 = vmatpush3.bf16.msra.mxu0 %v13209_v1  ;;  %v6360_v59 = vadd.f32 %v12410_v19, %v6288_v39  ;;  %v6227_v2 = vmul.f32 %v12406_v41, %v6203_v63  ;;  %v6202_v14 = vadd.f32 0.37409195, %v6178_v43  ;;  %v13211_v22 = vunpack.c.l.s8.bf16 %v12247_v34 }
 0xec7   : > { %8497 = vmatprep.subr.bf16.mxu0 %v13210_v62  ;;  %9310 = vpow2.f32 %v6389_v56  ;;  %v6391_v45 = vmul.f32 1.442695, %v6358_v60  ;;  %v6249_v36 = vadd.f32 1.0000237, %v6225_v57  ;;  %v6204_v18 = vadd.f32 0.37409195, %v6180_v40 }
 0xec8   : > { %7175 = vmatpush1.bf16.msra.mxu1 %v13211_v22  ;;  %v13212_v49 = vunpack.c.h.s8.bf16 %v12237_v28  ;;  %9312 = vpow2.f32 %v6393_v47  ;;  %v6395_v8 = vmul.f32 1.442695, %v6360_v59  ;;  %v6251_v44 = vadd.f32 1.0000237, %v6227_v2  ;;  %v6688_v22 = vld [vmem:[%s9867_s2 + $0x2b8] sm:$0xff] }
 0xec9   : > { %v6226_v19 = vmul.f32 %v12418_v23, %v6202_v14  ;;  %v13213_v7 = vunpack.c.l.s8.bf16 %v12371_v42  ;;  %9314 = vpow2.f32 %v6391_v45  ;;  %v6273_v11 = vmul.f32 %v12395_v38, %v6249_v36 }
 0xeca   : > { %7176 = vmatprep.subr.bf16.mxu1 %v13212_v49  ;;  %v6228_v48 = vmul.f32 %v12426_v0, %v6204_v18  ;;  %v13214_v31 = vunpack.c.h.s8.bf16 %v12361_v5  ;;  %v7011_v28 = vunpack.c.l.s8.bf16 %v12539_v9  ;;  %9316 = vpow2.f32 %v6395_v8 }
 0xecb   : > { %8498 = vmatpush3.bf16.msra.mxu0 %v13213_v7  ;;  %v6275_v52 = vmul.f32 %v12406_v41, %v6251_v44  ;;  %v6250_v10 = vadd.f32 1.0000237, %v6226_v19  ;;  %v6322_v37 = vsub.f32 0.0, %v12300_v61  ;;  %v13215_v54 = vunpack.c.h.s8.bf16 %v12247_v34  ;;  %v6689_v34 = vld [vmem:[%s9867_s2 + $0x2c0] sm:$0xff] }
 0xecc   : > { %8499 = vmatprep.subr.bf16.mxu0 %v13214_v31  ;;  %v6297_v3 = vadd.f32 -1.2655122, %v6273_v11  ;;  %v13216_v35 = vsub.f32 0.0, %v12264_v4  ;;  %v6252_v25 = vadd.f32 1.0000237, %v6228_v48  ;;  %v6324_v5 = vsub.f32 0.0, %v12315_v26 }
 0xecd   : > { %7177 = vmatpush1.bf16.msra.mxu1 %v13215_v54  ;;  %v13217_v17 = vunpack.c.l.s8.bf16 %v12261_v51  ;;  %v6299_v33 = vadd.f32 -1.2655122, %v6275_v52  ;;  %v13218_v39 = vsub.f32 0.0, %v12280_v16  ;;  %v6274_v43 = vmul.f32 %v12418_v23, %v6250_v10  ;;  %v6692_v11 = vld [vmem:[%s9867_s2 + $0x2d8] sm:$0xff]  ;;  %v12581_v48 = vld [vmem:[%s9867_s2 + $0x2d0] sm:$0xff] }
 0xece   : > { %v6345_v12 = vmul.f32 %v13216_v35, %v12264_v4  ;;  %v13219_v1 = vunpack.c.h.s8.bf16 %v12371_v42  ;;  %v6276_v4 = vmul.f32 %v12426_v0, %v6252_v25  ;;  %v6346_v40 = vmul.f32 %v6322_v37, %v12300_v61 }
 0xecf   : > { %7178 = vmatprep.subr.bf16.mxu1 %v13217_v17  ;;  %v6347_v63 = vmul.f32 %v13218_v39, %v12280_v16  ;;  %v6298_v57 = vadd.f32 -1.2655122, %v6274_v43  ;;  %v13220_v62 = vunpack.c.l.s8.bf16 %v12277_v50  ;;  %v6916_v16 = vunpack.c.h.s8.bf16 %v12277_v50 }
 0xed0   : > { %8500 = vmatpush3.bf16.msra.mxu0 %v13219_v1  ;;  %v6369_v56 = vadd.f32 %v6345_v12, %v6297_v3  ;;  %v6300_v59 = vadd.f32 -1.2655122, %v6276_v4  ;;  %v6348_v2 = vmul.f32 %v6324_v5, %v12315_v26  ;;  %v13221_v42 = vunpack.c.h.s8.bf16 %v12261_v51 }
 0xed1   : > { %8507 = vmatprep.subr.bf16.mxu0 %v7011_v28  ;;  %v6371_v60 = vadd.f32 %v6347_v63, %v6299_v33  ;;  %7179 = vmatpush1.bf16.msra.mxu1 %v13220_v62  ;;  %v6920_v14 = vunpack.c.l.s8.bf16 %v6689_v34  ;;  %v6370_v36 = vadd.f32 %v6346_v40, %v6298_v57  ;;  %v9311_v18 = vpop.eup %9310  ;;  %v6919_v44 = vunpack.c.l.s8.bf16 %v6688_v22 }
 0xed2   : > { %v6413_v47 = vmul.f32 1.442695, %v6369_v56  ;;  %7180 = vmatprep.subr.bf16.mxu1 %v13221_v42  ;;  %v6372_v61 = vadd.f32 %v6348_v2, %v6300_v59  ;;  %v9313_v49 = vpop.eup %9312  ;;  %v6429_v8 = vmul.f32 %v9311_v18, %v12327_v27  ;;  %v6923_v7 = vunpack.c.h.s8.bf16 %v6689_v34  ;;  %v6694_v2 = vld [vmem:[%s9867_s2 + $0x2e8] sm:$0xff] }
 0xed3   : > { %v6417_v45 = vmul.f32 1.442695, %v6371_v60  ;;  %v6415_v50 = vmul.f32 1.442695, %v6370_v36  ;;  %v9315_v26 = vpop.eup %9314  ;;  %v6431_v51 = vmul.f32 %v9313_v49, %v12337_v46  ;;  %v6922_v27 = vunpack.c.h.s8.bf16 %v6688_v22 }
 0xed4   : > { %9318 = vpow2.f32 %v6413_v47  ;;  %v6419_v19 = vmul.f32 1.442695, %v6372_v61  ;;  %v9317_v31 = vpop.eup %9316  ;;  %v6453_v28 = vsub.f32 1.0, %v6429_v8  ;;  %v6430_v52 = vmul.f32 %v9315_v26, %v12345_v53  ;;  %v13222_v8 = vld [vmem:[#allocation29_spill] sm:$0xff]  ;;  %v13223_v26 = vld [vmem:[#allocation28_spill] sm:$0xff] }
 0xed5   : > { %9320 = vpow2.f32 %v6417_v45  ;;  %7181 = vmatpush1.bf16.msra.mxu1 %v6916_v16  ;;  %v6455_v10 = vsub.f32 1.0, %v6431_v51  ;;  %v6432_v37 = vmul.f32 %v9317_v31, %v12352_v13  ;;  %v6926_v3 = vunpack.c.l.s8.bf16 %v6692_v11  ;;  %v6698_v31 = vld [vmem:[%s9867_s2 + $0x308] sm:$0xff] }
 0xed6   : > { %7182 = vmatprep.subr.bf16.mxu1 %v6920_v14  ;;  %9322 = vpow2.f32 %v6415_v50  ;;  %v6501_v54 = vsub.f32 0.0, %v6453_v28  ;;  %v6925_v46 = vunpack.c.l.s8.bf16 %v12581_v48  ;;  %v6454_v35 = vsub.f32 1.0, %v6430_v52 }
 0xed7   : > { %9324 = vpow2.f32 %v6419_v19  ;;  %v6503_v12 = vsub.f32 0.0, %v6455_v10  ;;  %v6929_v25 = vunpack.c.h.s8.bf16 %v6692_v11  ;;  %v6456_v5 = vsub.f32 1.0, %v6432_v37  ;;  %v13224_v11 = vld [vmem:[#allocation26_spill] sm:$0xff] }
 0xed8   : > { %v5709_v17 = vmul.f32 0.5, %v12124_v29  ;;  %v6525_v53 = vsel %vm6477_vm15, %v6453_v28, %v6501_v54  ;;  %v6502_v33 = vsub.f32 0.0, %v6454_v35  ;;  %v5711_v43 = vmul.f32 0.5, %v12135_v21  ;;  %v6695_v21 = vld [vmem:[%s9867_s2 + $0x2f0] sm:$0xff] }
 0xed9   : > { %7183 = vmatpush1.bf16.msra.mxu1 %v6919_v44  ;;  %v6549_v39 = vadd.f32 1.0, %v6525_v53  ;;  %v6527_v13 = vsel %vm6479_vm0, %v6455_v10, %v6503_v12  ;;  %v6504_v63 = vsub.f32 0.0, %v6456_v5  ;;  %v5710_v29 = vmul.f32 0.5, %v12138_v58  ;;  %v13226_v10 = vld [vmem:[#allocation30_spill] sm:$0xff] }
 0xeda   : > { %7184 = vmatprep.subr.bf16.mxu1 %v6923_v7  ;;  %v6551_v34 = vadd.f32 1.0, %v6527_v13  ;;  %v6526_v24 = vsel %vm6478_vm2, %v6454_v35, %v6502_v33  ;;  %v6928_v58 = vunpack.c.h.s8.bf16 %v12581_v48  ;;  %v6932_v45 = vunpack.c.l.s8.bf16 %v6695_v21  ;;  %v6697_v53 = vld [vmem:[%s9867_s2 + $0x300] sm:$0xff] }
 0xedb   : > { %v6573_v56 = vmul.f32 %v6549_v39, %v5709_v17  ;;  %v6550_v55 = vadd.f32 1.0, %v6526_v24  ;;  %v6528_v4 = vsel %vm6480_vm3, %v6456_v5, %v6504_v63  ;;  %v6931_v18 = vunpack.c.l.s8.bf16 %v6694_v2  ;;  %v6723_v63 = vld [vmem:[%s9867_s2 + $0x3d0] sm:$0xff] }
 0xedc   : > { %v6575_v57 = vmul.f32 %v6551_v34, %v5711_v43  ;;  %v6552_v62 = vadd.f32 1.0, %v6528_v4  ;;  %vm6491_vm5 = vcmp.ge.f32.partialorder %v13222_v8, 0.0  ;;  %v6935_v50 = vunpack.c.h.s8.bf16 %v6695_v21  ;;  %v6744_v8 = vld [vmem:[%s9867_s2 + $0x478] sm:$0xff] }
 0xedd   : > { %7185 = vmatpush1.bf16.msra.mxu1 %v6922_v27  ;;  %v6574_v16 = vmul.f32 %v6550_v55, %v5710_v29  ;;  %v5721_v51 = vmul.f32 0.5, %v13223_v26  ;;  %vm6490_vm6 = vcmp.ge.f32.partialorder %v13225_v6, 0.0  ;;  %vm6492_vm7 = vcmp.ge.f32.partialorder %v13226_v10, 0.0 }
 0xede   : > { %v9319_v1 = vpop.eup %9318  ;;  %7186 = vmatprep.subr.bf16.mxu1 %v6926_v3  ;;  %v6576_v42 = vmul.f32 %v6552_v62, %v5712_v15  ;;  %v6934_v27 = vunpack.c.h.s8.bf16 %v6694_v2  ;;  %v13227_v3 = vld [vmem:[#allocation36_spill] sm:$0xff]  ;;  %v6938_v17 = vunpack.c.l.s8.bf16 %v6698_v31  ;;  %v6987_v29 = vunpack.c.l.s8.bf16 %v6723_v63  ;;  %v6700_v62 = vld [vmem:[%s9867_s2 + $0x318] sm:$0xff]  ;;  %v6741_v2 = vld [vmem:[%s9867_s2 + $0x460] sm:$0xff] }
 0xedf   : > { %v9321_v60 = vpop.eup %9320  ;;  %v6441_v40 = vmul.f32 %v9319_v1, %v12395_v38  ;;  %v6937_v1 = vunpack.c.l.s8.bf16 %v6697_v53  ;;  %v6941_v4 = vunpack.c.h.s8.bf16 %v6698_v31  ;;  %v6940_v15 = vunpack.c.h.s8.bf16 %v6697_v53 }
 0xee0   : > { %v6443_v30 = vmul.f32 %v9321_v60, %v12406_v41  ;;  %v9323_v47 = vpop.eup %9322  ;;  %v6701_v60 = vld [vmem:[%s9867_s2 + $0x320] sm:$0xff] }
 0xee1   : > { %v6465_v59 = vsub.f32 1.0, %v6441_v40  ;;  %7187 = vmatpush1.bf16.msra.mxu1 %v6925_v46  ;;  %v9325_v14 = vpop.eup %9324  ;;  %v6442_v32 = vmul.f32 %v9323_v47, %v12418_v23  ;;  %v5722_v46 = vmul.f32 0.5, %v13227_v3  ;;  %v6990_v40 = vunpack.c.h.s8.bf16 %v6723_v63 }
 0xee2   : > { %v6467_v22 = vsub.f32 1.0, %v6443_v30  ;;  %7188 = vmatprep.subr.bf16.mxu1 %v6929_v25  ;;  %v6444_v38 = vmul.f32 %v9325_v14, %v12426_v0  ;;  %v5723_v0 = vmul.f32 0.5, %v13224_v11  ;;  %v13228_v25 = vld [vmem:[#allocation27_spill] sm:$0xff]  ;;  %v6944_v21 = vunpack.c.l.s8.bf16 %v6701_v60  ;;  %v6732_v11 = vld [vmem:[%s9867_s2 + $0x418] sm:$0xff] }
 0xee3   : > { %v6513_v36 = vsub.f32 0.0, %v6465_v59  ;;  %v6466_v61 = vsub.f32 1.0, %v6442_v32  ;;  %v5724_v5 = vmul.f32 0.5, %v13228_v25  ;;  %v6726_v30 = vld [vmem:[%s9867_s2 + $0x3e8] sm:$0xff]  ;;  %v6947_v47 = vunpack.c.h.s8.bf16 %v6701_v60  ;;  %v6719_v60 = vld [vmem:[%s9867_s2 + $0x3b0] sm:$0xff] }
 0xee4   : > { %v6515_v41 = vsub.f32 0.0, %v6467_v22  ;;  %v6468_v44 = vsub.f32 1.0, %v6444_v38  ;;  %v6996_v14 = vunpack.c.h.s8.bf16 %v6726_v30  ;;  %v7023_v32 = vunpack.c.l.s8.bf16 %v6741_v2 }
 0xee5   : > { %v6537_v49 = vsel %vm6489_vm4, %v6465_v59, %v6513_v36  ;;  %7189 = vmatpush1.bf16.msra.mxu1 %v6928_v58  ;;  %v6514_v23 = vsub.f32 0.0, %v6466_v61  ;;  %v6704_v58 = vld [vmem:[%s9867_s2 + $0x338] sm:$0xff]  ;;  %v6729_v36 = vld [vmem:[%s9867_s2 + $0x400] sm:$0xff]  ;;  %v7008_v3 = vunpack.c.h.s8.bf16 %v6732_v11 }
 0xee6   : > { %v6561_v19 = vadd.f32 1.0, %v6537_v49  ;;  %v6539_v7 = vsel %vm6491_vm5, %v6467_v22, %v6515_v41  ;;  %7190 = vmatprep.subr.bf16.mxu1 %v6932_v45  ;;  %v6516_v28 = vsub.f32 0.0, %v6468_v44  ;;  %v6950_v22 = vunpack.c.l.s8.bf16 %v6704_v58  ;;  %v6703_v45 = vld [vmem:[%s9867_s2 + $0x330] sm:$0xff] }
 0xee7   : > { %v6563_v48 = vadd.f32 1.0, %v6539_v7  ;;  %v6538_v37 = vsel %vm6490_vm6, %v6466_v61, %v6514_v23  ;;  %v6949_v38 = vunpack.c.l.s8.bf16 %v6703_v45  ;;  %v6999_v41 = vunpack.c.l.s8.bf16 %v6729_v36  ;;  %v6707_v49 = vld [vmem:[%s9867_s2 + $0x350] sm:$0xff] }
 0xee8   : > { %v6585_v52 = vmul.f32 %v6561_v19, %v5721_v51  ;;  %v6562_v35 = vadd.f32 1.0, %v6538_v37  ;;  %v6540_v12 = vsel %vm6492_vm7, %v6468_v44, %v6516_v28  ;;  %v7026_v61 = vunpack.c.h.s8.bf16 %v6741_v2  ;;  %v6706_v19 = vld [vmem:[%s9867_s2 + $0x348] sm:$0xff] }
 0xee9   : > { %v6587_v54 = vmul.f32 %v6563_v48, %v5723_v0  ;;  %7191 = vmatpush1.bf16.msra.mxu1 %v6931_v18  ;;  %v6564_v39 = vadd.f32 1.0, %v6540_v12  ;;  %v6953_v18 = vunpack.c.h.s8.bf16 %v6704_v58  ;;  %v7002_v26 = vunpack.c.h.s8.bf16 %v6729_v36  ;;  %v6710_v37 = vld [vmem:[%s9867_s2 + $0x368] sm:$0xff] }
 0xeea   : > { %7192 = vmatprep.subr.bf16.mxu1 %v6935_v50  ;;  %v12611_v33 = vpack.c.bf16 %v6585_v52, %v6573_v56  ;;  %v6586_v13 = vmul.f32 %v6562_v35, %v5722_v46  ;;  %v7014_v56 = vunpack.c.h.s8.bf16 %v12539_v9  ;;  %v6952_v50 = vunpack.c.h.s8.bf16 %v6703_v45  ;;  %v6709_v35 = vld [vmem:[%s9867_s2 + $0x360] sm:$0xff]  ;;  %v6722_v2 = vld [vmem:[%s9867_s2 + $0x3c8] sm:$0xff] }
 0xeeb   : > { %v12614_v43 = vpack.c.bf16 %v6587_v54, %v6575_v57  ;;  %v6588_v34 = vmul.f32 %v6564_v39, %v5724_v5  ;;  %v6738_v57 = vld [vmem:[%s9867_s2 + $0x448] sm:$0xff]  ;;  %v6956_v51 = vunpack.c.l.s8.bf16 %v6707_v49  ;;  %v7029_v23 = vunpack.c.l.s8.bf16 %v6744_v8  ;;  %v6713_v5 = vld [vmem:[%s9867_s2 + $0x380] sm:$0xff]  ;;  %v6712_v39 = vld [vmem:[%s9867_s2 + $0x378] sm:$0xff] }
 0xeec   : > { %v6598_v24 = vpack.c.bf16 %v6586_v13, %v6574_v16  ;;  %v7017_v9 = vunpack.c.l.s8.bf16 %v6738_v57  ;;  %v6993_v16 = vunpack.c.l.s8.bf16 %v6726_v30  ;;  %v7020_v59 = vunpack.c.h.s8.bf16 %v6738_v57  ;;  %v6721_v45 = vld [vmem:[%s9867_s2 + $0x3c0] sm:$0xff] }
 0xeed   : > { %7193 = vmatpush1.bf16.msra.mxu1 %v6934_v27  ;;  %v12616_v55 = vpack.c.bf16 %v6588_v34, %v6576_v42  ;;  %v6946_v42 = vunpack.c.h.s8.bf16 %v6700_v62  ;;  %v6955_v31 = vunpack.c.l.s8.bf16 %v6706_v19  ;;  %v7005_v52 = vunpack.c.l.s8.bf16 %v6732_v11  ;;  %v6716_v34 = vld [vmem:[%s9867_s2 + $0x398] sm:$0xff]  ;;  %v6730_v11 = vld [vmem:[%s9867_s2 + $0x408] sm:$0xff] }
 0xeee   : > { %7205 = vmatprep.subr.bf16.mxu1 %v6938_v17  ;;  %7487 = vmatprep.mubr.bf16.mxu0 %v6598_v24  ;;  %v6959_v10 = vunpack.c.h.s8.bf16 %v6707_v49  ;;  %v7032_v27 = vunpack.c.h.s8.bf16 %v6744_v8  ;;  %v6958_v54 = vunpack.c.h.s8.bf16 %v6706_v19  ;;  %v6962_v46 = vunpack.c.l.s8.bf16 %v6710_v37  ;;  %v6731_v19 = vld [vmem:[%s9867_s2 + $0x410] sm:$0xff] }
 0xeef   : > { %7488 = vmatmul.mubr.bf16.vlgmr.msra.gmra.mrb[84].mxu0 %v12611_v33  ;;  %v6961_v12 = vunpack.c.l.s8.bf16 %v6709_v35  ;;  %v6965_v25 = vunpack.c.h.s8.bf16 %v6710_v37  ;;  %v6964_v17 = vunpack.c.h.s8.bf16 %v6709_v35  ;;  %v6968_v53 = vunpack.c.l.s8.bf16 %v6713_v5  ;;  %v6737_v37 = vld [vmem:[%s9867_s2 + $0x440] sm:$0xff] }
 0xef0   : > { %7195 = vmatmul.mubr.bf16.vlgmr.msra.gmra.mrb[52].mxu1 %v12119_v20  ;;  %8508 = vmatpush3.bf16.msra.mxu0 %v6987_v29  ;;  %v6943_v20 = vunpack.c.l.s8.bf16 %v6700_v62  ;;  %v6967_v13 = vunpack.c.l.s8.bf16 %v6712_v39  ;;  %v6971_v63 = vunpack.c.h.s8.bf16 %v6713_v5  ;;  %v6715_v29 = vld [vmem:[%s9867_s2 + $0x390] sm:$0xff]  ;;  %v6983_v58 = vunpack.c.h.s8.bf16 %v6719_v60 }
 0xef1   : > { %7206 = vmatpush1.bf16.msra.mxu1 %v6937_v1  ;;  %7237 = vmatprep.mubr.bf16.mxu1 %v6598_v24  ;;  %v8413_v44 = vpop.f32.mrb[68].mxu0  ;;  %v6970_v24 = vunpack.c.h.s8.bf16 %v6712_v39  ;;  %v6974_v1 = vunpack.c.l.s8.bf16 %v6716_v34  ;;  %v6976_v57 = vunpack.c.h.s8.bf16 %v6715_v29  ;;  %v6989_v36 = vunpack.c.h.s8.bf16 %v6722_v2 }
 0xef2   : > { %7528 = vmatprep.mubr.bf16.mxu0 %v12616_v55  ;;  %7207 = vmatprep.subr.bf16.mxu1 %v6941_v4  ;;  %v8414_v7 = vpop.f32.mrb[69].mxu0  ;;  %v6973_v4 = vunpack.c.l.s8.bf16 %v6715_v29 }
 0xef3   : > { %8509 = vmatprep.subr.bf16.mxu0 %v7014_v56  ;;  %v8415_v0 = vadd.f32 %v8414_v7, %v8413_v44  ;;  %v8416_v48 = vpop.f32.mrb[70].mxu0  ;;  %v6977_v56 = vunpack.c.h.s8.bf16 %v6716_v34 }
 0xef4   : > { %8510 = vmatpush3.bf16.msra.mxu0 %v6990_v40  ;;  %v8417_v6 = vpop.f32.mrb[71].mxu0  ;;  %v6980_v40 = vunpack.c.l.s8.bf16 %v6719_v60 }
 0xef5   : > { %7208 = vmatpush1.bf16.msra.mxu1 %v6940_v15  ;;  %8511 = vmatprep.subr.bf16.mxu0 %v7017_v9  ;;  %v8418_v28 = vadd.f32 %v8417_v6, %v8416_v48  ;;  %v7007_v48 = vunpack.c.h.s8.bf16 %v6731_v19  ;;  %v6734_v6 = vld [vmem:[%s9867_s2 + $0x428] sm:$0xff] }
 0xef6   : > { %7209 = vmatprep.subr.bf16.mxu1 %v6944_v21  ;;  %v6718_v21 = vld [vmem:[%s9867_s2 + $0x3a8] sm:$0xff] }
 0xef8   : > { %8512 = vmatpush3.bf16.msra.mxu0 %v6993_v16  ;;  %v6979_v16 = vunpack.c.l.s8.bf16 %v6718_v21 }
 0xef9   : > { %7210 = vmatpush1.bf16.msra.mxu1 %v6943_v20  ;;  %8513 = vmatprep.subr.bf16.mxu0 %v7020_v59 }
 0xefa   : > { %7211 = vmatprep.subr.bf16.mxu1 %v6947_v47 }
 0xefc   : > { %8514 = vmatpush3.bf16.msra.mxu0 %v6996_v14  ;;  %v6982_v14 = vunpack.c.h.s8.bf16 %v6718_v21 }
 0xefd   : > { %7212 = vmatpush1.bf16.msra.mxu1 %v6946_v42  ;;  %8515 = vmatprep.subr.bf16.mxu0 %v7023_v32  ;;  %v6985_v32 = vunpack.c.l.s8.bf16 %v6721_v45 }
 0xefe   : > { %7213 = vmatprep.subr.bf16.mxu1 %v6950_v22  ;;  %v6986_v22 = vunpack.c.l.s8.bf16 %v6722_v2 }
 0xf00   : > { %8516 = vmatpush3.bf16.msra.mxu0 %v6999_v41  ;;  %v6988_v41 = vunpack.c.h.s8.bf16 %v6721_v45 }
 0xf01   : > { %7214 = vmatpush1.bf16.msra.mxu1 %v6949_v38  ;;  %8517 = vmatprep.subr.bf16.mxu0 %v7026_v61  ;;  %v6725_v38 = vld [vmem:[%s9867_s2 + $0x3e0] sm:$0xff]  ;;  %v6724_v61 = vld [vmem:[%s9867_s2 + $0x3d8] sm:$0xff] }
 0xf02   : > { %7215 = vmatprep.subr.bf16.mxu1 %v6953_v18  ;;  %v6992_v18 = vunpack.c.l.s8.bf16 %v6725_v38  ;;  %v6991_v49 = vunpack.c.l.s8.bf16 %v6724_v61  ;;  %v6995_v8 = vunpack.c.h.s8.bf16 %v6725_v38  ;;  %v6994_v44 = vunpack.c.h.s8.bf16 %v6724_v61 }
 0xf04   : > { %8518 = vmatpush3.bf16.msra.mxu0 %v7002_v26 }
 0xf05   : > { %7216 = vmatpush1.bf16.msra.mxu1 %v6952_v50  ;;  %8519 = vmatprep.subr.bf16.mxu0 %v7029_v23  ;;  %v6728_v50 = vld [vmem:[%s9867_s2 + $0x3f8] sm:$0xff]  ;;  %v7004_v23 = vunpack.c.l.s8.bf16 %v6731_v19  ;;  %v9358_v19 = vld [vmem:[%s9838_s9 + $0x40] sm:$0xff] }
 0xf06   : > { %7217 = vmatprep.subr.bf16.mxu1 %v6956_v51  ;;  %v6998_v26 = vunpack.c.l.s8.bf16 %v6728_v50 }
 0xf08   : > { %8520 = vmatpush3.bf16.msra.mxu0 %v7005_v52  ;;  %v6733_v52 = vld [vmem:[%s9867_s2 + $0x420] sm:$0xff] }
 0xf09   : > { %7218 = vmatpush1.bf16.msra.mxu1 %v6955_v31  ;;  %8521 = vmatprep.subr.bf16.mxu0 %v7032_v27  ;;  %v7006_v31 = vunpack.c.h.s8.bf16 %v6730_v11  ;;  %v7013_v27 = vunpack.c.h.s8.bf16 %v6734_v6 }
 0xf0a   : > { %7219 = vmatprep.subr.bf16.mxu1 %v6959_v10  ;;  %v7009_v10 = vunpack.c.l.s8.bf16 %v6733_v52 }
 0xf0c   : > { %8522 = vmatpush3.bf16.msra.mxu0 %v7008_v3  ;;  %v7016_v3 = vunpack.c.l.s8.bf16 %v6737_v37 }
 0xf0d   : > { %7220 = vmatpush1.bf16.msra.mxu1 %v6958_v54  ;;  %v7012_v54 = vunpack.c.h.s8.bf16 %v6733_v52 }
 0xf0e   : > { %7221 = vmatprep.subr.bf16.mxu1 %v6962_v46  ;;  %v6736_v46 = vld [vmem:[%s9867_s2 + $0x438] sm:$0xff] }
 0xf0f   : > { %7529 = vmatmul.mubr.bf16.vlgmr.msra.gmra.mrb[88].mxu0 %v12614_v43  ;;  %v7015_v35 = vunpack.c.l.s8.bf16 %v6736_v46  ;;  %v7018_v5 = vunpack.c.h.s8.bf16 %v6736_v46 }
 0xf11   : > { %7222 = vmatpush1.bf16.msra.mxu1 %v6961_v12  ;;  %v8435_v15 = vpop.f32.mrb[72].mxu0  ;;  %v7019_v12 = vunpack.c.h.s8.bf16 %v6737_v37 }
 0xf12   : > { %7223 = vmatprep.subr.bf16.mxu1 %v6965_v25  ;;  %v8436_v62 = vpop.f32.mrb[73].mxu0  ;;  %v6740_v25 = vld [vmem:[%s9867_s2 + $0x458] sm:$0xff] }
 0xf13   : > { %v8437_v9 = vadd.f32 %v8436_v62, %v8435_v15  ;;  %v8438_v30 = vpop.f32.mrb[74].mxu0 }
 0xf14   : > { %v8439_v20 = vpop.f32.mrb[75].mxu0 }
 0xf15   : > { %7224 = vmatpush1.bf16.msra.mxu1 %v6964_v17  ;;  %v12643_v47 = vadd.f32 %v8437_v9, %v8415_v0  ;;  %v8440_v59 = vadd.f32 %v8439_v20, %v8438_v30  ;;  %v7003_v0 = vunpack.c.l.s8.bf16 %v6730_v11  ;;  %v7022_v17 = vunpack.c.l.s8.bf16 %v6740_v25 }
 0xf16   : > { %7225 = vmatprep.subr.bf16.mxu1 %v6968_v53  ;;  %v6739_v53 = vld [vmem:[%s9867_s2 + $0x450] sm:$0xff] }
 0xf17   : > { %v12646_v42 = vadd.f32 %v8440_v59, %v8418_v28  ;;  %v7010_v28 = vunpack.c.l.s8.bf16 %v6734_v6  ;;  %v7021_v39 = vunpack.c.l.s8.bf16 %v6739_v53  ;;  %v7024_v34 = vunpack.c.h.s8.bf16 %v6739_v53 }
 0xf19   : > { %7226 = vmatpush1.bf16.msra.mxu1 %v6967_v13  ;;  %v7025_v13 = vunpack.c.h.s8.bf16 %v6740_v25  ;;  %v9360_v25 = vld [vmem:[%s9838_s9 + $0x50] sm:$0xff] }
 0xf1a   : > { %7227 = vmatprep.subr.bf16.mxu1 %v6971_v63  ;;  %v6743_v63 = vld [vmem:[%s9867_s2 + $0x470] sm:$0xff] }
 0xf1b   : > { %v7031_v15 = vunpack.c.h.s8.bf16 %v6743_v63 }
 0xf1d   : > { %7228 = vmatpush1.bf16.msra.mxu1 %v6970_v24  ;;  %v7028_v24 = vunpack.c.l.s8.bf16 %v6743_v63 }
 0xf1e   : > { %7229 = vmatprep.subr.bf16.mxu1 %v6974_v1  ;;  %v6742_v1 = vld [vmem:[%s9867_s2 + $0x468] sm:$0xff] }
 0xf1f   : > { %v7030_v9 = vunpack.c.h.s8.bf16 %v6742_v1 }
 0xf21   : > { %7230 = vmatpush1.bf16.msra.mxu1 %v6973_v4 }
 0xf22   : > { %7231 = vmatprep.subr.bf16.mxu1 %v6977_v56  ;;  %v7027_v56 = vunpack.c.l.s8.bf16 %v6742_v1 }
 0xf25   : > { %7232 = vmatpush1.bf16.msra.mxu1 %v6976_v57 }
 0xf26   : > { %7233 = vmatprep.subr.bf16.mxu1 %v6980_v40 }
 0xf29   : > { %7234 = vmatpush1.bf16.msra.mxu1 %v6979_v16 }
 0xf2a   : > { %7235 = vmatprep.subr.bf16.mxu1 %v6983_v58 }
 0xf2d   : > { %7236 = vmatpush1.bf16.msra.mxu1 %v6982_v14 }
 0xf2e   : > { %7248 = vmatprep.subr.bf16.mxu1 %v6986_v22 }
 0xf30   : > { %7238 = vmatmul.mubr.bf16.vlgmr.msra.gmra.mrb[52].mxu1 %v12611_v33  ;;  %v6727_v33 = vld [vmem:[%s9867_s2 + $0x3f0] sm:$0xff] }
 0xf31   : > { %7249 = vmatpush1.bf16.msra.mxu1 %v6985_v32  ;;  %7280 = vmatprep.mubr.bf16.mxu1 %v12616_v55  ;;  %v6997_v51 = vunpack.c.l.s8.bf16 %v6727_v33  ;;  %v7001_v55 = vunpack.c.h.s8.bf16 %v6728_v50  ;;  %v7000_v7 = vunpack.c.h.s8.bf16 %v6727_v33  ;;  %v9357_v50 = vld [vmem:[%s9838_s9 + $0x58] sm:$0xff] }
 0xf32   : > { %7250 = vmatprep.subr.bf16.mxu1 %v6989_v36 }
 0xf35   : > { %7251 = vmatpush1.bf16.msra.mxu1 %v6988_v41 }
 0xf36   : > { %7252 = vmatprep.subr.bf16.mxu1 %v6992_v18 }
 0xf39   : > { %7253 = vmatpush1.bf16.msra.mxu1 %v6991_v49 }
 0xf3a   : > { %7254 = vmatprep.subr.bf16.mxu1 %v6995_v8 }
 0xf3d   : > { %7255 = vmatpush1.bf16.msra.mxu1 %v6994_v44  ;;  %v13229_v44 = vld [vmem:[#allocation17_spill] sm:$0xff] }
 0xf3e   : > { %7256 = vmatprep.subr.bf16.mxu1 %v6998_v26  ;;  %v7548_v26 = vrot.slane %v9357_v50, %v13229_v44 }
 0xf41   : > { %7257 = vmatpush1.bf16.msra.mxu1 %v6997_v51 }
 0xf42   : > { %7258 = vmatprep.subr.bf16.mxu1 %v7001_v55 }
 0xf45   : > { %7259 = vmatpush1.bf16.msra.mxu1 %v7000_v7  ;;  %v13230_v7 = vld [vmem:[#allocation19_spill] sm:$0xff] }
 0xf46   : > { %7260 = vmatprep.subr.bf16.mxu1 %v7004_v23  ;;  %v7566_v23 = vrot.slane %v9358_v19, %v13230_v7 }
 0xf49   : > { %7261 = vmatpush1.bf16.msra.mxu1 %v7003_v0 }
 0xf4a   : > { %7262 = vmatprep.subr.bf16.mxu1 %v7007_v48  ;;  %v7584_v48 = vrot.slane %v9357_v50, %v13230_v7  ;;  %v7718_v50 = vld [vmem:[%s13237_s7 + $0x88] sm:$0xff] (!%p8232_p4) }
 0xf4d   : > { %7263 = vmatpush1.bf16.msra.mxu1 %v7006_v31 }
 0xf4e   : > { %7264 = vmatprep.subr.bf16.mxu1 %v7010_v28 }
 0xf51   : > { %7265 = vmatpush1.bf16.msra.mxu1 %v7009_v10 }
 0xf52   : > { %7266 = vmatprep.subr.bf16.mxu1 %v7013_v27  ;;  %v13231_v27 = vld [vmem:[#allocation23_spill] sm:$0xff] }
 0xf55   : > { %7267 = vmatpush1.bf16.msra.mxu1 %v7012_v54 }
 0xf56   : > { %7268 = vmatprep.subr.bf16.mxu1 %v7016_v3  ;;  %v13232_v3 = vld [vmem:[#allocation25_spill] sm:$0xff] }
 0xf59   : > { %7269 = vmatpush1.bf16.msra.mxu1 %v7015_v35  ;;  %v9359_v35 = vld [vmem:[%s9838_s9 + $0x48] sm:$0xff] }
 0xf5a   : > { %7270 = vmatprep.subr.bf16.mxu1 %v7019_v12  ;;  %v7540_v12 = vrot.slane %v9359_v35, %v13229_v44 }
 0xf5c   : > { %v8457_v29 = vpop.f32.mrb[76].mxu0 }
 0xf5d   : > { %7271 = vmatpush1.bf16.msra.mxu1 %v7018_v5  ;;  %v8458_v4 = vpop.f32.mrb[77].mxu0  ;;  %v7544_v5 = vrot.slane %v9360_v25, %v13229_v44  ;;  %v7701_v44 = vld [vmem:[%s13237_s7] sm:$0xff] (!%p8232_p4) }
 0xf5e   : > { %7272 = vmatprep.subr.bf16.mxu1 %v7022_v17  ;;  %v8459_v60 = vadd.f32 %v8458_v4, %v8457_v29  ;;  %v8460_v57 = vpop.f32.mrb[78].mxu0  ;;  %v9361_v17 = vld [vmem:[%s9838_s9 + $0x30] sm:$0xff]  ;;  %v7580_v4 = vrot.slane %v9360_v25, %v13230_v7 }
 0xf5f   : > { %v8461_v40 = vpop.f32.mrb[79].mxu0  ;;  %v7558_v53 = vrot.slane %v9361_v17, %v13230_v7 }
 0xf60   : > { %v7408_v21 = vadd.f32 %v8459_v60, %v12643_v47  ;;  %v8462_v62 = vadd.f32 %v8461_v40, %v8460_v57 }
 0xf61   : > { %7273 = vmatpush1.bf16.msra.mxu1 %v7021_v39 }
 0xf62   : > { %7274 = vmatprep.subr.bf16.mxu1 %v7025_v13  ;;  %v7411_v30 = vadd.f32 %v8462_v62, %v12646_v42  ;;  %v9362_v13 = vld [vmem:[%s9838_s9 + $0x38] sm:$0xff] }
 0xf63   : > { %v7562_v63 = vrot.slane %v9362_v13, %v13230_v7 }
 0xf65   : > { %7275 = vmatpush1.bf16.msra.mxu1 %v7024_v34 }
 0xf66   : > { %7276 = vmatprep.subr.bf16.mxu1 %v7028_v24  ;;  %v7576_v24 = vrot.slane %v9359_v35, %v13230_v7  ;;  %v7705_v35 = vld [vmem:[%s13237_s7 + $0x20] sm:$0xff] (!%p8232_p4) }
 0xf69   : > { %7277 = vmatpush1.bf16.msra.mxu1 %v7027_v56 }
 0xf6a   : > { %7278 = vmatprep.subr.bf16.mxu1 %v7031_v15 }
 0xf6d   : > { %7279 = vmatpush1.bf16.msra.mxu1 %v7030_v9 }
 0xf70   : > { %7281 = vmatmul.mubr.bf16.vlgmr.msra.gmra.mrb[52].mxu1 %v12614_v43 }
 0xf7c   : > { %v8479_v20 = vpop.f32.mrb[80].mxu0 }
 0xf7d   : > { %v8480_v16 = vpop.f32.mrb[81].mxu0 }
 0xf7e   : > { %v8481_v59 = vadd.f32 %v8480_v16, %v8479_v20  ;;  %v8482_v58 = vpop.f32.mrb[82].mxu0  ;;  %v13233_v16 = vld [vmem:[#allocation20_spill] sm:$0xff] }
 0xf7f   : > { %v8483_v2 = vpop.f32.mrb[83].mxu0 }
 0xf80   : > { %v7449_v14 = vadd.f32 %v8481_v59, %v7408_v21  ;;  %v8484_v22 = vadd.f32 %v8483_v2, %v8482_v58  ;;  %v13234_v2 = vld [vmem:[#allocation21_spill] sm:$0xff] }
 0xf82   : > { %v7452_v45 = vadd.f32 %v8484_v22, %v7411_v30 }
 0xfc2   : > { %v8501_v32 = vpop.f32.mrb[84].mxu0 }
 0xfc3   : > { %v8502_v47 = vpop.f32.mrb[85].mxu0 }
 0xfc4   : > { %v8503_v36 = vadd.f32 %v8502_v47, %v8501_v32  ;;  %v8504_v38 = vpop.f32.mrb[86].mxu0  ;;  %v13236_v47 = vld [vmem:[#allocation24_spill] sm:$0xff] }
 0xfc5   : > { %v8505_v41 = vpop.f32.mrb[87].mxu0 }
 0xfc6   : > { %v7490_v42 = vadd.f32 %v8503_v36, %v7449_v14  ;;  %v8506_v18 = vadd.f32 %v8505_v41, %v8504_v38 }
 0xfc8   : > { %v7493_v61 = vadd.f32 %v8506_v18, %v7452_v45  ;;  %v13235_v45 = vld [vmem:[#allocation22_spill] sm:$0xff] }
 0xfe2   : > { %v8523_v49 = vpop.f32.mrb[88].mxu0 }
 0xfe3   : > { %v8524_v43 = vpop.f32.mrb[89].mxu0 }
 0xfe4   : > { %v8525_v8 = vadd.f32 %v8524_v43, %v8523_v49  ;;  %v8526_v33 = vpop.f32.mrb[90].mxu0 }
 0xfe5   : > { %v8527_v51 = vpop.f32.mrb[91].mxu0 }
 0xfe6   : > { %v7531_v55 = vadd.f32 %v8525_v8, %v7490_v42  ;;  %v8528_v11 = vadd.f32 %v8527_v51, %v8526_v33  ;;  %v7717_v8 = vld [vmem:[%s13237_s7 + $0x80] sm:$0xff] (!%p8232_p4)  ;;  %v7702_v33 = vld [vmem:[%s13237_s7 + $0x8] sm:$0xff] (!%p8232_p4)  ;;  %v7719_v51 = vld [vmem:[%s13237_s7 + $0x90] sm:$0xff] (!%p8232_p4) }
 0xfe7   : > { %v8774_v19 = vpack.c.bf16 (!%p8232_p4), %v7702_v33, %v7701_v44  ;;  %v7728_v44 = vld [vmem:[%s13237_s7 + $0xd8] sm:$0xff] (!%p8232_p4) }
 0xfe8   : > { %v7551_v0 = vmul.f32 %v7548_v26, %v7531_v55  ;;  %v7534_v6 = vadd.f32 %v8528_v11, %v7493_v61  ;;  %v7720_v55 = vld [vmem:[%s13237_s7 + $0x98] sm:$0xff] (!%p8232_p4)  ;;  %v7734_v11 = vld [vmem:[%s13237_s7 + $0x108] sm:$0xff] (!%p8232_p4) }
 0xfe9   : > { %v8776_v7 = vpack.c.bf16 (!%p8232_p4), %v7720_v55, %v7719_v51  ;;  %v7742_v51 = vld [vmem:[%s13237_s7 + $0x148] sm:$0xff] (!%p8232_p4)  ;;  %v7711_v55 = vld [vmem:[%s13237_s7 + $0x50] sm:$0xff] (!%p8232_p4) }
 0xfea   : > { %v7569_v31 = vadd.f32 %v7566_v23, %v7551_v0  ;;  %v7554_v28 = vmul.f32 %v7548_v26, %v7534_v6  ;;  %v8772_v26 = vpack.c.bf16 (!%p8232_p4), %v7718_v50, %v7717_v8  ;;  %v7703_v0 = vld [vmem:[%s13237_s7 + $0x10] sm:$0xff] (!%p8232_p4)  ;;  %v7704_v6 = vld [vmem:[%s13237_s7 + $0x18] sm:$0xff] (!%p8232_p4) }
 0xfeb   : > { %v7727_v50 = vld [vmem:[%s13237_s7 + $0xd0] sm:$0xff] (!%p8232_p4) }
 0xfec   : > { %v7587_v52 = vmul.f32 %v7584_v48, %v7569_v31  ;;  %v7572_v10 = vadd.f32 %v7566_v23, %v7554_v28  ;;  %v7733_v23 = vld [vmem:[%s13237_s7 + $0x100] sm:$0xff] (!%p8232_p4)  ;;  %8773 = vmatprep.subr.bf16.mxu0 (!%p8232_p4), %v8772_v26  ;;  %v7722_v28 = vld [vmem:[%s13237_s7 + $0xa8] sm:$0xff] (!%p8232_p4)  ;;  %v8792_v33 = vpack.c.bf16 (!%p8232_p4), %v7728_v44, %v7727_v50 }
 0xfed   : > { %v7721_v31 = vld [vmem:[%s13237_s7 + $0xa0] sm:$0xff] (!%p8232_p4)  ;;  %8775 = vmatpush3.bf16.msra.mxu0 (!%p8232_p4), %v8774_v19  ;;  %v7712_v19 = vld [vmem:[%s13237_s7 + $0x58] sm:$0xff] (!%p8232_p4) }
 0xfee   : > { %v12674_v37 = vadd.f32 %v7587_v52, %v13231_v27  ;;  %v7590_v54 = vmul.f32 %v7584_v48, %v7572_v10  ;;  %v8804_v48 = vpack.c.bf16 (!%p8232_p4), %v7734_v11, %v7733_v23  ;;  %v8778_v52 = vpack.c.bf16 (!%p8232_p4), %v7704_v6, %v7703_v0  ;;  %v7735_v10 = vld [vmem:[%s13237_s7 + $0x110] sm:$0xff] (!%p8232_p4)  ;;  %v7736_v27 = vld [vmem:[%s13237_s7 + $0x118] sm:$0xff] (!%p8232_p4)  ;;  %8777 = vmatprep.subr.bf16.mxu0 (!%p8232_p4), %v8776_v7  ;;  %v7741_v26 = vld [vmem:[%s13237_s7 + $0x140] sm:$0xff] (!%p8232_p4) }
 0xfef   : > { %v8820_v7 = vpack.c.bf16 (!%p8232_p4), %v7742_v51, %v7741_v26  ;;  %v8794_v23 = vpack.c.bf16 (!%p8232_p4), %v7712_v19, %v7711_v55  ;;  %v7729_v11 = vld [vmem:[%s13237_s7 + $0xe0] sm:$0xff] (!%p8232_p4)  ;;  %v7730_v0 = vld [vmem:[%s13237_s7 + $0xe8] sm:$0xff] (!%p8232_p4) }
 0xff0   : > { %7599 = vst [vmem:[#allocation2 + $0x10] sm:$0xff] %v12674_v37  ;;  %v12678_v46 = vadd.f32 %v7590_v54, %v13232_v3  ;;  %8805 = vmatprep.subr.bf16.mxu1 (!%p8232_p4), %v8804_v48  ;;  %v8780_v54 = vpack.c.bf16 (!%p8232_p4), %v7722_v28, %v7721_v31  ;;  %v8808_v3 = vpack.c.bf16 (!%p8232_p4), %v7736_v27, %v7735_v10  ;;  %v7744_v31 = vld [vmem:[%s13237_s7 + $0x158] sm:$0xff] (!%p8232_p4)  ;;  %v7713_v28 = vld [vmem:[%s13237_s7 + $0x60] sm:$0xff] (!%p8232_p4) }
 0xff1   : > { %8807 = vmatpush3.bf16.msra.mxu1 (!%p8232_p4), %v8804_v48  ;;  %8779 = vmatpush3.bf16.msra.mxu0 (!%p8232_p4), %v8778_v52  ;;  %v7743_v48 = vld [vmem:[%s13237_s7 + $0x150] sm:$0xff] (!%p8232_p4)  ;;  %v8796_v6 = vpack.c.bf16 (!%p8232_p4), %v7730_v0, %v7729_v11  ;;  %v7714_v52 = vld [vmem:[%s13237_s7 + $0x68] sm:$0xff] (!%p8232_p4) }
 0xff2   : > { %7602 = vst [vmem:[#allocation2 + $0x28] sm:$0x3] %v12678_v46  ;;  %v7616_v61 = vsel (!%p8232_p4), %vm2193_vm1, %v12678_v46, 0.0  ;;  %8809 = vmatprep.subr.bf16.mxu1 (!%p8232_p4), %v8808_v3  ;;  %8781 = vmatprep.subr.bf16.mxu0 (!%p8232_p4), %v8780_v54  ;;  %v8824_v10 = vpack.c.bf16 (!%p8232_p4), %v7744_v31, %v7743_v48  ;;  %v8798_v27 = vpack.c.bf16 (!%p8232_p4), %v7714_v52, %v7713_v28  ;;  %v7731_v54 = vld [vmem:[%s13237_s7 + $0xf0] sm:$0xff] (!%p8232_p4) }
 0xff5   : > { %8811 = vmatpush3.bf16.msra.mxu1 (!%p8232_p4), %v8808_v3  ;;  %v7732_v3 = vld [vmem:[%s13237_s7 + $0xf8] sm:$0xff] (!%p8232_p4) }
0x1043   : > { %v7282_v39 = vpop.f32.mrb[52].mxu1 }
0x1044   : > { %v7549_v34 = vmul.f32 %v7540_v12, %v7282_v39  ;;  %v7284_v1 = vpop.f32.mrb[53].mxu1 }
0x1045   : > { %v7550_v29 = vmul.f32 %v7544_v5, %v7284_v1  ;;  %v7286_v56 = vpop.f32.mrb[54].mxu1 }
0x1046   : > { %v7567_v60 = vadd.f32 %v7558_v53, %v7549_v34  ;;  %v7552_v57 = vmul.f32 %v7540_v12, %v7286_v56  ;;  %v7288_v15 = vpop.f32.mrb[55].mxu1  ;;  %v7706_v12 = vld [vmem:[%s13237_s7 + $0x28] sm:$0xff] (!%p8232_p4) }
0x1047   : > { %v7568_v40 = vadd.f32 %v7562_v63, %v7550_v29  ;;  %v7553_v21 = vmul.f32 %v7544_v5, %v7288_v15  ;;  %v8782_v25 = vpack.c.bf16 (!%p8232_p4), %v7706_v12, %v7705_v35  ;;  %v7745_v35 = vld [vmem:[%s13237_s7 + $0x160] sm:$0xff] (!%p8232_p4)  ;;  %v8800_v12 = vpack.c.bf16 (!%p8232_p4), %v7732_v3, %v7731_v54 }
0x1048   : > { %v7585_v62 = vmul.f32 %v7576_v24, %v7567_v60  ;;  %v7570_v9 = vadd.f32 %v7558_v53, %v7552_v57 }
0x1049   : > { %v7586_v30 = vmul.f32 %v7580_v4, %v7568_v40  ;;  %v7571_v20 = vadd.f32 %v7562_v63, %v7553_v21  ;;  %7606 = sbr.rel (%p8232_p4) target bundleno = 4718 (0x126e), region = 116  ;;  %8783 = vmatpush3.bf16.msra.mxu0 (!%p8232_p4), %v8782_v25  ;;  %v7746_v25 = vld [vmem:[%s13237_s7 + $0x168] sm:$0xff] (!%p8232_p4) }
0x104a   : > { %v7591_v59 = vadd.f32 %v7585_v62, %v13233_v16  ;;  %v7588_v58 = vmul.f32 %v7576_v24, %v7570_v9  ;;  %v7723_v16 = vld [vmem:[%s13237_s7 + $0xb0] sm:$0xff] (!%p8232_p4) }
0x104b   : > { %v7592_v14 = vadd.f32 %v7586_v30, %v13234_v2  ;;  %v7589_v22 = vmul.f32 %v7580_v4, %v7571_v20 }
0x104c   : > { %7597 = vst [vmem:[#allocation2] sm:$0xff] %v7591_v59  ;;  %v7594_v32 = vadd.f32 %v7588_v58, %v13235_v45  ;;  %v7737_v58 = vld [vmem:[%s13237_s7 + $0x120] sm:$0xff] (!%p8232_p4)  ;;  %v7708_v45 = vld [vmem:[%s13237_s7 + $0x38] sm:$0xff] (!%p8232_p4) }
0x104d   : > { %7598 = vst [vmem:[#allocation2 + $0x8] sm:$0xff] %v7592_v14  ;;  %v7595_v36 = vadd.f32 %v7589_v22, %v13236_v47  ;;  %v7609_v38 = vadd.f32 (!%p8232_p4), %v7592_v14, %v7591_v59  ;;  %v7707_v22 = vld [vmem:[%s13237_s7 + $0x30] sm:$0xff] (!%p8232_p4) }
0x104e   : > { %7600 = vst [vmem:[#allocation2 + $0x18] sm:$0x3] %v7594_v32  ;;  %v7613_v41 = vsel (!%p8232_p4), %vm2193_vm1, %v7594_v32, 0.0  ;;  %v8786_v47 = vpack.c.bf16 (!%p8232_p4), %v7708_v45, %v7707_v22 }
0x104f   : > { %7601 = vst [vmem:[#allocation2 + $0x20] sm:$0x3] %v7595_v36  ;;  %v7614_v42 = vsel (!%p8232_p4), %vm2193_vm1, %v7595_v36, 0.0  ;;  %v7610_v49 = vadd.f32 (!%p8232_p4), %v7609_v38, %v12674_v37  ;;  %v7726_v38 = vld [vmem:[%s13237_s7 + $0xc8] sm:$0xff] (!%p8232_p4) }
0x1050   : > { %v7615_v18 = vadd.f32 %v7614_v42, %v7613_v41  ;;  %v7739_v41 = vld [vmem:[%s13237_s7 + $0x130] sm:$0xff] }
0x1051   : > { %7611 = vadd.xlane.f32.xlu0 %v7610_v49  ;;  %v7710_v49 = vld [vmem:[%s13237_s7 + $0x48] sm:$0xff] }
0x1052   : > { %v7617_v43 = vadd.f32 %v7616_v61, %v7615_v18  ;;  %v7740_v18 = vld [vmem:[%s13237_s7 + $0x138] sm:$0xff]  ;;  %v7709_v61 = vld [vmem:[%s13237_s7 + $0x40] sm:$0xff] }
0x1053   : > { %v8790_v8 = vpack.c.bf16 %v7710_v49, %v7709_v61 }
0x1055   : > { %7618 = vadd.xlane.f32.xlu0 %v7617_v43  ;;  %v8816_v43 = vpack.c.bf16 %v7740_v18, %v7739_v41 }
0x10de   : > { %v7612_v5 = vpop.xlane.xlu0 %7611 }
0x10df   : > { %v7620_v17 = vmul.f32 0.0026041667, %v7612_v5  ;;  %v7715_v5 = vld [vmem:[%s13237_s7 + $0x70] sm:$0xff] }
0x10e1   : > { %v12749_v53 = vsub.f32 %v7591_v59, %v7620_v17  ;;  %v12751_v39 = vsub.f32 %v7592_v14, %v7620_v17  ;;  %v12754_v13 = vsub.f32 %v12674_v37, %v7620_v17  ;;  %v7724_v59 = vld [vmem:[%s13237_s7 + $0xb8] sm:$0xff]  ;;  %v7738_v14 = vld [vmem:[%s13237_s7 + $0x128] sm:$0xff] }
0x10e2   : > { %v7619_v63 = vpop.xlane.xlu0 %7618  ;;  %v8784_v2 = vpack.c.bf16 %v7724_v59, %v7723_v16  ;;  %v7716_v17 = vld [vmem:[%s13237_s7 + $0x78] sm:$0xff]  ;;  %v13241_v16 = vld [vmem:[#allocation18_spill] sm:$0xff] }
0x10e3   : > { %v7621_v34 = vmul.f32 0.0026041667, %v7619_v63  ;;  %v7628_v24 = vmul.f32 %v12749_v53, %v12749_v53  ;;  %v7629_v1 = vmul.f32 %v12751_v39, %v12751_v39  ;;  %v7630_v29 = vmul.f32 %v12754_v13, %v12754_v13 }
0x10e4   : > { %8785 = vmatprep.subr.bf16.mxu0 %v8784_v2  ;;  %v8828_v63 = vpack.c.bf16 %v7746_v25, %v7745_v35 }
0x10e5   : > { %v12762_v4 = vsub.f32 %v7594_v32, %v7621_v34  ;;  %v12764_v56 = vsub.f32 %v7595_v36, %v7621_v34  ;;  %v12767_v60 = vsub.f32 %v12678_v46, %v7621_v34  ;;  %v7634_v37 = vadd.f32 %v7629_v1, %v7628_v24  ;;  %8787 = vmatpush3.bf16.msra.mxu0 %v8786_v47  ;;  %v7725_v36 = vld [vmem:[%s13237_s7 + $0xc0] sm:$0xff]  ;;  %v7747_v24 = vld [vmem:[%s13237_s7 + $0x170] sm:$0xff]  ;;  %v7748_v1 = vld [vmem:[%s13237_s7 + $0x178] sm:$0xff] }
0x10e6   : > { %v8812_v32 = vpack.c.bf16 %v7738_v14, %v7737_v58  ;;  %v8788_v42 = vpack.c.bf16 %v7726_v38, %v7725_v36  ;;  %v8802_v34 = vpack.c.bf16 %v7716_v17, %v7715_v5  ;;  %v13242_v58 = vld [vmem:[#allocation16_spill] sm:$0xff] }
0x10e7   : > { %v7635_v57 = vadd.f32 %v7634_v37, %v7630_v29  ;;  %v7631_v15 = vmul.f32 %v12762_v4, %v12762_v4  ;;  %v7632_v40 = vmul.f32 %v12764_v56, %v12764_v56  ;;  %v7633_v21 = vmul.f32 %v12767_v60, %v12767_v60 }
0x10e8   : > { %8813 = vmatprep.subr.bf16.mxu1 %v8812_v32  ;;  %8789 = vmatprep.subr.bf16.mxu0 %v8788_v42  ;;  %v8832_v29 = vpack.c.bf16 %v7748_v1, %v7747_v24 }
0x10e9   : > { %7636 = vadd.xlane.f32.xlu1 %v7635_v57  ;;  %v7638_v62 = vsel %vm2193_vm1, %v7631_v15, 0.0  ;;  %v7639_v9 = vsel %vm2193_vm1, %v7632_v40, 0.0  ;;  %v7641_v46 = vsel %vm2193_vm1, %v7633_v21, 0.0  ;;  %8815 = vmatpush3.bf16.msra.mxu1 %v8812_v32  ;;  %vm7907_vm1 = vcmask 74752  }
0x10ea   : > { %v7640_v30 = vadd.f32 %v7639_v9, %v7638_v62  ;;  %8817 = vmatprep.subr.bf16.mxu1 %v8816_v43  ;;  %8791 = vmatpush3.bf16.msra.mxu0 %v8790_v8  ;;  %v7607_v9 = vld [vmem:[%s13238_s23] sm:$0x7] }
0x10eb   : > { %8793 = vmatprep.subr.bf16.mxu0 %v8792_v33  ;;  %v7669_v59 = vrot.slane %v7607_v9, %v13241_v16  ;;  %v7661_v2 = vrot.slane %v7607_v9, %v13242_v58 }
0x10ec   : > { %v7642_v20 = vadd.f32 %v7641_v46, %v7640_v30  ;;  %v7608_v30 = vld [vmem:[%s13239_s0] sm:$0x7]  ;;  %v13240_v46 = vld [vmem:[#allocation19_spill] sm:$0xff] }
0x10ed   : > { %8819 = vmatpush3.bf16.msra.mxu1 %v8816_v43  ;;  %v7687_v22 = vrot.slane %v7608_v30, %v13240_v46  ;;  %v7691_v45 = vrot.slane %v7608_v30, %v13241_v16  ;;  %v7683_v38 = vrot.slane %v7608_v30, %v13242_v58 }
0x10ee   : > { %7643 = vadd.xlane.f32.xlu1 %v7642_v20  ;;  %8821 = vmatprep.subr.bf16.mxu1 %v8820_v7  ;;  %v7665_v20 = vrot.slane %v7607_v9, %v13240_v46 }
0x10ef   : > { %8795 = vmatpush3.bf16.msra.mxu0 %v8794_v23 }
0x10f0   : > { %8797 = vmatprep.subr.bf16.mxu0 %v8796_v6 }
0x10f1   : > { %8823 = vmatpush3.bf16.msra.mxu1 %v8820_v7 }
0x10f2   : > { %8825 = vmatprep.subr.bf16.mxu1 %v8824_v10 }
0x10f3   : > { %8799 = vmatpush3.bf16.msra.mxu0 %v8798_v27 }
0x10f4   : > { %8801 = vmatprep.subr.bf16.mxu0 %v8800_v12 }
0x10f5   : > { %8827 = vmatpush3.bf16.msra.mxu1 %v8824_v10 }
0x10f6   : > { %8829 = vmatprep.subr.bf16.mxu1 %v8828_v63 }
0x10f7   : > { %8803 = vmatpush3.bf16.msra.mxu0 %v8802_v34 }
0x10f9   : > { %8831 = vmatpush3.bf16.msra.mxu1 %v8828_v63 }
0x10fa   : > { %8833 = vmatprep.subr.bf16.mxu1 %v8832_v29 }
0x10fd   : > { %8835 = vmatpush3.bf16.msra.mxu1 %v8832_v29 }
0x1176   : > { %v7637_v37 = vpop.xlane.xlu1 %7636 }
0x1177   : > { %v7645_v57 = vmul.f32 0.0026041667, %v7637_v37 }
0x1179   : > { %v7647_v15 = vadd.f32 1e-06, %v7645_v57 }
0x117b   : > { %9363 = vrsqrt.f32 %v7647_v15  ;;  %v7644_v40 = vpop.xlane.xlu1 %7643 }
0x117c   : > { %v7646_v21 = vmul.f32 0.0026041667, %v7644_v40 }
0x117e   : > { %v7648_v62 = vadd.f32 1e-06, %v7646_v21 }
0x1180   : > { %9365 = vrsqrt.f32 %v7648_v62 }
0x1185   : > { %v9364_v14 = vpop.eup %9363 }
0x1186   : > { %v7652_v32 = vmul.f32 %v9364_v14, %v12751_v39  ;;  %v7653_v47 = vmul.f32 %v9364_v14, %v12754_v13  ;;  %v7651_v36 = vmul.f32 %v9364_v14, %v12749_v53 }
0x1188   : > { %v7674_v41 = vmul.f32 %v7665_v20, %v7652_v32  ;;  %v7675_v42 = vmul.f32 %v7669_v59, %v7653_v47  ;;  %v7673_v18 = vmul.f32 %v7661_v2, %v7651_v36 }
0x118a   : > { %v9366_v61 = vpop.eup %9365  ;;  %v7696_v49 = vadd.f32 %v7687_v22, %v7674_v41  ;;  %v7697_v43 = vadd.f32 %v7691_v45, %v7675_v42  ;;  %v7695_v8 = vadd.f32 %v7683_v38, %v7673_v18 }
0x118b   : > { %v7655_v50 = vmul.f32 %v9366_v61, %v12764_v56  ;;  %v7656_v44 = vmul.f32 %v9366_v61, %v12767_v60  ;;  %v7654_v26 = vmul.f32 %v9366_v61, %v12762_v4  ;;  %v8233_v56 = vld [vmem:[%s13243_s18] ss:$0 sm:$0xff] }
0x118c   : > { %7820 = vmatprep.mubr.f32.mxu0 %v7696_v49  ;;  %8713 = vmatprep.mubr.f32.mxu1 %v7697_v43 }
0x118d   : > { %7821 = vmatmul.mubr.f32.vlgmr.msra.gmra.mrb[0].mxu0 %v7695_v8  ;;  %v7677_v39 = vmul.f32 %v7665_v20, %v7655_v50  ;;  %v7678_v53 = vmul.f32 %v7669_v59, %v7656_v44  ;;  %v7676_v13 = vmul.f32 %v7661_v2, %v7654_v26 }
0x118f   : > { %v7699_v33 = vadd.f32 %v7687_v22, %v7677_v39  ;;  %v7700_v51 = vadd.f32 %v7691_v45, %v7678_v53  ;;  %v7698_v55 = vadd.f32 %v7683_v38, %v7676_v13 }
0x1191   : > { %7825 = vmatprep.mubr.f32.mxu0 %v7699_v33  ;;  %8714 = vmatmul.mubr.f32.vlgmr.msra.gmra.mrb[0].mxu1 %v7700_v51 }
0x1192   : > { %7826 = vmatmul.mubr.f32.gmra.mrb[2].mxu0 %v7698_v55 }
0x1260   : > { %v8561_v19 = vpop.f32.mrb[0].mxu0 }
0x1261   : > { %v8562_v7 = vpop.f32.mrb[1].mxu0 }
0x1262   : > { %v8563_v60 = vadd.f32 %v8562_v7, %v8561_v19 }
0x1264   : > { %v8715_v4 = vpop.f32.mrb[0].mxu1  ;;  %v7823_v23 = vadd.f32 %v8563_v60, %v8233_v56 }
0x1265   : > { %v8564_v11 = vpop.f32.mrb[2].mxu0  ;;  %v7897_v0 = vpop.f32.mrb[1].mxu1 }
0x1266   : > { %v7898_v48 = vadd.f32 %v7897_v0, %v7823_v23  ;;  %v8565_v6 = vpop.f32.mrb[3].mxu0 }
0x1267   : > { %v8566_v31 = vadd.f32 %v8565_v6, %v8564_v11 }
0x1268   : > { %7906 = vst.msk [vmem:[%s13244_s12] sm:$0xff] %vm3648_vm9, %v7898_v48 }
0x1269   : > { %v7828_v28 = vadd.f32 %v8566_v31, %v8233_v56 }
0x126b   : > { %v7903_v52 = vadd.f32 %v8715_v4, %v7828_v28 }
0x126d   : > { %7908 = vst.msk [vmem:[%s13244_s12 + $0x8] sm:$0x3] %vm7907_vm1, %v7903_v52 }
0x126e PF: > { %s13245_s30 = sld [smem:[#allocation14_spill]]  ;;  %s13246_s6 = sld [smem:[#allocation13_spill]] }
0x126f   : > { %s13247_s29 = sld [smem:[#allocation15_spill]]  ;;  %s13248_s27 = smov %s9519_s28 }
0x1274   : > { %p32_p2 = scmp.ge.s32.totalorder %s13245_s30, 14   ;;  %s13249_s28 = smov %s13246_s6 }
0x1276   :  { %34 = sbr.rel (!%p32_p2) target bundleno = 20 (0x14), region = 174 }
0x127d   :  { %7920 = vsyncpa [#allocation4], 1 }
0x127e   :  { %7922 = vsyncpa [#allocation4 + $0x1], 1 }
0x127f   :  { %7923 = vsyncpa [#allocation6], 1 }
0x1280   :  { %7925 = vsyncpa [#allocation6 + $0x1], 1 }
0x1281   :  { %7926 = vsyncpa [#allocation9], 1 }
0x1282   :  { %7928 = vsyncpa [#allocation9 + $0x1], 1 }

</bundles_post_ra>
